<compile_context>
chip_gen: v5e
topology: v5e:2x2
jax: 0.10.0
libtpu: 0.0.40
codegen_flags: <defaults>
</compile_context>

<pallas_src>
import functools

import jax
import jax.numpy as jnp
from jax import lax
from jax.experimental import pallas as pl
from jax.experimental.pallas import tpu as pltpu

INPUT_DIM = 300
HIDDEN = 128
NO_EVENTS = 500

_D_PAD = 384          # pad 300 -> 384 so the hoisted GEMM's contraction dim is lane-clean
_NEG_BIG = -1e30      # bias for padded FC columns -> softmax probability exactly 0
_MAX_BATCH_BLOCK = 256


def _round_up(n, m):
    return ((n + m - 1) // m) * m


def log2vec_kernel(x_ref, wih1_ref, whh1_ref, b1_ref,
                   wih2_ref, whh2_ref, b2_ref, wfc_ref, bfc_ref,
                   out_ref, xproj_ref, *, T, BB, unroll):
    """One batch block of the whole model (everything resident in VMEM).

    Shapes (per batch block):
      x_ref    : (T, BB, Dp)  bf16   time-major, batch padded, input padded to 384
      wih1_ref : (Dp, 4H)     bf16
      whh1_ref : (H, 4H)      bf16
      b1_ref   : (1, 4H)      f32    (= b_ih + b_hh of layer 1)
      wih2_ref : (H, 4H)      bf16
      whh2_ref : (H, 4H)      bf16
      b2_ref   : (1, 4H)      f32    (= b_ih + b_hh of layer 2)
      wfc_ref  : (H, Np)      bf16   FC weight padded to a lane multiple
      bfc_ref  : (1, Np)      f32    padded columns = -1e30
      out_ref  : (BB, Np)     f32
      xproj_ref: (T*BB, 4H)   f32    VMEM scratch for the hoisted layer-1 input GEMM
    """
    H = HIDDEN

    # ---- hoisted layer-1 input projection: one batched GEMM over all timesteps,
    #      written to explicit VMEM scratch (bias folded in) ----
    x2d = x_ref[...].reshape(T * BB, -1)   # layout-preserving merge (BB % 8 == 0)
    xproj_ref[...] = (jnp.dot(x2d, wih1_ref[...], preferred_element_type=jnp.float32)
                      + b1_ref[...])

    whh1 = whh1_ref[...]                                   # loop-invariant bf16 weights
    wih2 = wih2_ref[...]
    whh2 = whh2_ref[...]
    b2 = jnp.broadcast_to(b2_ref[...], (BB, 4 * H))        # broadcast hoisted out of the loop

    def sigm(x):
        # 1 EUP op + cheap VPU mul/add instead of exp + divide/reciprocal
        return 0.5 * jnp.tanh(0.5 * x) + 0.5

    def gates_to_hc(gates, c):
        i = sigm(gates[:, 0 * H:1 * H])
        f = sigm(gates[:, 1 * H:2 * H])
        g = jnp.tanh(gates[:, 2 * H:3 * H])
        o = sigm(gates[:, 3 * H:4 * H])
        c_new = f * c + i * g
        h_new = o * jnp.tanh(c_new)
        return h_new, c_new

    def step(t, carry):
        h1, c1, h2, c2 = carry
        row = pl.multiple_of(t * BB, 8)
        xp_t = xproj_ref[pl.ds(row, BB), :]                # single aligned (BB, 4H) load
        # layer 2's h2(t-1)-dependent half (+bias) is independent of layer-1 step-t work,
        # so it can issue early and overlap with layer 1's matmul / EUP chain.
        g2_rec = jnp.dot(h2.astype(jnp.bfloat16), whh2,
                         preferred_element_type=jnp.float32) + b2
        # layer 1: only the recurrent matmul remains on the critical path
        g1 = xp_t + jnp.dot(h1.astype(jnp.bfloat16), whh1,
                            preferred_element_type=jnp.float32)
        h1, c1 = gates_to_hc(g1, c1)
        # layer 2: h1(t)-dependent half
        g2 = g2_rec + jnp.dot(h1.astype(jnp.bfloat16), wih2,
                              preferred_element_type=jnp.float32)
        h2, c2 = gates_to_hc(g2, c2)
        return (h1, c1, h2, c2)

    z = jnp.zeros((BB, H), jnp.float32)
    _, _, h2, _ = lax.fori_loop(0, T, step, (z, z, z, z), unroll=unroll)

    # TODO(synk): nn.Dropout is identity in eval mode; no RNG/mask applied here.

    # ---- FC + softmax (lane-dense Np-wide; padded cols get 0 probability via -1e30 bias) ----
    logits = (jnp.dot(h2.astype(jnp.bfloat16), wfc_ref[...],
                      preferred_element_type=jnp.float32) + bfc_ref[...])
    m = jnp.max(logits, axis=-1, keepdims=True)
    e = jnp.exp(logits - m)
    s = jnp.sum(e, axis=-1, keepdims=True)
    r = pl.reciprocal(s, approx=True)
    r = r * (2.0 - s * r)          # one Newton-Raphson step -> near-exact normalization
    out_ref[...] = e * r


def init_params(key, no_events=NO_EVENTS):
    """Synthetic parameters matching the PyTorch module shapes, stored pre-transposed for
    right-multiplication. Each layer's bias is the combined b_ih + b_hh."""
    ks = jax.random.split(key, 8)
    s = 0.05
    return {
        "w_ih1": s * jax.random.normal(ks[0], (INPUT_DIM, 4 * HIDDEN), jnp.float32),
        "w_hh1": s * jax.random.normal(ks[1], (HIDDEN, 4 * HIDDEN), jnp.float32),
        "b1":    s * jax.random.normal(ks[2], (1, 4 * HIDDEN), jnp.float32),
        "w_ih2": s * jax.random.normal(ks[3], (HIDDEN, 4 * HIDDEN), jnp.float32),
        "w_hh2": s * jax.random.normal(ks[4], (HIDDEN, 4 * HIDDEN), jnp.float32),
        "b2":    s * jax.random.normal(ks[5], (1, 4 * HIDDEN), jnp.float32),
        "w_fc":  s * jax.random.normal(ks[6], (HIDDEN, no_events), jnp.float32),
        "b_fc":  s * jax.random.normal(ks[7], (1, no_events), jnp.float32),
    }


@jax.jit
def log2vec_forward(x, params):
    """x: (B, T, 300) float32 (batch_first, like the PyTorch module).
    Returns softmax probabilities of shape (B, no_events)."""
    B, T, D = x.shape
    assert D == INPUT_DIM
    no_events = params["w_fc"].shape[1]
    n_pad = _round_up(no_events, 128)

    # Batch padded to a multiple of 16 (bf16 sublane-dense LHS); block over batch so
    # non-trivial batches shard across both v7x TensorCores via the parallel grid.
    Bp = _round_up(B, 16)
    BB = Bp if Bp <= _MAX_BATCH_BLOCK else _MAX_BATCH_BLOCK
    Bp = _round_up(Bp, BB)
    grid = (Bp // BB,)

    # VMEM guard (per batch block): v7x is 64 MiB physical / 32 MiB default-scoped.
    # TODO(synk): for very long T, chunk the hoisted input GEMM over time blocks
    # (grid axis marked "arbitrary", h/c carried in VMEM scratch) instead of raising.
    per_block_bytes = 2 * T * BB * _D_PAD * 2 + T * BB * 4 * HIDDEN * 4
    if per_block_bytes > (24 << 20):
        raise NotImplementedError(
            "sequence too long for single-shot VMEM residency; add time chunking")

    unroll = True if T <= 32 else 8

    # ---- input layout: (B, T, D) -> (T, Bp, Dp), bf16 MXU operand ----
    x_tbd = jnp.transpose(x, (1, 0, 2))
    x_tbd = jnp.pad(x_tbd, ((0, 0), (0, Bp - B), (0, _D_PAD - D)))
    x3d = x_tbd.astype(jnp.bfloat16)

    # ---- weight prep (outside the kernel): pad / cast ----
    w_ih1 = jnp.pad(params["w_ih1"], ((0, _D_PAD - D), (0, 0))).astype(jnp.bfloat16)
    w_hh1 = params["w_hh1"].astype(jnp.bfloat16)
    w_ih2 = params["w_ih2"].astype(jnp.bfloat16)
    w_hh2 = params["w_hh2"].astype(jnp.bfloat16)
    w_fc = jnp.pad(params["w_fc"], ((0, 0), (0, n_pad - no_events))).astype(jnp.bfloat16)
    b_fc = jnp.pad(params["b_fc"], ((0, 0), (0, n_pad - no_events)),
                   constant_values=_NEG_BIG)                              # f32

    out = pl.pallas_call(
        functools.partial(log2vec_kernel, T=T, BB=BB, unroll=unroll),
        out_shape=jax.ShapeDtypeStruct((Bp, n_pad), jnp.float32),
        grid_spec=pltpu.PrefetchScalarGridSpec(
            num_scalar_prefetch=0,
            grid=grid,
            in_specs=[
                pl.BlockSpec((T, BB, _D_PAD), lambda i: (0, i, 0)),
                pl.BlockSpec((_D_PAD, 4 * HIDDEN), lambda i: (0, 0)),
                pl.BlockSpec((HIDDEN, 4 * HIDDEN), lambda i: (0, 0)),
                pl.BlockSpec((1, 4 * HIDDEN), lambda i: (0, 0)),
                pl.BlockSpec((HIDDEN, 4 * HIDDEN), lambda i: (0, 0)),
                pl.BlockSpec((HIDDEN, 4 * HIDDEN), lambda i: (0, 0)),
                pl.BlockSpec((1, 4 * HIDDEN), lambda i: (0, 0)),
                pl.BlockSpec((HIDDEN, n_pad), lambda i: (0, 0)),
                pl.BlockSpec((1, n_pad), lambda i: (0, 0)),
            ],
            out_specs=pl.BlockSpec((BB, n_pad), lambda i: (i, 0)),
            scratch_shapes=[pltpu.VMEM((T * BB, 4 * HIDDEN), jnp.float32)],
        ),
        compiler_params=pltpu.CompilerParams(
            dimension_semantics=("parallel",)),
    )(x3d, w_ih1, w_hh1, params["b1"], w_ih2, w_hh2, params["b2"], w_fc, b_fc)

    return out[:B, :no_events]


def _reference_forward(x, params):
    """Pure-JAX f32 reference with identical math (combined per-layer bias)."""
    H = HIDDEN

    def lstm(xs, w_ih, w_hh, b):
        B = xs.shape[0]

        def step(carry, x_t):
            h, c = carry
            g = x_t @ w_ih + h @ w_hh + b[0]
            i = jax.nn.sigmoid(g[:, 0 * H:1 * H])
            f = jax.nn.sigmoid(g[:, 1 * H:2 * H])
            gg = jnp.tanh(g[:, 2 * H:3 * H])
            o = jax.nn.sigmoid(g[:, 3 * H:4 * H])
            c = f * c + i * gg
            h = o * jnp.tanh(c)
            return (h, c), h

        init = (jnp.zeros((B, H), jnp.float32), jnp.zeros((B, H), jnp.float32))
        _, hs = lax.scan(step, init, jnp.transpose(xs, (1, 0, 2)))
        return jnp.transpose(hs, (1, 0, 2))

    h1 = lstm(x, params["w_ih1"], params["w_hh1"], params["b1"])
    h2 = lstm(h1, params["w_ih2"], params["w_hh2"], params["b2"])
    logits = h2[:, -1, :] @ params["w_fc"] + params["b_fc"][0]
    return jax.nn.softmax(logits, axis=-1)


if __name__ == "__main__":
    key = jax.random.PRNGKey(0)
    k_x, k_p = jax.random.split(key)

    B, T = 2, 8
    x = jax.random.normal(k_x, (B, T, INPUT_DIM), jnp.float32)
    params = init_params(k_p)

    probs = jax.block_until_ready(log2vec_forward(x, params))

    assert probs.shape == (B, NO_EVENTS)
    assert bool(jnp.all(jnp.isfinite(probs)))
    row_sums = jnp.sum(probs, axis=-1)
    assert jnp.allclose(row_sums, jnp.ones_like(row_sums), atol=1e-3)

    # parity vs. pure-JAX f32 reference (bf16 MXU operands -> loose absolute tolerance)
    ref = _reference_forward(x, params)
    assert float(jnp.max(jnp.abs(probs - ref))) < 5e-3

    print("KERNEL_OK")
</pallas_src>

<mosaic_0001>
module attributes {stable_mosaic.version = 11 : i64} {
  func.func @log2vec_kernel(%arg0: i32, %arg1: memref<8x16x384xbf16, #tpu.memory_space<vmem>>, %arg2: memref<384x512xbf16, #tpu.memory_space<vmem>>, %arg3: memref<128x512xbf16, #tpu.memory_space<vmem>>, %arg4: memref<1x512xf32, #tpu.memory_space<vmem>>, %arg5: memref<128x512xbf16, #tpu.memory_space<vmem>>, %arg6: memref<128x512xbf16, #tpu.memory_space<vmem>>, %arg7: memref<1x512xf32, #tpu.memory_space<vmem>>, %arg8: memref<128x512xbf16, #tpu.memory_space<vmem>>, %arg9: memref<1x512xf32, #tpu.memory_space<vmem>>, %arg10: memref<16x512xf32, #tpu.memory_space<vmem>>, %arg11: memref<128x512xf32, #tpu.memory_space<vmem>>) attributes {dimension_semantics = [#tpu.dimension_semantics<parallel>], iteration_bounds = array<i64: 1>, scalar_prefetch = 0 : i64, scratch_operands = 1 : i64, tpu.core_type = #tpu.core_type<tc>, window_params = [{transform_indices = @transform_0, window_bounds = array<i64: 8, 16, 384>}, {pipeline_mode = #tpu.pipeline_mode<synchronous>, transform_indices = @transform_1, window_bounds = array<i64: 384, 512>}, {pipeline_mode = #tpu.pipeline_mode<synchronous>, transform_indices = @transform_2, window_bounds = array<i64: 128, 512>}, {pipeline_mode = #tpu.pipeline_mode<synchronous>, transform_indices = @transform_3, window_bounds = array<i64: 1, 512>}, {pipeline_mode = #tpu.pipeline_mode<synchronous>, transform_indices = @transform_4, window_bounds = array<i64: 128, 512>}, {pipeline_mode = #tpu.pipeline_mode<synchronous>, transform_indices = @transform_5, window_bounds = array<i64: 128, 512>}, {pipeline_mode = #tpu.pipeline_mode<synchronous>, transform_indices = @transform_6, window_bounds = array<i64: 1, 512>}, {pipeline_mode = #tpu.pipeline_mode<synchronous>, transform_indices = @transform_7, window_bounds = array<i64: 128, 512>}, {pipeline_mode = #tpu.pipeline_mode<synchronous>, transform_indices = @transform_8, window_bounds = array<i64: 1, 512>}, {transform_indices = @transform_9, window_bounds = array<i64: 16, 512>}]} {
    %c0 = arith.constant 0 : index
    %c0_0 = arith.constant 0 : index
    %c0_1 = arith.constant 0 : index
    %0 = vector.load %arg1[%c0, %c0_0, %c0_1] : memref<8x16x384xbf16, #tpu.memory_space<vmem>>, vector<8x16x384xbf16>
    %1 = vector.shape_cast %0 : vector<8x16x384xbf16> to vector<128x384xbf16>
    %c0_2 = arith.constant 0 : index
    %c0_3 = arith.constant 0 : index
    %2 = vector.load %arg2[%c0_2, %c0_3] : memref<384x512xbf16, #tpu.memory_space<vmem>>, vector<384x512xbf16>
    %cst = arith.constant dense<0.000000e+00> : vector<128x512xf32>
    %3 = tpu.matmul %1, %2, %cst {dimension_numbers = #tpu.dot_dimension_numbers<[1], [0], [0], [1], [0, 0, 1, 1], [], []>} : vector<128x384xbf16>, vector<384x512xbf16>, vector<128x512xf32> -> vector<128x512xf32>
    %c0_4 = arith.constant 0 : index
    %c0_5 = arith.constant 0 : index
    %4 = vector.load %arg4[%c0_4, %c0_5] : memref<1x512xf32, #tpu.memory_space<vmem>>, vector<1x512xf32>
    %5 = vector.broadcast %4 : vector<1x512xf32> to vector<128x512xf32>
    %6 = arith.addf %3, %5 : vector<128x512xf32>
    %c0_6 = arith.constant 0 : index
    %c0_7 = arith.constant 0 : index
    %7 = vector.load %arg11[%c0_6, %c0_7] : memref<128x512xf32, #tpu.memory_space<vmem>>, vector<128x512xf32>
    tpu.vector_store %arg11[%c0_6, %c0_7], %6 {strides = array<i32>} : memref<128x512xf32, #tpu.memory_space<vmem>>, vector<128x512xf32>,
    %c0_8 = arith.constant 0 : index
    %c0_9 = arith.constant 0 : index
    %8 = vector.load %arg3[%c0_8, %c0_9] : memref<128x512xbf16, #tpu.memory_space<vmem>>, vector<128x512xbf16>
    %c0_10 = arith.constant 0 : index
    %c0_11 = arith.constant 0 : index
    %9 = vector.load %arg5[%c0_10, %c0_11] : memref<128x512xbf16, #tpu.memory_space<vmem>>, vector<128x512xbf16>
    %c0_12 = arith.constant 0 : index
    %c0_13 = arith.constant 0 : index
    %10 = vector.load %arg6[%c0_12, %c0_13] : memref<128x512xbf16, #tpu.memory_space<vmem>>, vector<128x512xbf16>
    %c0_14 = arith.constant 0 : index
    %c0_15 = arith.constant 0 : index
    %11 = vector.load %arg7[%c0_14, %c0_15] : memref<1x512xf32, #tpu.memory_space<vmem>>, vector<1x512xf32>
    %12 = vector.shape_cast %11 : vector<1x512xf32> to vector<1x512xf32>
    %13 = vector.broadcast %12 : vector<1x512xf32> to vector<16x512xf32>
    %cst_16 = arith.constant 0.000000e+00 : f32
    %14 = vector.broadcast %cst_16 : f32 to vector<16x128xf32>
    %c0_i32 = arith.constant 0 : i32
    %c16_i32 = arith.constant 16 : i32
    %15 = arith.muli %c0_i32, %c16_i32 : i32
    %16 = tpu.assume_multiple %15, 8 : i32
    %17 = arith.index_cast %16 : i32 to index
    %c0_17 = arith.constant 0 : index
    %18 = vector.load %arg11[%17, %c0_17] : memref<128x512xf32, #tpu.memory_space<vmem>>, vector<16x512xf32>
    %19 = arith.truncf %14 : vector<16x128xf32> to vector<16x128xbf16>
    %cst_18 = arith.constant dense<0.000000e+00> : vector<16x512xf32>
    %20 = tpu.matmul %19, %10, %cst_18 {dimension_numbers = #tpu.dot_dimension_numbers<[1], [0], [0], [1], [0, 0, 1, 1], [], []>} : vector<16x128xbf16>, vector<128x512xbf16>, vector<16x512xf32> -> vector<16x512xf32>
    %21 = arith.addf %20, %13 : vector<16x512xf32>
    %22 = arith.truncf %14 : vector<16x128xf32> to vector<16x128xbf16>
    %cst_19 = arith.constant dense<0.000000e+00> : vector<16x512xf32>
    %23 = tpu.matmul %22, %8, %cst_19 {dimension_numbers = #tpu.dot_dimension_numbers<[1], [0], [0], [1], [0, 0, 1, 1], [], []>} : vector<16x128xbf16>, vector<128x512xbf16>, vector<16x512xf32> -> vector<16x512xf32>
    %24 = arith.addf %18, %23 : vector<16x512xf32>
    %25 = vector.extract_strided_slice %24 {offsets = [0, 0], sizes = [16, 128], strides = [1, 1]} : vector<16x512xf32> to vector<16x128xf32>
    %cst_20 = arith.constant 5.000000e-01 : f32
    %26 = vector.broadcast %cst_20 : f32 to vector<16x128xf32>
    %27 = arith.mulf %26, %25 : vector<16x128xf32>
    %28 = math.tanh %27 : vector<16x128xf32>
    %cst_21 = arith.constant 5.000000e-01 : f32
    %29 = vector.broadcast %cst_21 : f32 to vector<16x128xf32>
    %30 = arith.mulf %29, %28 : vector<16x128xf32>
    %cst_22 = arith.constant 5.000000e-01 : f32
    %31 = vector.broadcast %cst_22 : f32 to vector<16x128xf32>
    %32 = arith.addf %30, %31 : vector<16x128xf32>
    %33 = vector.extract_strided_slice %24 {offsets = [0, 128], sizes = [16, 128], strides = [1, 1]} : vector<16x512xf32> to vector<16x128xf32>
    %cst_23 = arith.constant 5.000000e-01 : f32
    %34 = vector.broadcast %cst_23 : f32 to vector<16x128xf32>
    %35 = arith.mulf %34, %33 : vector<16x128xf32>
    %36 = math.tanh %35 : vector<16x128xf32>
    %cst_24 = arith.constant 5.000000e-01 : f32
    %37 = vector.broadcast %cst_24 : f32 to vector<16x128xf32>
    %38 = arith.mulf %37, %36 : vector<16x128xf32>
    %cst_25 = arith.constant 5.000000e-01 : f32
    %39 = vector.broadcast %cst_25 : f32 to vector<16x128xf32>
    %40 = arith.addf %38, %39 : vector<16x128xf32>
    %41 = vector.extract_strided_slice %24 {offsets = [0, 256], sizes = [16, 128], strides = [1, 1]} : vector<16x512xf32> to vector<16x128xf32>
    %42 = math.tanh %41 : vector<16x128xf32>
    %43 = vector.extract_strided_slice %24 {offsets = [0, 384], sizes = [16, 128], strides = [1, 1]} : vector<16x512xf32> to vector<16x128xf32>
    %cst_26 = arith.constant 5.000000e-01 : f32
    %44 = vector.broadcast %cst_26 : f32 to vector<16x128xf32>
    %45 = arith.mulf %44, %43 : vector<16x128xf32>
    %46 = math.tanh %45 : vector<16x128xf32>
    %cst_27 = arith.constant 5.000000e-01 : f32
    %47 = vector.broadcast %cst_27 : f32 to vector<16x128xf32>
    %48 = arith.mulf %47, %46 : vector<16x128xf32>
    %cst_28 = arith.constant 5.000000e-01 : f32
    %49 = vector.broadcast %cst_28 : f32 to vector<16x128xf32>
    %50 = arith.addf %48, %49 : vector<16x128xf32>
    %51 = arith.mulf %40, %14 : vector<16x128xf32>
    %52 = arith.mulf %32, %42 : vector<16x128xf32>
    %53 = arith.addf %51, %52 : vector<16x128xf32>
    %54 = math.tanh %53 : vector<16x128xf32>
    %55 = arith.mulf %50, %54 : vector<16x128xf32>
    %56 = arith.truncf %55 : vector<16x128xf32> to vector<16x128xbf16>
    %cst_29 = arith.constant dense<0.000000e+00> : vector<16x512xf32>
    %57 = tpu.matmul %56, %9, %cst_29 {dimension_numbers = #tpu.dot_dimension_numbers<[1], [0], [0], [1], [0, 0, 1, 1], [], []>} : vector<16x128xbf16>, vector<128x512xbf16>, vector<16x512xf32> -> vector<16x512xf32>
    %58 = arith.addf %21, %57 : vector<16x512xf32>
    %59 = vector.extract_strided_slice %58 {offsets = [0, 0], sizes = [16, 128], strides = [1, 1]} : vector<16x512xf32> to vector<16x128xf32>
    %cst_30 = arith.constant 5.000000e-01 : f32
    %60 = vector.broadcast %cst_30 : f32 to vector<16x128xf32>
    %61 = arith.mulf %60, %59 : vector<16x128xf32>
    %62 = math.tanh %61 : vector<16x128xf32>
    %cst_31 = arith.constant 5.000000e-01 : f32
    %63 = vector.broadcast %cst_31 : f32 to vector<16x128xf32>
    %64 = arith.mulf %63, %62 : vector<16x128xf32>
    %cst_32 = arith.constant 5.000000e-01 : f32
    %65 = vector.broadcast %cst_32 : f32 to vector<16x128xf32>
    %66 = arith.addf %64, %65 : vector<16x128xf32>
    %67 = vector.extract_strided_slice %58 {offsets = [0, 128], sizes = [16, 128], strides = [1, 1]} : vector<16x512xf32> to vector<16x128xf32>
    %cst_33 = arith.constant 5.000000e-01 : f32
    %68 = vector.broadcast %cst_33 : f32 to vector<16x128xf32>
    %69 = arith.mulf %68, %67 : vector<16x128xf32>
    %70 = math.tanh %69 : vector<16x128xf32>
    %cst_34 = arith.constant 5.000000e-01 : f32
    %71 = vector.broadcast %cst_34 : f32 to vector<16x128xf32>
    %72 = arith.mulf %71, %70 : vector<16x128xf32>
    %cst_35 = arith.constant 5.000000e-01 : f32
    %73 = vector.broadcast %cst_35 : f32 to vector<16x128xf32>
    %74 = arith.addf %72, %73 : vector<16x128xf32>
    %75 = vector.extract_strided_slice %58 {offsets = [0, 256], sizes = [16, 128], strides = [1, 1]} : vector<16x512xf32> to vector<16x128xf32>
    %76 = math.tanh %75 : vector<16x128xf32>
    %77 = vector.extract_strided_slice %58 {offsets = [0, 384], sizes = [16, 128], strides = [1, 1]} : vector<16x512xf32> to vector<16x128xf32>
    %cst_36 = arith.constant 5.000000e-01 : f32
    %78 = vector.broadcast %cst_36 : f32 to vector<16x128xf32>
    %79 = arith.mulf %78, %77 : vector<16x128xf32>
    %80 = math.tanh %79 : vector<16x128xf32>
    %cst_37 = arith.constant 5.000000e-01 : f32
    %81 = vector.broadcast %cst_37 : f32 to vector<16x128xf32>
    %82 = arith.mulf %81, %80 : vector<16x128xf32>
    %cst_38 = arith.constant 5.000000e-01 : f32
    %83 = vector.broadcast %cst_38 : f32 to vector<16x128xf32>
    %84 = arith.addf %82, %83 : vector<16x128xf32>
    %85 = arith.mulf %74, %14 : vector<16x128xf32>
    %86 = arith.mulf %66, %76 : vector<16x128xf32>
    %87 = arith.addf %85, %86 : vector<16x128xf32>
    %88 = math.tanh %87 : vector<16x128xf32>
    %89 = arith.mulf %84, %88 : vector<16x128xf32>
    %c1_i32 = arith.constant 1 : i32
    %c16_i32_39 = arith.constant 16 : i32
    %90 = arith.muli %c1_i32, %c16_i32_39 : i32
    %91 = tpu.assume_multiple %90, 8 : i32
    %92 = arith.index_cast %91 : i32 to index
    %c0_40 = arith.constant 0 : index
    %93 = vector.load %arg11[%92, %c0_40] : memref<128x512xf32, #tpu.memory_space<vmem>>, vector<16x512xf32>
    %94 = arith.truncf %89 : vector<16x128xf32> to vector<16x128xbf16>
    %cst_41 = arith.constant dense<0.000000e+00> : vector<16x512xf32>
    %95 = tpu.matmul %94, %10, %cst_41 {dimension_numbers = #tpu.dot_dimension_numbers<[1], [0], [0], [1], [0, 0, 1, 1], [], []>} : vector<16x128xbf16>, vector<128x512xbf16>, vector<16x512xf32> -> vector<16x512xf32>
    %96 = arith.addf %95, %13 : vector<16x512xf32>
    %97 = arith.truncf %55 : vector<16x128xf32> to vector<16x128xbf16>
    %cst_42 = arith.constant dense<0.000000e+00> : vector<16x512xf32>
    %98 = tpu.matmul %97, %8, %cst_42 {dimension_numbers = #tpu.dot_dimension_numbers<[1], [0], [0], [1], [0, 0, 1, 1], [], []>} : vector<16x128xbf16>, vector<128x512xbf16>, vector<16x512xf32> -> vector<16x512xf32>
    %99 = arith.addf %93, %98 : vector<16x512xf32>
    %100 = vector.extract_strided_slice %99 {offsets = [0, 0], sizes = [16, 128], strides = [1, 1]} : vector<16x512xf32> to vector<16x128xf32>
    %cst_43 = arith.constant 5.000000e-01 : f32
    %101 = vector.broadcast %cst_43 : f32 to vector<16x128xf32>
    %102 = arith.mulf %101, %100 : vector<16x128xf32>
    %103 = math.tanh %102 : vector<16x128xf32>
    %cst_44 = arith.constant 5.000000e-01 : f32
    %104 = vector.broadcast %cst_44 : f32 to vector<16x128xf32>
    %105 = arith.mulf %104, %103 : vector<16x128xf32>
    %cst_45 = arith.constant 5.000000e-01 : f32
    %106 = vector.broadcast %cst_45 : f32 to vector<16x128xf32>
    %107 = arith.addf %105, %106 : vector<16x128xf32>
    %108 = vector.extract_strided_slice %99 {offsets = [0, 128], sizes = [16, 128], strides = [1, 1]} : vector<16x512xf32> to vector<16x128xf32>
    %cst_46 = arith.constant 5.000000e-01 : f32
    %109 = vector.broadcast %cst_46 : f32 to vector<16x128xf32>
    %110 = arith.mulf %109, %108 : vector<16x128xf32>
    %111 = math.tanh %110 : vector<16x128xf32>
    %cst_47 = arith.constant 5.000000e-01 : f32
    %112 = vector.broadcast %cst_47 : f32 to vector<16x128xf32>
    %113 = arith.mulf %112, %111 : vector<16x128xf32>
    %cst_48 = arith.constant 5.000000e-01 : f32
    %114 = vector.broadcast %cst_48 : f32 to vector<16x128xf32>
    %115 = arith.addf %113, %114 : vector<16x128xf32>
    %116 = vector.extract_strided_slice %99 {offsets = [0, 256], sizes = [16, 128], strides = [1, 1]} : vector<16x512xf32> to vector<16x128xf32>
    %117 = math.tanh %116 : vector<16x128xf32>
    %118 = vector.extract_strided_slice %99 {offsets = [0, 384], sizes = [16, 128], strides = [1, 1]} : vector<16x512xf32> to vector<16x128xf32>
    %cst_49 = arith.constant 5.000000e-01 : f32
    %119 = vector.broadcast %cst_49 : f32 to vector<16x128xf32>
    %120 = arith.mulf %119, %118 : vector<16x128xf32>
    %121 = math.tanh %120 : vector<16x128xf32>
    %cst_50 = arith.constant 5.000000e-01 : f32
    %122 = vector.broadcast %cst_50 : f32 to vector<16x128xf32>
    %123 = arith.mulf %122, %121 : vector<16x128xf32>
    %cst_51 = arith.constant 5.000000e-01 : f32
    %124 = vector.broadcast %cst_51 : f32 to vector<16x128xf32>
    %125 = arith.addf %123, %124 : vector<16x128xf32>
    %126 = arith.mulf %115, %53 : vector<16x128xf32>
    %127 = arith.mulf %107, %117 : vector<16x128xf32>
    %128 = arith.addf %126, %127 : vector<16x128xf32>
    %129 = math.tanh %128 : vector<16x128xf32>
    %130 = arith.mulf %125, %129 : vector<16x128xf32>
    %131 = arith.truncf %130 : vector<16x128xf32> to vector<16x128xbf16>
    %cst_52 = arith.constant dense<0.000000e+00> : vector<16x512xf32>
    %132 = tpu.matmul %131, %9, %cst_52 {dimension_numbers = #tpu.dot_dimension_numbers<[1], [0], [0], [1], [0, 0, 1, 1], [], []>} : vector<16x128xbf16>, vector<128x512xbf16>, vector<16x512xf32> -> vector<16x512xf32>
    %133 = arith.addf %96, %132 : vector<16x512xf32>
    %134 = vector.extract_strided_slice %133 {offsets = [0, 0], sizes = [16, 128], strides = [1, 1]} : vector<16x512xf32> to vector<16x128xf32>
    %cst_53 = arith.constant 5.000000e-01 : f32
    %135 = vector.broadcast %cst_53 : f32 to vector<16x128xf32>
    %136 = arith.mulf %135, %134 : vector<16x128xf32>
    %137 = math.tanh %136 : vector<16x128xf32>
    %cst_54 = arith.constant 5.000000e-01 : f32
    %138 = vector.broadcast %cst_54 : f32 to vector<16x128xf32>
    %139 = arith.mulf %138, %137 : vector<16x128xf32>
    %cst_55 = arith.constant 5.000000e-01 : f32
    %140 = vector.broadcast %cst_55 : f32 to vector<16x128xf32>
    %141 = arith.addf %139, %140 : vector<16x128xf32>
    %142 = vector.extract_strided_slice %133 {offsets = [0, 128], sizes = [16, 128], strides = [1, 1]} : vector<16x512xf32> to vector<16x128xf32>
    %cst_56 = arith.constant 5.000000e-01 : f32
    %143 = vector.broadcast %cst_56 : f32 to vector<16x128xf32>
    %144 = arith.mulf %143, %142 : vector<16x128xf32>
    %145 = math.tanh %144 : vector<16x128xf32>
    %cst_57 = arith.constant 5.000000e-01 : f32
    %146 = vector.broadcast %cst_57 : f32 to vector<16x128xf32>
    %147 = arith.mulf %146, %145 : vector<16x128xf32>
    %cst_58 = arith.constant 5.000000e-01 : f32
    %148 = vector.broadcast %cst_58 : f32 to vector<16x128xf32>
    %149 = arith.addf %147, %148 : vector<16x128xf32>
    %150 = vector.extract_strided_slice %133 {offsets = [0, 256], sizes = [16, 128], strides = [1, 1]} : vector<16x512xf32> to vector<16x128xf32>
    %151 = math.tanh %150 : vector<16x128xf32>
    %152 = vector.extract_strided_slice %133 {offsets = [0, 384], sizes = [16, 128], strides = [1, 1]} : vector<16x512xf32> to vector<16x128xf32>
    %cst_59 = arith.constant 5.000000e-01 : f32
    %153 = vector.broadcast %cst_59 : f32 to vector<16x128xf32>
    %154 = arith.mulf %153, %152 : vector<16x128xf32>
    %155 = math.tanh %154 : vector<16x128xf32>
    %cst_60 = arith.constant 5.000000e-01 : f32
    %156 = vector.broadcast %cst_60 : f32 to vector<16x128xf32>
    %157 = arith.mulf %156, %155 : vector<16x128xf32>
    %cst_61 = arith.constant 5.000000e-01 : f32
    %158 = vector.broadcast %cst_61 : f32 to vector<16x128xf32>
    %159 = arith.addf %157, %158 : vector<16x128xf32>
    %160 = arith.mulf %149, %87 : vector<16x128xf32>
    %161 = arith.mulf %141, %151 : vector<16x128xf32>
    %162 = arith.addf %160, %161 : vector<16x128xf32>
    %163 = math.tanh %162 : vector<16x128xf32>
    %164 = arith.mulf %159, %163 : vector<16x128xf32>
    %c2_i32 = arith.constant 2 : i32
    %c16_i32_62 = arith.constant 16 : i32
    %165 = arith.muli %c2_i32, %c16_i32_62 : i32
    %166 = tpu.assume_multiple %165, 8 : i32
    %167 = arith.index_cast %166 : i32 to index
    %c0_63 = arith.constant 0 : index
    %168 = vector.load %arg11[%167, %c0_63] : memref<128x512xf32, #tpu.memory_space<vmem>>, vector<16x512xf32>
    %169 = arith.truncf %164 : vector<16x128xf32> to vector<16x128xbf16>
    %cst_64 = arith.constant dense<0.000000e+00> : vector<16x512xf32>
    %170 = tpu.matmul %169, %10, %cst_64 {dimension_numbers = #tpu.dot_dimension_numbers<[1], [0], [0], [1], [0, 0, 1, 1], [], []>} : vector<16x128xbf16>, vector<128x512xbf16>, vector<16x512xf32> -> vector<16x512xf32>
    %171 = arith.addf %170, %13 : vector<16x512xf32>
    %172 = arith.truncf %130 : vector<16x128xf32> to vector<16x128xbf16>
    %cst_65 = arith.constant dense<0.000000e+00> : vector<16x512xf32>
    %173 = tpu.matmul %172, %8, %cst_65 {dimension_numbers = #tpu.dot_dimension_numbers<[1], [0], [0], [1], [0, 0, 1, 1], [], []>} : vector<16x128xbf16>, vector<128x512xbf16>, vector<16x512xf32> -> vector<16x512xf32>
    %174 = arith.addf %168, %173 : vector<16x512xf32>
    %175 = vector.extract_strided_slice %174 {offsets = [0, 0], sizes = [16, 128], strides = [1, 1]} : vector<16x512xf32> to vector<16x128xf32>
    %cst_66 = arith.constant 5.000000e-01 : f32
    %176 = vector.broadcast %cst_66 : f32 to vector<16x128xf32>
    %177 = arith.mulf %176, %175 : vector<16x128xf32>
    %178 = math.tanh %177 : vector<16x128xf32>
    %cst_67 = arith.constant 5.000000e-01 : f32
    %179 = vector.broadcast %cst_67 : f32 to vector<16x128xf32>
    %180 = arith.mulf %179, %178 : vector<16x128xf32>
    %cst_68 = arith.constant 5.000000e-01 : f32
    %181 = vector.broadcast %cst_68 : f32 to vector<16x128xf32>
    %182 = arith.addf %180, %181 : vector<16x128xf32>
    %183 = vector.extract_strided_slice %174 {offsets = [0, 128], sizes = [16, 128], strides = [1, 1]} : vector<16x512xf32> to vector<16x128xf32>
    %cst_69 = arith.constant 5.000000e-01 : f32
    %184 = vector.broadcast %cst_69 : f32 to vector<16x128xf32>
    %185 = arith.mulf %184, %183 : vector<16x128xf32>
    %186 = math.tanh %185 : vector<16x128xf32>
    %cst_70 = arith.constant 5.000000e-01 : f32
    %187 = vector.broadcast %cst_70 : f32 to vector<16x128xf32>
    %188 = arith.mulf %187, %186 : vector<16x128xf32>
    %cst_71 = arith.constant 5.000000e-01 : f32
    %189 = vector.broadcast %cst_71 : f32 to vector<16x128xf32>
    %190 = arith.addf %188, %189 : vector<16x128xf32>
    %191 = vector.extract_strided_slice %174 {offsets = [0, 256], sizes = [16, 128], strides = [1, 1]} : vector<16x512xf32> to vector<16x128xf32>
    %192 = math.tanh %191 : vector<16x128xf32>
    %193 = vector.extract_strided_slice %174 {offsets = [0, 384], sizes = [16, 128], strides = [1, 1]} : vector<16x512xf32> to vector<16x128xf32>
    %cst_72 = arith.constant 5.000000e-01 : f32
    %194 = vector.broadcast %cst_72 : f32 to vector<16x128xf32>
    %195 = arith.mulf %194, %193 : vector<16x128xf32>
    %196 = math.tanh %195 : vector<16x128xf32>
    %cst_73 = arith.constant 5.000000e-01 : f32
    %197 = vector.broadcast %cst_73 : f32 to vector<16x128xf32>
    %198 = arith.mulf %197, %196 : vector<16x128xf32>
    %cst_74 = arith.constant 5.000000e-01 : f32
    %199 = vector.broadcast %cst_74 : f32 to vector<16x128xf32>
    %200 = arith.addf %198, %199 : vector<16x128xf32>
    %201 = arith.mulf %190, %128 : vector<16x128xf32>
    %202 = arith.mulf %182, %192 : vector<16x128xf32>
    %203 = arith.addf %201, %202 : vector<16x128xf32>
    %204 = math.tanh %203 : vector<16x128xf32>
    %205 = arith.mulf %200, %204 : vector<16x128xf32>
    %206 = arith.truncf %205 : vector<16x128xf32> to vector<16x128xbf16>
    %cst_75 = arith.constant dense<0.000000e+00> : vector<16x512xf32>
    %207 = tpu.matmul %206, %9, %cst_75 {dimension_numbers = #tpu.dot_dimension_numbers<[1], [0], [0], [1], [0, 0, 1, 1], [], []>} : vector<16x128xbf16>, vector<128x512xbf16>, vector<16x512xf32> -> vector<16x512xf32>
    %208 = arith.addf %171, %207 : vector<16x512xf32>
    %209 = vector.extract_strided_slice %208 {offsets = [0, 0], sizes = [16, 128], strides = [1, 1]} : vector<16x512xf32> to vector<16x128xf32>
    %cst_76 = arith.constant 5.000000e-01 : f32
    %210 = vector.broadcast %cst_76 : f32 to vector<16x128xf32>
    %211 = arith.mulf %210, %209 : vector<16x128xf32>
    %212 = math.tanh %211 : vector<16x128xf32>
    %cst_77 = arith.constant 5.000000e-01 : f32
    %213 = vector.broadcast %cst_77 : f32 to vector<16x128xf32>
    %214 = arith.mulf %213, %212 : vector<16x128xf32>
    %cst_78 = arith.constant 5.000000e-01 : f32
    %215 = vector.broadcast %cst_78 : f32 to vector<16x128xf32>
    %216 = arith.addf %214, %215 : vector<16x128xf32>
    %217 = vector.extract_strided_slice %208 {offsets = [0, 128], sizes = [16, 128], strides = [1, 1]} : vector<16x512xf32> to vector<16x128xf32>
    %cst_79 = arith.constant 5.000000e-01 : f32
    %218 = vector.broadcast %cst_79 : f32 to vector<16x128xf32>
    %219 = arith.mulf %218, %217 : vector<16x128xf32>
    %220 = math.tanh %219 : vector<16x128xf32>
    %cst_80 = arith.constant 5.000000e-01 : f32
    %221 = vector.broadcast %cst_80 : f32 to vector<16x128xf32>
    %222 = arith.mulf %221, %220 : vector<16x128xf32>
    %cst_81 = arith.constant 5.000000e-01 : f32
    %223 = vector.broadcast %cst_81 : f32 to vector<16x128xf32>
    %224 = arith.addf %222, %223 : vector<16x128xf32>
    %225 = vector.extract_strided_slice %208 {offsets = [0, 256], sizes = [16, 128], strides = [1, 1]} : vector<16x512xf32> to vector<16x128xf32>
    %226 = math.tanh %225 : vector<16x128xf32>
    %227 = vector.extract_strided_slice %208 {offsets = [0, 384], sizes = [16, 128], strides = [1, 1]} : vector<16x512xf32> to vector<16x128xf32>
    %cst_82 = arith.constant 5.000000e-01 : f32
    %228 = vector.broadcast %cst_82 : f32 to vector<16x128xf32>
    %229 = arith.mulf %228, %227 : vector<16x128xf32>
    %230 = math.tanh %229 : vector<16x128xf32>
    %cst_83 = arith.constant 5.000000e-01 : f32
    %231 = vector.broadcast %cst_83 : f32 to vector<16x128xf32>
    %232 = arith.mulf %231, %230 : vector<16x128xf32>
    %cst_84 = arith.constant 5.000000e-01 : f32
    %233 = vector.broadcast %cst_84 : f32 to vector<16x128xf32>
    %234 = arith.addf %232, %233 : vector<16x128xf32>
    %235 = arith.mulf %224, %162 : vector<16x128xf32>
    %236 = arith.mulf %216, %226 : vector<16x128xf32>
    %237 = arith.addf %235, %236 : vector<16x128xf32>
    %238 = math.tanh %237 : vector<16x128xf32>
    %239 = arith.mulf %234, %238 : vector<16x128xf32>
    %c3_i32 = arith.constant 3 : i32
    %c16_i32_85 = arith.constant 16 : i32
    %240 = arith.muli %c3_i32, %c16_i32_85 : i32
    %241 = tpu.assume_multiple %240, 8 : i32
    %242 = arith.index_cast %241 : i32 to index
    %c0_86 = arith.constant 0 : index
    %243 = vector.load %arg11[%242, %c0_86] : memref<128x512xf32, #tpu.memory_space<vmem>>, vector<16x512xf32>
    %244 = arith.truncf %239 : vector<16x128xf32> to vector<16x128xbf16>
    %cst_87 = arith.constant dense<0.000000e+00> : vector<16x512xf32>
    %245 = tpu.matmul %244, %10, %cst_87 {dimension_numbers = #tpu.dot_dimension_numbers<[1], [0], [0], [1], [0, 0, 1, 1], [], []>} : vector<16x128xbf16>, vector<128x512xbf16>, vector<16x512xf32> -> vector<16x512xf32>
    %246 = arith.addf %245, %13 : vector<16x512xf32>
    %247 = arith.truncf %205 : vector<16x128xf32> to vector<16x128xbf16>
    %cst_88 = arith.constant dense<0.000000e+00> : vector<16x512xf32>
    %248 = tpu.matmul %247, %8, %cst_88 {dimension_numbers = #tpu.dot_dimension_numbers<[1], [0], [0], [1], [0, 0, 1, 1], [], []>} : vector<16x128xbf16>, vector<128x512xbf16>, vector<16x512xf32> -> vector<16x512xf32>
    %249 = arith.addf %243, %248 : vector<16x512xf32>
    %250 = vector.extract_strided_slice %249 {offsets = [0, 0], sizes = [16, 128], strides = [1, 1]} : vector<16x512xf32> to vector<16x128xf32>
    %cst_89 = arith.constant 5.000000e-01 : f32
    %251 = vector.broadcast %cst_89 : f32 to vector<16x128xf32>
    %252 = arith.mulf %251, %250 : vector<16x128xf32>
    %253 = math.tanh %252 : vector<16x128xf32>
    %cst_90 = arith.constant 5.000000e-01 : f32
    %254 = vector.broadcast %cst_90 : f32 to vector<16x128xf32>
    %255 = arith.mulf %254, %253 : vector<16x128xf32>
    %cst_91 = arith.constant 5.000000e-01 : f32
    %256 = vector.broadcast %cst_91 : f32 to vector<16x128xf32>
    %257 = arith.addf %255, %256 : vector<16x128xf32>
    %258 = vector.extract_strided_slice %249 {offsets = [0, 128], sizes = [16, 128], strides = [1, 1]} : vector<16x512xf32> to vector<16x128xf32>
    %cst_92 = arith.constant 5.000000e-01 : f32
    %259 = vector.broadcast %cst_92 : f32 to vector<16x128xf32>
    %260 = arith.mulf %259, %258 : vector<16x128xf32>
    %261 = math.tanh %260 : vector<16x128xf32>
    %cst_93 = arith.constant 5.000000e-01 : f32
    %262 = vector.broadcast %cst_93 : f32 to vector<16x128xf32>
    %263 = arith.mulf %262, %261 : vector<16x128xf32>
    %cst_94 = arith.constant 5.000000e-01 : f32
    %264 = vector.broadcast %cst_94 : f32 to vector<16x128xf32>
    %265 = arith.addf %263, %264 : vector<16x128xf32>
    %266 = vector.extract_strided_slice %249 {offsets = [0, 256], sizes = [16, 128], strides = [1, 1]} : vector<16x512xf32> to vector<16x128xf32>
    %267 = math.tanh %266 : vector<16x128xf32>
    %268 = vector.extract_strided_slice %249 {offsets = [0, 384], sizes = [16, 128], strides = [1, 1]} : vector<16x512xf32> to vector<16x128xf32>
    %cst_95 = arith.constant 5.000000e-01 : f32
    %269 = vector.broadcast %cst_95 : f32 to vector<16x128xf32>
    %270 = arith.mulf %269, %268 : vector<16x128xf32>
    %271 = math.tanh %270 : vector<16x128xf32>
    %cst_96 = arith.constant 5.000000e-01 : f32
    %272 = vector.broadcast %cst_96 : f32 to vector<16x128xf32>
    %273 = arith.mulf %272, %271 : vector<16x128xf32>
    %cst_97 = arith.constant 5.000000e-01 : f32
    %274 = vector.broadcast %cst_97 : f32 to vector<16x128xf32>
    %275 = arith.addf %273, %274 : vector<16x128xf32>
    %276 = arith.mulf %265, %203 : vector<16x128xf32>
    %277 = arith.mulf %257, %267 : vector<16x128xf32>
    %278 = arith.addf %276, %277 : vector<16x128xf32>
    %279 = math.tanh %278 : vector<16x128xf32>
    %280 = arith.mulf %275, %279 : vector<16x128xf32>
    %281 = arith.truncf %280 : vector<16x128xf32> to vector<16x128xbf16>
    %cst_98 = arith.constant dense<0.000000e+00> : vector<16x512xf32>
    %282 = tpu.matmul %281, %9, %cst_98 {dimension_numbers = #tpu.dot_dimension_numbers<[1], [0], [0], [1], [0, 0, 1, 1], [], []>} : vector<16x128xbf16>, vector<128x512xbf16>, vector<16x512xf32> -> vector<16x512xf32>
    %283 = arith.addf %246, %282 : vector<16x512xf32>
    %284 = vector.extract_strided_slice %283 {offsets = [0, 0], sizes = [16, 128], strides = [1, 1]} : vector<16x512xf32> to vector<16x128xf32>
    %cst_99 = arith.constant 5.000000e-01 : f32
    %285 = vector.broadcast %cst_99 : f32 to vector<16x128xf32>
    %286 = arith.mulf %285, %284 : vector<16x128xf32>
    %287 = math.tanh %286 : vector<16x128xf32>
    %cst_100 = arith.constant 5.000000e-01 : f32
    %288 = vector.broadcast %cst_100 : f32 to vector<16x128xf32>
    %289 = arith.mulf %288, %287 : vector<16x128xf32>
    %cst_101 = arith.constant 5.000000e-01 : f32
    %290 = vector.broadcast %cst_101 : f32 to vector<16x128xf32>
    %291 = arith.addf %289, %290 : vector<16x128xf32>
    %292 = vector.extract_strided_slice %283 {offsets = [0, 128], sizes = [16, 128], strides = [1, 1]} : vector<16x512xf32> to vector<16x128xf32>
    %cst_102 = arith.constant 5.000000e-01 : f32
    %293 = vector.broadcast %cst_102 : f32 to vector<16x128xf32>
    %294 = arith.mulf %293, %292 : vector<16x128xf32>
    %295 = math.tanh %294 : vector<16x128xf32>
    %cst_103 = arith.constant 5.000000e-01 : f32
    %296 = vector.broadcast %cst_103 : f32 to vector<16x128xf32>
    %297 = arith.mulf %296, %295 : vector<16x128xf32>
    %cst_104 = arith.constant 5.000000e-01 : f32
    %298 = vector.broadcast %cst_104 : f32 to vector<16x128xf32>
    %299 = arith.addf %297, %298 : vector<16x128xf32>
    %300 = vector.extract_strided_slice %283 {offsets = [0, 256], sizes = [16, 128], strides = [1, 1]} : vector<16x512xf32> to vector<16x128xf32>
    %301 = math.tanh %300 : vector<16x128xf32>
    %302 = vector.extract_strided_slice %283 {offsets = [0, 384], sizes = [16, 128], strides = [1, 1]} : vector<16x512xf32> to vector<16x128xf32>
    %cst_105 = arith.constant 5.000000e-01 : f32
    %303 = vector.broadcast %cst_105 : f32 to vector<16x128xf32>
    %304 = arith.mulf %303, %302 : vector<16x128xf32>
    %305 = math.tanh %304 : vector<16x128xf32>
    %cst_106 = arith.constant 5.000000e-01 : f32
    %306 = vector.broadcast %cst_106 : f32 to vector<16x128xf32>
    %307 = arith.mulf %306, %305 : vector<16x128xf32>
    %cst_107 = arith.constant 5.000000e-01 : f32
    %308 = vector.broadcast %cst_107 : f32 to vector<16x128xf32>
    %309 = arith.addf %307, %308 : vector<16x128xf32>
    %310 = arith.mulf %299, %237 : vector<16x128xf32>
    %311 = arith.mulf %291, %301 : vector<16x128xf32>
    %312 = arith.addf %310, %311 : vector<16x128xf32>
    %313 = math.tanh %312 : vector<16x128xf32>
    %314 = arith.mulf %309, %313 : vector<16x128xf32>
    %c4_i32 = arith.constant 4 : i32
    %c16_i32_108 = arith.constant 16 : i32
    %315 = arith.muli %c4_i32, %c16_i32_108 : i32
    %316 = tpu.assume_multiple %315, 8 : i32
    %317 = arith.index_cast %316 : i32 to index
    %c0_109 = arith.constant 0 : index
    %318 = vector.load %arg11[%317, %c0_109] : memref<128x512xf32, #tpu.memory_space<vmem>>, vector<16x512xf32>
    %319 = arith.truncf %314 : vector<16x128xf32> to vector<16x128xbf16>
    %cst_110 = arith.constant dense<0.000000e+00> : vector<16x512xf32>
    %320 = tpu.matmul %319, %10, %cst_110 {dimension_numbers = #tpu.dot_dimension_numbers<[1], [0], [0], [1], [0, 0, 1, 1], [], []>} : vector<16x128xbf16>, vector<128x512xbf16>, vector<16x512xf32> -> vector<16x512xf32>
    %321 = arith.addf %320, %13 : vector<16x512xf32>
    %322 = arith.truncf %280 : vector<16x128xf32> to vector<16x128xbf16>
    %cst_111 = arith.constant dense<0.000000e+00> : vector<16x512xf32>
    %323 = tpu.matmul %322, %8, %cst_111 {dimension_numbers = #tpu.dot_dimension_numbers<[1], [0], [0], [1], [0, 0, 1, 1], [], []>} : vector<16x128xbf16>, vector<128x512xbf16>, vector<16x512xf32> -> vector<16x512xf32>
    %324 = arith.addf %318, %323 : vector<16x512xf32>
    %325 = vector.extract_strided_slice %324 {offsets = [0, 0], sizes = [16, 128], strides = [1, 1]} : vector<16x512xf32> to vector<16x128xf32>
    %cst_112 = arith.constant 5.000000e-01 : f32
    %326 = vector.broadcast %cst_112 : f32 to vector<16x128xf32>
    %327 = arith.mulf %326, %325 : vector<16x128xf32>
    %328 = math.tanh %327 : vector<16x128xf32>
    %cst_113 = arith.constant 5.000000e-01 : f32
    %329 = vector.broadcast %cst_113 : f32 to vector<16x128xf32>
    %330 = arith.mulf %329, %328 : vector<16x128xf32>
    %cst_114 = arith.constant 5.000000e-01 : f32
    %331 = vector.broadcast %cst_114 : f32 to vector<16x128xf32>
    %332 = arith.addf %330, %331 : vector<16x128xf32>
    %333 = vector.extract_strided_slice %324 {offsets = [0, 128], sizes = [16, 128], strides = [1, 1]} : vector<16x512xf32> to vector<16x128xf32>
    %cst_115 = arith.constant 5.000000e-01 : f32
    %334 = vector.broadcast %cst_115 : f32 to vector<16x128xf32>
    %335 = arith.mulf %334, %333 : vector<16x128xf32>
    %336 = math.tanh %335 : vector<16x128xf32>
    %cst_116 = arith.constant 5.000000e-01 : f32
    %337 = vector.broadcast %cst_116 : f32 to vector<16x128xf32>
    %338 = arith.mulf %337, %336 : vector<16x128xf32>
    %cst_117 = arith.constant 5.000000e-01 : f32
    %339 = vector.broadcast %cst_117 : f32 to vector<16x128xf32>
    %340 = arith.addf %338, %339 : vector<16x128xf32>
    %341 = vector.extract_strided_slice %324 {offsets = [0, 256], sizes = [16, 128], strides = [1, 1]} : vector<16x512xf32> to vector<16x128xf32>
    %342 = math.tanh %341 : vector<16x128xf32>
    %343 = vector.extract_strided_slice %324 {offsets = [0, 384], sizes = [16, 128], strides = [1, 1]} : vector<16x512xf32> to vector<16x128xf32>
    %cst_118 = arith.constant 5.000000e-01 : f32
    %344 = vector.broadcast %cst_118 : f32 to vector<16x128xf32>
    %345 = arith.mulf %344, %343 : vector<16x128xf32>
    %346 = math.tanh %345 : vector<16x128xf32>
    %cst_119 = arith.constant 5.000000e-01 : f32
    %347 = vector.broadcast %cst_119 : f32 to vector<16x128xf32>
    %348 = arith.mulf %347, %346 : vector<16x128xf32>
    %cst_120 = arith.constant 5.000000e-01 : f32
    %349 = vector.broadcast %cst_120 : f32 to vector<16x128xf32>
    %350 = arith.addf %348, %349 : vector<16x128xf32>
    %351 = arith.mulf %340, %278 : vector<16x128xf32>
    %352 = arith.mulf %332, %342 : vector<16x128xf32>
    %353 = arith.addf %351, %352 : vector<16x128xf32>
    %354 = math.tanh %353 : vector<16x128xf32>
    %355 = arith.mulf %350, %354 : vector<16x128xf32>
    %356 = arith.truncf %355 : vector<16x128xf32> to vector<16x128xbf16>
    %cst_121 = arith.constant dense<0.000000e+00> : vector<16x512xf32>
    %357 = tpu.matmul %356, %9, %cst_121 {dimension_numbers = #tpu.dot_dimension_numbers<[1], [0], [0], [1], [0, 0, 1, 1], [], []>} : vector<16x128xbf16>, vector<128x512xbf16>, vector<16x512xf32> -> vector<16x512xf32>
    %358 = arith.addf %321, %357 : vector<16x512xf32>
    %359 = vector.extract_strided_slice %358 {offsets = [0, 0], sizes = [16, 128], strides = [1, 1]} : vector<16x512xf32> to vector<16x128xf32>
    %cst_122 = arith.constant 5.000000e-01 : f32
    %360 = vector.broadcast %cst_122 : f32 to vector<16x128xf32>
    %361 = arith.mulf %360, %359 : vector<16x128xf32>
    %362 = math.tanh %361 : vector<16x128xf32>
    %cst_123 = arith.constant 5.000000e-01 : f32
    %363 = vector.broadcast %cst_123 : f32 to vector<16x128xf32>
    %364 = arith.mulf %363, %362 : vector<16x128xf32>
    %cst_124 = arith.constant 5.000000e-01 : f32
    %365 = vector.broadcast %cst_124 : f32 to vector<16x128xf32>
    %366 = arith.addf %364, %365 : vector<16x128xf32>
    %367 = vector.extract_strided_slice %358 {offsets = [0, 128], sizes = [16, 128], strides = [1, 1]} : vector<16x512xf32> to vector<16x128xf32>
    %cst_125 = arith.constant 5.000000e-01 : f32
    %368 = vector.broadcast %cst_125 : f32 to vector<16x128xf32>
    %369 = arith.mulf %368, %367 : vector<16x128xf32>
    %370 = math.tanh %369 : vector<16x128xf32>
    %cst_126 = arith.constant 5.000000e-01 : f32
    %371 = vector.broadcast %cst_126 : f32 to vector<16x128xf32>
    %372 = arith.mulf %371, %370 : vector<16x128xf32>
    %cst_127 = arith.constant 5.000000e-01 : f32
    %373 = vector.broadcast %cst_127 : f32 to vector<16x128xf32>
    %374 = arith.addf %372, %373 : vector<16x128xf32>
    %375 = vector.extract_strided_slice %358 {offsets = [0, 256], sizes = [16, 128], strides = [1, 1]} : vector<16x512xf32> to vector<16x128xf32>
    %376 = math.tanh %375 : vector<16x128xf32>
    %377 = vector.extract_strided_slice %358 {offsets = [0, 384], sizes = [16, 128], strides = [1, 1]} : vector<16x512xf32> to vector<16x128xf32>
    %cst_128 = arith.constant 5.000000e-01 : f32
    %378 = vector.broadcast %cst_128 : f32 to vector<16x128xf32>
    %379 = arith.mulf %378, %377 : vector<16x128xf32>
    %380 = math.tanh %379 : vector<16x128xf32>
    %cst_129 = arith.constant 5.000000e-01 : f32
    %381 = vector.broadcast %cst_129 : f32 to vector<16x128xf32>
    %382 = arith.mulf %381, %380 : vector<16x128xf32>
    %cst_130 = arith.constant 5.000000e-01 : f32
    %383 = vector.broadcast %cst_130 : f32 to vector<16x128xf32>
    %384 = arith.addf %382, %383 : vector<16x128xf32>
    %385 = arith.mulf %374, %312 : vector<16x128xf32>
    %386 = arith.mulf %366, %376 : vector<16x128xf32>
    %387 = arith.addf %385, %386 : vector<16x128xf32>
    %388 = math.tanh %387 : vector<16x128xf32>
    %389 = arith.mulf %384, %388 : vector<16x128xf32>
    %c5_i32 = arith.constant 5 : i32
    %c16_i32_131 = arith.constant 16 : i32
    %390 = arith.muli %c5_i32, %c16_i32_131 : i32
    %391 = tpu.assume_multiple %390, 8 : i32
    %392 = arith.index_cast %391 : i32 to index
    %c0_132 = arith.constant 0 : index
    %393 = vector.load %arg11[%392, %c0_132] : memref<128x512xf32, #tpu.memory_space<vmem>>, vector<16x512xf32>
    %394 = arith.truncf %389 : vector<16x128xf32> to vector<16x128xbf16>
    %cst_133 = arith.constant dense<0.000000e+00> : vector<16x512xf32>
    %395 = tpu.matmul %394, %10, %cst_133 {dimension_numbers = #tpu.dot_dimension_numbers<[1], [0], [0], [1], [0, 0, 1, 1], [], []>} : vector<16x128xbf16>, vector<128x512xbf16>, vector<16x512xf32> -> vector<16x512xf32>
    %396 = arith.addf %395, %13 : vector<16x512xf32>
    %397 = arith.truncf %355 : vector<16x128xf32> to vector<16x128xbf16>
    %cst_134 = arith.constant dense<0.000000e+00> : vector<16x512xf32>
    %398 = tpu.matmul %397, %8, %cst_134 {dimension_numbers = #tpu.dot_dimension_numbers<[1], [0], [0], [1], [0, 0, 1, 1], [], []>} : vector<16x128xbf16>, vector<128x512xbf16>, vector<16x512xf32> -> vector<16x512xf32>
    %399 = arith.addf %393, %398 : vector<16x512xf32>
    %400 = vector.extract_strided_slice %399 {offsets = [0, 0], sizes = [16, 128], strides = [1, 1]} : vector<16x512xf32> to vector<16x128xf32>
    %cst_135 = arith.constant 5.000000e-01 : f32
    %401 = vector.broadcast %cst_135 : f32 to vector<16x128xf32>
    %402 = arith.mulf %401, %400 : vector<16x128xf32>
    %403 = math.tanh %402 : vector<16x128xf32>
    %cst_136 = arith.constant 5.000000e-01 : f32
    %404 = vector.broadcast %cst_136 : f32 to vector<16x128xf32>
    %405 = arith.mulf %404, %403 : vector<16x128xf32>
    %cst_137 = arith.constant 5.000000e-01 : f32
    %406 = vector.broadcast %cst_137 : f32 to vector<16x128xf32>
    %407 = arith.addf %405, %406 : vector<16x128xf32>
    %408 = vector.extract_strided_slice %399 {offsets = [0, 128], sizes = [16, 128], strides = [1, 1]} : vector<16x512xf32> to vector<16x128xf32>
    %cst_138 = arith.constant 5.000000e-01 : f32
    %409 = vector.broadcast %cst_138 : f32 to vector<16x128xf32>
    %410 = arith.mulf %409, %408 : vector<16x128xf32>
    %411 = math.tanh %410 : vector<16x128xf32>
    %cst_139 = arith.constant 5.000000e-01 : f32
    %412 = vector.broadcast %cst_139 : f32 to vector<16x128xf32>
    %413 = arith.mulf %412, %411 : vector<16x128xf32>
    %cst_140 = arith.constant 5.000000e-01 : f32
    %414 = vector.broadcast %cst_140 : f32 to vector<16x128xf32>
    %415 = arith.addf %413, %414 : vector<16x128xf32>
    %416 = vector.extract_strided_slice %399 {offsets = [0, 256], sizes = [16, 128], strides = [1, 1]} : vector<16x512xf32> to vector<16x128xf32>
    %417 = math.tanh %416 : vector<16x128xf32>
    %418 = vector.extract_strided_slice %399 {offsets = [0, 384], sizes = [16, 128], strides = [1, 1]} : vector<16x512xf32> to vector<16x128xf32>
    %cst_141 = arith.constant 5.000000e-01 : f32
    %419 = vector.broadcast %cst_141 : f32 to vector<16x128xf32>
    %420 = arith.mulf %419, %418 : vector<16x128xf32>
    %421 = math.tanh %420 : vector<16x128xf32>
    %cst_142 = arith.constant 5.000000e-01 : f32
    %422 = vector.broadcast %cst_142 : f32 to vector<16x128xf32>
    %423 = arith.mulf %422, %421 : vector<16x128xf32>
    %cst_143 = arith.constant 5.000000e-01 : f32
    %424 = vector.broadcast %cst_143 : f32 to vector<16x128xf32>
    %425 = arith.addf %423, %424 : vector<16x128xf32>
    %426 = arith.mulf %415, %353 : vector<16x128xf32>
    %427 = arith.mulf %407, %417 : vector<16x128xf32>
    %428 = arith.addf %426, %427 : vector<16x128xf32>
    %429 = math.tanh %428 : vector<16x128xf32>
    %430 = arith.mulf %425, %429 : vector<16x128xf32>
    %431 = arith.truncf %430 : vector<16x128xf32> to vector<16x128xbf16>
    %cst_144 = arith.constant dense<0.000000e+00> : vector<16x512xf32>
    %432 = tpu.matmul %431, %9, %cst_144 {dimension_numbers = #tpu.dot_dimension_numbers<[1], [0], [0], [1], [0, 0, 1, 1], [], []>} : vector<16x128xbf16>, vector<128x512xbf16>, vector<16x512xf32> -> vector<16x512xf32>
    %433 = arith.addf %396, %432 : vector<16x512xf32>
    %434 = vector.extract_strided_slice %433 {offsets = [0, 0], sizes = [16, 128], strides = [1, 1]} : vector<16x512xf32> to vector<16x128xf32>
    %cst_145 = arith.constant 5.000000e-01 : f32
    %435 = vector.broadcast %cst_145 : f32 to vector<16x128xf32>
    %436 = arith.mulf %435, %434 : vector<16x128xf32>
    %437 = math.tanh %436 : vector<16x128xf32>
    %cst_146 = arith.constant 5.000000e-01 : f32
    %438 = vector.broadcast %cst_146 : f32 to vector<16x128xf32>
    %439 = arith.mulf %438, %437 : vector<16x128xf32>
    %cst_147 = arith.constant 5.000000e-01 : f32
    %440 = vector.broadcast %cst_147 : f32 to vector<16x128xf32>
    %441 = arith.addf %439, %440 : vector<16x128xf32>
    %442 = vector.extract_strided_slice %433 {offsets = [0, 128], sizes = [16, 128], strides = [1, 1]} : vector<16x512xf32> to vector<16x128xf32>
    %cst_148 = arith.constant 5.000000e-01 : f32
    %443 = vector.broadcast %cst_148 : f32 to vector<16x128xf32>
    %444 = arith.mulf %443, %442 : vector<16x128xf32>
    %445 = math.tanh %444 : vector<16x128xf32>
    %cst_149 = arith.constant 5.000000e-01 : f32
    %446 = vector.broadcast %cst_149 : f32 to vector<16x128xf32>
    %447 = arith.mulf %446, %445 : vector<16x128xf32>
    %cst_150 = arith.constant 5.000000e-01 : f32
    %448 = vector.broadcast %cst_150 : f32 to vector<16x128xf32>
    %449 = arith.addf %447, %448 : vector<16x128xf32>
    %450 = vector.extract_strided_slice %433 {offsets = [0, 256], sizes = [16, 128], strides = [1, 1]} : vector<16x512xf32> to vector<16x128xf32>
    %451 = math.tanh %450 : vector<16x128xf32>
    %452 = vector.extract_strided_slice %433 {offsets = [0, 384], sizes = [16, 128], strides = [1, 1]} : vector<16x512xf32> to vector<16x128xf32>
    %cst_151 = arith.constant 5.000000e-01 : f32
    %453 = vector.broadcast %cst_151 : f32 to vector<16x128xf32>
    %454 = arith.mulf %453, %452 : vector<16x128xf32>
    %455 = math.tanh %454 : vector<16x128xf32>
    %cst_152 = arith.constant 5.000000e-01 : f32
    %456 = vector.broadcast %cst_152 : f32 to vector<16x128xf32>
    %457 = arith.mulf %456, %455 : vector<16x128xf32>
    %cst_153 = arith.constant 5.000000e-01 : f32
    %458 = vector.broadcast %cst_153 : f32 to vector<16x128xf32>
    %459 = arith.addf %457, %458 : vector<16x128xf32>
    %460 = arith.mulf %449, %387 : vector<16x128xf32>
    %461 = arith.mulf %441, %451 : vector<16x128xf32>
    %462 = arith.addf %460, %461 : vector<16x128xf32>
    %463 = math.tanh %462 : vector<16x128xf32>
    %464 = arith.mulf %459, %463 : vector<16x128xf32>
    %c6_i32 = arith.constant 6 : i32
    %c16_i32_154 = arith.constant 16 : i32
    %465 = arith.muli %c6_i32, %c16_i32_154 : i32
    %466 = tpu.assume_multiple %465, 8 : i32
    %467 = arith.index_cast %466 : i32 to index
    %c0_155 = arith.constant 0 : index
    %468 = vector.load %arg11[%467, %c0_155] : memref<128x512xf32, #tpu.memory_space<vmem>>, vector<16x512xf32>
    %469 = arith.truncf %464 : vector<16x128xf32> to vector<16x128xbf16>
    %cst_156 = arith.constant dense<0.000000e+00> : vector<16x512xf32>
    %470 = tpu.matmul %469, %10, %cst_156 {dimension_numbers = #tpu.dot_dimension_numbers<[1], [0], [0], [1], [0, 0, 1, 1], [], []>} : vector<16x128xbf16>, vector<128x512xbf16>, vector<16x512xf32> -> vector<16x512xf32>
    %471 = arith.addf %470, %13 : vector<16x512xf32>
    %472 = arith.truncf %430 : vector<16x128xf32> to vector<16x128xbf16>
    %cst_157 = arith.constant dense<0.000000e+00> : vector<16x512xf32>
    %473 = tpu.matmul %472, %8, %cst_157 {dimension_numbers = #tpu.dot_dimension_numbers<[1], [0], [0], [1], [0, 0, 1, 1], [], []>} : vector<16x128xbf16>, vector<128x512xbf16>, vector<16x512xf32> -> vector<16x512xf32>
    %474 = arith.addf %468, %473 : vector<16x512xf32>
    %475 = vector.extract_strided_slice %474 {offsets = [0, 0], sizes = [16, 128], strides = [1, 1]} : vector<16x512xf32> to vector<16x128xf32>
    %cst_158 = arith.constant 5.000000e-01 : f32
    %476 = vector.broadcast %cst_158 : f32 to vector<16x128xf32>
    %477 = arith.mulf %476, %475 : vector<16x128xf32>
    %478 = math.tanh %477 : vector<16x128xf32>
    %cst_159 = arith.constant 5.000000e-01 : f32
    %479 = vector.broadcast %cst_159 : f32 to vector<16x128xf32>
    %480 = arith.mulf %479, %478 : vector<16x128xf32>
    %cst_160 = arith.constant 5.000000e-01 : f32
    %481 = vector.broadcast %cst_160 : f32 to vector<16x128xf32>
    %482 = arith.addf %480, %481 : vector<16x128xf32>
    %483 = vector.extract_strided_slice %474 {offsets = [0, 128], sizes = [16, 128], strides = [1, 1]} : vector<16x512xf32> to vector<16x128xf32>
    %cst_161 = arith.constant 5.000000e-01 : f32
    %484 = vector.broadcast %cst_161 : f32 to vector<16x128xf32>
    %485 = arith.mulf %484, %483 : vector<16x128xf32>
    %486 = math.tanh %485 : vector<16x128xf32>
    %cst_162 = arith.constant 5.000000e-01 : f32
    %487 = vector.broadcast %cst_162 : f32 to vector<16x128xf32>
    %488 = arith.mulf %487, %486 : vector<16x128xf32>
    %cst_163 = arith.constant 5.000000e-01 : f32
    %489 = vector.broadcast %cst_163 : f32 to vector<16x128xf32>
    %490 = arith.addf %488, %489 : vector<16x128xf32>
    %491 = vector.extract_strided_slice %474 {offsets = [0, 256], sizes = [16, 128], strides = [1, 1]} : vector<16x512xf32> to vector<16x128xf32>
    %492 = math.tanh %491 : vector<16x128xf32>
    %493 = vector.extract_strided_slice %474 {offsets = [0, 384], sizes = [16, 128], strides = [1, 1]} : vector<16x512xf32> to vector<16x128xf32>
    %cst_164 = arith.constant 5.000000e-01 : f32
    %494 = vector.broadcast %cst_164 : f32 to vector<16x128xf32>
    %495 = arith.mulf %494, %493 : vector<16x128xf32>
    %496 = math.tanh %495 : vector<16x128xf32>
    %cst_165 = arith.constant 5.000000e-01 : f32
    %497 = vector.broadcast %cst_165 : f32 to vector<16x128xf32>
    %498 = arith.mulf %497, %496 : vector<16x128xf32>
    %cst_166 = arith.constant 5.000000e-01 : f32
    %499 = vector.broadcast %cst_166 : f32 to vector<16x128xf32>
    %500 = arith.addf %498, %499 : vector<16x128xf32>
    %501 = arith.mulf %490, %428 : vector<16x128xf32>
    %502 = arith.mulf %482, %492 : vector<16x128xf32>
    %503 = arith.addf %501, %502 : vector<16x128xf32>
    %504 = math.tanh %503 : vector<16x128xf32>
    %505 = arith.mulf %500, %504 : vector<16x128xf32>
    %506 = arith.truncf %505 : vector<16x128xf32> to vector<16x128xbf16>
    %cst_167 = arith.constant dense<0.000000e+00> : vector<16x512xf32>
    %507 = tpu.matmul %506, %9, %cst_167 {dimension_numbers = #tpu.dot_dimension_numbers<[1], [0], [0], [1], [0, 0, 1, 1], [], []>} : vector<16x128xbf16>, vector<128x512xbf16>, vector<16x512xf32> -> vector<16x512xf32>
    %508 = arith.addf %471, %507 : vector<16x512xf32>
    %509 = vector.extract_strided_slice %508 {offsets = [0, 0], sizes = [16, 128], strides = [1, 1]} : vector<16x512xf32> to vector<16x128xf32>
    %cst_168 = arith.constant 5.000000e-01 : f32
    %510 = vector.broadcast %cst_168 : f32 to vector<16x128xf32>
    %511 = arith.mulf %510, %509 : vector<16x128xf32>
    %512 = math.tanh %511 : vector<16x128xf32>
    %cst_169 = arith.constant 5.000000e-01 : f32
    %513 = vector.broadcast %cst_169 : f32 to vector<16x128xf32>
    %514 = arith.mulf %513, %512 : vector<16x128xf32>
    %cst_170 = arith.constant 5.000000e-01 : f32
    %515 = vector.broadcast %cst_170 : f32 to vector<16x128xf32>
    %516 = arith.addf %514, %515 : vector<16x128xf32>
    %517 = vector.extract_strided_slice %508 {offsets = [0, 128], sizes = [16, 128], strides = [1, 1]} : vector<16x512xf32> to vector<16x128xf32>
    %cst_171 = arith.constant 5.000000e-01 : f32
    %518 = vector.broadcast %cst_171 : f32 to vector<16x128xf32>
    %519 = arith.mulf %518, %517 : vector<16x128xf32>
    %520 = math.tanh %519 : vector<16x128xf32>
    %cst_172 = arith.constant 5.000000e-01 : f32
    %521 = vector.broadcast %cst_172 : f32 to vector<16x128xf32>
    %522 = arith.mulf %521, %520 : vector<16x128xf32>
    %cst_173 = arith.constant 5.000000e-01 : f32
    %523 = vector.broadcast %cst_173 : f32 to vector<16x128xf32>
    %524 = arith.addf %522, %523 : vector<16x128xf32>
    %525 = vector.extract_strided_slice %508 {offsets = [0, 256], sizes = [16, 128], strides = [1, 1]} : vector<16x512xf32> to vector<16x128xf32>
    %526 = math.tanh %525 : vector<16x128xf32>
    %527 = vector.extract_strided_slice %508 {offsets = [0, 384], sizes = [16, 128], strides = [1, 1]} : vector<16x512xf32> to vector<16x128xf32>
    %cst_174 = arith.constant 5.000000e-01 : f32
    %528 = vector.broadcast %cst_174 : f32 to vector<16x128xf32>
    %529 = arith.mulf %528, %527 : vector<16x128xf32>
    %530 = math.tanh %529 : vector<16x128xf32>
    %cst_175 = arith.constant 5.000000e-01 : f32
    %531 = vector.broadcast %cst_175 : f32 to vector<16x128xf32>
    %532 = arith.mulf %531, %530 : vector<16x128xf32>
    %cst_176 = arith.constant 5.000000e-01 : f32
    %533 = vector.broadcast %cst_176 : f32 to vector<16x128xf32>
    %534 = arith.addf %532, %533 : vector<16x128xf32>
    %535 = arith.mulf %524, %462 : vector<16x128xf32>
    %536 = arith.mulf %516, %526 : vector<16x128xf32>
    %537 = arith.addf %535, %536 : vector<16x128xf32>
    %538 = math.tanh %537 : vector<16x128xf32>
    %539 = arith.mulf %534, %538 : vector<16x128xf32>
    %c7_i32 = arith.constant 7 : i32
    %c16_i32_177 = arith.constant 16 : i32
    %540 = arith.muli %c7_i32, %c16_i32_177 : i32
    %541 = tpu.assume_multiple %540, 8 : i32
    %542 = arith.index_cast %541 : i32 to index
    %c0_178 = arith.constant 0 : index
    %543 = vector.load %arg11[%542, %c0_178] : memref<128x512xf32, #tpu.memory_space<vmem>>, vector<16x512xf32>
    %544 = arith.truncf %539 : vector<16x128xf32> to vector<16x128xbf16>
    %cst_179 = arith.constant dense<0.000000e+00> : vector<16x512xf32>
    %545 = tpu.matmul %544, %10, %cst_179 {dimension_numbers = #tpu.dot_dimension_numbers<[1], [0], [0], [1], [0, 0, 1, 1], [], []>} : vector<16x128xbf16>, vector<128x512xbf16>, vector<16x512xf32> -> vector<16x512xf32>
    %546 = arith.addf %545, %13 : vector<16x512xf32>
    %547 = arith.truncf %505 : vector<16x128xf32> to vector<16x128xbf16>
    %cst_180 = arith.constant dense<0.000000e+00> : vector<16x512xf32>
    %548 = tpu.matmul %547, %8, %cst_180 {dimension_numbers = #tpu.dot_dimension_numbers<[1], [0], [0], [1], [0, 0, 1, 1], [], []>} : vector<16x128xbf16>, vector<128x512xbf16>, vector<16x512xf32> -> vector<16x512xf32>
    %549 = arith.addf %543, %548 : vector<16x512xf32>
    %550 = vector.extract_strided_slice %549 {offsets = [0, 0], sizes = [16, 128], strides = [1, 1]} : vector<16x512xf32> to vector<16x128xf32>
    %cst_181 = arith.constant 5.000000e-01 : f32
    %551 = vector.broadcast %cst_181 : f32 to vector<16x128xf32>
    %552 = arith.mulf %551, %550 : vector<16x128xf32>
    %553 = math.tanh %552 : vector<16x128xf32>
    %cst_182 = arith.constant 5.000000e-01 : f32
    %554 = vector.broadcast %cst_182 : f32 to vector<16x128xf32>
    %555 = arith.mulf %554, %553 : vector<16x128xf32>
    %cst_183 = arith.constant 5.000000e-01 : f32
    %556 = vector.broadcast %cst_183 : f32 to vector<16x128xf32>
    %557 = arith.addf %555, %556 : vector<16x128xf32>
    %558 = vector.extract_strided_slice %549 {offsets = [0, 128], sizes = [16, 128], strides = [1, 1]} : vector<16x512xf32> to vector<16x128xf32>
    %cst_184 = arith.constant 5.000000e-01 : f32
    %559 = vector.broadcast %cst_184 : f32 to vector<16x128xf32>
    %560 = arith.mulf %559, %558 : vector<16x128xf32>
    %561 = math.tanh %560 : vector<16x128xf32>
    %cst_185 = arith.constant 5.000000e-01 : f32
    %562 = vector.broadcast %cst_185 : f32 to vector<16x128xf32>
    %563 = arith.mulf %562, %561 : vector<16x128xf32>
    %cst_186 = arith.constant 5.000000e-01 : f32
    %564 = vector.broadcast %cst_186 : f32 to vector<16x128xf32>
    %565 = arith.addf %563, %564 : vector<16x128xf32>
    %566 = vector.extract_strided_slice %549 {offsets = [0, 256], sizes = [16, 128], strides = [1, 1]} : vector<16x512xf32> to vector<16x128xf32>
    %567 = math.tanh %566 : vector<16x128xf32>
    %568 = vector.extract_strided_slice %549 {offsets = [0, 384], sizes = [16, 128], strides = [1, 1]} : vector<16x512xf32> to vector<16x128xf32>
    %cst_187 = arith.constant 5.000000e-01 : f32
    %569 = vector.broadcast %cst_187 : f32 to vector<16x128xf32>
    %570 = arith.mulf %569, %568 : vector<16x128xf32>
    %571 = math.tanh %570 : vector<16x128xf32>
    %cst_188 = arith.constant 5.000000e-01 : f32
    %572 = vector.broadcast %cst_188 : f32 to vector<16x128xf32>
    %573 = arith.mulf %572, %571 : vector<16x128xf32>
    %cst_189 = arith.constant 5.000000e-01 : f32
    %574 = vector.broadcast %cst_189 : f32 to vector<16x128xf32>
    %575 = arith.addf %573, %574 : vector<16x128xf32>
    %576 = arith.mulf %565, %503 : vector<16x128xf32>
    %577 = arith.mulf %557, %567 : vector<16x128xf32>
    %578 = arith.addf %576, %577 : vector<16x128xf32>
    %579 = math.tanh %578 : vector<16x128xf32>
    %580 = arith.mulf %575, %579 : vector<16x128xf32>
    %581 = arith.truncf %580 : vector<16x128xf32> to vector<16x128xbf16>
    %cst_190 = arith.constant dense<0.000000e+00> : vector<16x512xf32>
    %582 = tpu.matmul %581, %9, %cst_190 {dimension_numbers = #tpu.dot_dimension_numbers<[1], [0], [0], [1], [0, 0, 1, 1], [], []>} : vector<16x128xbf16>, vector<128x512xbf16>, vector<16x512xf32> -> vector<16x512xf32>
    %583 = arith.addf %546, %582 : vector<16x512xf32>
    %584 = vector.extract_strided_slice %583 {offsets = [0, 0], sizes = [16, 128], strides = [1, 1]} : vector<16x512xf32> to vector<16x128xf32>
    %cst_191 = arith.constant 5.000000e-01 : f32
    %585 = vector.broadcast %cst_191 : f32 to vector<16x128xf32>
    %586 = arith.mulf %585, %584 : vector<16x128xf32>
    %587 = math.tanh %586 : vector<16x128xf32>
    %cst_192 = arith.constant 5.000000e-01 : f32
    %588 = vector.broadcast %cst_192 : f32 to vector<16x128xf32>
    %589 = arith.mulf %588, %587 : vector<16x128xf32>
    %cst_193 = arith.constant 5.000000e-01 : f32
    %590 = vector.broadcast %cst_193 : f32 to vector<16x128xf32>
    %591 = arith.addf %589, %590 : vector<16x128xf32>
    %592 = vector.extract_strided_slice %583 {offsets = [0, 128], sizes = [16, 128], strides = [1, 1]} : vector<16x512xf32> to vector<16x128xf32>
    %cst_194 = arith.constant 5.000000e-01 : f32
    %593 = vector.broadcast %cst_194 : f32 to vector<16x128xf32>
    %594 = arith.mulf %593, %592 : vector<16x128xf32>
    %595 = math.tanh %594 : vector<16x128xf32>
    %cst_195 = arith.constant 5.000000e-01 : f32
    %596 = vector.broadcast %cst_195 : f32 to vector<16x128xf32>
    %597 = arith.mulf %596, %595 : vector<16x128xf32>
    %cst_196 = arith.constant 5.000000e-01 : f32
    %598 = vector.broadcast %cst_196 : f32 to vector<16x128xf32>
    %599 = arith.addf %597, %598 : vector<16x128xf32>
    %600 = vector.extract_strided_slice %583 {offsets = [0, 256], sizes = [16, 128], strides = [1, 1]} : vector<16x512xf32> to vector<16x128xf32>
    %601 = math.tanh %600 : vector<16x128xf32>
    %602 = vector.extract_strided_slice %583 {offsets = [0, 384], sizes = [16, 128], strides = [1, 1]} : vector<16x512xf32> to vector<16x128xf32>
    %cst_197 = arith.constant 5.000000e-01 : f32
    %603 = vector.broadcast %cst_197 : f32 to vector<16x128xf32>
    %604 = arith.mulf %603, %602 : vector<16x128xf32>
    %605 = math.tanh %604 : vector<16x128xf32>
    %cst_198 = arith.constant 5.000000e-01 : f32
    %606 = vector.broadcast %cst_198 : f32 to vector<16x128xf32>
    %607 = arith.mulf %606, %605 : vector<16x128xf32>
    %cst_199 = arith.constant 5.000000e-01 : f32
    %608 = vector.broadcast %cst_199 : f32 to vector<16x128xf32>
    %609 = arith.addf %607, %608 : vector<16x128xf32>
    %610 = arith.mulf %599, %537 : vector<16x128xf32>
    %611 = arith.mulf %591, %601 : vector<16x128xf32>
    %612 = arith.addf %610, %611 : vector<16x128xf32>
    %613 = math.tanh %612 : vector<16x128xf32>
    %614 = arith.mulf %609, %613 : vector<16x128xf32>
    %c8_i32 = arith.constant 8 : i32
    %615 = arith.truncf %614 : vector<16x128xf32> to vector<16x128xbf16>
    %c0_200 = arith.constant 0 : index
    %c0_201 = arith.constant 0 : index
    %616 = vector.load %arg8[%c0_200, %c0_201] : memref<128x512xbf16, #tpu.memory_space<vmem>>, vector<128x512xbf16>
    %cst_202 = arith.constant dense<0.000000e+00> : vector<16x512xf32>
    %617 = tpu.matmul %615, %616, %cst_202 {dimension_numbers = #tpu.dot_dimension_numbers<[1], [0], [0], [1], [0, 0, 1, 1], [], []>} : vector<16x128xbf16>, vector<128x512xbf16>, vector<16x512xf32> -> vector<16x512xf32>
    %c0_203 = arith.constant 0 : index
    %c0_204 = arith.constant 0 : index
    %618 = vector.load %arg9[%c0_203, %c0_204] : memref<1x512xf32, #tpu.memory_space<vmem>>, vector<1x512xf32>
    %619 = vector.broadcast %618 : vector<1x512xf32> to vector<16x512xf32>
    %620 = arith.addf %617, %619 : vector<16x512xf32>
    %cst_205 = arith.constant dense<0xFF800000> : vector<16xf32>
    %621 = vector.multi_reduction <maximumf>, %620, %cst_205 [1] : vector<16x512xf32> to vector<16xf32>
    %622 = vector.shape_cast %621 : vector<16xf32> to vector<16x1xf32>
    %623 = vector.broadcast %622 : vector<16x1xf32> to vector<16x512xf32>
    %624 = arith.subf %620, %623 : vector<16x512xf32>
    %625 = math.exp %624 : vector<16x512xf32>
    %cst_206 = arith.constant dense<0.000000e+00> : vector<16xf32>
    %626 = vector.multi_reduction <add>, %625, %cst_206 [1] : vector<16x512xf32> to vector<16xf32>
    %627 = vector.shape_cast %626 : vector<16xf32> to vector<16x1xf32>
    %628 = tpu.reciprocal %627 {approx = true} : vector<16x1xf32> -> vector<16x1xf32>
    %629 = arith.mulf %627, %628 : vector<16x1xf32>
    %cst_207 = arith.constant 2.000000e+00 : f32
    %630 = vector.broadcast %cst_207 : f32 to vector<16x1xf32>
    %631 = arith.subf %630, %629 : vector<16x1xf32>
    %632 = arith.mulf %628, %631 : vector<16x1xf32>
    %633 = vector.broadcast %632 : vector<16x1xf32> to vector<16x512xf32>
    %634 = arith.mulf %625, %633 : vector<16x512xf32>
    %c0_208 = arith.constant 0 : index
    %c0_209 = arith.constant 0 : index
    %635 = vector.load %arg10[%c0_208, %c0_209] : memref<16x512xf32, #tpu.memory_space<vmem>>, vector<16x512xf32>
    tpu.vector_store %arg10[%c0_208, %c0_209], %634 {strides = array<i32>} : memref<16x512xf32, #tpu.memory_space<vmem>>, vector<16x512xf32>,
    return
  }
  func.func @transform_0(%arg0: i32) -> (i32, i32, i32) {
    %c0_i32 = arith.constant 0 : i32
    %c0_i32_0 = arith.constant 0 : i32
    %c0_i32_1 = arith.constant 0 : i32
    return %c0_i32, %arg0, %c0_i32_0 : i32, i32, i32
  }
  func.func @transform_1(%arg0: i32) -> (i32, i32) {
    %c0_i32 = arith.constant 0 : i32
    %c0_i32_0 = arith.constant 0 : i32
    %c0_i32_1 = arith.constant 0 : i32
    return %c0_i32, %c0_i32_0 : i32, i32
  }
  func.func @transform_2(%arg0: i32) -> (i32, i32) {
    %c0_i32 = arith.constant 0 : i32
    %c0_i32_0 = arith.constant 0 : i32
    %c0_i32_1 = arith.constant 0 : i32
    return %c0_i32, %c0_i32_0 : i32, i32
  }
  func.func @transform_3(%arg0: i32) -> (i32, i32) {
    %c0_i32 = arith.constant 0 : i32
    %c0_i32_0 = arith.constant 0 : i32
    %c0_i32_1 = arith.constant 0 : i32
    return %c0_i32, %c0_i32_0 : i32, i32
  }
  func.func @transform_4(%arg0: i32) -> (i32, i32) {
    %c0_i32 = arith.constant 0 : i32
    %c0_i32_0 = arith.constant 0 : i32
    %c0_i32_1 = arith.constant 0 : i32
    return %c0_i32, %c0_i32_0 : i32, i32
  }
  func.func @transform_5(%arg0: i32) -> (i32, i32) {
    %c0_i32 = arith.constant 0 : i32
    %c0_i32_0 = arith.constant 0 : i32
    %c0_i32_1 = arith.constant 0 : i32
    return %c0_i32, %c0_i32_0 : i32, i32
  }
  func.func @transform_6(%arg0: i32) -> (i32, i32) {
    %c0_i32 = arith.constant 0 : i32
    %c0_i32_0 = arith.constant 0 : i32
    %c0_i32_1 = arith.constant 0 : i32
    return %c0_i32, %c0_i32_0 : i32, i32
  }
  func.func @transform_7(%arg0: i32) -> (i32, i32) {
    %c0_i32 = arith.constant 0 : i32
    %c0_i32_0 = arith.constant 0 : i32
    %c0_i32_1 = arith.constant 0 : i32
    return %c0_i32, %c0_i32_0 : i32, i32
  }
  func.func @transform_8(%arg0: i32) -> (i32, i32) {
    %c0_i32 = arith.constant 0 : i32
    %c0_i32_0 = arith.constant 0 : i32
    %c0_i32_1 = arith.constant 0 : i32
    return %c0_i32, %c0_i32_0 : i32, i32
  }
  func.func @transform_9(%arg0: i32) -> (i32, i32) {
    %c0_i32 = arith.constant 0 : i32
    %c0_i32_0 = arith.constant 0 : i32
    return %arg0, %c0_i32 : i32, i32
  }
}

</mosaic_0001>

<bundles_post_ra>
// kernel: log2vec_forward.1
= control target key start
LH: loop header
LB: loop body
LE: loop exit
PB: predicated region body
PF: predicated region fallthrough
CT: control target
= control target key end

     0   :  { %s9638_s1 = inlined_call_operand.vmem [shape: bf16[384,512], index: 1, kind: input, shape index: {}]   ;;  %s9639_s0 = inlined_call_operand.vmem [shape: bf16[8,16,384], index: 0, kind: input, shape index: {}]   ;;  %s9640_s3 = inlined_call_operand.vmem [shape: f32[1,512], index: 3, kind: input, shape index: {}]   ;;  %s9641_s5 = inlined_call_operand.vmem [shape: bf16[128,512], index: 5, kind: input, shape index: {}]   ;;  %s9642_s2 = inlined_call_operand.vmem [shape: bf16[128,512], index: 2, kind: input, shape index: {}]   ;;  %s9643_s4 = inlined_call_operand.vmem [shape: bf16[128,512], index: 4, kind: input, shape index: {}]   ;;  %s9644_s6 = inlined_call_operand.vmem [shape: f32[1,512], index: 6, kind: input, shape index: {}]   ;;  %s9645_s7 = inlined_call_operand.vmem [shape: bf16[128,512], index: 7, kind: input, shape index: {}]   ;;  %s9646_s8 = inlined_call_operand.vmem [shape: f32[1,512], index: 8, kind: input, shape index: {}]   ;;  %s9647_s9 = inlined_call_operand.vmem [shape: f32[16,512], index: 9, kind: output, shape index: {}]  }
   0x1   :  { %v4716_v0 = vld [vmem:[%s9638_s1 + $0xe0] sm:$0xf]  ;;  %v5552_v1 = vld [vmem:[%s9638_s1 + $0xec] sm:$0xf0]  ;;  %v5550_v9 = vld [vmem:[%s9638_s1 + $0xe4] sm:$0xf] }
   0x2   :  { %v4844_v2 = vld [vmem:[%s9638_s1 + $0x1e0] sm:$0xf]  ;;  %v4717_v3 = vor.u32 %v5552_v1, %v4716_v0  ;;  %v5584_v4 = vld [vmem:[%s9638_s1 + $0x1ec] sm:$0xf0]  ;;  %v4718_v10 = vld [vmem:[%s9638_s1 + $0xf0] sm:$0xf0] }
   0x3   :  { %v4972_v5 = vld [vmem:[%s9638_s1 + $0x2e0] sm:$0xf]  ;;  %v5616_v6 = vld [vmem:[%s9638_s1 + $0x2ec] sm:$0xf0]  ;;  %v4845_v7 = vor.u32 %v5584_v4, %v4844_v2  ;;  %v4721_v12 = vor.u32 %v5550_v9, %v4718_v10  ;;  %v5546_v20 = vld [vmem:[%s9638_s1 + $0xc4] sm:$0xf] }
   0x4   :  { %v4973_v8 = vor.u32 %v5616_v6, %v4972_v5  ;;  %v4700_v11 = vld [vmem:[%s9638_s1 + $0xc0] sm:$0xf]  ;;  %779 = vmatpush.bf16.msra.mxu0 %v4717_v3  ;;  %v5548_v13 = vld [vmem:[%s9638_s1 + $0xcc] sm:$0xf0]  ;;  %v4702_v22 = vld [vmem:[%s9638_s1 + $0xd0] sm:$0xf0] }
   0x5   :  { %v4828_v14 = vld [vmem:[%s9638_s1 + $0x1c0] sm:$0xf]  ;;  %v5580_v15 = vld [vmem:[%s9638_s1 + $0x1cc] sm:$0xf0]  ;;  %828 = vmatpush.bf16.msra.mxu1 %v4845_v7  ;;  %v4701_v16 = vor.u32 %v5548_v13, %v4700_v11  ;;  %926 = vmatpush.bf16.msra.mxu3 %v4721_v12  ;;  %v4705_v25 = vor.u32 %v5546_v20, %v4702_v22  ;;  %v5542_v31 = vld [vmem:[%s9638_s1 + $0xa4] sm:$0xf] }
   0x6   :  { %877 = vmatpush.bf16.msra.mxu2 %v4973_v8  ;;  %v4829_v17 = vor.u32 %v5580_v15, %v4828_v14  ;;  %v4956_v18 = vld [vmem:[%s9638_s1 + $0x2c0] sm:$0xf]  ;;  %v5612_v19 = vld [vmem:[%s9638_s1 + $0x2cc] sm:$0xf0]  ;;  %v4686_v32 = vld [vmem:[%s9638_s1 + $0xb0] sm:$0xf0] }
   0x7   :  { %v4957_v21 = vor.u32 %v5612_v19, %v4956_v18  ;;  %v4684_v23 = vld [vmem:[%s9638_s1 + $0xa0] sm:$0xf]  ;;  %v5544_v24 = vld [vmem:[%s9638_s1 + $0xac] sm:$0xf0]  ;;  %v4689_v38 = vor.u32 %v5542_v31, %v4686_v32  ;;  %v5538_v42 = vld [vmem:[%s9638_s1 + $0x84] sm:$0xf] }
   0x8   :  { %v4812_v26 = vld [vmem:[%s9638_s1 + $0x1a0] sm:$0xf]  ;;  %v5576_v27 = vld [vmem:[%s9638_s1 + $0x1ac] sm:$0xf0]  ;;  %780 = vmatpush.bf16.msra.mxu0 %v4701_v16  ;;  %v4685_v29 = vor.u32 %v5544_v24, %v4684_v23  ;;  %v4670_v43 = vld [vmem:[%s9638_s1 + $0x90] sm:$0xf0] }
   0x9   :  { %v4940_v28 = vld [vmem:[%s9638_s1 + $0x2a0] sm:$0xf]  ;;  %v5608_v30 = vld [vmem:[%s9638_s1 + $0x2ac] sm:$0xf0]  ;;  %829 = vmatpush.bf16.msra.mxu1 %v4829_v17  ;;  %v4813_v33 = vor.u32 %v5576_v27, %v4812_v26  ;;  %927 = vmatpush.bf16.msra.mxu3 %v4705_v25  ;;  %v4673_v50 = vor.u32 %v5538_v42, %v4670_v43  ;;  %v5534_v54 = vld [vmem:[%s9638_s1 + $0x64] sm:$0xf] }
   0xa   :  { %878 = vmatpush.bf16.msra.mxu2 %v4957_v21  ;;  %v4941_v34 = vor.u32 %v5608_v30, %v4940_v28  ;;  %v4668_v35 = vld [vmem:[%s9638_s1 + $0x80] sm:$0xf]  ;;  %v5540_v36 = vld [vmem:[%s9638_s1 + $0x8c] sm:$0xf0]  ;;  %v4654_v55 = vld [vmem:[%s9638_s1 + $0x70] sm:$0xf0] }
   0xb   :  { %v4796_v37 = vld [vmem:[%s9638_s1 + $0x180] sm:$0xf]  ;;  %v5572_v39 = vld [vmem:[%s9638_s1 + $0x18c] sm:$0xf0]  ;;  %v4669_v44 = vor.u32 %v5540_v36, %v4668_v35  ;;  %v4657_v62 = vor.u32 %v5534_v54, %v4654_v55  ;;  %v5530_v2 = vld [vmem:[%s9638_s1 + $0x44] sm:$0xf] }
   0xc   :  { %v4924_v40 = vld [vmem:[%s9638_s1 + $0x280] sm:$0xf]  ;;  %v5604_v41 = vld [vmem:[%s9638_s1 + $0x28c] sm:$0xf0]  ;;  %781 = vmatpush.bf16.msra.mxu0 %v4685_v29  ;;  %v4797_v45 = vor.u32 %v5572_v39, %v4796_v37  ;;  %v4638_v3 = vld [vmem:[%s9638_s1 + $0x50] sm:$0xf0] }
   0xd   :  { %830 = vmatpush.bf16.msra.mxu1 %v4813_v33  ;;  %v4925_v46 = vor.u32 %v5604_v41, %v4924_v40  ;;  %v4652_v47 = vld [vmem:[%s9638_s1 + $0x60] sm:$0xf]  ;;  %v5536_v48 = vld [vmem:[%s9638_s1 + $0x6c] sm:$0xf0]  ;;  %928 = vmatpush.bf16.msra.mxu3 %v4689_v38  ;;  %v4641_v10 = vor.u32 %v5530_v2, %v4638_v3  ;;  %v5526_v14 = vld [vmem:[%s9638_s1 + $0x24] sm:$0xf] }
   0xe   :  { %879 = vmatpush.bf16.msra.mxu2 %v4941_v34  ;;  %v4780_v49 = vld [vmem:[%s9638_s1 + $0x160] sm:$0xf]  ;;  %v5568_v51 = vld [vmem:[%s9638_s1 + $0x16c] sm:$0xf0]  ;;  %v4653_v56 = vor.u32 %v5536_v48, %v4652_v47  ;;  %v4622_v15 = vld [vmem:[%s9638_s1 + $0x30] sm:$0xf0] }
   0xf   :  { %v4908_v52 = vld [vmem:[%s9638_s1 + $0x260] sm:$0xf]  ;;  %v5600_v53 = vld [vmem:[%s9638_s1 + $0x26c] sm:$0xf0]  ;;  %v4781_v57 = vor.u32 %v5568_v51, %v4780_v49  ;;  %v4625_v25 = vor.u32 %v5526_v14, %v4622_v15  ;;  %v5522_v26 = vld [vmem:[%s9638_s1 + $0x4] sm:$0xf] }
  0x10   :  { %782 = vmatpush.bf16.msra.mxu0 %v4669_v44  ;;  %v4909_v58 = vor.u32 %v5600_v53, %v4908_v52  ;;  %v4636_v59 = vld [vmem:[%s9638_s1 + $0x40] sm:$0xf]  ;;  %v5532_v60 = vld [vmem:[%s9638_s1 + $0x4c] sm:$0xf0]  ;;  %v4606_v27 = vld [vmem:[%s9638_s1 + $0x10] sm:$0xf0] }
  0x11   :  { %831 = vmatpush.bf16.msra.mxu1 %v4797_v45  ;;  %v4764_v61 = vld [vmem:[%s9638_s1 + $0x140] sm:$0xf]  ;;  %929 = vmatpush.bf16.msra.mxu3 %v4673_v50  ;;  %v5564_v63 = vld [vmem:[%s9638_s1 + $0x14c] sm:$0xf0]  ;;  %v4637_v4 = vor.u32 %v5532_v60, %v4636_v59  ;;  %v5499_v29 = vld [vmem:[%s9639_s0 + $0x8] sm:$0xf0]  ;;  %v4609_v41 = vor.u32 %v5522_v26, %v4606_v27 }
  0x12   :  { %880 = vmatpush.bf16.msra.mxu2 %v4925_v46  ;;  %v4892_v0 = vld [vmem:[%s9638_s1 + $0x240] sm:$0xf]  ;;  %v5596_v1 = vld [vmem:[%s9638_s1 + $0x24c] sm:$0xf0]  ;;  %v4765_v5 = vor.u32 %v5564_v63, %v4764_v61  ;;  %v5582_v30 = vld [vmem:[%s9638_s1 + $0x1e4] sm:$0xf] }
  0x13   :  { %v4893_v6 = vor.u32 %v5596_v1, %v4892_v0  ;;  %v4620_v7 = vld [vmem:[%s9638_s1 + $0x20] sm:$0xf]  ;;  %v5528_v8 = vld [vmem:[%s9638_s1 + $0x2c] sm:$0xf0]  ;;  %v4846_v31 = vld [vmem:[%s9638_s1 + $0x1f0] sm:$0xf0] }
  0x14   :  { %783 = vmatpush.bf16.msra.mxu0 %v4653_v56  ;;  %v4748_v9 = vld [vmem:[%s9638_s1 + $0x120] sm:$0xf]  ;;  %v5560_v11 = vld [vmem:[%s9638_s1 + $0x12c] sm:$0xf0]  ;;  %v4621_v16 = vor.u32 %v5528_v8, %v4620_v7  ;;  %v5498_v33 = vld [vmem:[%s9639_s0 + $0x4] sm:$0xf]  ;;  %v4849_v42 = vor.u32 %v5582_v30, %v4846_v31 }
  0x15   :  { %832 = vmatpush.bf16.msra.mxu1 %v4781_v57  ;;  %930 = vmatpush.bf16.msra.mxu3 %v4657_v62  ;;  %v4876_v12 = vld [vmem:[%s9638_s1 + $0x220] sm:$0xf]  ;;  %v5592_v13 = vld [vmem:[%s9638_s1 + $0x22c] sm:$0xf0]  ;;  %v4749_v20 = vor.u32 %v5560_v11, %v4748_v9  ;;  %v5614_v34 = vld [vmem:[%s9638_s1 + $0x2e4] sm:$0xf] }
  0x16   :  { %881 = vmatpush.bf16.msra.mxu2 %v4909_v58  ;;  %v4604_v17 = vld [vmem:[%s9638_s1] sm:$0xf]  ;;  %v5524_v18 = vld [vmem:[%s9638_s1 + $0xc] sm:$0xf0]  ;;  %v4877_v21 = vor.u32 %v5592_v13, %v4876_v12  ;;  %v4974_v35 = vld [vmem:[%s9638_s1 + $0x2f0] sm:$0xf0] }
  0x17   :  { %v4732_v19 = vld [vmem:[%s9638_s1 + $0x100] sm:$0xf]  ;;  %v5556_v22 = vld [vmem:[%s9638_s1 + $0x10c] sm:$0xf0]  ;;  %v4605_v32 = vor.u32 %v5524_v18, %v4604_v17  ;;  %v4516_v39 = vld [vmem:[%s9639_s0 + $0x8] sm:$0xf]  ;;  %v4977_v47 = vor.u32 %v5614_v34, %v4974_v35 }
  0x18   :  { %784 = vmatpush.bf16.msra.mxu0 %v4637_v4  ;;  %v4860_v23 = vld [vmem:[%s9638_s1 + $0x200] sm:$0xf]  ;;  %v5588_v24 = vld [vmem:[%s9638_s1 + $0x20c] sm:$0xf0]  ;;  %v4733_v36 = vor.u32 %v5556_v22, %v4732_v19  ;;  %v5500_v40 = vld [vmem:[%s9639_s0 + $0x10] sm:$0xf0] }
  0x19   :  { %833 = vmatpush.bf16.msra.mxu1 %v4765_v5  ;;  %931 = vmatpush.bf16.msra.mxu3 %v4641_v10  ;;  %v4508_v28 = vld [vmem:[%s9639_s0] sm:$0xf]  ;;  %v4861_v37 = vor.u32 %v5588_v24, %v4860_v23  ;;  %v4510_v38 = vld [vmem:[%s9639_s0 + $0xc] sm:$0xf0]  ;;  %v4724_v43 = vld [vmem:[%s9638_s1 + $0xe8] sm:$0xf]  ;;  %v6383_v52 = vor.u32 %v5500_v40, %v4516_v39 }
  0x1a   :  { %882 = vmatpush.bf16.msra.mxu2 %v4893_v6  ;;  %v5553_v44 = vld [vmem:[%s9638_s1 + $0xf4] sm:$0xf0]  ;;  %v4852_v45 = vld [vmem:[%s9638_s1 + $0x1e8] sm:$0xf]  ;;  %v6370_v46 = vor.u32 %v5499_v29, %v4508_v28  ;;  %v5578_v49 = vld [vmem:[%s9638_s1 + $0x1c4] sm:$0xf]  ;;  %v6381_v51 = vor.u32 %v5498_v33, %v4510_v38 }
  0x1b   :  { %v5585_v48 = vld [vmem:[%s9638_s1 + $0x1f4] sm:$0xf0]  ;;  %v4830_v50 = vld [vmem:[%s9638_s1 + $0x1d0] sm:$0xf0]  ;;  %v5610_v53 = vld [vmem:[%s9638_s1 + $0x2c4] sm:$0xf]  ;;  %v4725_v55 = vor.u32 %v5553_v44, %v4724_v43 }
  0x1c   :  { %785 = vmatpush.bf16.msra.mxu0 %v4621_v16  ;;  %v4958_v54 = vld [vmem:[%s9638_s1 + $0x2d0] sm:$0xf0]  ;;  %v4853_v56 = vor.u32 %v5585_v48, %v4852_v45  ;;  %v4833_v57 = vor.u32 %v5578_v49, %v4830_v50  ;;  %v4708_v58 = vld [vmem:[%s9638_s1 + $0xc8] sm:$0xf]  ;;  %v5549_v59 = vld [vmem:[%s9638_s1 + $0xd4] sm:$0xf0] }
  0x1d   :  { %834 = vmatpush.bf16.msra.mxu1 %v4749_v20  ;;  %932 = vmatpush.bf16.msra.mxu3 %v4625_v25  ;;  %v4961_v60 = vor.u32 %v5610_v53, %v4958_v54  ;;  %v4836_v61 = vld [vmem:[%s9638_s1 + $0x1c8] sm:$0xf]  ;;  %v5581_v62 = vld [vmem:[%s9638_s1 + $0x1d4] sm:$0xf0]  ;;  %v4709_v63 = vor.u32 %v5549_v59, %v4708_v58  ;;  %v5574_v0 = vld [vmem:[%s9638_s1 + $0x1a4] sm:$0xf] }
  0x1e   :  { %883 = vmatpush.bf16.msra.mxu2 %v4877_v21  ;;  %v4814_v1 = vld [vmem:[%s9638_s1 + $0x1b0] sm:$0xf0]  ;;  %v5606_v2 = vld [vmem:[%s9638_s1 + $0x2a4] sm:$0xf]  ;;  %v4837_v3 = vor.u32 %v5581_v62, %v4836_v61  ;;  %v4692_v6 = vld [vmem:[%s9638_s1 + $0xa8] sm:$0xf] }
  0x1f   :  { %v4817_v4 = vor.u32 %v5574_v0, %v4814_v1  ;;  %v4942_v5 = vld [vmem:[%s9638_s1 + $0x2b0] sm:$0xf0]  ;;  %v5545_v7 = vld [vmem:[%s9638_s1 + $0xb4] sm:$0xf0]  ;;  %v4820_v9 = vld [vmem:[%s9638_s1 + $0x1a8] sm:$0xf] }
  0x20   :  { %786 = vmatpush.bf16.msra.mxu0 %v4605_v32  ;;  %v4945_v8 = vor.u32 %v5606_v2, %v4942_v5  ;;  %v5577_v10 = vld [vmem:[%s9638_s1 + $0x1b4] sm:$0xf0]  ;;  %v4693_v11 = vor.u32 %v5545_v7, %v4692_v6  ;;  %v5502_v14 = vld [vmem:[%s9639_s0 + $0x20] sm:$0xf0]  ;;  %v5501_v15 = vld [vmem:[%s9639_s0 + $0x1c] sm:$0xf] }
  0x21   :  { %835 = vmatpush.bf16.msra.mxu1 %v4733_v36  ;;  %933 = vmatpush.bf16.msra.mxu3 %v4609_v41  ;;  %v4821_v12 = vor.u32 %v5577_v10, %v4820_v9  ;;  %v4520_v13 = vld [vmem:[%s9639_s0 + $0x18] sm:$0xf]  ;;  %v4522_v16 = vld [vmem:[%s9639_s0 + $0x24] sm:$0xf0]  ;;  %v4528_v17 = vld [vmem:[%s9639_s0 + $0x20] sm:$0xf] }
  0x22   :  { %884 = vmatpush.bf16.msra.mxu2 %v4861_v37  ;;  %v5503_v18 = vld [vmem:[%s9639_s0 + $0x28] sm:$0xf0]  ;;  %v6449_v19 = vor.u32 %v5502_v14, %v4520_v13  ;;  %v6451_v20 = vor.u32 %v5501_v15, %v4522_v16  ;;  %v5570_v22 = vld [vmem:[%s9638_s1 + $0x184] sm:$0xf]  ;;  %v4798_v23 = vld [vmem:[%s9638_s1 + $0x190] sm:$0xf0] }
  0x23   :  { %787 = vmatmul.bf16.vlgmr.msra.gmra.mxu0 %v6370_v46  ;;  %v6453_v21 = vor.u32 %v5503_v18, %v4528_v17  ;;  %v5602_v24 = vld [vmem:[%s9638_s1 + $0x284] sm:$0xf]  ;;  %v4801_v25 = vor.u32 %v5570_v22, %v4798_v23  ;;  %v4926_v26 = vld [vmem:[%s9638_s1 + $0x290] sm:$0xf0]  ;;  %v4676_v27 = vld [vmem:[%s9638_s1 + $0x88] sm:$0xf] }
  0x24   :  { %975 = vmatpush.bf16.msrb.mxu0 %v4849_v42  ;;  %836 = vmatmul.bf16.vlgmr.msra.gmra.mxu1 %v6381_v51  ;;  %v5541_v28 = vld [vmem:[%s9638_s1 + $0x94] sm:$0xf0]  ;;  %v4929_v29 = vor.u32 %v5602_v24, %v4926_v26  ;;  %v4804_v31 = vld [vmem:[%s9638_s1 + $0x188] sm:$0xf]  ;;  %v4532_v34 = vld [vmem:[%s9639_s0 + $0x30] sm:$0xf] }
  0x25   :  { %1024 = vmatpush.bf16.msrb.mxu1 %v4977_v47  ;;  %885 = vmatmul.bf16.vlgmr.msra.gmra.mxu2 %v6383_v52  ;;  %v4677_v30 = vor.u32 %v5541_v28, %v4676_v27  ;;  %v5573_v32 = vld [vmem:[%s9638_s1 + $0x194] sm:$0xf0]  ;;  %v5505_v35 = vld [vmem:[%s9639_s0 + $0x38] sm:$0xf0]  ;;  %v5504_v36 = vld [vmem:[%s9639_s0 + $0x34] sm:$0xf] }
  0x26   :  { %934 = vmatmul.bf16.vlgmr.msra.gmra.mxu3 %v6370_v46  ;;  %1073 = vmatpush.bf16.msrb.mxu2 %v4725_v55  ;;  %v4805_v33 = vor.u32 %v5573_v32, %v4804_v31  ;;  %v4534_v37 = vld [vmem:[%s9639_s0 + $0x3c] sm:$0xf0]  ;;  %v4540_v38 = vld [vmem:[%s9639_s0 + $0x38] sm:$0xf]  ;;  %v5506_v39 = vld [vmem:[%s9639_s0 + $0x40] sm:$0xf0]  ;;  %v6501_v40 = vor.u32 %v5505_v35, %v4532_v34 }
  0x27   :  { %1122 = vmatpush.bf16.msrb.mxu3 %v4853_v56  ;;  %v6503_v41 = vor.u32 %v5504_v36, %v4534_v37  ;;  %v6505_v42 = vor.u32 %v5506_v39, %v4540_v38  ;;  %v5566_v43 = vld [vmem:[%s9638_s1 + $0x164] sm:$0xf]  ;;  %v4782_v44 = vld [vmem:[%s9638_s1 + $0x170] sm:$0xf0]  ;;  %v4660_v49 = vld [vmem:[%s9638_s1 + $0x68] sm:$0xf] }
  0x28   :  { %976 = vmatpush.bf16.msrb.mxu0 %v4833_v57  ;;  %v5598_v45 = vld [vmem:[%s9638_s1 + $0x264] sm:$0xf]  ;;  %v4785_v47 = vor.u32 %v5566_v43, %v4782_v44  ;;  %v4910_v48 = vld [vmem:[%s9638_s1 + $0x270] sm:$0xf0]  ;;  %v5537_v50 = vld [vmem:[%s9638_s1 + $0x74] sm:$0xf0] }
  0x29   :  { %1025 = vmatpush.bf16.msrb.mxu1 %v4961_v60  ;;  %v4913_v53 = vor.u32 %v5598_v45, %v4910_v48  ;;  %v4661_v54 = vor.u32 %v5537_v50, %v4660_v49  ;;  %v4788_v55 = vld [vmem:[%s9638_s1 + $0x168] sm:$0xf]  ;;  %v5569_v56 = vld [vmem:[%s9638_s1 + $0x174] sm:$0xf0]  ;;  %v5508_v59 = vld [vmem:[%s9639_s0 + $0x50] sm:$0xf0] }
  0x2a   :  { %1074 = vmatpush.bf16.msrb.mxu2 %v4709_v63  ;;  %v4789_v57 = vor.u32 %v5569_v56, %v4788_v55  ;;  %v4544_v58 = vld [vmem:[%s9639_s0 + $0x48] sm:$0xf]  ;;  %v5507_v60 = vld [vmem:[%s9639_s0 + $0x4c] sm:$0xf]  ;;  %v4546_v61 = vld [vmem:[%s9639_s0 + $0x54] sm:$0xf0] }
  0x2b   :  { %1123 = vmatpush.bf16.msrb.mxu3 %v4837_v3  ;;  %v4552_v62 = vld [vmem:[%s9639_s0 + $0x50] sm:$0xf]  ;;  %v5509_v63 = vld [vmem:[%s9639_s0 + $0x58] sm:$0xf0]  ;;  %v6553_v0 = vor.u32 %v5508_v59, %v4544_v58  ;;  %v6555_v1 = vor.u32 %v5507_v60, %v4546_v61  ;;  %v5562_v3 = vld [vmem:[%s9638_s1 + $0x144] sm:$0xf] }
  0x2c   :  { %977 = vmatpush.bf16.msrb.mxu0 %v4817_v4  ;;  %v6557_v2 = vor.u32 %v5509_v63, %v4552_v62  ;;  %v4766_v4 = vld [vmem:[%s9638_s1 + $0x150] sm:$0xf0]  ;;  %v5594_v5 = vld [vmem:[%s9638_s1 + $0x244] sm:$0xf]  ;;  %v5533_v9 = vld [vmem:[%s9638_s1 + $0x54] sm:$0xf0] }
  0x2d   :  { %1026 = vmatpush.bf16.msrb.mxu1 %v4945_v8  ;;  %v4769_v6 = vor.u32 %v5562_v3, %v4766_v4  ;;  %v4894_v7 = vld [vmem:[%s9638_s1 + $0x250] sm:$0xf0]  ;;  %v4644_v8 = vld [vmem:[%s9638_s1 + $0x48] sm:$0xf]  ;;  %v5565_v13 = vld [vmem:[%s9638_s1 + $0x154] sm:$0xf0] }
  0x2e   :  { %1075 = vmatpush.bf16.msrb.mxu2 %v4693_v11  ;;  %v4897_v10 = vor.u32 %v5594_v5, %v4894_v7  ;;  %v4645_v11 = vor.u32 %v5533_v9, %v4644_v8  ;;  %v4556_v15 = vld [vmem:[%s9639_s0 + $0x60] sm:$0xf]  ;;  %v5511_v16 = vld [vmem:[%s9639_s0 + $0x68] sm:$0xf0]  ;;  %v5510_v17 = vld [vmem:[%s9639_s0 + $0x64] sm:$0xf] }
  0x2f   :  { %1124 = vmatpush.bf16.msrb.mxu3 %v4821_v12  ;;  %v4772_v12 = vld [vmem:[%s9638_s1 + $0x148] sm:$0xf]  ;;  %v4558_v18 = vld [vmem:[%s9639_s0 + $0x6c] sm:$0xf0]  ;;  %v5512_v23 = vld [vmem:[%s9639_s0 + $0x70] sm:$0xf0]  ;;  %v6605_v24 = vor.u32 %v5511_v16, %v4556_v15 }
  0x30   :  { %978 = vmatpush.bf16.msrb.mxu0 %v4801_v25  ;;  %v4773_v14 = vor.u32 %v5565_v13, %v4772_v12  ;;  %v4564_v22 = vld [vmem:[%s9639_s0 + $0x68] sm:$0xf]  ;;  %v6607_v25 = vor.u32 %v5510_v17, %v4558_v18  ;;  %v5558_v27 = vld [vmem:[%s9638_s1 + $0x124] sm:$0xf]  ;;  %v4750_v28 = vld [vmem:[%s9638_s1 + $0x130] sm:$0xf0] }
  0x31   :  { %1027 = vmatpush.bf16.msrb.mxu1 %v4929_v29  ;;  %v6609_v26 = vor.u32 %v5512_v23, %v4564_v22  ;;  %v5590_v29 = vld [vmem:[%s9638_s1 + $0x224] sm:$0xf]  ;;  %v4878_v31 = vld [vmem:[%s9638_s1 + $0x230] sm:$0xf0]  ;;  %v4628_v32 = vld [vmem:[%s9638_s1 + $0x28] sm:$0xf] }
  0x32   :  { %1076 = vmatpush.bf16.msrb.mxu2 %v4677_v30  ;;  %v4753_v30 = vor.u32 %v5558_v27, %v4750_v28  ;;  %v4881_v34 = vor.u32 %v5590_v29, %v4878_v31  ;;  %v4756_v36 = vld [vmem:[%s9638_s1 + $0x128] sm:$0xf]  ;;  %v5561_v37 = vld [vmem:[%s9638_s1 + $0x134] sm:$0xf0]  ;;  %v5514_v43 = vld [vmem:[%s9639_s0 + $0x80] sm:$0xf0] }
  0x33   :  { %792 = vmatmul.bf16.gmra.mxu0 %v6449_v19  ;;  %1125 = vmatpush.bf16.msrb.mxu3 %v4805_v33  ;;  %v5529_v33 = vld [vmem:[%s9638_s1 + $0x34] sm:$0xf0]  ;;  %v4757_v38 = vor.u32 %v5561_v37, %v4756_v36  ;;  %v5513_v44 = vld [vmem:[%s9639_s0 + $0x7c] sm:$0xf]  ;;  %v4570_v45 = vld [vmem:[%s9639_s0 + $0x84] sm:$0xf0] }
  0x34   :  { %841 = vmatmul.bf16.gmra.mxu1 %v6451_v20  ;;  %979 = vmatpush.bf16.msrb.mxu0 %v4785_v47  ;;  %v4629_v35 = vor.u32 %v5529_v33, %v4628_v32  ;;  %v4568_v39 = vld [vmem:[%s9639_s0 + $0x78] sm:$0xf]  ;;  %v4576_v47 = vld [vmem:[%s9639_s0 + $0x80] sm:$0xf]  ;;  %v5515_v48 = vld [vmem:[%s9639_s0 + $0x88] sm:$0xf0]  ;;  %v6659_v50 = vor.u32 %v5513_v44, %v4570_v45 }
  0x35   :  { %890 = vmatmul.bf16.gmra.mxu2 %v6453_v21  ;;  %1028 = vmatpush.bf16.msrb.mxu1 %v4913_v53  ;;  %v6657_v49 = vor.u32 %v5514_v43, %v4568_v39  ;;  %v6661_v53 = vor.u32 %v5515_v48, %v4576_v47  ;;  %v4734_v55 = vld [vmem:[%s9638_s1 + $0x110] sm:$0xf0]  ;;  %v5586_v56 = vld [vmem:[%s9638_s1 + $0x204] sm:$0xf]  ;;  %v4612_v59 = vld [vmem:[%s9638_s1 + $0x8] sm:$0xf] }
  0x36   :  { %939 = vmatmul.bf16.gmra.mxu3 %v6449_v19  ;;  %1077 = vmatpush.bf16.msrb.mxu2 %v4661_v54  ;;  %v5554_v54 = vld [vmem:[%s9638_s1 + $0x104] sm:$0xf]  ;;  %v4862_v58 = vld [vmem:[%s9638_s1 + $0x210] sm:$0xf0]  ;;  %v5525_v60 = vld [vmem:[%s9638_s1 + $0x14] sm:$0xf0] }
  0x37   :  { %1126 = vmatpush.bf16.msrb.mxu3 %v4789_v57  ;;  %v4737_v57 = vor.u32 %v5554_v54, %v4734_v55  ;;  %v4865_v61 = vor.u32 %v5586_v56, %v4862_v58  ;;  %v4613_v62 = vor.u32 %v5525_v60, %v4612_v59  ;;  %v4740_v63 = vld [vmem:[%s9638_s1 + $0x108] sm:$0xf]  ;;  %v5557_v3 = vld [vmem:[%s9638_s1 + $0x114] sm:$0xf0]  ;;  %v4580_v5 = vld [vmem:[%s9639_s0 + $0x90] sm:$0xf] }
  0x38   :  { %980 = vmatpush.bf16.msrb.mxu0 %v4769_v6  ;;  %v4741_v4 = vor.u32 %v5557_v3, %v4740_v63  ;;  %v5517_v6 = vld [vmem:[%s9639_s0 + $0x98] sm:$0xf0]  ;;  %v5516_v7 = vld [vmem:[%s9639_s0 + $0x94] sm:$0xf]  ;;  %v4582_v8 = vld [vmem:[%s9639_s0 + $0x9c] sm:$0xf0] }
  0x39   :  { %1029 = vmatpush.bf16.msrb.mxu1 %v4897_v10  ;;  %v4588_v9 = vld [vmem:[%s9639_s0 + $0x98] sm:$0xf]  ;;  %v5518_v10 = vld [vmem:[%s9639_s0 + $0xa0] sm:$0xf0]  ;;  %v6711_v12 = vor.u32 %v5516_v7, %v4582_v8  ;;  %v5551_v16 = vld [vmem:[%s9638_s1 + $0xec] sm:$0xf] }
  0x3a   :  { %1078 = vmatpush.bf16.msrb.mxu2 %v4645_v11  ;;  %v6709_v11 = vor.u32 %v5517_v6, %v4580_v5  ;;  %v6713_v13 = vor.u32 %v5518_v10, %v4588_v9  ;;  %v5617_v15 = vld [vmem:[%s9638_s1 + $0x2f4] sm:$0xf0]  ;;  %v4726_v18 = vld [vmem:[%s9638_s1 + $0xf8] sm:$0xf0]  ;;  %v5583_v22 = vld [vmem:[%s9638_s1 + $0x1ec] sm:$0xf] }
  0x3b   :  { %1127 = vmatpush.bf16.msrb.mxu3 %v4773_v14  ;;  %v4980_v14 = vld [vmem:[%s9638_s1 + $0x2e8] sm:$0xf]  ;;  %v4854_v23 = vld [vmem:[%s9638_s1 + $0x1f8] sm:$0xf0]  ;;  %v4729_v27 = vor.u32 %v5551_v16, %v4726_v18  ;;  %v5615_v29 = vld [vmem:[%s9638_s1 + $0x2ec] sm:$0xf] }
  0x3c   :  { %981 = vmatpush.bf16.msrb.mxu0 %v4753_v30  ;;  %v4981_v17 = vor.u32 %v5617_v15, %v4980_v14  ;;  %v4857_v28 = vor.u32 %v5583_v22, %v4854_v23  ;;  %v4982_v30 = vld [vmem:[%s9638_s1 + $0x2f8] sm:$0xf0]  ;;  %v4592_v31 = vld [vmem:[%s9639_s0 + $0xa8] sm:$0xf]  ;;  %v5520_v32 = vld [vmem:[%s9639_s0 + $0xb0] sm:$0xf0] }
  0x3d   :  { %1030 = vmatpush.bf16.msrb.mxu1 %v4881_v34  ;;  %v5519_v33 = vld [vmem:[%s9639_s0 + $0xac] sm:$0xf]  ;;  %v4985_v34 = vor.u32 %v5615_v29, %v4982_v30  ;;  %v4600_v36 = vld [vmem:[%s9639_s0 + $0xb0] sm:$0xf]  ;;  %v5521_v37 = vld [vmem:[%s9639_s0 + $0xb8] sm:$0xf0] }
  0x3e   :  { %1079 = vmatpush.bf16.msrb.mxu2 %v4629_v35  ;;  %v4594_v35 = vld [vmem:[%s9639_s0 + $0xb4] sm:$0xf0]  ;;  %v6765_v43 = vor.u32 %v5521_v37, %v4600_v36  ;;  %v4964_v44 = vld [vmem:[%s9638_s1 + $0x2c8] sm:$0xf]  ;;  %v5547_v47 = vld [vmem:[%s9638_s1 + $0xcc] sm:$0xf] }
  0x3f   :  { %1128 = vmatpush.bf16.msrb.mxu3 %v4757_v38  ;;  %v6761_v38 = vor.u32 %v5520_v32, %v4592_v31  ;;  %v6763_v39 = vor.u32 %v5519_v33, %v4594_v35  ;;  %v5613_v45 = vld [vmem:[%s9638_s1 + $0x2d4] sm:$0xf0]  ;;  %v4710_v54 = vld [vmem:[%s9638_s1 + $0xd8] sm:$0xf0]  ;;  %v5579_v55 = vld [vmem:[%s9638_s1 + $0x1cc] sm:$0xf] }
  0x40   :  { %982 = vmatpush.bf16.msrb.mxu0 %v4737_v57  ;;  %v4965_v48 = vor.u32 %v5613_v45, %v4964_v44  ;;  %v4838_v56 = vld [vmem:[%s9638_s1 + $0x1d8] sm:$0xf0]  ;;  %v4713_v57 = vor.u32 %v5547_v47, %v4710_v54  ;;  %v6792_v59 = vld [vmem:[%s9640_s3] sm:$0xf]  ;;  %v5611_v60 = vld [vmem:[%s9638_s1 + $0x2cc] sm:$0xf] }
  0x41   :  { %1031 = vmatpush.bf16.msrb.mxu1 %v4865_v61  ;;  %v4841_v58 = vor.u32 %v5579_v55, %v4838_v56  ;;  %v4966_v61 = vld [vmem:[%s9638_s1 + $0x2d8] sm:$0xf0]  ;;  %v6801_v63 = vperm.slane %v6792_v59, 0  ;;  %v4948_v7 = vld [vmem:[%s9638_s1 + $0x2a8] sm:$0xf] }
  0x42   :  { %1080 = vmatpush.bf16.msrb.mxu2 %v4613_v62  ;;  %v4969_v62 = vor.u32 %v5611_v60, %v4966_v61  ;;  %v5609_v8 = vld [vmem:[%s9638_s1 + $0x2b4] sm:$0xf0]  ;;  %v5543_v9 = vld [vmem:[%s9638_s1 + $0xac] sm:$0xf]  ;;  %v4694_v14 = vld [vmem:[%s9638_s1 + $0xb8] sm:$0xf0] }
  0x43   :  { %797 = vmatmul.bf16.gmra.mxu0 %v6501_v40  ;;  %1129 = vmatpush.bf16.msrb.mxu3 %v4741_v4  ;;  %v4949_v10 = vor.u32 %v5609_v8, %v4948_v7  ;;  %v5575_v15 = vld [vmem:[%s9638_s1 + $0x1ac] sm:$0xf]  ;;  %v4822_v16 = vld [vmem:[%s9638_s1 + $0x1b8] sm:$0xf0]  ;;  %v4697_v18 = vor.u32 %v5543_v9, %v4694_v14  ;;  %v4932_v54 = vld [vmem:[%s9638_s1 + $0x288] sm:$0xf] }
  0x44   :  { %846 = vmatmul.bf16.gmra.mxu1 %v6503_v41  ;;  %1171 = vmatpush.bf16.msra.mxu0 %v4981_v17  ;;  %v4825_v22 = vor.u32 %v5575_v15, %v4822_v16  ;;  %v5607_v32 = vld [vmem:[%s9638_s1 + $0x2ac] sm:$0xf]  ;;  %v4950_v33 = vld [vmem:[%s9638_s1 + $0x2b8] sm:$0xf0]  ;;  %v5605_v55 = vld [vmem:[%s9638_s1 + $0x294] sm:$0xf0] }
  0x45   :  { %895 = vmatmul.bf16.gmra.mxu2 %v6505_v42  ;;  %1220 = vmatpush.bf16.msra.mxu1 %v4729_v27  ;;  %v5539_v56 = vld [vmem:[%s9638_s1 + $0x8c] sm:$0xf]  ;;  %v4806_v61 = vld [vmem:[%s9638_s1 + $0x198] sm:$0xf0] }
  0x46   :  { %944 = vmatmul.bf16.gmra.mxu3 %v6501_v40  ;;  %1269 = vmatpush.bf16.msra.mxu2 %v4857_v28  ;;  %v5571_v60 = vld [vmem:[%s9638_s1 + $0x18c] sm:$0xf]  ;;  %v4934_v15 = vld [vmem:[%s9638_s1 + $0x298] sm:$0xf0] }
  0x47   :  { %1318 = vmatpush.bf16.msra.mxu3 %v4985_v34  ;;  %v4953_v34 = vor.u32 %v5607_v32, %v4950_v33  ;;  %v5603_v14 = vld [vmem:[%s9638_s1 + $0x28c] sm:$0xf]  ;;  %v4916_v32 = vld [vmem:[%s9638_s1 + $0x268] sm:$0xf]  ;;  %v5601_v33 = vld [vmem:[%s9638_s1 + $0x274] sm:$0xf0] }
  0x48   :  { %1172 = vmatpush.bf16.msra.mxu0 %v4965_v48  ;;  %v4937_v16 = vor.u32 %v5603_v14, %v4934_v15 }
  0x49   :  { %1221 = vmatpush.bf16.msra.mxu1 %v4713_v57  ;;  %v4933_v57 = vor.u32 %v5605_v55, %v4932_v54 }
  0x4a   :  { %1270 = vmatpush.bf16.msra.mxu2 %v4841_v58  ;;  %v4678_v58 = vld [vmem:[%s9638_s1 + $0x98] sm:$0xf0] }
  0x4b   :  { %1319 = vmatpush.bf16.msra.mxu3 %v4969_v62 }
  0x4c   :  { %1173 = vmatpush.bf16.msra.mxu0 %v4949_v10 }
  0x4d   :  { %1222 = vmatpush.bf16.msra.mxu1 %v4697_v18 }
  0x4e   :  { %1271 = vmatpush.bf16.msra.mxu2 %v4825_v22 }
  0x4f   :  { %1320 = vmatpush.bf16.msra.mxu3 %v4953_v34  ;;  %v5535_v34 = vld [vmem:[%s9638_s1 + $0x6c] sm:$0xf] }
  0x50   :  { %1174 = vmatpush.bf16.msra.mxu0 %v4933_v57 }
  0x53   :  { %802 = vmatmul.bf16.gmra.mxu0 %v6553_v0  ;;  %1321 = vmatpush.bf16.msra.mxu3 %v4937_v16 }
  0x54   :  { %851 = vmatmul.bf16.gmra.mxu1 %v6555_v1 }
  0x55   :  { %900 = vmatmul.bf16.gmra.mxu2 %v6557_v2 }
  0x56   :  { %949 = vmatmul.bf16.gmra.mxu3 %v6553_v0 }
  0x63   :  { %807 = vmatmul.bf16.gmra.mxu0 %v6605_v24 }
  0x64   :  { %856 = vmatmul.bf16.gmra.mxu1 %v6607_v25 }
  0x65   :  { %905 = vmatmul.bf16.gmra.mxu2 %v6609_v26 }
  0x66   :  { %954 = vmatmul.bf16.gmra.mxu3 %v6605_v24 }
  0x73   :  { %812 = vmatmul.bf16.gmra.mxu0 %v6657_v49 }
  0x74   :  { %861 = vmatmul.bf16.gmra.mxu1 %v6659_v50 }
  0x75   :  { %910 = vmatmul.bf16.gmra.mxu2 %v6661_v53 }
  0x76   :  { %959 = vmatmul.bf16.gmra.mxu3 %v6657_v49 }
  0x83   :  { %817 = vmatmul.bf16.gmra.mxu0 %v6709_v11 }
  0x84   :  { %866 = vmatmul.bf16.gmra.mxu1 %v6711_v12 }
  0x85   :  { %915 = vmatmul.bf16.gmra.mxu2 %v6713_v13 }
  0x86   :  { %964 = vmatmul.bf16.gmra.mxu3 %v6709_v11 }
  0x93   :  { %822 = vmatmul.bf16.gmra.mxu0 %v6761_v38 }
  0x94   :  { %871 = vmatmul.bf16.gmra.mxu1 %v6763_v39 }
  0x95   :  { %920 = vmatmul.bf16.gmra.mxu2 %v6765_v43 }
  0x96   :  { %969 = vmatmul.bf16.gmra.mxu3 %v6761_v38 }
  0xa0   :  { %v788_v3 = vpop.f32.mrf.mxu0 }
  0xa1   :  { %v789_v4 = vadd.f32 %v788_v3, %v6801_v63  ;;  %v837_v5 = vpop.f32.mrf.mxu1  ;;  %v4681_v3 = vor.u32 %v5539_v56, %v4678_v58 }
  0xa3   :  { %v838_v6 = vadd.f32 %v837_v5, %v789_v4  ;;  %983 = vmatmul.bf16.vlgmr.msrb.gmra.mxu0 %v6381_v51  ;;  %v4809_v4 = vor.u32 %v5571_v60, %v4806_v61  ;;  %1223 = vmatpush.bf16.msra.mxu1 %v4681_v3  ;;  %v5599_v3 = vld [vmem:[%s9638_s1 + $0x26c] sm:$0xf] }
  0xa4   :  { %1032 = vmatmul.bf16.vlgmr.msrb.gmra.mxu1 %v6383_v52 }
  0xa5   :  { %1081 = vmatmul.bf16.vlgmr.msrb.gmra.mxu2 %v6370_v46 }
  0xa6   :  { %1130 = vmatmul.bf16.vlgmr.msrb.gmra.mxu3 %v6381_v51  ;;  %1272 = vmatpush.bf16.msra.mxu2 %v4809_v4  ;;  %v4918_v4 = vld [vmem:[%s9638_s1 + $0x278] sm:$0xf0] }
  0xa8   :  { %v886_v17 = vpop.f32.mrf.mxu2  ;;  %v790_v28 = vpop.f32.mrf.mxu0 }
  0xa9   :  { %v6826_v23 = vadd.f32 %v886_v17, %v838_v6  ;;  %v6828_v27 = vpop.f32.mrf.mxu3  ;;  %v791_v29 = vadd.f32 %v790_v28, %v6801_v63  ;;  %v839_v30 = vpop.f32.mrf.mxu1 }
  0xab   :  { %v840_v31 = vadd.f32 %v839_v30, %v791_v29 }
  0xb0   :  { %v888_v35 = vpop.f32.mrf.mxu2  ;;  %v793_v44 = vpop.f32.mrf.mxu0 }
  0xb1   :  { %v6837_v36 = vadd.f32 %v888_v35, %v840_v31  ;;  %v6839_v37 = vpop.f32.mrf.mxu3  ;;  %v794_v45 = vadd.f32 %v793_v44, %v6801_v63  ;;  %v842_v47 = vpop.f32.mrf.mxu1  ;;  %v4917_v35 = vor.u32 %v5601_v33, %v4916_v32  ;;  %v4662_v44 = vld [vmem:[%s9638_s1 + $0x78] sm:$0xf0]  ;;  %v5563_v33 = vld [vmem:[%s9638_s1 + $0x14c] sm:$0xf] }
  0xb2   :  { %v4665_v54 = vor.u32 %v5535_v34, %v4662_v44  ;;  %v4646_v32 = vld [vmem:[%s9638_s1 + $0x58] sm:$0xf0] }
  0xb3   :  { %v843_v48 = vadd.f32 %v842_v47, %v794_v45  ;;  %988 = vmatmul.bf16.gmra.mxu0 %v6451_v20  ;;  %v5567_v45 = vld [vmem:[%s9638_s1 + $0x16c] sm:$0xf]  ;;  %v4790_v47 = vld [vmem:[%s9638_s1 + $0x178] sm:$0xf0] }
  0xb4   :  { %1037 = vmatmul.bf16.gmra.mxu1 %v6453_v21  ;;  %v4793_v55 = vor.u32 %v5567_v45, %v4790_v47  ;;  %1175 = vmatpush.bf16.msra.mxu0 %v4917_v35  ;;  %v4774_v34 = vld [vmem:[%s9638_s1 + $0x158] sm:$0xf0] }
  0xb5   :  { %1086 = vmatmul.bf16.gmra.mxu2 %v6449_v19  ;;  %1224 = vmatpush.bf16.msra.mxu1 %v4665_v54  ;;  %v4777_v45 = vor.u32 %v5563_v33, %v4774_v34  ;;  %v5559_v33 = vld [vmem:[%s9638_s1 + $0x12c] sm:$0xf]  ;;  %v4758_v34 = vld [vmem:[%s9638_s1 + $0x138] sm:$0xf0] }
  0xb6   :  { %1135 = vmatmul.bf16.gmra.mxu3 %v6451_v20  ;;  %1273 = vmatpush.bf16.msra.mxu2 %v4793_v55 }
  0xb8   :  { %v891_v62 = vpop.f32.mrf.mxu2  ;;  %v795_v7 = vpop.f32.mrf.mxu0 }
  0xb9   :  { %v6864_v5 = vadd.f32 %v891_v62, %v843_v48  ;;  %v6866_v6 = vpop.f32.mrf.mxu3  ;;  %v796_v8 = vadd.f32 %v795_v7, %v6801_v63  ;;  %v844_v9 = vpop.f32.mrf.mxu1  ;;  %v4921_v7 = vor.u32 %v5599_v3, %v4918_v4 }
  0xba   :  { %1274 = vmatpush.bf16.msra.mxu2 %v4777_v45  ;;  %v4761_v45 = vor.u32 %v5559_v33, %v4758_v34  ;;  %v5589_v33 = vld [vmem:[%s9638_s1 + $0x214] sm:$0xf0]  ;;  %v5523_v34 = vld [vmem:[%s9638_s1 + $0xc] sm:$0xf] }
  0xbb   :  { %9897 = vst [vmem:[#allocation3_spill] sm:$0xff] %v6864_v5  ;;  %v845_v10 = vadd.f32 %v844_v9, %v796_v8  ;;  %1322 = vmatpush.bf16.msra.mxu3 %v4921_v7 }
  0xbe   :  { %1275 = vmatpush.bf16.msra.mxu2 %v4761_v45  ;;  %v5555_v45 = vld [vmem:[%s9638_s1 + $0x10c] sm:$0xf] }
  0xc0   :  { %v893_v17 = vpop.f32.mrf.mxu2  ;;  %v798_v28 = vpop.f32.mrf.mxu0 }
  0xc1   :  { %v6875_v18 = vadd.f32 %v893_v17, %v845_v10  ;;  %v6877_v22 = vpop.f32.mrf.mxu3  ;;  %v799_v29 = vadd.f32 %v798_v28, %v6801_v63  ;;  %v847_v30 = vpop.f32.mrf.mxu1  ;;  %v4900_v28 = vld [vmem:[%s9638_s1 + $0x248] sm:$0xf] }
  0xc3   :  { %9898 = vst [vmem:[#allocation4_spill] sm:$0xff] %v6875_v18  ;;  %v848_v31 = vadd.f32 %v847_v30, %v799_v29  ;;  %993 = vmatmul.bf16.gmra.mxu0 %v6503_v41  ;;  %v5597_v29 = vld [vmem:[%s9638_s1 + $0x254] sm:$0xf0]  ;;  %v5531_v30 = vld [vmem:[%s9638_s1 + $0x4c] sm:$0xf] }
  0xc4   :  { %1042 = vmatmul.bf16.gmra.mxu1 %v6505_v42  ;;  %v4649_v44 = vor.u32 %v5531_v30, %v4646_v32  ;;  %v5527_v30 = vld [vmem:[%s9638_s1 + $0x2c] sm:$0xf]  ;;  %v4630_v32 = vld [vmem:[%s9638_s1 + $0x38] sm:$0xf0] }
  0xc5   :  { %1091 = vmatmul.bf16.gmra.mxu2 %v6501_v40 }
  0xc6   :  { %1140 = vmatmul.bf16.gmra.mxu3 %v6503_v41  ;;  %1225 = vmatpush.bf16.msra.mxu1 %v4649_v44  ;;  %v4633_v44 = vor.u32 %v5527_v30, %v4630_v32  ;;  %v4868_v32 = vld [vmem:[%s9638_s1 + $0x208] sm:$0xf] }
  0xc8   :  { %v896_v48 = vpop.f32.mrf.mxu2  ;;  %v800_v58 = vpop.f32.mrf.mxu0 }
  0xc9   :  { %v6902_v56 = vadd.f32 %v896_v48, %v848_v31  ;;  %v6904_v57 = vpop.f32.mrf.mxu3  ;;  %v801_v60 = vadd.f32 %v800_v58, %v6801_v63  ;;  %v849_v61 = vpop.f32.mrf.mxu1  ;;  %v4901_v31 = vor.u32 %v5597_v29, %v4900_v28  ;;  %v4884_v28 = vld [vmem:[%s9638_s1 + $0x228] sm:$0xf]  ;;  %v5593_v29 = vld [vmem:[%s9638_s1 + $0x234] sm:$0xf0] }
  0xca   :  { %1226 = vmatpush.bf16.msra.mxu1 %v4633_v44  ;;  %v4614_v44 = vld [vmem:[%s9638_s1 + $0x18] sm:$0xf0] }
  0xcb   :  { %9899 = vst [vmem:[#allocation5_spill] sm:$0xff] %v6902_v56  ;;  %v850_v62 = vadd.f32 %v849_v61, %v801_v60  ;;  %1176 = vmatpush.bf16.msra.mxu0 %v4901_v31  ;;  %v5595_v61 = vld [vmem:[%s9638_s1 + $0x24c] sm:$0xf]  ;;  %v4885_v31 = vor.u32 %v5593_v29, %v4884_v28 }
  0xcf   :  { %1177 = vmatpush.bf16.msra.mxu0 %v4885_v31 }
  0xd0   :  { %v898_v8 = vpop.f32.mrf.mxu2  ;;  %v803_v14 = vpop.f32.mrf.mxu0 }
  0xd1   :  { %v6913_v9 = vadd.f32 %v898_v8, %v850_v62  ;;  %v6915_v10 = vpop.f32.mrf.mxu3  ;;  %v804_v15 = vadd.f32 %v803_v14, %v6801_v63  ;;  %v852_v16 = vpop.f32.mrf.mxu1  ;;  %v4902_v62 = vld [vmem:[%s9638_s1 + $0x258] sm:$0xf0] }
  0xd2   :  { %v4905_v3 = vor.u32 %v5595_v61, %v4902_v62 }
  0xd3   :  { %9900 = vst [vmem:[#allocation6_spill] sm:$0xff] %v6913_v9  ;;  %v853_v17 = vadd.f32 %v852_v16, %v804_v15  ;;  %998 = vmatmul.bf16.gmra.mxu0 %v6555_v1 }
  0xd4   :  { %1047 = vmatmul.bf16.gmra.mxu1 %v6557_v2  ;;  %1323 = vmatpush.bf16.msra.mxu3 %v4905_v3  ;;  %v5591_v3 = vld [vmem:[%s9638_s1 + $0x22c] sm:$0xf] }
  0xd5   :  { %1096 = vmatmul.bf16.gmra.mxu2 %v6553_v0 }
  0xd6   :  { %1145 = vmatmul.bf16.gmra.mxu3 %v6555_v1 }
  0xd8   :  { %v901_v35 = vpop.f32.mrf.mxu2  ;;  %v805_v54 = vpop.f32.mrf.mxu0 }
  0xd9   :  { %v6940_v47 = vadd.f32 %v901_v35, %v853_v17  ;;  %v6942_v48 = vpop.f32.mrf.mxu3  ;;  %v806_v55 = vadd.f32 %v805_v54, %v6801_v63  ;;  %v854_v58 = vpop.f32.mrf.mxu1 }
  0xdb   :  { %9901 = vst [vmem:[#allocation7_spill] sm:$0xff] %v6940_v47  ;;  %v855_v60 = vadd.f32 %v854_v58, %v806_v55  ;;  %v7119_v47 = vperm.slane %v6792_v59, 1 }
  0xdd   :  { %9918 = vst [vmem:[#allocation24_spill] sm:$0xff] %v7119_v47 }
  0xe0   :  { %v903_v4 = vpop.f32.mrf.mxu2  ;;  %v808_v14 = vpop.f32.mrf.mxu0 }
  0xe1   :  { %v6951_v7 = vadd.f32 %v903_v4, %v855_v60  ;;  %v6953_v8 = vpop.f32.mrf.mxu3  ;;  %v809_v15 = vadd.f32 %v808_v14, %v6801_v63  ;;  %v857_v16 = vpop.f32.mrf.mxu1  ;;  %v4886_v4 = vld [vmem:[%s9638_s1 + $0x238] sm:$0xf0] }
  0xe2   :  { %v4889_v14 = vor.u32 %v5591_v3, %v4886_v4 }
  0xe3   :  { %9902 = vst [vmem:[#allocation8_spill] sm:$0xff] %v6951_v7  ;;  %v858_v17 = vadd.f32 %v857_v16, %v809_v15  ;;  %1003 = vmatmul.bf16.gmra.mxu0 %v6607_v25 }
  0xe4   :  { %1052 = vmatmul.bf16.gmra.mxu1 %v6609_v26  ;;  %1324 = vmatpush.bf16.msra.mxu3 %v4889_v14 }
  0xe5   :  { %1101 = vmatmul.bf16.gmra.mxu2 %v6605_v24 }
  0xe6   :  { %1150 = vmatmul.bf16.gmra.mxu3 %v6607_v25 }
  0xe8   :  { %v906_v35 = vpop.f32.mrf.mxu2  ;;  %v810_v58 = vpop.f32.mrf.mxu0 }
  0xe9   :  { %v6978_v54 = vadd.f32 %v906_v35, %v858_v17  ;;  %v6980_v55 = vpop.f32.mrf.mxu3  ;;  %v811_v60 = vadd.f32 %v810_v58, %v6801_v63  ;;  %v859_v61 = vpop.f32.mrf.mxu1  ;;  %v4869_v35 = vor.u32 %v5589_v33, %v4868_v32  ;;  %v4742_v58 = vld [vmem:[%s9638_s1 + $0x118] sm:$0xf0] }
  0xea   :  { %v4870_v32 = vld [vmem:[%s9638_s1 + $0x218] sm:$0xf0] }
  0xeb   :  { %9903 = vst [vmem:[#allocation9_spill] sm:$0xff] %v6978_v54  ;;  %v860_v62 = vadd.f32 %v859_v61, %v811_v60  ;;  %v4617_v61 = vor.u32 %v5523_v34, %v4614_v44  ;;  %1178 = vmatpush.bf16.msra.mxu0 %v4869_v35 }
  0xed   :  { %1227 = vmatpush.bf16.msra.mxu1 %v4617_v61  ;;  %v5100_v61 = vld [vmem:[%s9641_s5 + $0xe0] sm:$0xf] }
  0xf0   :  { %v908_v15 = vpop.f32.mrf.mxu2  ;;  %v813_v28 = vpop.f32.mrf.mxu0 }
  0xf1   :  { %v6989_v16 = vadd.f32 %v908_v15, %v860_v62  ;;  %v6991_v17 = vpop.f32.mrf.mxu3  ;;  %v814_v29 = vadd.f32 %v813_v28, %v6801_v63  ;;  %v862_v30 = vpop.f32.mrf.mxu1  ;;  %v4745_v62 = vor.u32 %v5555_v45, %v4742_v58 }
  0xf3   :  { %9904 = vst [vmem:[#allocation10_spill] sm:$0xff] %v6989_v16  ;;  %v863_v31 = vadd.f32 %v862_v30, %v814_v29  ;;  %1008 = vmatmul.bf16.gmra.mxu0 %v6659_v50  ;;  %1276 = vmatpush.bf16.msra.mxu2 %v4745_v62  ;;  %v5587_v30 = vld [vmem:[%s9638_s1 + $0x20c] sm:$0xf]  ;;  %v5712_v62 = vld [vmem:[%s9641_s5 + $0xec] sm:$0xf0] }
  0xf4   :  { %1057 = vmatmul.bf16.gmra.mxu1 %v6661_v53 }
  0xf5   :  { %1106 = vmatmul.bf16.gmra.mxu2 %v6657_v49 }
  0xf6   :  { %1155 = vmatmul.bf16.gmra.mxu3 %v6659_v50 }
  0xf8   :  { %v911_v60 = vpop.f32.mrf.mxu2  ;;  %v815_v14 = vpop.f32.mrf.mxu0 }
  0xf9   :  { %v7016_v3 = vadd.f32 %v911_v60, %v863_v31  ;;  %v7018_v4 = vpop.f32.mrf.mxu3  ;;  %v816_v15 = vadd.f32 %v815_v14, %v6801_v63  ;;  %v864_v28 = vpop.f32.mrf.mxu1  ;;  %v4873_v31 = vor.u32 %v5587_v30, %v4870_v32  ;;  %v5710_v14 = vld [vmem:[%s9641_s5 + $0xe4] sm:$0xf]  ;;  %v5713_v30 = vld [vmem:[%s9641_s5 + $0xf4] sm:$0xf0] }
  0xfb   :  { %9905 = vst [vmem:[#allocation11_spill] sm:$0xff] %v7016_v3  ;;  %v865_v29 = vadd.f32 %v864_v28, %v816_v15  ;;  %1325 = vmatpush.bf16.msra.mxu3 %v4873_v31  ;;  %v7045_v15 = vor.u32 %v5712_v62, %v5100_v61  ;;  %v5102_v28 = vld [vmem:[%s9641_s5 + $0xf0] sm:$0xf0] }
  0xfc   :  { %v7056_v31 = vor.u32 %v5710_v14, %v5102_v28  ;;  %v5711_v14 = vld [vmem:[%s9641_s5 + $0xec] sm:$0xf] }
  0xfd   :  { %9907 = vst [vmem:[#allocation13_spill] sm:$0xff] %v7045_v15  ;;  %1708 = vmatpush.bf16.msrb.mxu0 %v7045_v15 }
  0xfe   :  { %9908 = vst [vmem:[#allocation14_spill] sm:$0xff] %v7056_v31  ;;  %1722 = vmatpush.bf16.msrb.mxu1 %v7056_v31 }
 0x100   :  { %v913_v33 = vpop.f32.mrf.mxu2  ;;  %v818_v44 = vpop.f32.mrf.mxu0 }
 0x101   :  { %v7027_v34 = vadd.f32 %v913_v33, %v865_v29  ;;  %v7029_v35 = vpop.f32.mrf.mxu3  ;;  %v819_v45 = vadd.f32 %v818_v44, %v6801_v63  ;;  %v867_v58 = vpop.f32.mrf.mxu1  ;;  %v5108_v29 = vld [vmem:[%s9641_s5 + $0xe8] sm:$0xf] }
 0x102   :  { %v7058_v33 = vor.u32 %v5713_v30, %v5108_v29 }
 0x103   :  { %9906 = vst [vmem:[#allocation12_spill] sm:$0xff] %v7027_v34  ;;  %v868_v60 = vadd.f32 %v867_v58, %v819_v45  ;;  %1013 = vmatmul.bf16.gmra.mxu0 %v6711_v12 }
 0x104   :  { %1062 = vmatmul.bf16.gmra.mxu1 %v6713_v13  ;;  %9909 = vst [vmem:[#allocation15_spill] sm:$0xff] %v7058_v33  ;;  %1736 = vmatpush.bf16.msrb.mxu2 %v7058_v33 }
 0x105   :  { %1111 = vmatmul.bf16.gmra.mxu2 %v6709_v11 }
 0x106   :  { %1160 = vmatmul.bf16.gmra.mxu3 %v6711_v12 }
 0x108   :  { %v916_v32 = vpop.f32.mrf.mxu2  ;;  %v820_v58 = vpop.f32.mrf.mxu0 }
 0x109   :  { %v7060_v44 = vadd.f32 %v916_v32, %v868_v60  ;;  %v7062_v45 = vpop.f32.mrf.mxu3  ;;  %v821_v61 = vadd.f32 %v820_v58, %v6801_v63  ;;  %v869_v62 = vpop.f32.mrf.mxu1  ;;  %v5110_v60 = vld [vmem:[%s9641_s5 + $0xf8] sm:$0xf0] }
 0x10a   :  { %v7074_v28 = vor.u32 %v5711_v14, %v5110_v60  ;;  %v5708_v14 = vld [vmem:[%s9641_s5 + $0xcc] sm:$0xf0]  ;;  %v5706_v60 = vld [vmem:[%s9641_s5 + $0xc4] sm:$0xf] }
 0x10b   :  { %9910 = vst [vmem:[#allocation16_spill] sm:$0xff] %v7060_v44  ;;  %v870_v34 = vadd.f32 %v869_v62, %v821_v61 }
 0x10c   :  { %9911 = vst [vmem:[#allocation17_spill] sm:$0xff] %v7074_v28  ;;  %1750 = vmatpush.bf16.msrb.mxu3 %v7074_v28 }
 0x110   :  { %v918_v29 = vpop.f32.mrf.mxu2  ;;  %v823_v58 = vpop.f32.mrf.mxu0 }
 0x111   :  { %v7077_v30 = vadd.f32 %v918_v29, %v870_v34  ;;  %v7079_v32 = vpop.f32.mrf.mxu3  ;;  %v824_v61 = vadd.f32 %v823_v58, %v6801_v63  ;;  %v872_v62 = vpop.f32.mrf.mxu1  ;;  %v5084_v34 = vld [vmem:[%s9641_s5 + $0xc0] sm:$0xf]  ;;  %v5086_v58 = vld [vmem:[%s9641_s5 + $0xd0] sm:$0xf0] }
 0x112   :  { %9913 = vst [vmem:[#allocation19_spill] sm:$0xff] %v7079_v32  ;;  %v7095_v29 = vor.u32 %v5708_v14, %v5084_v34  ;;  %v7106_v32 = vor.u32 %v5706_v60, %v5086_v58 }
 0x113   :  { %9912 = vst [vmem:[#allocation18_spill] sm:$0xff] %v7077_v30  ;;  %v873_v44 = vadd.f32 %v872_v62, %v824_v61  ;;  %1018 = vmatmul.bf16.gmra.mxu0 %v6763_v39  ;;  %v5092_v61 = vld [vmem:[%s9641_s5 + $0xc8] sm:$0xf]  ;;  %v5709_v62 = vld [vmem:[%s9641_s5 + $0xd4] sm:$0xf0] }
 0x114   :  { %1067 = vmatmul.bf16.gmra.mxu1 %v6765_v43  ;;  %9914 = vst [vmem:[#allocation20_spill] sm:$0xff] %v7095_v29  ;;  %v7108_v3 = vor.u32 %v5709_v62, %v5092_v61  ;;  %1709 = vmatpush.bf16.msrb.mxu0 %v7095_v29 }
 0x115   :  { %1116 = vmatmul.bf16.gmra.mxu2 %v6761_v38  ;;  %9915 = vst [vmem:[#allocation21_spill] sm:$0xff] %v7106_v32  ;;  %1723 = vmatpush.bf16.msrb.mxu1 %v7106_v32 }
 0x116   :  { %1165 = vmatmul.bf16.gmra.mxu3 %v6763_v39  ;;  %9916 = vst [vmem:[#allocation22_spill] sm:$0xff] %v7108_v3  ;;  %1737 = vmatpush.bf16.msrb.mxu2 %v7108_v3 }
 0x118   :  { %v921_v30 = vpop.f32.mrf.mxu2  ;;  %v825_v14 = vpop.f32.mrf.mxu0 }
 0x119   :  { %v7110_v16 = vadd.f32 %v921_v30, %v873_v44  ;;  %v7112_v34 = vpop.f32.mrf.mxu3  ;;  %v826_v54 = vadd.f32 %v825_v14, %v6801_v63  ;;  %v874_v7 = vpop.f32.mrf.mxu1  ;;  %v5707_v44 = vld [vmem:[%s9641_s5 + $0xcc] sm:$0xf]  ;;  %v5094_v30 = vld [vmem:[%s9641_s5 + $0xd8] sm:$0xf0]  ;;  %v936_v63 = vadd.f32 %v6828_v27, %v7119_v47  ;;  %v5068_v27 = vld [vmem:[%s9641_s5 + $0xa0] sm:$0xf] }
 0x11a   :  { %v7127_v58 = vor.u32 %v5707_v44, %v5094_v30  ;;  %v7142_v44 = vperm.slane %v6792_v59, 2  ;;  %v5705_v59 = vld [vmem:[%s9641_s5 + $0xb4] sm:$0xf0]  ;;  %v938_v30 = vadd.f32 %v6839_v37, %v7119_v47 }
 0x11b   :  { %9917 = vst [vmem:[#allocation23_spill] sm:$0xff] %v7110_v16  ;;  %v875_v60 = vadd.f32 %v874_v7, %v826_v54 }
 0x11c   :  { %9919 = vst [vmem:[#allocation25_spill] sm:$0xff] %v7127_v58  ;;  %1751 = vmatpush.bf16.msrb.mxu3 %v7127_v58 }
 0x11d   :  { %9922 = vst [vmem:[#allocation28_spill] sm:$0xff] %v7142_v44 }
 0x120   :  { %v923_v61 = vpop.f32.mrf.mxu2  ;;  %v984_v7 = vpop.f32.mrf.mxu0 }
 0x121   :  { %v7132_v62 = vadd.f32 %v923_v61, %v875_v60  ;;  %v7134_v14 = vpop.f32.mrf.mxu3  ;;  %v985_v54 = vadd.f32 %v984_v7, %v936_v63  ;;  %v1033_v16 = vpop.f32.mrf.mxu1  ;;  %v5702_v60 = vld [vmem:[%s9641_s5 + $0xa4] sm:$0xf] }
 0x122   :  { %9921 = vst [vmem:[#allocation27_spill] sm:$0xff] %v7134_v14 }
 0x123   :  { %9920 = vst [vmem:[#allocation26_spill] sm:$0xff] %v7132_v62  ;;  %v7136_v9 = vadd.f32 %v1033_v16, %v985_v54  ;;  %1179 = vmatmul.bf16.vlgmr.msra.gmra.mxu0 %v6383_v52  ;;  %v5704_v16 = vld [vmem:[%s9641_s5 + $0xac] sm:$0xf0] }
 0x124   :  { %1228 = vmatmul.bf16.vlgmr.msra.gmra.mxu1 %v6370_v46  ;;  %v7154_v46 = vor.u32 %v5704_v16, %v5068_v27 }
 0x125   :  { %1277 = vmatmul.bf16.vlgmr.msra.gmra.mxu2 %v6381_v51  ;;  %v5070_v51 = vld [vmem:[%s9641_s5 + $0xb0] sm:$0xf0] }
 0x126   :  { %1326 = vmatmul.bf16.vlgmr.msra.gmra.mxu3 %v6383_v52  ;;  %9923 = vst [vmem:[#allocation29_spill] sm:$0xff] %v7154_v46  ;;  %v5076_v52 = vld [vmem:[%s9641_s5 + $0xa8] sm:$0xf]  ;;  %v7167_v61 = vor.u32 %v5702_v60, %v5070_v51  ;;  %1710 = vmatpush.bf16.msrb.mxu0 %v7154_v46  ;;  %v5703_v60 = vld [vmem:[%s9641_s5 + $0xac] sm:$0xf] }
 0x127   :  { %v7169_v7 = vor.u32 %v5705_v59, %v5076_v52  ;;  %v5078_v51 = vld [vmem:[%s9641_s5 + $0xb8] sm:$0xf0]  ;;  %v941_v59 = vadd.f32 %v6866_v6, %v7119_v47  ;;  %v5052_v6 = vld [vmem:[%s9641_s5 + $0x80] sm:$0xf] }
 0x128   :  { %v1082_v63 = vpop.f32.mrf.mxu2  ;;  %9924 = vst [vmem:[#allocation30_spill] sm:$0xff] %v7167_v61  ;;  %v986_v16 = vpop.f32.mrf.mxu0  ;;  %1724 = vmatpush.bf16.msrb.mxu1 %v7167_v61  ;;  %v7185_v52 = vor.u32 %v5703_v60, %v5078_v51  ;;  %v5700_v60 = vld [vmem:[%s9641_s5 + $0x8c] sm:$0xf0]  ;;  %v5698_v51 = vld [vmem:[%s9641_s5 + $0x84] sm:$0xf] }
 0x129   :  { %9925 = vst [vmem:[#allocation31_spill] sm:$0xff] %v7169_v7  ;;  %v1083_v54 = vadd.f32 %v1082_v63, %v7142_v44  ;;  %v1131_v27 = vpop.f32.mrf.mxu3  ;;  %v987_v62 = vadd.f32 %v986_v16, %v938_v30  ;;  %v1035_v14 = vpop.f32.mrf.mxu1  ;;  %1738 = vmatpush.bf16.msrb.mxu2 %v7169_v7 }
 0x12a   :  { %9926 = vst [vmem:[#allocation32_spill] sm:$0xff] %v7185_v52  ;;  %1752 = vmatpush.bf16.msrb.mxu3 %v7185_v52 }
 0x12b   :  { %v7175_v56 = vadd.f32 %v1131_v27, %v1083_v54  ;;  %v7177_v37 = vadd.f32 %v1035_v14, %v987_v62 }
 0x130   :  { %v1084_v30 = vpop.f32.mrf.mxu2  ;;  %v989_v14 = vpop.f32.mrf.mxu0 }
 0x131   :  { %v1085_v63 = vadd.f32 %v1084_v30, %v7142_v44  ;;  %v1133_v62 = vpop.f32.mrf.mxu3  ;;  %v990_v54 = vadd.f32 %v989_v14, %v941_v59  ;;  %v1038_v27 = vpop.f32.mrf.mxu1  ;;  %v7208_v59 = vor.u32 %v5700_v60, %v5052_v6  ;;  %v943_v30 = vadd.f32 %v6877_v22, %v7119_v47 }
 0x133   :  { %v7191_v16 = vadd.f32 %v1133_v62, %v1085_v63  ;;  %v7193_v18 = vadd.f32 %v1038_v27, %v990_v54  ;;  %1184 = vmatmul.bf16.gmra.mxu0 %v6453_v21  ;;  %9928 = vst [vmem:[#allocation34_spill] sm:$0xff] %v7208_v59 }
 0x134   :  { %1233 = vmatmul.bf16.gmra.mxu1 %v6449_v19  ;;  %v5054_v19 = vld [vmem:[%s9641_s5 + $0x90] sm:$0xf0]  ;;  %1711 = vmatpush.bf16.msrb.mxu0 %v7208_v59 }
 0x135   :  { %9927 = vst [vmem:[#allocation33_spill] sm:$0xff] %v7193_v18  ;;  %1282 = vmatmul.bf16.gmra.mxu2 %v6451_v20  ;;  %v5060_v20 = vld [vmem:[%s9641_s5 + $0x88] sm:$0xf]  ;;  %v7221_v62 = vor.u32 %v5698_v51, %v5054_v19  ;;  %v5699_v51 = vld [vmem:[%s9641_s5 + $0x8c] sm:$0xf] }
 0x136   :  { %1331 = vmatmul.bf16.gmra.mxu3 %v6453_v21  ;;  %v5701_v21 = vld [vmem:[%s9641_s5 + $0x94] sm:$0xf0]  ;;  %v5062_v19 = vld [vmem:[%s9641_s5 + $0x98] sm:$0xf0] }
 0x137   :  { %9929 = vst [vmem:[#allocation35_spill] sm:$0xff] %v7221_v62  ;;  %v7223_v14 = vor.u32 %v5701_v21, %v5060_v20  ;;  %1725 = vmatpush.bf16.msrb.mxu1 %v7221_v62  ;;  %v7239_v20 = vor.u32 %v5699_v51, %v5062_v19  ;;  %v946_v21 = vadd.f32 %v6904_v57, %v7119_v47  ;;  %v5036_v57 = vld [vmem:[%s9641_s5 + $0x60] sm:$0xf]  ;;  %v5696_v51 = vld [vmem:[%s9641_s5 + $0x6c] sm:$0xf0] }
 0x138   :  { %v1087_v63 = vpop.f32.mrf.mxu2  ;;  %v991_v6 = vpop.f32.mrf.mxu0  ;;  %v5694_v19 = vld [vmem:[%s9641_s5 + $0x64] sm:$0xf] }
 0x139   :  { %9930 = vst [vmem:[#allocation36_spill] sm:$0xff] %v7223_v14  ;;  %v1088_v54 = vadd.f32 %v1087_v63, %v7142_v44  ;;  %v1136_v27 = vpop.f32.mrf.mxu3  ;;  %v992_v60 = vadd.f32 %v991_v6, %v943_v30  ;;  %v1040_v18 = vpop.f32.mrf.mxu1  ;;  %1739 = vmatpush.bf16.msrb.mxu2 %v7223_v14  ;;  %1753 = vmatpush.bf16.msrb.mxu3 %v7239_v20 }
 0x13a   :  { %9932 = vst [vmem:[#allocation38_spill] sm:$0xff] %v7239_v20 }
 0x13b   :  { %v7229_v5 = vadd.f32 %v1136_v27, %v1088_v54  ;;  %v7231_v22 = vadd.f32 %v1040_v18, %v992_v60 }
 0x13d   :  { %9931 = vst [vmem:[#allocation37_spill] sm:$0xff] %v7231_v22 }
 0x140   :  { %v1089_v30 = vpop.f32.mrf.mxu2  ;;  %v994_v54 = vpop.f32.mrf.mxu0 }
 0x141   :  { %v1090_v63 = vadd.f32 %v1089_v30, %v7142_v44  ;;  %v1138_v18 = vpop.f32.mrf.mxu3  ;;  %v995_v27 = vadd.f32 %v994_v54, %v946_v21  ;;  %v1043_v6 = vpop.f32.mrf.mxu1  ;;  %v7262_v21 = vor.u32 %v5696_v51, %v5036_v57  ;;  %v948_v30 = vadd.f32 %v6915_v10, %v7119_v47 }
 0x143   :  { %v7245_v60 = vadd.f32 %v1138_v18, %v1090_v63  ;;  %v7247_v22 = vadd.f32 %v1043_v6, %v995_v27  ;;  %1189 = vmatmul.bf16.gmra.mxu0 %v6505_v42  ;;  %9935 = vst [vmem:[#allocation41_spill] sm:$0xff] %v7262_v21 }
 0x144   :  { %1238 = vmatmul.bf16.gmra.mxu1 %v6501_v40  ;;  %v5038_v40 = vld [vmem:[%s9641_s5 + $0x70] sm:$0xf0]  ;;  %1712 = vmatpush.bf16.msrb.mxu0 %v7262_v21 }
 0x145   :  { %9933 = vst [vmem:[#allocation39_spill] sm:$0xff] %v7245_v60  ;;  %1287 = vmatmul.bf16.gmra.mxu2 %v6503_v41  ;;  %v5044_v41 = vld [vmem:[%s9641_s5 + $0x68] sm:$0xf]  ;;  %v7275_v18 = vor.u32 %v5694_v19, %v5038_v40  ;;  %v5695_v19 = vld [vmem:[%s9641_s5 + $0x6c] sm:$0xf] }
 0x146   :  { %9934 = vst [vmem:[#allocation40_spill] sm:$0xff] %v7247_v22  ;;  %1336 = vmatmul.bf16.gmra.mxu3 %v6505_v42  ;;  %v5697_v42 = vld [vmem:[%s9641_s5 + $0x74] sm:$0xf0]  ;;  %v5046_v40 = vld [vmem:[%s9641_s5 + $0x78] sm:$0xf0] }
 0x147   :  { %9936 = vst [vmem:[#allocation42_spill] sm:$0xff] %v7275_v18  ;;  %v7277_v54 = vor.u32 %v5697_v42, %v5044_v41  ;;  %1726 = vmatpush.bf16.msrb.mxu1 %v7275_v18  ;;  %v7293_v41 = vor.u32 %v5695_v19, %v5046_v40  ;;  %v951_v42 = vadd.f32 %v6942_v48, %v7119_v47  ;;  %v5020_v48 = vld [vmem:[%s9641_s5 + $0x40] sm:$0xf]  ;;  %v5692_v19 = vld [vmem:[%s9641_s5 + $0x4c] sm:$0xf0] }
 0x148   :  { %v1092_v63 = vpop.f32.mrf.mxu2  ;;  %v996_v57 = vpop.f32.mrf.mxu0  ;;  %v5690_v40 = vld [vmem:[%s9641_s5 + $0x44] sm:$0xf] }
 0x149   :  { %9937 = vst [vmem:[#allocation43_spill] sm:$0xff] %v7277_v54  ;;  %v1093_v27 = vadd.f32 %v1092_v63, %v7142_v44  ;;  %v1141_v6 = vpop.f32.mrf.mxu3  ;;  %v997_v51 = vadd.f32 %v996_v57, %v948_v30  ;;  %v1045_v22 = vpop.f32.mrf.mxu1  ;;  %1740 = vmatpush.bf16.msrb.mxu2 %v7277_v54  ;;  %1754 = vmatpush.bf16.msrb.mxu3 %v7293_v41 }
 0x14a   :  { %9939 = vst [vmem:[#allocation45_spill] sm:$0xff] %v7293_v41 }
 0x14b   :  { %v7283_v60 = vadd.f32 %v1141_v6, %v1093_v27  ;;  %v7285_v10 = vadd.f32 %v1045_v22, %v997_v51 }
 0x14d   :  { %9938 = vst [vmem:[#allocation44_spill] sm:$0xff] %v7285_v10 }
 0x150   :  { %v1094_v30 = vpop.f32.mrf.mxu2  ;;  %v999_v27 = vpop.f32.mrf.mxu0 }
 0x151   :  { %v1095_v63 = vadd.f32 %v1094_v30, %v7142_v44  ;;  %v1143_v22 = vpop.f32.mrf.mxu3  ;;  %v1000_v6 = vadd.f32 %v999_v27, %v951_v42  ;;  %v1048_v57 = vpop.f32.mrf.mxu1  ;;  %v7316_v42 = vor.u32 %v5692_v19, %v5020_v48  ;;  %v953_v30 = vadd.f32 %v6953_v8, %v7119_v47 }
 0x153   :  { %v7299_v51 = vadd.f32 %v1143_v22, %v1095_v63  ;;  %v7301_v10 = vadd.f32 %v1048_v57, %v1000_v6  ;;  %1194 = vmatmul.bf16.gmra.mxu0 %v6557_v2  ;;  %9942 = vst [vmem:[#allocation48_spill] sm:$0xff] %v7316_v42 }
 0x154   :  { %1243 = vmatmul.bf16.gmra.mxu1 %v6553_v0  ;;  %v5022_v0 = vld [vmem:[%s9641_s5 + $0x50] sm:$0xf0]  ;;  %1713 = vmatpush.bf16.msrb.mxu0 %v7316_v42 }
 0x155   :  { %9940 = vst [vmem:[#allocation46_spill] sm:$0xff] %v7299_v51  ;;  %1292 = vmatmul.bf16.gmra.mxu2 %v6555_v1  ;;  %v5028_v1 = vld [vmem:[%s9641_s5 + $0x48] sm:$0xf]  ;;  %v7329_v22 = vor.u32 %v5690_v40, %v5022_v0  ;;  %v5691_v40 = vld [vmem:[%s9641_s5 + $0x4c] sm:$0xf] }
 0x156   :  { %9941 = vst [vmem:[#allocation47_spill] sm:$0xff] %v7301_v10  ;;  %1341 = vmatmul.bf16.gmra.mxu3 %v6557_v2  ;;  %v5693_v2 = vld [vmem:[%s9641_s5 + $0x54] sm:$0xf0]  ;;  %v5030_v0 = vld [vmem:[%s9641_s5 + $0x58] sm:$0xf0] }
 0x157   :  { %9943 = vst [vmem:[#allocation49_spill] sm:$0xff] %v7329_v22  ;;  %v7331_v27 = vor.u32 %v5693_v2, %v5028_v1  ;;  %1727 = vmatpush.bf16.msrb.mxu1 %v7329_v22  ;;  %v7347_v1 = vor.u32 %v5691_v40, %v5030_v0  ;;  %v956_v2 = vadd.f32 %v6980_v55, %v7119_v47  ;;  %v5004_v55 = vld [vmem:[%s9641_s5 + $0x20] sm:$0xf]  ;;  %v5688_v40 = vld [vmem:[%s9641_s5 + $0x2c] sm:$0xf0] }
 0x158   :  { %v1097_v63 = vpop.f32.mrf.mxu2  ;;  %v1001_v48 = vpop.f32.mrf.mxu0  ;;  %v5686_v0 = vld [vmem:[%s9641_s5 + $0x24] sm:$0xf] }
 0x159   :  { %9944 = vst [vmem:[#allocation50_spill] sm:$0xff] %v7331_v27  ;;  %v1098_v6 = vadd.f32 %v1097_v63, %v7142_v44  ;;  %v1146_v57 = vpop.f32.mrf.mxu3  ;;  %v1002_v19 = vadd.f32 %v1001_v48, %v953_v30  ;;  %v1050_v10 = vpop.f32.mrf.mxu1  ;;  %1741 = vmatpush.bf16.msrb.mxu2 %v7331_v27  ;;  %1755 = vmatpush.bf16.msrb.mxu3 %v7347_v1 }
 0x15a   :  { %9946 = vst [vmem:[#allocation52_spill] sm:$0xff] %v7347_v1 }
 0x15b   :  { %v7337_v51 = vadd.f32 %v1146_v57, %v1098_v6  ;;  %v7339_v8 = vadd.f32 %v1050_v10, %v1002_v19 }
 0x15d   :  { %9945 = vst [vmem:[#allocation51_spill] sm:$0xff] %v7339_v8 }
 0x160   :  { %v1099_v30 = vpop.f32.mrf.mxu2  ;;  %v1004_v6 = vpop.f32.mrf.mxu0 }
 0x161   :  { %v1100_v63 = vadd.f32 %v1099_v30, %v7142_v44  ;;  %v1148_v10 = vpop.f32.mrf.mxu3  ;;  %v1005_v57 = vadd.f32 %v1004_v6, %v956_v2  ;;  %v1053_v48 = vpop.f32.mrf.mxu1  ;;  %v7370_v2 = vor.u32 %v5688_v40, %v5004_v55  ;;  %v958_v30 = vadd.f32 %v6991_v17, %v7119_v47 }
 0x163   :  { %v7353_v19 = vadd.f32 %v1148_v10, %v1100_v63  ;;  %v7355_v8 = vadd.f32 %v1053_v48, %v1005_v57  ;;  %1199 = vmatmul.bf16.gmra.mxu0 %v6609_v26  ;;  %9949 = vst [vmem:[#allocation55_spill] sm:$0xff] %v7370_v2 }
 0x164   :  { %1248 = vmatmul.bf16.gmra.mxu1 %v6605_v24  ;;  %v5006_v24 = vld [vmem:[%s9641_s5 + $0x30] sm:$0xf0]  ;;  %1714 = vmatpush.bf16.msrb.mxu0 %v7370_v2 }
 0x165   :  { %9947 = vst [vmem:[#allocation53_spill] sm:$0xff] %v7353_v19  ;;  %1297 = vmatmul.bf16.gmra.mxu2 %v6607_v25  ;;  %v5012_v25 = vld [vmem:[%s9641_s5 + $0x28] sm:$0xf]  ;;  %v7383_v10 = vor.u32 %v5686_v0, %v5006_v24  ;;  %v5687_v0 = vld [vmem:[%s9641_s5 + $0x2c] sm:$0xf] }
 0x166   :  { %9948 = vst [vmem:[#allocation54_spill] sm:$0xff] %v7355_v8  ;;  %1346 = vmatmul.bf16.gmra.mxu3 %v6609_v26  ;;  %v5689_v26 = vld [vmem:[%s9641_s5 + $0x34] sm:$0xf0]  ;;  %v5014_v24 = vld [vmem:[%s9641_s5 + $0x38] sm:$0xf0] }
 0x167   :  { %9950 = vst [vmem:[#allocation56_spill] sm:$0xff] %v7383_v10  ;;  %v7385_v6 = vor.u32 %v5689_v26, %v5012_v25  ;;  %1728 = vmatpush.bf16.msrb.mxu1 %v7383_v10  ;;  %v7401_v25 = vor.u32 %v5687_v0, %v5014_v24  ;;  %v961_v26 = vadd.f32 %v7018_v4, %v7119_v47  ;;  %v5684_v0 = vld [vmem:[%s9641_s5 + $0xc] sm:$0xf0]  ;;  %v5682_v4 = vld [vmem:[%s9641_s5 + $0x4] sm:$0xf] }
 0x168   :  { %v1102_v63 = vpop.f32.mrf.mxu2  ;;  %v1006_v55 = vpop.f32.mrf.mxu0 }
 0x169   :  { %9951 = vst [vmem:[#allocation57_spill] sm:$0xff] %v7385_v6  ;;  %v1103_v57 = vadd.f32 %v1102_v63, %v7142_v44  ;;  %v1151_v48 = vpop.f32.mrf.mxu3  ;;  %v1007_v40 = vadd.f32 %v1006_v55, %v958_v30  ;;  %v1055_v8 = vpop.f32.mrf.mxu1  ;;  %1742 = vmatpush.bf16.msrb.mxu2 %v7385_v6  ;;  %1756 = vmatpush.bf16.msrb.mxu3 %v7401_v25 }
 0x16a   :  { %9953 = vst [vmem:[#allocation59_spill] sm:$0xff] %v7401_v25 }
 0x16b   :  { %v7391_v19 = vadd.f32 %v1151_v48, %v1103_v57  ;;  %v7393_v17 = vadd.f32 %v1055_v8, %v1007_v40 }
 0x16d   :  { %9952 = vst [vmem:[#allocation58_spill] sm:$0xff] %v7393_v17  ;;  %v4988_v17 = vld [vmem:[%s9641_s5] sm:$0xf] }
 0x170   :  { %v1104_v30 = vpop.f32.mrf.mxu2  ;;  %v1009_v57 = vpop.f32.mrf.mxu0 }
 0x171   :  { %v1105_v63 = vadd.f32 %v1104_v30, %v7142_v44  ;;  %v1153_v8 = vpop.f32.mrf.mxu3  ;;  %v1010_v48 = vadd.f32 %v1009_v57, %v961_v26  ;;  %v1058_v55 = vpop.f32.mrf.mxu1  ;;  %v7421_v26 = vor.u32 %v5684_v0, %v4988_v17  ;;  %v4990_v30 = vld [vmem:[%s9641_s5 + $0x10] sm:$0xf0]  ;;  %v5228_v0 = vld [vmem:[%s9642_s2 + $0xe0] sm:$0xf] }
 0x172   :  { %v7434_v57 = vor.u32 %v5682_v4, %v4990_v30  ;;  %v5646_v4 = vld [vmem:[%s9642_s2 + $0xe4] sm:$0xf]  ;;  %v5230_v30 = vld [vmem:[%s9642_s2 + $0xf0] sm:$0xf0] }
 0x173   :  { %v7407_v40 = vadd.f32 %v1153_v8, %v1105_v63  ;;  %v7418_v24 = vadd.f32 %v1058_v55, %v1010_v48  ;;  %1204 = vmatmul.bf16.gmra.mxu0 %v6661_v53  ;;  %9956 = vst [vmem:[#allocation62_spill] sm:$0xff] %v7421_v26  ;;  %v4996_v63 = vld [vmem:[%s9641_s5 + $0x8] sm:$0xf]  ;;  %v5685_v8 = vld [vmem:[%s9641_s5 + $0x14] sm:$0xf0] }
 0x174   :  { %1253 = vmatmul.bf16.gmra.mxu1 %v6657_v49  ;;  %9957 = vst [vmem:[#allocation63_spill] sm:$0xff] %v7434_v57  ;;  %v7436_v17 = vor.u32 %v5685_v8, %v4996_v63  ;;  %v5683_v48 = vld [vmem:[%s9641_s5 + $0xc] sm:$0xf]  ;;  %v4998_v55 = vld [vmem:[%s9641_s5 + $0x18] sm:$0xf0]  ;;  %1715 = vmatpush.bf16.msrb.mxu0 %v7421_v26  ;;  %v7464_v63 = vor.u32 %v5646_v4, %v5230_v30 }
 0x175   :  { %9954 = vst [vmem:[#allocation60_spill] sm:$0xff] %v7407_v40  ;;  %1302 = vmatmul.bf16.gmra.mxu2 %v6659_v50  ;;  %v7449_v49 = vor.u32 %v5683_v48, %v4998_v55  ;;  %v5648_v50 = vld [vmem:[%s9642_s2 + $0xec] sm:$0xf0]  ;;  %1729 = vmatpush.bf16.msrb.mxu1 %v7434_v57  ;;  %v5236_v8 = vld [vmem:[%s9642_s2 + $0xe8] sm:$0xf] }
 0x176   :  { %9955 = vst [vmem:[#allocation61_spill] sm:$0xff] %v7418_v24  ;;  %1351 = vmatmul.bf16.gmra.mxu3 %v6661_v53  ;;  %1743 = vmatpush.bf16.msrb.mxu2 %v7436_v17  ;;  %v7462_v53 = vor.u32 %v5648_v50, %v5228_v0  ;;  %v5649_v48 = vld [vmem:[%s9642_s2 + $0xf4] sm:$0xf0]  ;;  %v5647_v55 = vld [vmem:[%s9642_s2 + $0xec] sm:$0xf]  ;;  %v963_v24 = vadd.f32 %v7029_v35, %v7119_v47 }
 0x177   :  { %9958 = vst [vmem:[#allocation64_spill] sm:$0xff] %v7436_v17  ;;  %1757 = vmatpush.bf16.msrb.mxu3 %v7449_v49  ;;  %v7478_v0 = vor.u32 %v5649_v48, %v5236_v8  ;;  %v5238_v50 = vld [vmem:[%s9642_s2 + $0xf8] sm:$0xf0]  ;;  %v5212_v4 = vld [vmem:[%s9642_s2 + $0xc0] sm:$0xf] }
 0x178   :  { %9959 = vst [vmem:[#allocation65_spill] sm:$0xff] %v7449_v49  ;;  %v1107_v40 = vpop.f32.mrf.mxu2  ;;  %v5644_v30 = vld [vmem:[%s9642_s2 + $0xcc] sm:$0xf0]  ;;  %v1011_v57 = vpop.f32.mrf.mxu0  ;;  %1924 = vmatpush.bf16.msra.mxu0 %v7462_v53  ;;  %v7492_v8 = vor.u32 %v5647_v55, %v5238_v50  ;;  %v5642_v49 = vld [vmem:[%s9642_s2 + $0xc4] sm:$0xf] }
 0x179   :  { %9960 = vst [vmem:[#allocation66_spill] sm:$0xff] %v7462_v53  ;;  %v1108_v17 = vadd.f32 %v1107_v40, %v7142_v44  ;;  %v1156_v35 = vpop.f32.mrf.mxu3  ;;  %1938 = vmatpush.bf16.msra.mxu1 %v7464_v63  ;;  %v7494_v48 = vor.u32 %v5644_v30, %v5212_v4  ;;  %v5214_v26 = vld [vmem:[%s9642_s2 + $0xd0] sm:$0xf0]  ;;  %v5220_v40 = vld [vmem:[%s9642_s2 + $0xc8] sm:$0xf]  ;;  %v1012_v25 = vadd.f32 %v1011_v57, %v963_v24  ;;  %v1060_v53 = vpop.f32.mrf.mxu1 }
 0x17a   :  { %9961 = vst [vmem:[#allocation67_spill] sm:$0xff] %v7464_v63  ;;  %1952 = vmatpush.bf16.msra.mxu2 %v7478_v0  ;;  %v7506_v55 = vor.u32 %v5642_v49, %v5214_v26  ;;  %v5645_v50 = vld [vmem:[%s9642_s2 + $0xd4] sm:$0xf0]  ;;  %v5643_v4 = vld [vmem:[%s9642_s2 + $0xcc] sm:$0xf] }
 0x17b   :  { %9962 = vst [vmem:[#allocation68_spill] sm:$0xff] %v7478_v0  ;;  %v5222_v30 = vld [vmem:[%s9642_s2 + $0xd8] sm:$0xf0]  ;;  %v7517_v63 = vadd.f32 %v1156_v35, %v1108_v17  ;;  %1966 = vmatpush.bf16.msra.mxu3 %v7492_v8  ;;  %v7520_v24 = vor.u32 %v5645_v50, %v5220_v40  ;;  %v7524_v57 = vadd.f32 %v1060_v53, %v1012_v25  ;;  %v5196_v49 = vld [vmem:[%s9642_s2 + $0xa0] sm:$0xf] }
 0x17c   :  { %9963 = vst [vmem:[#allocation69_spill] sm:$0xff] %v7492_v8  ;;  %v7522_v26 = vor.u32 %v5643_v4, %v5222_v30  ;;  %v5640_v0 = vld [vmem:[%s9642_s2 + $0xac] sm:$0xf0]  ;;  %v5638_v17 = vld [vmem:[%s9642_s2 + $0xa4] sm:$0xf]  ;;  %1925 = vmatpush.bf16.msra.mxu0 %v7494_v48 }
 0x17d   :  { %9964 = vst [vmem:[#allocation70_spill] sm:$0xff] %v7494_v48  ;;  %1939 = vmatpush.bf16.msra.mxu1 %v7506_v55  ;;  %v7537_v35 = vor.u32 %v5640_v0, %v5196_v49  ;;  %v5198_v25 = vld [vmem:[%s9642_s2 + $0xb0] sm:$0xf0]  ;;  %v5204_v53 = vld [vmem:[%s9642_s2 + $0xa8] sm:$0xf] }
 0x17e   :  { %9965 = vst [vmem:[#allocation71_spill] sm:$0xff] %v7506_v55  ;;  %v5641_v40 = vld [vmem:[%s9642_s2 + $0xb4] sm:$0xf0]  ;;  %1953 = vmatpush.bf16.msra.mxu2 %v7520_v24  ;;  %v7549_v50 = vor.u32 %v5638_v17, %v5198_v25  ;;  %v5639_v0 = vld [vmem:[%s9642_s2 + $0xac] sm:$0xf] }
 0x17f   :  { %9966 = vst [vmem:[#allocation72_spill] sm:$0xff] %v7520_v24  ;;  %v7551_v4 = vor.u32 %v5641_v40, %v5204_v53  ;;  %v5206_v30 = vld [vmem:[%s9642_s2 + $0xb8] sm:$0xf0]  ;;  %1967 = vmatpush.bf16.msra.mxu3 %v7522_v26  ;;  %v5180_v17 = vld [vmem:[%s9642_s2 + $0x80] sm:$0xf] }
 0x180   :  { %9967 = vst [vmem:[#allocation73_spill] sm:$0xff] %v7522_v26  ;;  %v7560_v49 = vor.u32 %v5639_v0, %v5206_v30  ;;  %v1109_v24 = vpop.f32.mrf.mxu2  ;;  %v5636_v25 = vld [vmem:[%s9642_s2 + $0x8c] sm:$0xf0]  ;;  %v5634_v53 = vld [vmem:[%s9642_s2 + $0x84] sm:$0xf]  ;;  %v1014_v30 = vpop.f32.mrf.mxu0  ;;  %1926 = vmatpush.bf16.msra.mxu0 %v7537_v35 }
 0x181   :  { %9968 = vst [vmem:[#allocation74_spill] sm:$0xff] %v7524_v57  ;;  %v966_v57 = vadd.f32 %v7062_v45, %v7119_v47  ;;  %v1110_v40 = vadd.f32 %v1109_v24, %v7142_v44  ;;  %v1158_v0 = vpop.f32.mrf.mxu3  ;;  %1940 = vmatpush.bf16.msra.mxu1 %v7549_v50  ;;  %v5182_v45 = vld [vmem:[%s9642_s2 + $0x90] sm:$0xf0]  ;;  %v5188_v26 = vld [vmem:[%s9642_s2 + $0x88] sm:$0xf]  ;;  %v1063_v24 = vpop.f32.mrf.mxu1  ;;  %v7586_v8 = vor.u32 %v5636_v25, %v5180_v17 }
 0x182   :  { %9969 = vst [vmem:[#allocation75_spill] sm:$0xff] %v7537_v35  ;;  %v5637_v55 = vld [vmem:[%s9642_s2 + $0x94] sm:$0xf0]  ;;  %1954 = vmatpush.bf16.msra.mxu2 %v7551_v4  ;;  %v5190_v35 = vld [vmem:[%s9642_s2 + $0x98] sm:$0xf0]  ;;  %v7597_v10 = vor.u32 %v5634_v53, %v5182_v45 }
 0x183   :  { %9970 = vst [vmem:[#allocation76_spill] sm:$0xff] %v7549_v50  ;;  %v1015_v48 = vadd.f32 %v1014_v30, %v966_v57  ;;  %v5635_v50 = vld [vmem:[%s9642_s2 + $0x8c] sm:$0xf]  ;;  %v7594_v6 = vadd.f32 %v1158_v0, %v1110_v40  ;;  %1968 = vmatpush.bf16.msra.mxu3 %v7560_v49  ;;  %v7599_v57 = vor.u32 %v5637_v55, %v5188_v26  ;;  %v5164_v25 = vld [vmem:[%s9642_s2 + $0x60] sm:$0xf] }
 0x184   :  { %9971 = vst [vmem:[#allocation77_spill] sm:$0xff] %v7551_v4  ;;  %1209 = vmatmul.bf16.gmra.mxu0 %v6713_v13  ;;  %v7604_v17 = vor.u32 %v5635_v50, %v5190_v35  ;;  %v5632_v40 = vld [vmem:[%s9642_s2 + $0x6c] sm:$0xf0]  ;;  %v5630_v53 = vld [vmem:[%s9642_s2 + $0x64] sm:$0xf]  ;;  %1258 = vmatmul.bf16.gmra.mxu1 %v6709_v11 }
 0x185   :  { %9972 = vst [vmem:[#allocation78_spill] sm:$0xff] %v7560_v49  ;;  %v7601_v30 = vadd.f32 %v1063_v24, %v1015_v48  ;;  %1307 = vmatmul.bf16.gmra.mxu2 %v6711_v12  ;;  %v5166_v48 = vld [vmem:[%s9642_s2 + $0x70] sm:$0xf0]  ;;  %v5172_v55 = vld [vmem:[%s9642_s2 + $0x68] sm:$0xf]  ;;  %1927 = vmatpush.bf16.msra.mxu0 %v7586_v8  ;;  %v7628_v35 = vor.u32 %v5632_v40, %v5164_v25 }
 0x186   :  { %9973 = vst [vmem:[#allocation79_spill] sm:$0xff] %v7586_v8  ;;  %v5633_v26 = vld [vmem:[%s9642_s2 + $0x74] sm:$0xf0]  ;;  %1356 = vmatmul.bf16.gmra.mxu3 %v6713_v13  ;;  %v5631_v11 = vld [vmem:[%s9642_s2 + $0x6c] sm:$0xf]  ;;  %1941 = vmatpush.bf16.msra.mxu1 %v7597_v10  ;;  %v7638_v50 = vor.u32 %v5630_v53, %v5166_v48 }
 0x187   :  { %9974 = vst [vmem:[#allocation80_spill] sm:$0xff] %v7594_v6  ;;  %v5174_v12 = vld [vmem:[%s9642_s2 + $0x78] sm:$0xf0]  ;;  %1955 = vmatpush.bf16.msra.mxu2 %v7599_v57  ;;  %v7640_v0 = vor.u32 %v5633_v26, %v5172_v55  ;;  %1969 = vmatpush.bf16.msra.mxu3 %v7604_v17  ;;  %v5148_v24 = vld [vmem:[%s9642_s2 + $0x40] sm:$0xf] }
 0x188   :  { %9975 = vst [vmem:[#allocation81_spill] sm:$0xff] %v7597_v10  ;;  %v1112_v13 = vpop.f32.mrf.mxu2  ;;  %v7643_v45 = vor.u32 %v5631_v11, %v5174_v12  ;;  %v5628_v25 = vld [vmem:[%s9642_s2 + $0x4c] sm:$0xf0]  ;;  %v5626_v40 = vld [vmem:[%s9642_s2 + $0x44] sm:$0xf]  ;;  %v7655_v55 = vpop.f32.mrf.mxu0 }
 0x189   :  { %9976 = vst [vmem:[#allocation82_spill] sm:$0xff] %v7599_v57  ;;  %v1113_v53 = vadd.f32 %v1112_v13, %v7142_v44  ;;  %v1161_v48 = vpop.f32.mrf.mxu3  ;;  %v5150_v26 = vld [vmem:[%s9642_s2 + $0x50] sm:$0xf0]  ;;  %v5156_v11 = vld [vmem:[%s9642_s2 + $0x48] sm:$0xf]  ;;  %1928 = vmatpush.bf16.msra.mxu0 %v7628_v35  ;;  %v7669_v13 = vor.u32 %v5628_v25, %v5148_v24 }
 0x18a   :  { %9977 = vst [vmem:[#allocation83_spill] sm:$0xff] %v7601_v30  ;;  %v5629_v12 = vld [vmem:[%s9642_s2 + $0x54] sm:$0xf0]  ;;  %v7666_v30 = vpop.f32.mrf.mxu1  ;;  %v5158_v6 = vld [vmem:[%s9642_s2 + $0x58] sm:$0xf0]  ;;  %1942 = vmatpush.bf16.msra.mxu1 %v7638_v50  ;;  %v7681_v57 = vor.u32 %v5626_v40, %v5150_v26 }
 0x18b   :  { %9978 = vst [vmem:[#allocation84_spill] sm:$0xff] %v7604_v17  ;;  %v7677_v17 = vadd.f32 %v1161_v48, %v1113_v53  ;;  %1956 = vmatpush.bf16.msra.mxu2 %v7640_v0  ;;  %v5132_v24 = vld [vmem:[%s9642_s2 + $0x20] sm:$0xf]  ;;  %v5624_v25 = vld [vmem:[%s9642_s2 + $0x2c] sm:$0xf0]  ;;  %1970 = vmatpush.bf16.msra.mxu3 %v7643_v45 }
 0x18c   :  { %9979 = vst [vmem:[#allocation85_spill] sm:$0xff] %v7628_v35  ;;  %v5622_v53 = vld [vmem:[%s9642_s2 + $0x24] sm:$0xf]  ;;  %v5134_v40 = vld [vmem:[%s9642_s2 + $0x30] sm:$0xf0] }
 0x18d   :  { %9980 = vst [vmem:[#allocation86_spill] sm:$0xff] %v7638_v50  ;;  %v5140_v26 = vld [vmem:[%s9642_s2 + $0x28] sm:$0xf]  ;;  %1929 = vmatpush.bf16.msra.mxu0 %v7669_v13  ;;  %v971_v50 = vadd.f32 %v7112_v34, %v7119_v47 }
 0x18e   :  { %9981 = vst [vmem:[#allocation87_spill] sm:$0xff] %v7640_v0  ;;  %1943 = vmatpush.bf16.msra.mxu1 %v7681_v57 }
 0x18f   :  { %9982 = vst [vmem:[#allocation88_spill] sm:$0xff] %v7643_v45  ;;  %v7717_v45 = vor.u32 %v5622_v53, %v5134_v40  ;;  %v5618_v53 = vld [vmem:[%s9642_s2 + $0x4] sm:$0xf] }
 0x190   :  { %9983 = vst [vmem:[#allocation89_spill] sm:$0xff] %v7655_v55  ;;  %v5627_v55 = vld [vmem:[%s9642_s2 + $0x4c] sm:$0xf]  ;;  %v7723_v35 = vpop.f32.mrf.mxu2  ;;  %v1019_v34 = vpop.f32.mrf.mxu0 }
 0x191   :  { %9984 = vst [vmem:[#allocation90_spill] sm:$0xff] %v7666_v30  ;;  %v7683_v30 = vor.u32 %v5629_v12, %v5156_v11  ;;  %v7695_v48 = vor.u32 %v5627_v55, %v5158_v6  ;;  %v5625_v11 = vld [vmem:[%s9642_s2 + $0x34] sm:$0xf0]  ;;  %v5623_v12 = vld [vmem:[%s9642_s2 + $0x2c] sm:$0xf]  ;;  %v7713_v55 = vor.u32 %v5624_v25, %v5132_v24  ;;  %v7737_v40 = vpop.f32.mrf.mxu3 }
 0x192   :  { %9985 = vst [vmem:[#allocation91_spill] sm:$0xff] %v7669_v13  ;;  %v5142_v6 = vld [vmem:[%s9642_s2 + $0x38] sm:$0xf0]  ;;  %v7719_v0 = vor.u32 %v5625_v11, %v5140_v26  ;;  %v5116_v24 = vld [vmem:[%s9642_s2] sm:$0xf]  ;;  %1944 = vmatpush.bf16.msra.mxu1 %v7717_v45 }
 0x193   :  { %9986 = vst [vmem:[#allocation92_spill] sm:$0xff] %v7681_v57  ;;  %1957 = vmatpush.bf16.msra.mxu2 %v7683_v30  ;;  %1971 = vmatpush.bf16.msra.mxu3 %v7695_v48  ;;  %v7726_v10 = vor.u32 %v5623_v12, %v5142_v6  ;;  %v5620_v25 = vld [vmem:[%s9642_s2 + $0xc] sm:$0xf0]  ;;  %v5118_v26 = vld [vmem:[%s9642_s2 + $0x10] sm:$0xf0]  ;;  %v1020_v6 = vadd.f32 %v1019_v34, %v971_v50 }
 0x194   :  { %9987 = vst [vmem:[#allocation93_spill] sm:$0xff] %v7683_v30  ;;  %v5124_v11 = vld [vmem:[%s9642_s2 + $0x8] sm:$0xf]  ;;  %v5621_v12 = vld [vmem:[%s9642_s2 + $0x14] sm:$0xf0]  ;;  %1930 = vmatpush.bf16.msra.mxu0 %v7713_v55  ;;  %v7749_v47 = vor.u32 %v5620_v25, %v5116_v24  ;;  %v7759_v30 = vor.u32 %v5618_v53, %v5118_v26  ;;  %1263 = vmatmul.bf16.gmra.mxu1 %v6761_v38 }
 0x195   :  { %9988 = vst [vmem:[#allocation94_spill] sm:$0xff] %v7695_v48  ;;  %v5126_v48 = vld [vmem:[%s9642_s2 + $0x18] sm:$0xf0]  ;;  %v7761_v50 = vor.u32 %v5621_v12, %v5124_v11  ;;  %1214 = vmatmul.bf16.gmra.mxu0 %v6765_v43  ;;  %1312 = vmatmul.bf16.gmra.mxu2 %v6763_v39 }
 0x196   :  { %9989 = vst [vmem:[#allocation95_spill] sm:$0xff] %v7713_v55  ;;  %1361 = vmatmul.bf16.gmra.mxu3 %v6765_v43  ;;  %1945 = vmatpush.bf16.msra.mxu1 %v7759_v30 }
 0x197   :  { %9990 = vst [vmem:[#allocation96_spill] sm:$0xff] %v7717_v45  ;;  %1958 = vmatpush.bf16.msra.mxu2 %v7719_v0  ;;  %1972 = vmatpush.bf16.msra.mxu3 %v7726_v10 }
 0x198   :  { %9991 = vst [vmem:[#allocation97_spill] sm:$0xff] %v7719_v0  ;;  %1931 = vmatpush.bf16.msra.mxu0 %v7749_v47 }
 0x199   :  { %9992 = vst [vmem:[#allocation98_spill] sm:$0xff] %v7723_v35  ;;  %v1068_v35 = vpop.f32.mrf.mxu1  ;;  %v1166_v53 = vpop.f32.mrf.mxu3 }
 0x19a   :  { %9993 = vst [vmem:[#allocation99_spill] sm:$0xff] %v7726_v10  ;;  %v7763_v34 = vadd.f32 %v1068_v35, %v1020_v6  ;;  %v1117_v35 = vpop.f32.mrf.mxu2  ;;  %v6087_v6 = vld [vmem:[%s9640_s3] sm:$0xf] }
 0x19b   :  { %9994 = vst [vmem:[#allocation100_spill] sm:$0xff] %v7737_v40  ;;  %v5619_v40 = vld [vmem:[%s9642_s2 + $0xc] sm:$0xf]  ;;  %1959 = vmatpush.bf16.msra.mxu2 %v7761_v50  ;;  %v1118_v25 = vadd.f32 %v1117_v35, %v7142_v44  ;;  %v7793_v35 = vperm.slane %v6087_v6, 3 }
 0x19c   :  { %9995 = vst [vmem:[#allocation101_spill] sm:$0xff] %v7749_v47  ;;  %v7767_v24 = vor.u32 %v5619_v40, %v5126_v48  ;;  %v7777_v48 = vpop.f32.mrf.mxu0 }
 0x19d   :  { %9996 = vst [vmem:[#allocation102_spill] sm:$0xff] %v7759_v30  ;;  %v7781_v38 = vadd.f32 %v1166_v53, %v1118_v25 }
 0x19e   :  { %9997 = vst [vmem:[#allocation103_spill] sm:$0xff] %v7761_v50  ;;  %1973 = vmatpush.bf16.msra.mxu3 %v7767_v24 }
 0x19f   :  { %9998 = vst [vmem:[#allocation104_spill] sm:$0xff] %v7763_v34 }
 0x1a0   :  { %9999 = vst [vmem:[#allocation105_spill] sm:$0xff] %v7767_v24 }
 0x1a1   :  { %10000 = vst [vmem:[#allocation106_spill] sm:$0xff] %v7777_v48  ;;  %v7779_v40 = vpop.f32.mrf.mxu1  ;;  %v7785_v43 = vpop.f32.mrf.mxu3  ;;  %v6088_v48 = vmov 0  }
 0x1a2   :  { %10001 = vst [vmem:[#allocation107_spill] sm:$0xff] %v7779_v40  ;;  %v7783_v39 = vpop.f32.mrf.mxu2 }
 0x1a3   :  { %10002 = vst [vmem:[#allocation108_spill] sm:$0xff] %v7783_v39 }
 0x1a4   :  { %10003 = vst [vmem:[#allocation109_spill] sm:$0xff] %v7785_v43  ;;  %v1180_v26 = vpop.f32.mrf.mxu0  ;;  %1730 = vmatmul.bf16.vlgmr.msrb.gmra.mxu1 %v6088_v48 }
 0x1a5   :  { %v7788_v11 = vadd.f32 %v1180_v26, %v7175_v56  ;;  %10004 = vst [vmem:[#allocation110_spill] sm:$0xff] %v7793_v35  ;;  %1716 = vmatmul.bf16.vlgmr.msrb.gmra.mxu0 %v6088_v48  ;;  %1744 = vmatmul.bf16.vlgmr.msrb.gmra.mxu2 %v6088_v48 }
 0x1a6   :  { %1758 = vmatmul.bf16.vlgmr.msrb.gmra.mxu3 %v6088_v48 }
 0x1a9   :  { %v1229_v12 = vpop.f32.mrf.mxu1  ;;  %v1327_v39 = vpop.f32.mrf.mxu3 }
 0x1aa   :  { %v1230_v25 = vadd.f32 %v1229_v12, %v7793_v35  ;;  %v1278_v53 = vpop.f32.mrf.mxu2 }
 0x1ac   :  { %v1279_v43 = vadd.f32 %v1278_v53, %v1230_v25  ;;  %v7796_v40 = vpop.f32.mrf.mxu0 }
 0x1ae   :  { %v7800_v26 = vadd.f32 %v1327_v39, %v1279_v43 }
 0x1b1   :  { %v7798_v56 = vpop.f32.mrf.mxu1  ;;  %v7804_v6 = vpop.f32.mrf.mxu3 }
 0x1b2   :  { %v7802_v34 = vpop.f32.mrf.mxu2 }
 0x1b4   :  { %v1185_v44 = vpop.f32.mrf.mxu0  ;;  %1946 = vmatmul.bf16.vlgmr.msra.gmra.mxu1 %v6088_v48 }
 0x1b5   :  { %v7807_v24 = vadd.f32 %v1185_v44, %v7229_v5  ;;  %1932 = vmatmul.bf16.vlgmr.msra.gmra.mxu0 %v6088_v48  ;;  %1960 = vmatmul.bf16.vlgmr.msra.gmra.mxu2 %v6088_v48 }
 0x1b6   :  { %1974 = vmatmul.bf16.vlgmr.msra.gmra.mxu3 %v6088_v48 }
 0x1b7   :  { %10005 = vst [vmem:[#allocation111_spill] sm:$0xff] %v7807_v24 }
 0x1b9   :  { %v1234_v50 = vpop.f32.mrf.mxu1  ;;  %v1332_v30 = vpop.f32.mrf.mxu3 }
 0x1ba   :  { %v1235_v12 = vadd.f32 %v1234_v50, %v7793_v35  ;;  %v1283_v25 = vpop.f32.mrf.mxu2 }
 0x1bc   :  { %v1284_v53 = vadd.f32 %v1283_v25, %v1235_v12  ;;  %v7810_v39 = vpop.f32.mrf.mxu0 }
 0x1bd   :  { %10006 = vst [vmem:[#allocation112_spill] sm:$0xff] %v7810_v39 }
 0x1be   :  { %v7814_v47 = vadd.f32 %v1332_v30, %v1284_v53 }
 0x1c0   :  { %10008 = vst [vmem:[#allocation114_spill] sm:$0xff] %v7814_v47 }
 0x1c1   :  { %v7812_v43 = vpop.f32.mrf.mxu1  ;;  %v7818_v5 = vpop.f32.mrf.mxu3 }
 0x1c2   :  { %10007 = vst [vmem:[#allocation113_spill] sm:$0xff] %v7812_v43  ;;  %v7816_v10 = vpop.f32.mrf.mxu2  ;;  %v5669_v43 = vld [vmem:[%s9643_s4 + $0x94] sm:$0xf0] }
 0x1c3   :  { %10009 = vst [vmem:[#allocation115_spill] sm:$0xff] %v7816_v10 }
 0x1c4   :  { %10010 = vst [vmem:[#allocation116_spill] sm:$0xff] %v7818_v5  ;;  %v1190_v44 = vpop.f32.mrf.mxu0 }
 0x1c5   :  { %v7821_v24 = vadd.f32 %v1190_v44, %v7283_v60 }
 0x1c7   :  { %10011 = vst [vmem:[#allocation117_spill] sm:$0xff] %v7821_v24 }
 0x1c9   :  { %v1239_v48 = vpop.f32.mrf.mxu1  ;;  %v1337_v25 = vpop.f32.mrf.mxu3 }
 0x1ca   :  { %v1240_v50 = vadd.f32 %v1239_v48, %v7793_v35  ;;  %v1288_v0 = vpop.f32.mrf.mxu2 }
 0x1cc   :  { %v1289_v12 = vadd.f32 %v1288_v0, %v1240_v50  ;;  %v7824_v45 = vpop.f32.mrf.mxu0 }
 0x1cd   :  { %10012 = vst [vmem:[#allocation118_spill] sm:$0xff] %v7824_v45 }
 0x1ce   :  { %v7828_v30 = vadd.f32 %v1337_v25, %v1289_v12 }
 0x1d0   :  { %10014 = vst [vmem:[#allocation120_spill] sm:$0xff] %v7828_v30 }
 0x1d1   :  { %v7826_v39 = vpop.f32.mrf.mxu1  ;;  %v7832_v47 = vpop.f32.mrf.mxu3 }
 0x1d2   :  { %10013 = vst [vmem:[#allocation119_spill] sm:$0xff] %v7826_v39  ;;  %v7830_v53 = vpop.f32.mrf.mxu2 }
 0x1d3   :  { %10015 = vst [vmem:[#allocation121_spill] sm:$0xff] %v7830_v53 }
 0x1d4   :  { %10016 = vst [vmem:[#allocation122_spill] sm:$0xff] %v7832_v47  ;;  %v1195_v5 = vpop.f32.mrf.mxu0 }
 0x1d5   :  { %v7835_v60 = vadd.f32 %v1195_v5, %v7337_v51 }
 0x1d7   :  { %10017 = vst [vmem:[#allocation123_spill] sm:$0xff] %v7835_v60 }
 0x1d9   :  { %v1244_v44 = vpop.f32.mrf.mxu1  ;;  %v1342_v50 = vpop.f32.mrf.mxu3 }
 0x1da   :  { %v1245_v48 = vadd.f32 %v1244_v44, %v7793_v35  ;;  %v1293_v24 = vpop.f32.mrf.mxu2 }
 0x1dc   :  { %v1294_v0 = vadd.f32 %v1293_v24, %v1245_v48  ;;  %v7838_v10 = vpop.f32.mrf.mxu0 }
 0x1dd   :  { %10018 = vst [vmem:[#allocation124_spill] sm:$0xff] %v7838_v10 }
 0x1de   :  { %v7842_v12 = vadd.f32 %v1342_v50, %v1294_v0 }
 0x1e0   :  { %10020 = vst [vmem:[#allocation126_spill] sm:$0xff] %v7842_v12 }
 0x1e1   :  { %v7840_v45 = vpop.f32.mrf.mxu1  ;;  %v7846_v30 = vpop.f32.mrf.mxu3 }
 0x1e2   :  { %10019 = vst [vmem:[#allocation125_spill] sm:$0xff] %v7840_v45  ;;  %v7844_v25 = vpop.f32.mrf.mxu2 }
 0x1e3   :  { %10021 = vst [vmem:[#allocation127_spill] sm:$0xff] %v7844_v25 }
 0x1e4   :  { %10022 = vst [vmem:[#allocation128_spill] sm:$0xff] %v7846_v30  ;;  %v1200_v47 = vpop.f32.mrf.mxu0 }
 0x1e5   :  { %v7849_v51 = vadd.f32 %v1200_v47, %v7391_v19 }
 0x1e7   :  { %10023 = vst [vmem:[#allocation129_spill] sm:$0xff] %v7849_v51 }
 0x1e9   :  { %v1249_v5 = vpop.f32.mrf.mxu1  ;;  %v1347_v48 = vpop.f32.mrf.mxu3 }
 0x1ea   :  { %v1250_v44 = vadd.f32 %v1249_v5, %v7793_v35  ;;  %v1298_v60 = vpop.f32.mrf.mxu2 }
 0x1ec   :  { %v1299_v24 = vadd.f32 %v1298_v60, %v1250_v44  ;;  %v7852_v53 = vpop.f32.mrf.mxu0 }
 0x1ed   :  { %10024 = vst [vmem:[#allocation130_spill] sm:$0xff] %v7852_v53 }
 0x1ee   :  { %v7856_v0 = vadd.f32 %v1347_v48, %v1299_v24 }
 0x1f0   :  { %10026 = vst [vmem:[#allocation132_spill] sm:$0xff] %v7856_v0 }
 0x1f1   :  { %v7854_v10 = vpop.f32.mrf.mxu1  ;;  %v7860_v12 = vpop.f32.mrf.mxu3 }
 0x1f2   :  { %10025 = vst [vmem:[#allocation131_spill] sm:$0xff] %v7854_v10  ;;  %v7858_v50 = vpop.f32.mrf.mxu2 }
 0x1f3   :  { %10027 = vst [vmem:[#allocation133_spill] sm:$0xff] %v7858_v50 }
 0x1f4   :  { %10028 = vst [vmem:[#allocation134_spill] sm:$0xff] %v7860_v12  ;;  %v1205_v30 = vpop.f32.mrf.mxu0 }
 0x1f5   :  { %v7863_v47 = vadd.f32 %v1205_v30, %v7517_v63 }
 0x1f7   :  { %10029 = vst [vmem:[#allocation135_spill] sm:$0xff] %v7863_v47 }
 0x1f9   :  { %v1254_v19 = vpop.f32.mrf.mxu1  ;;  %v1352_v44 = vpop.f32.mrf.mxu3 }
 0x1fa   :  { %v1255_v5 = vadd.f32 %v1254_v19, %v7793_v35  ;;  %v1303_v51 = vpop.f32.mrf.mxu2 }
 0x1fc   :  { %v1304_v60 = vadd.f32 %v1303_v51, %v1255_v5  ;;  %v7866_v25 = vpop.f32.mrf.mxu0 }
 0x1fd   :  { %10030 = vst [vmem:[#allocation136_spill] sm:$0xff] %v7866_v25 }
 0x1fe   :  { %v7870_v24 = vadd.f32 %v1352_v44, %v1304_v60 }
 0x200   :  { %10032 = vst [vmem:[#allocation138_spill] sm:$0xff] %v7870_v24 }
 0x201   :  { %v7868_v53 = vpop.f32.mrf.mxu1  ;;  %v7874_v0 = vpop.f32.mrf.mxu3 }
 0x202   :  { %10031 = vst [vmem:[#allocation137_spill] sm:$0xff] %v7868_v53  ;;  %v7872_v48 = vpop.f32.mrf.mxu2  ;;  %v5673_v53 = vld [vmem:[%s9643_s4 + $0xb4] sm:$0xf0] }
 0x203   :  { %10033 = vst [vmem:[#allocation139_spill] sm:$0xff] %v7872_v48  ;;  %v5332_v48 = vld [vmem:[%s9643_s4 + $0xa8] sm:$0xf] }
 0x204   :  { %10034 = vst [vmem:[#allocation140_spill] sm:$0xff] %v7874_v0  ;;  %v1210_v12 = vpop.f32.mrf.mxu0  ;;  %v8002_v45 = vor.u32 %v5673_v53, %v5332_v48  ;;  %v5308_v53 = vld [vmem:[%s9643_s4 + $0x80] sm:$0xf]  ;;  %v5668_v48 = vld [vmem:[%s9643_s4 + $0x8c] sm:$0xf0] }
 0x205   :  { %v7877_v63 = vadd.f32 %v1210_v12, %v7677_v17 }
 0x206   :  { %10057 = vst [vmem:[#allocation163_spill] sm:$0xff] %v8002_v45 }
 0x207   :  { %10035 = vst [vmem:[#allocation141_spill] sm:$0xff] %v7877_v63 }
 0x209   :  { %v1259_v30 = vpop.f32.mrf.mxu1  ;;  %v1357_v5 = vpop.f32.mrf.mxu3 }
 0x20a   :  { %v1260_v19 = vadd.f32 %v1259_v30, %v7793_v35  ;;  %v1308_v47 = vpop.f32.mrf.mxu2 }
 0x20c   :  { %v1309_v51 = vadd.f32 %v1308_v47, %v1260_v19  ;;  %v7880_v50 = vpop.f32.mrf.mxu0  ;;  %v5356_v47 = vld [vmem:[%s9643_s4 + $0xe0] sm:$0xf]  ;;  %v5680_v19 = vld [vmem:[%s9643_s4 + $0xec] sm:$0xf0] }
 0x20d   :  { %10036 = vst [vmem:[#allocation142_spill] sm:$0xff] %v7880_v50  ;;  %v5681_v50 = vld [vmem:[%s9643_s4 + $0xf4] sm:$0xf0] }
 0x20e   :  { %v7884_v60 = vadd.f32 %v1357_v5, %v1309_v51  ;;  %v5678_v51 = vld [vmem:[%s9643_s4 + $0xe4] sm:$0xf] }
 0x210   :  { %10038 = vst [vmem:[#allocation144_spill] sm:$0xff] %v7884_v60 }
 0x211   :  { %v7882_v25 = vpop.f32.mrf.mxu1  ;;  %v7888_v24 = vpop.f32.mrf.mxu3 }
 0x212   :  { %10037 = vst [vmem:[#allocation143_spill] sm:$0xff] %v7882_v25  ;;  %v7886_v44 = vpop.f32.mrf.mxu2 }
 0x213   :  { %10039 = vst [vmem:[#allocation145_spill] sm:$0xff] %v7886_v44 }
 0x214   :  { %10040 = vst [vmem:[#allocation146_spill] sm:$0xff] %v7888_v24  ;;  %v1215_v0 = vpop.f32.mrf.mxu0 }
 0x215   :  { %v7891_v17 = vadd.f32 %v1215_v0, %v7781_v38  ;;  %v7905_v0 = vor.u32 %v5680_v19, %v5356_v47  ;;  %v5679_v47 = vld [vmem:[%s9643_s4 + $0xec] sm:$0xf]  ;;  %v5366_v19 = vld [vmem:[%s9643_s4 + $0xf8] sm:$0xf0] }
 0x216   :  { %v7931_v44 = vor.u32 %v5679_v47, %v5366_v19  ;;  %v5677_v47 = vld [vmem:[%s9643_s4 + $0xd4] sm:$0xf0] }
 0x217   :  { %10041 = vst [vmem:[#allocation147_spill] sm:$0xff] %v7891_v17  ;;  %v5364_v17 = vld [vmem:[%s9643_s4 + $0xe8] sm:$0xf]  ;;  %2185 = vmatpush.bf16.msrb.mxu0 %v7905_v0 }
 0x218   :  { %10043 = vst [vmem:[#allocation149_spill] sm:$0xff] %v7905_v0  ;;  %2227 = vmatpush.bf16.msrb.mxu3 %v7931_v44 }
 0x219   :  { %v1264_v12 = vpop.f32.mrf.mxu1  ;;  %v1362_v24 = vpop.f32.mrf.mxu3  ;;  %10048 = vst [vmem:[#allocation154_spill] sm:$0xff] %v7931_v44 }
 0x21a   :  { %v1265_v30 = vadd.f32 %v1264_v12, %v7793_v35  ;;  %v1313_v63 = vpop.f32.mrf.mxu2  ;;  %v5358_v12 = vld [vmem:[%s9643_s4 + $0xf0] sm:$0xf0] }
 0x21c   :  { %v1314_v5 = vadd.f32 %v1313_v63, %v1265_v30  ;;  %v7903_v38 = vpop.f32.mrf.mxu0  ;;  %v7918_v63 = vor.u32 %v5678_v51, %v5358_v12  ;;  %v7920_v30 = vor.u32 %v5681_v50, %v5364_v17  ;;  %v5340_v50 = vld [vmem:[%s9643_s4 + $0xc0] sm:$0xf]  ;;  %v5676_v17 = vld [vmem:[%s9643_s4 + $0xcc] sm:$0xf0]  ;;  %v5348_v12 = vld [vmem:[%s9643_s4 + $0xc8] sm:$0xf] }
 0x21d   :  { %10042 = vst [vmem:[#allocation148_spill] sm:$0xff] %v7903_v38  ;;  %v7945_v51 = vor.u32 %v5676_v17, %v5340_v50  ;;  %v5675_v50 = vld [vmem:[%s9643_s4 + $0xcc] sm:$0xf]  ;;  %v5350_v17 = vld [vmem:[%s9643_s4 + $0xd8] sm:$0xf0] }
 0x21e   :  { %10045 = vst [vmem:[#allocation151_spill] sm:$0xff] %v7918_v63  ;;  %v7928_v38 = vadd.f32 %v1362_v24, %v1314_v5  ;;  %2199 = vmatpush.bf16.msrb.mxu1 %v7918_v63  ;;  %2213 = vmatpush.bf16.msrb.mxu2 %v7920_v30  ;;  %v5674_v24 = vld [vmem:[%s9643_s4 + $0xc4] sm:$0xf]  ;;  %v5342_v5 = vld [vmem:[%s9643_s4 + $0xd0] sm:$0xf0] }
 0x21f   :  { %10046 = vst [vmem:[#allocation152_spill] sm:$0xff] %v7920_v30  ;;  %v7956_v19 = vor.u32 %v5674_v24, %v5342_v5  ;;  %2186 = vmatpush.bf16.msrb.mxu0 %v7945_v51  ;;  %v5657_v30 = vld [vmem:[%s9643_s4 + $0x34] sm:$0xf0] }
 0x220   :  { %10047 = vst [vmem:[#allocation153_spill] sm:$0xff] %v7928_v38  ;;  %v7958_v38 = vor.u32 %v5677_v47, %v5348_v12  ;;  %v5324_v12 = vld [vmem:[%s9643_s4 + $0xa0] sm:$0xf]  ;;  %v5672_v47 = vld [vmem:[%s9643_s4 + $0xac] sm:$0xf0] }
 0x221   :  { %v7916_v60 = vpop.f32.mrf.mxu1  ;;  %10049 = vst [vmem:[#allocation155_spill] sm:$0xff] %v7945_v51  ;;  %v7973_v24 = vpop.f32.mrf.mxu3 }
 0x222   :  { %10044 = vst [vmem:[#allocation150_spill] sm:$0xff] %v7916_v60  ;;  %v7967_v60 = vor.u32 %v5675_v50, %v5350_v17  ;;  %v7969_v25 = vpop.f32.mrf.mxu2  ;;  %2200 = vmatpush.bf16.msrb.mxu1 %v7956_v19  ;;  %2214 = vmatpush.bf16.msrb.mxu2 %v7958_v38  ;;  %v5670_v50 = vld [vmem:[%s9643_s4 + $0xa4] sm:$0xf] }
 0x223   :  { %10050 = vst [vmem:[#allocation156_spill] sm:$0xff] %v7956_v19 }
 0x224   :  { %10051 = vst [vmem:[#allocation157_spill] sm:$0xff] %v7958_v38  ;;  %v7975_v5 = vpop.f32.mrf.mxu0  ;;  %2228 = vmatpush.bf16.msrb.mxu3 %v7967_v60 }
 0x225   :  { %10052 = vst [vmem:[#allocation158_spill] sm:$0xff] %v7967_v60 }
 0x226   :  { %10053 = vst [vmem:[#allocation159_spill] sm:$0xff] %v7969_v25  ;;  %v7989_v25 = vor.u32 %v5672_v47, %v5324_v12  ;;  %v5671_v12 = vld [vmem:[%s9643_s4 + $0xac] sm:$0xf]  ;;  %v5334_v47 = vld [vmem:[%s9643_s4 + $0xb8] sm:$0xf0]  ;;  %2215 = vmatpush.bf16.msrb.mxu2 %v8002_v45 }
 0x227   :  { %10054 = vst [vmem:[#allocation160_spill] sm:$0xff] %v7973_v24  ;;  %v5326_v24 = vld [vmem:[%s9643_s4 + $0xb0] sm:$0xf0]  ;;  %v8011_v39 = vor.u32 %v5671_v12, %v5334_v47  ;;  %v5316_v47 = vld [vmem:[%s9643_s4 + $0x88] sm:$0xf] }
 0x228   :  { %10055 = vst [vmem:[#allocation161_spill] sm:$0xff] %v7989_v25  ;;  %v8000_v10 = vor.u32 %v5670_v50, %v5326_v24  ;;  %2187 = vmatpush.bf16.msrb.mxu0 %v7989_v25  ;;  %v5666_v24 = vld [vmem:[%s9643_s4 + $0x84] sm:$0xf]  ;;  %v8025_v50 = vor.u32 %v5668_v48, %v5308_v53  ;;  %v5310_v12 = vld [vmem:[%s9643_s4 + $0x90] sm:$0xf0] }
 0x229   :  { %v7987_v17 = vpop.f32.mrf.mxu1  ;;  %10058 = vst [vmem:[#allocation164_spill] sm:$0xff] %v8011_v39  ;;  %2229 = vmatpush.bf16.msrb.mxu3 %v8011_v39  ;;  %v8036_v45 = vor.u32 %v5666_v24, %v5310_v12  ;;  %v5667_v53 = vld [vmem:[%s9643_s4 + $0x8c] sm:$0xf]  ;;  %v5318_v48 = vld [vmem:[%s9643_s4 + $0x98] sm:$0xf0]  ;;  %v8051_v60 = vpop.f32.mrf.mxu3 }
 0x22a   :  { %10056 = vst [vmem:[#allocation162_spill] sm:$0xff] %v8000_v10  ;;  %2201 = vmatpush.bf16.msrb.mxu1 %v8000_v10  ;;  %v8038_v10 = vor.u32 %v5669_v43, %v5316_v47  ;;  %v8046_v39 = vpop.f32.mrf.mxu2  ;;  %v8049_v25 = vor.u32 %v5667_v53, %v5318_v48  ;;  %v5292_v43 = vld [vmem:[%s9643_s4 + $0x60] sm:$0xf]  ;;  %v5664_v12 = vld [vmem:[%s9643_s4 + $0x6c] sm:$0xf0] }
 0x22b   :  { %10059 = vst [vmem:[#allocation165_spill] sm:$0xff] %v8025_v50  ;;  %v5662_v47 = vld [vmem:[%s9643_s4 + $0x64] sm:$0xf]  ;;  %v8069_v48 = vor.u32 %v5664_v12, %v5292_v43  ;;  %v5663_v43 = vld [vmem:[%s9643_s4 + $0x6c] sm:$0xf] }
 0x22c   :  { %10060 = vst [vmem:[#allocation166_spill] sm:$0xff] %v8036_v45  ;;  %2188 = vmatpush.bf16.msrb.mxu0 %v8025_v50  ;;  %v8053_v24 = vpop.f32.mrf.mxu0  ;;  %2216 = vmatpush.bf16.msrb.mxu2 %v8038_v10  ;;  %v5665_v50 = vld [vmem:[%s9643_s4 + $0x74] sm:$0xf0]  ;;  %v5302_v12 = vld [vmem:[%s9643_s4 + $0x78] sm:$0xf0] }
 0x22d   :  { %10061 = vst [vmem:[#allocation167_spill] sm:$0xff] %v8038_v10  ;;  %2230 = vmatpush.bf16.msrb.mxu3 %v8049_v25  ;;  %v5294_v10 = vld [vmem:[%s9643_s4 + $0x70] sm:$0xf0] }
 0x22e   :  { %10062 = vst [vmem:[#allocation168_spill] sm:$0xff] %v8049_v25  ;;  %2202 = vmatpush.bf16.msrb.mxu1 %v8036_v45  ;;  %v5300_v45 = vld [vmem:[%s9643_s4 + $0x68] sm:$0xf]  ;;  %v8080_v38 = vor.u32 %v5662_v47, %v5294_v10  ;;  %v8091_v25 = vor.u32 %v5663_v43, %v5302_v12  ;;  %v5276_v10 = vld [vmem:[%s9643_s4 + $0x40] sm:$0xf] }
 0x22f   :  { %10063 = vst [vmem:[#allocation169_spill] sm:$0xff] %v8069_v48  ;;  %v8082_v19 = vor.u32 %v5665_v50, %v5300_v45  ;;  %v5660_v45 = vld [vmem:[%s9643_s4 + $0x4c] sm:$0xf0]  ;;  %v5658_v50 = vld [vmem:[%s9643_s4 + $0x44] sm:$0xf] }
 0x230   :  { %10064 = vst [vmem:[#allocation170_spill] sm:$0xff] %v8080_v38  ;;  %2189 = vmatpush.bf16.msrb.mxu0 %v8069_v48  ;;  %v8105_v47 = vor.u32 %v5660_v45, %v5276_v10  ;;  %v5278_v43 = vld [vmem:[%s9643_s4 + $0x50] sm:$0xf0]  ;;  %v5284_v12 = vld [vmem:[%s9643_s4 + $0x48] sm:$0xf] }
 0x231   :  { %v8066_v53 = vpop.f32.mrf.mxu1  ;;  %10065 = vst [vmem:[#allocation171_spill] sm:$0xff] %v8082_v19  ;;  %2217 = vmatpush.bf16.msrb.mxu2 %v8082_v19  ;;  %2231 = vmatpush.bf16.msrb.mxu3 %v8091_v25  ;;  %v5661_v19 = vld [vmem:[%s9643_s4 + $0x54] sm:$0xf0]  ;;  %v5659_v10 = vld [vmem:[%s9643_s4 + $0x4c] sm:$0xf]  ;;  %v8131_v44 = vpop.f32.mrf.mxu3 }
 0x232   :  { %10066 = vst [vmem:[#allocation172_spill] sm:$0xff] %v8091_v25  ;;  %2203 = vmatpush.bf16.msrb.mxu1 %v8080_v38  ;;  %v8116_v38 = vor.u32 %v5658_v50, %v5278_v43  ;;  %v8118_v48 = vor.u32 %v5661_v19, %v5284_v12  ;;  %v5286_v45 = vld [vmem:[%s9643_s4 + $0x58] sm:$0xf0]  ;;  %v8126_v25 = vpop.f32.mrf.mxu2  ;;  %v5260_v19 = vld [vmem:[%s9643_s4 + $0x20] sm:$0xf] }
 0x233   :  { %10067 = vst [vmem:[#allocation173_spill] sm:$0xff] %v8105_v47  ;;  %v8129_v51 = vor.u32 %v5659_v10, %v5286_v45  ;;  %v5656_v43 = vld [vmem:[%s9643_s4 + $0x2c] sm:$0xf0]  ;;  %v5654_v12 = vld [vmem:[%s9643_s4 + $0x24] sm:$0xf] }
 0x234   :  { %10068 = vst [vmem:[#allocation174_spill] sm:$0xff] %v8116_v38  ;;  %2190 = vmatpush.bf16.msrb.mxu0 %v8105_v47  ;;  %v1933_v50 = vpop.f32.mrf.mxu0  ;;  %v5268_v47 = vld [vmem:[%s9643_s4 + $0x28] sm:$0xf] }
 0x235   :  { %10069 = vst [vmem:[#allocation175_spill] sm:$0xff] %v8118_v48  ;;  %2218 = vmatpush.bf16.msrb.mxu2 %v8118_v48  ;;  %v1980_v10 = vadd.f32 %v1933_v50, %v6826_v23  ;;  %2232 = vmatpush.bf16.msrb.mxu3 %v8129_v51  ;;  %v5262_v48 = vld [vmem:[%s9643_s4 + $0x30] sm:$0xf0]  ;;  %v8160_v50 = vor.u32 %v5657_v30, %v5268_v47  ;;  %v5652_v30 = vld [vmem:[%s9643_s4 + $0xc] sm:$0xf0] }
 0x236   :  { %10070 = vst [vmem:[#allocation176_spill] sm:$0xff] %v8129_v51  ;;  %2204 = vmatpush.bf16.msrb.mxu1 %v8116_v38  ;;  %v8146_v38 = vor.u32 %v5656_v43, %v5260_v19  ;;  %v8158_v23 = vor.u32 %v5654_v12, %v5262_v48  ;;  %v5655_v19 = vld [vmem:[%s9643_s4 + $0x2c] sm:$0xf]  ;;  %v5270_v43 = vld [vmem:[%s9643_s4 + $0x38] sm:$0xf0] }
 0x237   :  { %10071 = vst [vmem:[#allocation177_spill] sm:$0xff] %v8131_v44  ;;  %v1988_v51 = vmul.f32 0.5, %v1980_v10  ;;  %v8169_v0 = vor.u32 %v5655_v19, %v5270_v43  ;;  %v5246_v47 = vld [vmem:[%s9643_s4 + $0x10] sm:$0xf0]  ;;  %v5252_v12 = vld [vmem:[%s9643_s4 + $0x8] sm:$0xf] }
 0x238   :  { %10072 = vst [vmem:[#allocation178_spill] sm:$0xff] %v8146_v38  ;;  %2191 = vmatpush.bf16.msrb.mxu0 %v8146_v38  ;;  %v5254_v19 = vld [vmem:[%s9643_s4 + $0x18] sm:$0xf0] }
 0x239   :  { %v1947_v45 = vpop.f32.mrf.mxu1  ;;  %10073 = vst [vmem:[#allocation179_spill] sm:$0xff] %v8158_v23  ;;  %2219 = vmatpush.bf16.msrb.mxu2 %v8160_v50  ;;  %5747 = vtanh.f32 %v1988_v51  ;;  %2233 = vmatpush.bf16.msrb.mxu3 %v8169_v0  ;;  %v5653_v51 = vld [vmem:[%s9643_s4 + $0x14] sm:$0xf0] }
 0x23a   :  { %v1981_v63 = vadd.f32 %v1947_v45, %v7136_v9  ;;  %10074 = vst [vmem:[#allocation180_spill] sm:$0xff] %v8160_v50  ;;  %2205 = vmatpush.bf16.msrb.mxu1 %v8158_v23  ;;  %v5244_v9 = vld [vmem:[%s9643_s4] sm:$0xf]  ;;  %v5651_v45 = vld [vmem:[%s9643_s4 + $0xc] sm:$0xf]  ;;  %v1961_v43 = vpop.f32.mrf.mxu2 }
 0x23b   :  { %10075 = vst [vmem:[#allocation181_spill] sm:$0xff] %v8169_v0  ;;  %v8180_v48 = vor.u32 %v5652_v30, %v5244_v9  ;;  %v8203_v9 = vor.u32 %v5653_v51, %v5252_v12  ;;  %v1982_v30 = vadd.f32 %v1961_v43, %v7788_v11  ;;  %v1232_v0 = vadd.f32 %v7798_v56, %v7793_v35 }
 0x23c   :  { %v1996_v44 = vmul.f32 0.5, %v1981_v63  ;;  %v5650_v63 = vld [vmem:[%s9643_s4 + $0x4] sm:$0xf] }
 0x23d   :  { %10076 = vst [vmem:[#allocation182_spill] sm:$0xff] %v8180_v48  ;;  %v8191_v10 = vor.u32 %v5650_v63, %v5246_v47  ;;  %2192 = vmatpush.bf16.msrb.mxu0 %v8180_v48  ;;  %v1975_v63 = vpop.f32.mrf.mxu3  ;;  %v1935_v47 = vpop.f32.mrf.mxu0  ;;  %2220 = vmatpush.bf16.msrb.mxu2 %v8203_v9  ;;  %v1281_v51 = vadd.f32 %v7802_v34, %v1232_v0 }
 0x23e   :  { %5749 = vtanh.f32 %v1996_v44  ;;  %10078 = vst [vmem:[#allocation184_spill] sm:$0xff] %v8203_v9  ;;  %v8205_v44 = vor.u32 %v5651_v45, %v5254_v19  ;;  %v1984_v50 = vadd.f32 %v1935_v47, %v6837_v36 }
 0x23f   :  { %10077 = vst [vmem:[#allocation183_spill] sm:$0xff] %v8191_v10  ;;  %2206 = vmatpush.bf16.msrb.mxu1 %v8191_v10  ;;  %5751 = vtanh.f32 %v1982_v30  ;;  %v5748_v11 = vpop.eup %5747  ;;  %v1983_v30 = vadd.f32 %v1975_v63, %v7800_v26  ;;  %v1330_v34 = vadd.f32 %v7804_v6, %v1281_v51 }
 0x240   :  { %10079 = vst [vmem:[#allocation185_spill] sm:$0xff] %v8205_v44  ;;  %2234 = vmatpush.bf16.msrb.mxu3 %v8205_v44  ;;  %v1989_v45 = vmul.f32 0.5, %v1984_v50  ;;  %v1992_v36 = vmul.f32 0.5, %v5748_v11 }
 0x241   :  { %2297 = vmatpush.bf16.msra.mxu0 %v7045_v15  ;;  %v1949_v23 = vpop.f32.mrf.mxu1  ;;  %2325 = vmatpush.bf16.msra.mxu2 %v7058_v33 }
 0x242   :  { %v1985_v12 = vadd.f32 %v1949_v23, %v7177_v37  ;;  %v1183_v37 = vadd.f32 %v7796_v40, %v7191_v16  ;;  %v1994_v23 = vadd.f32 0.5, %v1992_v36  ;;  %5753 = vtanh.f32 %v1989_v45  ;;  %v1963_v50 = vpop.f32.mrf.mxu2 }
 0x243   :  { %2311 = vmatpush.bf16.msra.mxu1 %v7056_v31  ;;  %v2006_v40 = vmul.f32 0.5, %v1983_v30 }
 0x244   :  { %2339 = vmatpush.bf16.msra.mxu3 %v7074_v28  ;;  %v5750_v56 = vpop.eup %5749  ;;  %v1997_v19 = vmul.f32 0.5, %v1985_v12  ;;  %v1986_v12 = vadd.f32 %v1963_v50, %v1183_v37 }
 0x245   :  { %2298 = vmatpush.bf16.msra.mxu0 %v7095_v29  ;;  %v2000_v43 = vmul.f32 0.5, %v5750_v56  ;;  %2326 = vmatpush.bf16.msra.mxu2 %v7108_v3  ;;  %v5752_v47 = vpop.eup %5751  ;;  %v1977_v11 = vpop.f32.mrf.mxu3 }
 0x246   :  { %5755 = vtanh.f32 %v1997_v19  ;;  %v2016_v16 = vmul.f32 %v5752_v47, %v1994_v23  ;;  %v1987_v63 = vadd.f32 %v1977_v11, %v1330_v34 }
 0x247   :  { %2312 = vmatpush.bf16.msra.mxu1 %v7106_v32  ;;  %v2002_v0 = vadd.f32 0.5, %v2000_v43  ;;  %5757 = vtanh.f32 %v1986_v12 }
 0x248   :  { %2340 = vmatpush.bf16.msra.mxu3 %v7127_v58  ;;  %v2007_v51 = vmul.f32 0.5, %v1987_v63  ;;  %v5754_v45 = vpop.eup %5753  ;;  %5759 = vtanh.f32 %v2006_v40  ;;  %v10082_v40 = vld [vmem:[#allocation57_spill] sm:$0xff] }
 0x249   :  { %2299 = vmatpush.bf16.msra.mxu0 %v7154_v46  ;;  %v2014_v26 = vmul.f32 0.0, %v2002_v0  ;;  %2327 = vmatpush.bf16.msra.mxu2 %v7169_v7  ;;  %v1993_v36 = vmul.f32 0.5, %v5754_v45  ;;  %v10083_v45 = vld [vmem:[#allocation59_spill] sm:$0xff] }
 0x24a   :  { %5761 = vtanh.f32 %v2007_v51 }
 0x24b   :  { %2313 = vmatpush.bf16.msra.mxu1 %v7167_v61  ;;  %v8231_v6 = vadd.f32 %v2016_v16, %v2014_v26  ;;  %v1995_v43 = vadd.f32 0.5, %v1993_v36  ;;  %v10081_v16 = vld [vmem:[#allocation56_spill] sm:$0xff]  ;;  %v10084_v36 = vld [vmem:[#allocation62_spill] sm:$0xff] }
 0x24c   :  { %2341 = vmatpush.bf16.msra.mxu3 %v7185_v52  ;;  %v5756_v56 = vpop.eup %5755 }
 0x24d   :  { %2300 = vmatpush.bf16.msra.mxu0 %v7208_v59  ;;  %v2001_v19 = vmul.f32 0.5, %v5756_v56  ;;  %2328 = vmatpush.bf16.msra.mxu2 %v7223_v14  ;;  %v5758_v30 = vpop.eup %5757  ;;  %5763 = vtanh.f32 %v8231_v6 }
 0x24e   :  { %v2017_v23 = vmul.f32 %v5758_v30, %v1995_v43  ;;  %v5760_v0 = vpop.eup %5759  ;;  %v10085_v30 = vld [vmem:[#allocation63_spill] sm:$0xff] }
 0x24f   :  { %2314 = vmatpush.bf16.msra.mxu1 %v7221_v62  ;;  %v2003_v37 = vadd.f32 0.5, %v2001_v19  ;;  %v2010_v12 = vmul.f32 0.5, %v5760_v0  ;;  %v10088_v0 = vld [vmem:[#allocation66_spill] sm:$0xff] }
 0x250   :  { %2342 = vmatpush.bf16.msra.mxu3 %v7239_v20  ;;  %v5762_v50 = vpop.eup %5761 }
 0x251   :  { %2301 = vmatpush.bf16.msra.mxu0 %v7262_v21  ;;  %v2015_v34 = vmul.f32 0.0, %v2003_v37  ;;  %2329 = vmatpush.bf16.msra.mxu2 %v7277_v54  ;;  %v2011_v11 = vmul.f32 0.5, %v5762_v50  ;;  %v2012_v63 = vadd.f32 0.5, %v2010_v12  ;;  %v10086_v37 = vld [vmem:[#allocation64_spill] sm:$0xff]  ;;  %v10089_v50 = vld [vmem:[#allocation67_spill] sm:$0xff] }
 0x252   :  { %v10090_v12 = vld [vmem:[#allocation68_spill] sm:$0xff] }
 0x253   :  { %2315 = vmatpush.bf16.msra.mxu1 %v7275_v18  ;;  %v8243_v47 = vadd.f32 %v2017_v23, %v2015_v34  ;;  %v5764_v26 = vpop.eup %5763  ;;  %v2013_v51 = vadd.f32 0.5, %v2011_v11  ;;  %v10087_v34 = vld [vmem:[#allocation65_spill] sm:$0xff] }
 0x254   :  { %2343 = vmatpush.bf16.msra.mxu3 %v7293_v41  ;;  %v2022_v19 = vmul.f32 %v5764_v26, %v2012_v63  ;;  %v10091_v11 = vld [vmem:[#allocation69_spill] sm:$0xff]  ;;  %v10092_v26 = vld [vmem:[#allocation70_spill] sm:$0xff]  ;;  %v10093_v63 = vld [vmem:[#allocation71_spill] sm:$0xff] }
 0x255   :  { %10080 = vst [vmem:[#allocation186_spill] sm:$0xff] %v8243_v47  ;;  %2302 = vmatpush.bf16.msra.mxu0 %v7316_v42  ;;  %5765 = vtanh.f32 %v8243_v47  ;;  %2330 = vmatpush.bf16.msra.mxu2 %v7331_v27 }
 0x257   :  { %2316 = vmatpush.bf16.msra.mxu1 %v7329_v22 }
 0x258   :  { %2344 = vmatpush.bf16.msra.mxu3 %v7347_v1 }
 0x259   :  { %2303 = vmatpush.bf16.msra.mxu0 %v7370_v2  ;;  %2331 = vmatpush.bf16.msra.mxu2 %v10082_v40 }
 0x25b   :  { %2317 = vmatpush.bf16.msra.mxu1 %v10081_v16  ;;  %v5766_v56 = vpop.eup %5765 }
 0x25c   :  { %2345 = vmatpush.bf16.msra.mxu3 %v10083_v45  ;;  %v2023_v43 = vmul.f32 %v5766_v56, %v2013_v51  ;;  %v10094_v51 = vld [vmem:[#allocation72_spill] sm:$0xff]  ;;  %v10095_v56 = vld [vmem:[#allocation73_spill] sm:$0xff] }
 0x25d   :  { %2304 = vmatpush.bf16.msra.mxu0 %v10084_v36  ;;  %2332 = vmatpush.bf16.msra.mxu2 %v10086_v37 }
 0x25e   :  { %v8257_v23 = vpack.c.bf16 %v2023_v43, %v2022_v19  ;;  %v10096_v19 = vld [vmem:[#allocation75_spill] sm:$0xff]  ;;  %v10097_v43 = vld [vmem:[#allocation76_spill] sm:$0xff] }
 0x25f   :  { %2318 = vmatpush.bf16.msra.mxu1 %v10085_v30 }
 0x260   :  { %2346 = vmatpush.bf16.msra.mxu3 %v10087_v34  ;;  %2193 = vmatmul.bf16.vlgmr.msrb.gmra.mxu0 %v8257_v23 }
 0x261   :  { %2207 = vmatmul.bf16.vlgmr.msrb.gmra.mxu1 %v8257_v23  ;;  %2221 = vmatmul.bf16.vlgmr.msrb.gmra.mxu2 %v8257_v23 }
 0x262   :  { %2235 = vmatmul.bf16.vlgmr.msrb.gmra.mxu3 %v8257_v23  ;;  %2353 = vmatpush.bf16.msrb.mxu0 %v10088_v0 }
 0x263   :  { %2367 = vmatpush.bf16.msrb.mxu1 %v10089_v50  ;;  %2381 = vmatpush.bf16.msrb.mxu2 %v10090_v12  ;;  %v10098_v12 = vld [vmem:[#allocation81_spill] sm:$0xff] }
 0x264   :  { %2395 = vmatpush.bf16.msrb.mxu3 %v10091_v11  ;;  %v10099_v11 = vld [vmem:[#allocation82_spill] sm:$0xff] }
 0x266   :  { %2354 = vmatpush.bf16.msrb.mxu0 %v10092_v26  ;;  %v10100_v26 = vld [vmem:[#allocation84_spill] sm:$0xff] }
 0x267   :  { %2368 = vmatpush.bf16.msrb.mxu1 %v10093_v63  ;;  %2382 = vmatpush.bf16.msrb.mxu2 %v10094_v51  ;;  %v10101_v63 = vld [vmem:[#allocation85_spill] sm:$0xff]  ;;  %v10102_v51 = vld [vmem:[#allocation86_spill] sm:$0xff] }
 0x268   :  { %2396 = vmatpush.bf16.msrb.mxu3 %v10095_v56  ;;  %v10103_v56 = vld [vmem:[#allocation87_spill] sm:$0xff] }
 0x26a   :  { %2355 = vmatpush.bf16.msrb.mxu0 %v10096_v19  ;;  %v10104_v19 = vld [vmem:[#allocation88_spill] sm:$0xff] }
 0x26b   :  { %2369 = vmatpush.bf16.msrb.mxu1 %v10097_v43  ;;  %2383 = vmatpush.bf16.msrb.mxu2 %v7551_v4 }
 0x26c   :  { %2397 = vmatpush.bf16.msrb.mxu3 %v7560_v49  ;;  %v10105_v49 = vld [vmem:[#allocation93_spill] sm:$0xff] }
 0x26e   :  { %2356 = vmatpush.bf16.msrb.mxu0 %v7586_v8  ;;  %v10106_v8 = vld [vmem:[#allocation94_spill] sm:$0xff] }
 0x26f   :  { %2370 = vmatpush.bf16.msrb.mxu1 %v10098_v12  ;;  %2384 = vmatpush.bf16.msrb.mxu2 %v10099_v11  ;;  %v10107_v11 = vld [vmem:[#allocation96_spill] sm:$0xff] }
 0x270   :  { %2398 = vmatpush.bf16.msrb.mxu3 %v10100_v26  ;;  %v10108_v26 = vld [vmem:[#allocation97_spill] sm:$0xff] }
 0x272   :  { %2357 = vmatpush.bf16.msrb.mxu0 %v10101_v63  ;;  %v10109_v63 = vld [vmem:[#allocation99_spill] sm:$0xff] }
 0x273   :  { %2371 = vmatpush.bf16.msrb.mxu1 %v10102_v51  ;;  %2385 = vmatpush.bf16.msrb.mxu2 %v10103_v56  ;;  %v10110_v51 = vld [vmem:[#allocation101_spill] sm:$0xff]  ;;  %v10111_v56 = vld [vmem:[#allocation102_spill] sm:$0xff] }
 0x274   :  { %2399 = vmatpush.bf16.msrb.mxu3 %v10104_v19  ;;  %v10112_v19 = vld [vmem:[#allocation103_spill] sm:$0xff] }
 0x276   :  { %2358 = vmatpush.bf16.msrb.mxu0 %v7669_v13  ;;  %v10113_v13 = vld [vmem:[#allocation105_spill] sm:$0xff] }
 0x277   :  { %2372 = vmatpush.bf16.msrb.mxu1 %v7681_v57  ;;  %2386 = vmatpush.bf16.msrb.mxu2 %v10105_v49 }
 0x278   :  { %2400 = vmatpush.bf16.msrb.mxu3 %v10106_v8  ;;  %v1527_v8 = vld [vmem:[%s9644_s6] sm:$0xf] }
 0x279   :  { %v8299_v49 = vperm.slane %v1527_v8, 0  ;;  %v8307_v57 = vperm.slane %v1527_v8, 2  ;;  %v8311_v43 = vperm.slane %v1527_v8, 3 }
 0x27a   :  { %2359 = vmatpush.bf16.msrb.mxu0 %v7713_v55  ;;  %v8301_v55 = vperm.slane %v1527_v8, 1 }
 0x27b   :  { %2373 = vmatpush.bf16.msrb.mxu1 %v10107_v11  ;;  %2387 = vmatpush.bf16.msrb.mxu2 %v10108_v26  ;;  %10114 = vst [vmem:[#allocation187_spill] sm:$0xff] %v8299_v49  ;;  %v1718_v26 = vadd.f32 %v7975_v5, %v8299_v49  ;;  %v1746_v4 = vadd.f32 %v8046_v39, %v8307_v57 }
 0x27c   :  { %2401 = vmatpush.bf16.msrb.mxu3 %v10109_v63  ;;  %10115 = vst [vmem:[#allocation188_spill] sm:$0xff] %v8301_v55  ;;  %v1720_v5 = vadd.f32 %v8053_v24, %v8299_v49 }
 0x27d   :  { %10116 = vst [vmem:[#allocation189_spill] sm:$0xff] %v8307_v57 }
 0x27e   :  { %2360 = vmatpush.bf16.msrb.mxu0 %v10110_v51  ;;  %v1732_v51 = vadd.f32 %v7987_v17, %v8301_v55  ;;  %10117 = vst [vmem:[#allocation190_spill] sm:$0xff] %v8311_v43  ;;  %v1734_v17 = vadd.f32 %v8066_v53, %v8301_v55  ;;  %v1748_v53 = vadd.f32 %v8126_v25, %v8307_v57 }
 0x27f   :  { %2374 = vmatpush.bf16.msrb.mxu1 %v10111_v56  ;;  %2388 = vmatpush.bf16.msrb.mxu2 %v10112_v19 }
 0x280   :  { %2402 = vmatpush.bf16.msrb.mxu3 %v10113_v13 }
 0x2dd   :  { %v2194_v63 = vpop.f32.mrf.mxu0 }
 0x2de   :  { %v2208_v56 = vpop.f32.mrf.mxu1  ;;  %v2241_v11 = vadd.f32 %v2194_v63, %v1718_v26 }
 0x2df   :  { %v2242_v19 = vadd.f32 %v2208_v56, %v1732_v51 }
 0x2e0   :  { %v2249_v13 = vmul.f32 0.5, %v2241_v11 }
 0x2e1   :  { %v2257_v12 = vmul.f32 0.5, %v2242_v19 }
 0x2e2   :  { %5767 = vtanh.f32 %v2249_v13  ;;  %v1760_v13 = vadd.f32 %v8051_v60, %v8311_v43 }
 0x2e3   :  { %5769 = vtanh.f32 %v2257_v12 }
 0x2e4   :  { %v2222_v50 = vpop.f32.mrf.mxu2 }
 0x2e5   :  { %v2236_v26 = vpop.f32.mrf.mxu3  ;;  %v2243_v63 = vadd.f32 %v2222_v50, %v1746_v4  ;;  %v2196_v51 = vpop.f32.mrf.mxu0  ;;  %v10118_v4 = vld [vmem:[#allocation177_spill] sm:$0xff] }
 0x2e6   :  { %v2210_v56 = vpop.f32.mrf.mxu1  ;;  %v2245_v11 = vadd.f32 %v2196_v51, %v1720_v5  ;;  %v2244_v24 = vadd.f32 %v2236_v26, %v1760_v13  ;;  %v1762_v50 = vadd.f32 %v10118_v4, %v8311_v43 }
 0x2e7   :  { %v2246_v19 = vadd.f32 %v2210_v56, %v1734_v17  ;;  %5771 = vtanh.f32 %v2243_v63 }
 0x2e8   :  { %v5768_v8 = vpop.eup %5767  ;;  %v2250_v39 = vmul.f32 0.5, %v2245_v11  ;;  %v2267_v56 = vmul.f32 0.5, %v2244_v24 }
 0x2e9   :  { %v2258_v12 = vmul.f32 0.5, %v2246_v19  ;;  %v5770_v0 = vpop.eup %5769  ;;  %v2253_v47 = vmul.f32 0.5, %v5768_v8 }
 0x2ea   :  { %v2261_v49 = vmul.f32 0.5, %v5770_v0  ;;  %5773 = vtanh.f32 %v2250_v39 }
 0x2eb   :  { %v2255_v5 = vadd.f32 0.5, %v2253_v47  ;;  %5775 = vtanh.f32 %v2258_v12 }
 0x2ec   :  { %v2263_v17 = vadd.f32 0.5, %v2261_v49  ;;  %v2224_v51 = vpop.f32.mrf.mxu2 }
 0x2ed   :  { %v2238_v60 = vpop.f32.mrf.mxu3  ;;  %v5772_v63 = vpop.eup %5771  ;;  %v2247_v11 = vadd.f32 %v2224_v51, %v1748_v53 }
 0x2ee   :  { %v2248_v19 = vadd.f32 %v2238_v60, %v1762_v50  ;;  %v2275_v55 = vmul.f32 0.0, %v2263_v17  ;;  %v2277_v8 = vmul.f32 %v5772_v63, %v2255_v5 }
 0x2ef   :  { %5777 = vtanh.f32 %v2247_v11 }
 0x2f0   :  { %v2268_v0 = vmul.f32 0.5, %v2248_v19  ;;  %v5774_v26 = vpop.eup %5773  ;;  %v8323_v13 = vadd.f32 %v2277_v8, %v2275_v55  ;;  %5779 = vtanh.f32 %v2267_v56  ;;  %v10119_v8 = vld [vmem:[#allocation149_spill] sm:$0xff] }
 0x2f1   :  { %v5776_v25 = vpop.eup %5775  ;;  %v2254_v39 = vmul.f32 0.5, %v5774_v26  ;;  %v10123_v26 = vld [vmem:[#allocation155_spill] sm:$0xff] }
 0x2f2   :  { %v2262_v4 = vmul.f32 0.5, %v5776_v25  ;;  %5781 = vtanh.f32 %v2268_v0  ;;  %v10120_v0 = vld [vmem:[#allocation151_spill] sm:$0xff]  ;;  %v10124_v25 = vld [vmem:[#allocation156_spill] sm:$0xff] }
 0x2f3   :  { %v2256_v47 = vadd.f32 0.5, %v2254_v39  ;;  %5783 = vtanh.f32 %v8323_v13  ;;  %v10125_v39 = vld [vmem:[#allocation157_spill] sm:$0xff] }
 0x2f4   :  { %v2264_v49 = vadd.f32 0.5, %v2262_v4  ;;  %v10126_v4 = vld [vmem:[#allocation158_spill] sm:$0xff] }
 0x2f5   :  { %v5778_v12 = vpop.eup %5777 }
 0x2f6   :  { %v2276_v43 = vmul.f32 0.0, %v2264_v49  ;;  %v2278_v57 = vmul.f32 %v5778_v12, %v2256_v47  ;;  %v5780_v24 = vpop.eup %5779  ;;  %v10127_v47 = vld [vmem:[#allocation161_spill] sm:$0xff]  ;;  %v10128_v49 = vld [vmem:[#allocation162_spill] sm:$0xff]  ;;  %v10129_v12 = vld [vmem:[#allocation163_spill] sm:$0xff] }
 0x2f7   :  { %v2271_v55 = vmul.f32 0.5, %v5780_v24  ;;  %v10130_v24 = vld [vmem:[#allocation164_spill] sm:$0xff] }
 0x2f8   :  { %v5782_v53 = vpop.eup %5781  ;;  %v8326_v50 = vadd.f32 %v2278_v57, %v2276_v43  ;;  %v10121_v57 = vld [vmem:[#allocation152_spill] sm:$0xff]  ;;  %v10122_v43 = vld [vmem:[#allocation154_spill] sm:$0xff] }
 0x2f9   :  { %v2272_v5 = vmul.f32 0.5, %v5782_v53  ;;  %v5784_v17 = vpop.eup %5783  ;;  %v2273_v51 = vadd.f32 0.5, %v2271_v55  ;;  %v10131_v53 = vld [vmem:[#allocation165_spill] sm:$0xff]  ;;  %v10132_v55 = vld [vmem:[#allocation166_spill] sm:$0xff] }
 0x2fa   :  { %5785 = vtanh.f32 %v8326_v50 }
 0x2fb   :  { %v2274_v60 = vadd.f32 0.5, %v2272_v5  ;;  %v2283_v56 = vmul.f32 %v5784_v17, %v2273_v51  ;;  %v10133_v5 = vld [vmem:[#allocation167_spill] sm:$0xff]  ;;  %v10134_v17 = vld [vmem:[#allocation168_spill] sm:$0xff]  ;;  %v10135_v51 = vld [vmem:[#allocation169_spill] sm:$0xff] }
 0x300   :  { %v5786_v63 = vpop.eup %5785 }
 0x301   :  { %v2284_v11 = vmul.f32 %v5786_v63, %v2274_v60  ;;  %v10136_v60 = vld [vmem:[#allocation170_spill] sm:$0xff]  ;;  %v10137_v63 = vld [vmem:[#allocation171_spill] sm:$0xff] }
 0x303   :  { %v2296_v19 = vpack.c.bf16 %v2284_v11, %v2283_v56  ;;  %v10138_v56 = vld [vmem:[#allocation172_spill] sm:$0xff]  ;;  %v10139_v11 = vld [vmem:[#allocation173_spill] sm:$0xff] }
 0x305   :  { %2305 = vmatmul.bf16.vlgmr.msra.gmra.mxu0 %v2296_v19  ;;  %2319 = vmatmul.bf16.vlgmr.msra.gmra.mxu1 %v2296_v19 }
 0x306   :  { %2333 = vmatmul.bf16.vlgmr.msra.gmra.mxu2 %v2296_v19  ;;  %2347 = vmatmul.bf16.vlgmr.msra.gmra.mxu3 %v2296_v19  ;;  %v10140_v19 = vld [vmem:[#allocation174_spill] sm:$0xff] }
 0x307   :  { %2454 = vmatpush.bf16.msra.mxu0 %v10119_v8  ;;  %2468 = vmatpush.bf16.msra.mxu1 %v10120_v0 }
 0x308   :  { %2482 = vmatpush.bf16.msra.mxu2 %v10121_v57  ;;  %2496 = vmatpush.bf16.msra.mxu3 %v10122_v43 }
 0x30b   :  { %2455 = vmatpush.bf16.msra.mxu0 %v10123_v26  ;;  %2469 = vmatpush.bf16.msra.mxu1 %v10124_v25 }
 0x30c   :  { %2483 = vmatpush.bf16.msra.mxu2 %v10125_v39  ;;  %2497 = vmatpush.bf16.msra.mxu3 %v10126_v4 }
 0x30f   :  { %2456 = vmatpush.bf16.msra.mxu0 %v10127_v47  ;;  %2470 = vmatpush.bf16.msra.mxu1 %v10128_v49 }
 0x310   :  { %2484 = vmatpush.bf16.msra.mxu2 %v10129_v12  ;;  %2498 = vmatpush.bf16.msra.mxu3 %v10130_v24 }
 0x313   :  { %2457 = vmatpush.bf16.msra.mxu0 %v10131_v53  ;;  %2471 = vmatpush.bf16.msra.mxu1 %v10132_v55  ;;  %v10143_v55 = vld [vmem:[#allocation179_spill] sm:$0xff] }
 0x314   :  { %2485 = vmatpush.bf16.msra.mxu2 %v10133_v5  ;;  %2499 = vmatpush.bf16.msra.mxu3 %v10134_v17  ;;  %v10141_v17 = vld [vmem:[#allocation175_spill] sm:$0xff]  ;;  %v10142_v5 = vld [vmem:[#allocation176_spill] sm:$0xff] }
 0x315   :  { %2361 = vmatmul.bf16.vlgmr.msrb.gmra.mxu0 %v8257_v23  ;;  %2375 = vmatmul.bf16.vlgmr.msrb.gmra.mxu1 %v8257_v23 }
 0x316   :  { %2389 = vmatmul.bf16.vlgmr.msrb.gmra.mxu2 %v8257_v23  ;;  %2403 = vmatmul.bf16.vlgmr.msrb.gmra.mxu3 %v8257_v23  ;;  %v10144_v23 = vld [vmem:[#allocation180_spill] sm:$0xff] }
 0x317   :  { %2458 = vmatpush.bf16.msra.mxu0 %v10135_v51  ;;  %2472 = vmatpush.bf16.msra.mxu1 %v10136_v60  ;;  %v10145_v51 = vld [vmem:[#allocation181_spill] sm:$0xff] }
 0x318   :  { %2486 = vmatpush.bf16.msra.mxu2 %v10137_v63  ;;  %2500 = vmatpush.bf16.msra.mxu3 %v10138_v56 }
 0x31b   :  { %2459 = vmatpush.bf16.msra.mxu0 %v10139_v11  ;;  %2473 = vmatpush.bf16.msra.mxu1 %v10140_v19 }
 0x31c   :  { %2487 = vmatpush.bf16.msra.mxu2 %v10141_v17  ;;  %2501 = vmatpush.bf16.msra.mxu3 %v10142_v5 }
 0x31f   :  { %2460 = vmatpush.bf16.msra.mxu0 %v8146_v38  ;;  %2474 = vmatpush.bf16.msra.mxu1 %v10143_v55 }
 0x320   :  { %2488 = vmatpush.bf16.msra.mxu2 %v10144_v23  ;;  %2502 = vmatpush.bf16.msra.mxu3 %v10145_v51 }
 0x323   :  { %2461 = vmatpush.bf16.msra.mxu0 %v8180_v48  ;;  %2475 = vmatpush.bf16.msra.mxu1 %v8191_v10 }
 0x324   :  { %2489 = vmatpush.bf16.msra.mxu2 %v8203_v9  ;;  %2503 = vmatpush.bf16.msra.mxu3 %v8205_v44 }
 0x327   :  { %2566 = vmatpush.bf16.msrb.mxu0 %v7045_v15  ;;  %2580 = vmatpush.bf16.msrb.mxu1 %v7056_v31 }
 0x328   :  { %2594 = vmatpush.bf16.msrb.mxu2 %v7058_v33  ;;  %2608 = vmatpush.bf16.msrb.mxu3 %v7074_v28 }
 0x32b   :  { %2567 = vmatpush.bf16.msrb.mxu0 %v7095_v29  ;;  %2581 = vmatpush.bf16.msrb.mxu1 %v7106_v32  ;;  %v10151_v32 = vld [vmem:[#allocation37_spill] sm:$0xff] }
 0x32c   :  { %2595 = vmatpush.bf16.msrb.mxu2 %v7108_v3  ;;  %2609 = vmatpush.bf16.msrb.mxu3 %v7127_v58  ;;  %v10150_v58 = vld [vmem:[#allocation4_spill] sm:$0xff] }
 0x32f   :  { %2568 = vmatpush.bf16.msrb.mxu0 %v7154_v46  ;;  %2582 = vmatpush.bf16.msrb.mxu1 %v7167_v61 }
 0x330   :  { %2596 = vmatpush.bf16.msrb.mxu2 %v7169_v7  ;;  %2610 = vmatpush.bf16.msrb.mxu3 %v7185_v52  ;;  %v10149_v52 = vld [vmem:[#allocation111_spill] sm:$0xff] }
 0x333   :  { %2569 = vmatpush.bf16.msrb.mxu0 %v7208_v59  ;;  %2583 = vmatpush.bf16.msrb.mxu1 %v7221_v62  ;;  %v10148_v62 = vld [vmem:[#allocation113_spill] sm:$0xff] }
 0x334   :  { %2597 = vmatpush.bf16.msrb.mxu2 %v7223_v14  ;;  %2611 = vmatpush.bf16.msrb.mxu3 %v7239_v20  ;;  %v1237_v59 = vadd.f32 %v10148_v62, %v7793_v35  ;;  %v10154_v62 = vld [vmem:[#allocation39_spill] sm:$0xff]  ;;  %v10156_v35 = vld [vmem:[#allocation116_spill] sm:$0xff] }
 0x337   :  { %2570 = vmatpush.bf16.msrb.mxu0 %v7262_v21  ;;  %2584 = vmatpush.bf16.msrb.mxu1 %v7275_v18 }
 0x338   :  { %2598 = vmatpush.bf16.msrb.mxu2 %v7277_v54  ;;  %2612 = vmatpush.bf16.msrb.mxu3 %v7293_v41  ;;  %v10147_v41 = vld [vmem:[#allocation33_spill] sm:$0xff] }
 0x33b   :  { %2571 = vmatpush.bf16.msrb.mxu0 %v7316_v42  ;;  %2585 = vmatpush.bf16.msrb.mxu1 %v7329_v22  ;;  %v10146_v42 = vld [vmem:[#allocation3_spill] sm:$0xff] }
 0x33c   :  { %2599 = vmatpush.bf16.msrb.mxu2 %v7331_v27  ;;  %2613 = vmatpush.bf16.msrb.mxu3 %v7347_v1 }
 0x33f   :  { %2572 = vmatpush.bf16.msrb.mxu0 %v7370_v2  ;;  %2586 = vmatpush.bf16.msrb.mxu1 %v10081_v16 }
 0x340   :  { %2600 = vmatpush.bf16.msrb.mxu2 %v10082_v40  ;;  %2614 = vmatpush.bf16.msrb.mxu3 %v10083_v45 }
 0x343   :  { %2573 = vmatpush.bf16.msrb.mxu0 %v10084_v36  ;;  %2587 = vmatpush.bf16.msrb.mxu1 %v10085_v30 }
 0x344   :  { %2601 = vmatpush.bf16.msrb.mxu2 %v10086_v37  ;;  %2615 = vmatpush.bf16.msrb.mxu3 %v10087_v34 }
 0x382   :  { %v8397_v22 = vpop.f32.mrf.mxu0  ;;  %v8399_v27 = vpop.f32.mrf.mxu1 }
 0x389   :  { %v8401_v1 = vpop.f32.mrf.mxu2  ;;  %v8403_v2 = vpop.f32.mrf.mxu3 }
 0x38a   :  { %v8405_v16 = vpop.f32.mrf.mxu0  ;;  %v8407_v40 = vpop.f32.mrf.mxu1 }
 0x391   :  { %v8409_v45 = vpop.f32.mrf.mxu2  ;;  %v8411_v36 = vpop.f32.mrf.mxu3 }
 0x392   :  { %v2362_v30 = vpop.f32.mrf.mxu0  ;;  %v2376_v37 = vpop.f32.mrf.mxu1 }
 0x393   :  { %v2409_v34 = vadd.f32 %v2362_v30, %v10146_v42  ;;  %v2410_v54 = vadd.f32 %v2376_v37, %v10147_v41  ;;  %v10152_v42 = vld [vmem:[#allocation115_spill] sm:$0xff] }
 0x394   :  { %v1286_v30 = vadd.f32 %v10152_v42, %v1237_v59 }
 0x395   :  { %v2417_v18 = vmul.f32 0.5, %v2409_v34  ;;  %v2425_v21 = vmul.f32 0.5, %v2410_v54  ;;  %v10153_v34 = vld [vmem:[#allocation114_spill] sm:$0xff] }
 0x396   :  { %v1335_v31 = vadd.f32 %v10156_v35, %v1286_v30 }
 0x397   :  { %5787 = vtanh.f32 %v2417_v18 }
 0x398   :  { %5789 = vtanh.f32 %v2425_v21 }
 0x399   :  { %v2390_v20 = vpop.f32.mrf.mxu2  ;;  %v2404_v14 = vpop.f32.mrf.mxu3 }
 0x39a   :  { %v2411_v7 = vadd.f32 %v2390_v20, %v10149_v52  ;;  %v2364_v61 = vpop.f32.mrf.mxu0  ;;  %v2378_v46 = vpop.f32.mrf.mxu1  ;;  %v2412_v28 = vadd.f32 %v2404_v14, %v10153_v34  ;;  %v10155_v52 = vld [vmem:[#allocation112_spill] sm:$0xff] }
 0x39b   :  { %v2413_v3 = vadd.f32 %v2364_v61, %v10150_v58  ;;  %v2414_v29 = vadd.f32 %v2378_v46, %v10151_v32  ;;  %v1188_v20 = vadd.f32 %v10155_v52, %v10154_v62  ;;  %v10157_v62 = vld [vmem:[#allocation186_spill] sm:$0xff] }
 0x39c   :  { %5791 = vtanh.f32 %v2411_v7  ;;  %v2435_v59 = vmul.f32 0.5, %v2412_v28 }
 0x39d   :  { %v5788_v41 = vpop.eup %5787  ;;  %v2418_v54 = vmul.f32 0.5, %v2413_v3  ;;  %v2426_v18 = vmul.f32 0.5, %v2414_v29 }
 0x39e   :  { %v5790_v21 = vpop.eup %5789  ;;  %v2421_v37 = vmul.f32 0.5, %v5788_v41 }
 0x39f   :  { %v2429_v33 = vmul.f32 0.5, %v5790_v21  ;;  %5793 = vtanh.f32 %v2418_v54 }
 0x3a0   :  { %v2423_v58 = vadd.f32 0.5, %v2421_v37  ;;  %5795 = vtanh.f32 %v2426_v18 }
 0x3a1   :  { %v2431_v32 = vadd.f32 0.5, %v2429_v33  ;;  %v2392_v46 = vpop.f32.mrf.mxu2  ;;  %v2406_v61 = vpop.f32.mrf.mxu3 }
 0x3a2   :  { %v5792_v7 = vpop.eup %5791  ;;  %v2415_v3 = vadd.f32 %v2392_v46, %v1188_v20  ;;  %v2416_v29 = vadd.f32 %v2406_v61, %v1335_v31 }
 0x3a3   :  { %v2443_v42 = vmul.f32 %v2431_v32, %v8231_v6  ;;  %v2445_v41 = vmul.f32 %v5792_v7, %v2423_v58 }
 0x3a4   :  { %5797 = vtanh.f32 %v2415_v3  ;;  %v2436_v14 = vmul.f32 0.5, %v2416_v29 }
 0x3a5   :  { %v5794_v54 = vpop.eup %5793  ;;  %v8426_v21 = vadd.f32 %v2445_v41, %v2443_v42  ;;  %5799 = vtanh.f32 %v2435_v59  ;;  %v10158_v41 = vld [vmem:[#allocation66_spill] sm:$0xff] }
 0x3a6   :  { %v5796_v34 = vpop.eup %5795  ;;  %v2422_v35 = vmul.f32 0.5, %v5794_v54  ;;  %5801 = vtanh.f32 %v2436_v14  ;;  %v10159_v14 = vld [vmem:[#allocation67_spill] sm:$0xff]  ;;  %v10160_v54 = vld [vmem:[#allocation68_spill] sm:$0xff] }
 0x3a7   :  { %v2430_v30 = vmul.f32 0.5, %v5796_v34  ;;  %5803 = vtanh.f32 %v8426_v21  ;;  %v10161_v34 = vld [vmem:[#allocation69_spill] sm:$0xff] }
 0x3a8   :  { %v2424_v33 = vadd.f32 0.5, %v2422_v35  ;;  %v10162_v35 = vld [vmem:[#allocation70_spill] sm:$0xff] }
 0x3a9   :  { %v2432_v18 = vadd.f32 0.5, %v2430_v30  ;;  %v10163_v30 = vld [vmem:[#allocation71_spill] sm:$0xff] }
 0x3aa   :  { %v5798_v37 = vpop.eup %5797 }
 0x3ab   :  { %v2444_v28 = vmul.f32 %v2432_v18, %v10157_v62  ;;  %v2446_v52 = vmul.f32 %v5798_v37, %v2424_v33  ;;  %v5800_v31 = vpop.eup %5799  ;;  %v10164_v33 = vld [vmem:[#allocation72_spill] sm:$0xff]  ;;  %v10165_v18 = vld [vmem:[#allocation73_spill] sm:$0xff]  ;;  %v10166_v37 = vld [vmem:[#allocation75_spill] sm:$0xff] }
 0x3ac   :  { %v5802_v20 = vpop.eup %5801  ;;  %v2439_v58 = vmul.f32 0.5, %v5800_v31  ;;  %v10167_v62 = vld [vmem:[#allocation76_spill] sm:$0xff]  ;;  %v10170_v31 = vld [vmem:[#allocation79_spill] sm:$0xff] }
 0x3ad   :  { %v8430_v6 = vadd.f32 %v2446_v52, %v2444_v28  ;;  %v2440_v32 = vmul.f32 0.5, %v5802_v20  ;;  %v5804_v46 = vpop.eup %5803  ;;  %v10168_v28 = vld [vmem:[#allocation77_spill] sm:$0xff]  ;;  %v10169_v52 = vld [vmem:[#allocation78_spill] sm:$0xff] }
 0x3ae   :  { %v2441_v61 = vadd.f32 0.5, %v2439_v58  ;;  %v10171_v20 = vld [vmem:[#allocation81_spill] sm:$0xff]  ;;  %v10172_v58 = vld [vmem:[#allocation82_spill] sm:$0xff] }
 0x3af   :  { %5805 = vtanh.f32 %v8430_v6  ;;  %v2442_v7 = vadd.f32 0.5, %v2440_v32  ;;  %v10173_v32 = vld [vmem:[#allocation84_spill] sm:$0xff] }
 0x3b0   :  { %v2451_v3 = vmul.f32 %v5804_v46, %v2441_v61  ;;  %v10174_v46 = vld [vmem:[#allocation85_spill] sm:$0xff]  ;;  %v10175_v61 = vld [vmem:[#allocation86_spill] sm:$0xff] }
 0x3b5   :  { %v5806_v59 = vpop.eup %5805 }
 0x3b6   :  { %v2452_v29 = vmul.f32 %v5806_v59, %v2442_v7  ;;  %v10176_v7 = vld [vmem:[#allocation87_spill] sm:$0xff]  ;;  %v10177_v59 = vld [vmem:[#allocation88_spill] sm:$0xff] }
 0x3b8   :  { %v8433_v42 = vpack.c.bf16 %v2452_v29, %v2451_v3  ;;  %v10178_v3 = vld [vmem:[#allocation91_spill] sm:$0xff]  ;;  %v10179_v29 = vld [vmem:[#allocation92_spill] sm:$0xff] }
 0x3ba   :  { %2462 = vmatmul.bf16.vlgmr.msra.gmra.mxu0 %v8433_v42  ;;  %2476 = vmatmul.bf16.vlgmr.msra.gmra.mxu1 %v8433_v42 }
 0x3bb   :  { %2490 = vmatmul.bf16.vlgmr.msra.gmra.mxu2 %v8433_v42  ;;  %2504 = vmatmul.bf16.vlgmr.msra.gmra.mxu3 %v8433_v42 }
 0x3bc   :  { %2622 = vmatpush.bf16.msra.mxu0 %v10158_v41  ;;  %2636 = vmatpush.bf16.msra.mxu1 %v10159_v14 }
 0x3bd   :  { %2650 = vmatpush.bf16.msra.mxu2 %v10160_v54  ;;  %2664 = vmatpush.bf16.msra.mxu3 %v10161_v34 }
 0x3c0   :  { %2623 = vmatpush.bf16.msra.mxu0 %v10162_v35  ;;  %2637 = vmatpush.bf16.msra.mxu1 %v10163_v30 }
 0x3c1   :  { %2651 = vmatpush.bf16.msra.mxu2 %v10164_v33  ;;  %2665 = vmatpush.bf16.msra.mxu3 %v10165_v18 }
 0x3c4   :  { %2624 = vmatpush.bf16.msra.mxu0 %v10166_v37  ;;  %2638 = vmatpush.bf16.msra.mxu1 %v10167_v62 }
 0x3c5   :  { %2652 = vmatpush.bf16.msra.mxu2 %v10168_v28  ;;  %2666 = vmatpush.bf16.msra.mxu3 %v10169_v52  ;;  %v10180_v52 = vld [vmem:[#allocation93_spill] sm:$0xff] }
 0x3c8   :  { %2625 = vmatpush.bf16.msra.mxu0 %v10170_v31  ;;  %2639 = vmatpush.bf16.msra.mxu1 %v10171_v20  ;;  %v10181_v31 = vld [vmem:[#allocation94_spill] sm:$0xff]  ;;  %v10182_v20 = vld [vmem:[#allocation95_spill] sm:$0xff] }
 0x3c9   :  { %2653 = vmatpush.bf16.msra.mxu2 %v10172_v58  ;;  %2667 = vmatpush.bf16.msra.mxu3 %v10173_v32  ;;  %v10183_v58 = vld [vmem:[#allocation96_spill] sm:$0xff]  ;;  %v10184_v32 = vld [vmem:[#allocation97_spill] sm:$0xff] }
 0x3cc   :  { %2626 = vmatpush.bf16.msra.mxu0 %v10174_v46  ;;  %2640 = vmatpush.bf16.msra.mxu1 %v10175_v61  ;;  %v10185_v46 = vld [vmem:[#allocation99_spill] sm:$0xff]  ;;  %v10186_v61 = vld [vmem:[#allocation101_spill] sm:$0xff] }
 0x3cd   :  { %2654 = vmatpush.bf16.msra.mxu2 %v10176_v7  ;;  %2668 = vmatpush.bf16.msra.mxu3 %v10177_v59  ;;  %v10187_v7 = vld [vmem:[#allocation102_spill] sm:$0xff]  ;;  %v10188_v59 = vld [vmem:[#allocation103_spill] sm:$0xff] }
 0x3d0   :  { %2627 = vmatpush.bf16.msra.mxu0 %v10178_v3  ;;  %2641 = vmatpush.bf16.msra.mxu1 %v10179_v29  ;;  %v10189_v3 = vld [vmem:[#allocation105_spill] sm:$0xff]  ;;  %v10190_v29 = vld [vmem:[#allocation187_spill] sm:$0xff] }
 0x3d1   :  { %2655 = vmatpush.bf16.msra.mxu2 %v10180_v52  ;;  %2669 = vmatpush.bf16.msra.mxu3 %v10181_v31  ;;  %v2307_v52 = vadd.f32 %v8397_v22, %v10190_v29  ;;  %v10191_v31 = vld [vmem:[#allocation188_spill] sm:$0xff] }
 0x3d2   :  { %v2323_v22 = vadd.f32 %v8407_v40, %v10191_v31 }
 0x3d4   :  { %2628 = vmatpush.bf16.msra.mxu0 %v10182_v20  ;;  %2642 = vmatpush.bf16.msra.mxu1 %v10183_v58  ;;  %v2321_v20 = vadd.f32 %v8399_v27, %v10191_v31 }
 0x3d5   :  { %2656 = vmatpush.bf16.msra.mxu2 %v10184_v32  ;;  %2670 = vmatpush.bf16.msra.mxu3 %v10185_v46 }
 0x3d8   :  { %2629 = vmatpush.bf16.msra.mxu0 %v10186_v61  ;;  %2643 = vmatpush.bf16.msra.mxu1 %v10187_v7  ;;  %v10192_v61 = vld [vmem:[#allocation189_spill] sm:$0xff] }
 0x3d9   :  { %2657 = vmatpush.bf16.msra.mxu2 %v10188_v59  ;;  %2671 = vmatpush.bf16.msra.mxu3 %v10189_v3  ;;  %v2335_v7 = vadd.f32 %v8401_v1, %v10192_v61  ;;  %v2309_v3 = vadd.f32 %v8405_v16, %v10190_v29  ;;  %v2337_v40 = vadd.f32 %v8409_v45, %v10192_v61 }
 0x437   :  { %v2463_v28 = vpop.f32.mrf.mxu0  ;;  %v2477_v58 = vpop.f32.mrf.mxu1 }
 0x438   :  { %v2510_v62 = vadd.f32 %v2463_v28, %v2307_v52  ;;  %v2511_v32 = vadd.f32 %v2477_v58, %v2321_v20 }
 0x43a   :  { %v2518_v37 = vmul.f32 0.5, %v2510_v62  ;;  %v2526_v46 = vmul.f32 0.5, %v2511_v32  ;;  %v10193_v62 = vld [vmem:[#allocation190_spill] sm:$0xff] }
 0x43c   :  { %5807 = vtanh.f32 %v2518_v37  ;;  %v2349_v37 = vadd.f32 %v8403_v2, %v10193_v62 }
 0x43d   :  { %5809 = vtanh.f32 %v2526_v46 }
 0x43e   :  { %v2491_v59 = vpop.f32.mrf.mxu2  ;;  %v2505_v18 = vpop.f32.mrf.mxu3 }
 0x43f   :  { %v2512_v27 = vadd.f32 %v2491_v59, %v2335_v7  ;;  %v2465_v33 = vpop.f32.mrf.mxu0  ;;  %v2479_v30 = vpop.f32.mrf.mxu1  ;;  %v2513_v16 = vadd.f32 %v2505_v18, %v2349_v37  ;;  %v2351_v7 = vadd.f32 %v8411_v36, %v10193_v62 }
 0x440   :  { %v2514_v28 = vadd.f32 %v2465_v33, %v2309_v3  ;;  %v2515_v52 = vadd.f32 %v2479_v30, %v2323_v22 }
 0x441   :  { %5811 = vtanh.f32 %v2512_v27  ;;  %v2536_v22 = vmul.f32 0.5, %v2513_v16 }
 0x442   :  { %v5808_v20 = vpop.eup %5807  ;;  %v2519_v1 = vmul.f32 0.5, %v2514_v28  ;;  %v2527_v58 = vmul.f32 0.5, %v2515_v52 }
 0x443   :  { %v5810_v32 = vpop.eup %5809  ;;  %v2522_v46 = vmul.f32 0.5, %v5808_v20 }
 0x444   :  { %v2530_v29 = vmul.f32 0.5, %v5810_v32  ;;  %5813 = vtanh.f32 %v2519_v1 }
 0x445   :  { %v2524_v33 = vadd.f32 0.5, %v2522_v46  ;;  %5815 = vtanh.f32 %v2527_v58 }
 0x446   :  { %v2532_v30 = vadd.f32 0.5, %v2530_v29  ;;  %v2493_v59 = vpop.f32.mrf.mxu2  ;;  %v2507_v2 = vpop.f32.mrf.mxu3 }
 0x447   :  { %v5812_v3 = vpop.eup %5811  ;;  %v2516_v27 = vadd.f32 %v2493_v59, %v2337_v40  ;;  %v2517_v28 = vadd.f32 %v2507_v2, %v2351_v7 }
 0x448   :  { %v2544_v52 = vmul.f32 %v2532_v30, %v8323_v13  ;;  %v2546_v18 = vmul.f32 %v5812_v3, %v2524_v33 }
 0x449   :  { %5817 = vtanh.f32 %v2516_v27  ;;  %v2537_v37 = vmul.f32 0.5, %v2517_v28 }
 0x44a   :  { %v5814_v20 = vpop.eup %5813  ;;  %v8488_v1 = vadd.f32 %v2546_v18, %v2544_v52  ;;  %5819 = vtanh.f32 %v2536_v22 }
 0x44b   :  { %v5816_v45 = vpop.eup %5815  ;;  %v2523_v36 = vmul.f32 0.5, %v5814_v20  ;;  %5821 = vtanh.f32 %v2537_v37  ;;  %v10195_v37 = vld [vmem:[#allocation167_spill] sm:$0xff]  ;;  %v10196_v20 = vld [vmem:[#allocation168_spill] sm:$0xff] }
 0x44c   :  { %v2531_v32 = vmul.f32 0.5, %v5816_v45  ;;  %5823 = vtanh.f32 %v8488_v1  ;;  %v10197_v45 = vld [vmem:[#allocation169_spill] sm:$0xff] }
 0x44d   :  { %v2525_v29 = vadd.f32 0.5, %v2523_v36  ;;  %v10199_v36 = vld [vmem:[#allocation15_spill] sm:$0xff] }
 0x44e   :  { %v2533_v58 = vadd.f32 0.5, %v2531_v32  ;;  %v10200_v32 = vld [vmem:[#allocation17_spill] sm:$0xff] }
 0x44f   :  { %v5818_v46 = vpop.eup %5817 }
 0x450   :  { %v2545_v16 = vmul.f32 %v2533_v58, %v8326_v50  ;;  %v2547_v40 = vmul.f32 %v5818_v46, %v2525_v29  ;;  %v5820_v7 = vpop.eup %5819  ;;  %v10194_v50 = vld [vmem:[#allocation166_spill] sm:$0xff]  ;;  %v10201_v29 = vld [vmem:[#allocation20_spill] sm:$0xff]  ;;  %v10202_v58 = vld [vmem:[#allocation21_spill] sm:$0xff] }
 0x451   :  { %v5822_v59 = vpop.eup %5821  ;;  %v2540_v33 = vmul.f32 0.5, %v5820_v7  ;;  %v10203_v46 = vld [vmem:[#allocation22_spill] sm:$0xff] }
 0x452   :  { %v8492_v13 = vadd.f32 %v2547_v40, %v2545_v16  ;;  %v2541_v30 = vmul.f32 0.5, %v5822_v59  ;;  %v5824_v2 = vpop.eup %5823  ;;  %v10204_v16 = vld [vmem:[#allocation25_spill] sm:$0xff]  ;;  %v10206_v7 = vld [vmem:[#allocation30_spill] sm:$0xff]  ;;  %v10207_v59 = vld [vmem:[#allocation31_spill] sm:$0xff] }
 0x453   :  { %v2542_v3 = vadd.f32 0.5, %v2540_v33  ;;  %v10205_v40 = vld [vmem:[#allocation29_spill] sm:$0xff]  ;;  %v10208_v33 = vld [vmem:[#allocation32_spill] sm:$0xff] }
 0x454   :  { %5825 = vtanh.f32 %v8492_v13  ;;  %v2543_v22 = vadd.f32 0.5, %v2541_v30  ;;  %v10209_v30 = vld [vmem:[#allocation34_spill] sm:$0xff] }
 0x455   :  { %v2552_v28 = vmul.f32 %v5824_v2, %v2542_v3  ;;  %v10210_v2 = vld [vmem:[#allocation35_spill] sm:$0xff]  ;;  %v10211_v3 = vld [vmem:[#allocation36_spill] sm:$0xff] }
 0x45a   :  { %v5826_v27 = vpop.eup %5825 }
 0x45b   :  { %v2553_v52 = vmul.f32 %v5826_v27, %v2543_v22  ;;  %v10212_v22 = vld [vmem:[#allocation38_spill] sm:$0xff]  ;;  %v10213_v27 = vld [vmem:[#allocation41_spill] sm:$0xff] }
 0x45d   :  { %v2565_v18 = vpack.c.bf16 %v2553_v52, %v2552_v28  ;;  %v10214_v28 = vld [vmem:[#allocation42_spill] sm:$0xff]  ;;  %v10215_v52 = vld [vmem:[#allocation43_spill] sm:$0xff] }
 0x45f   :  { %2574 = vmatmul.bf16.vlgmr.msrb.gmra.mxu0 %v2565_v18  ;;  %2588 = vmatmul.bf16.vlgmr.msrb.gmra.mxu1 %v2565_v18 }
 0x460   :  { %2602 = vmatmul.bf16.vlgmr.msrb.gmra.mxu2 %v2565_v18  ;;  %2616 = vmatmul.bf16.vlgmr.msrb.gmra.mxu3 %v2565_v18  ;;  %v10216_v18 = vld [vmem:[#allocation45_spill] sm:$0xff] }
 0x461   :  { %2723 = vmatpush.bf16.msrb.mxu0 %v10119_v8  ;;  %2737 = vmatpush.bf16.msrb.mxu1 %v10120_v0 }
 0x462   :  { %2751 = vmatpush.bf16.msrb.mxu2 %v10121_v57  ;;  %2765 = vmatpush.bf16.msrb.mxu3 %v10122_v43 }
 0x465   :  { %2724 = vmatpush.bf16.msrb.mxu0 %v10123_v26  ;;  %2738 = vmatpush.bf16.msrb.mxu1 %v10124_v25 }
 0x466   :  { %2752 = vmatpush.bf16.msrb.mxu2 %v10125_v39  ;;  %2766 = vmatpush.bf16.msrb.mxu3 %v10126_v4 }
 0x469   :  { %2725 = vmatpush.bf16.msrb.mxu0 %v10127_v47  ;;  %2739 = vmatpush.bf16.msrb.mxu1 %v10128_v49 }
 0x46a   :  { %2753 = vmatpush.bf16.msrb.mxu2 %v10129_v12  ;;  %2767 = vmatpush.bf16.msrb.mxu3 %v10130_v24 }
 0x46d   :  { %2726 = vmatpush.bf16.msrb.mxu0 %v10131_v53  ;;  %2740 = vmatpush.bf16.msrb.mxu1 %v10194_v50 }
 0x46e   :  { %2754 = vmatpush.bf16.msrb.mxu2 %v10195_v37  ;;  %2768 = vmatpush.bf16.msrb.mxu3 %v10196_v20 }
 0x46f   :  { %2630 = vmatmul.bf16.vlgmr.msra.gmra.mxu0 %v8433_v42  ;;  %2644 = vmatmul.bf16.vlgmr.msra.gmra.mxu1 %v8433_v42 }
 0x470   :  { %2658 = vmatmul.bf16.vlgmr.msra.gmra.mxu2 %v8433_v42  ;;  %2672 = vmatmul.bf16.vlgmr.msra.gmra.mxu3 %v8433_v42  ;;  %v10198_v42 = vld [vmem:[#allocation14_spill] sm:$0xff] }
 0x471   :  { %2727 = vmatpush.bf16.msrb.mxu0 %v10197_v45  ;;  %2741 = vmatpush.bf16.msrb.mxu1 %v10136_v60 }
 0x472   :  { %2755 = vmatpush.bf16.msrb.mxu2 %v10137_v63  ;;  %2769 = vmatpush.bf16.msrb.mxu3 %v10138_v56 }
 0x475   :  { %2728 = vmatpush.bf16.msrb.mxu0 %v10139_v11  ;;  %2742 = vmatpush.bf16.msrb.mxu1 %v10140_v19 }
 0x476   :  { %2756 = vmatpush.bf16.msrb.mxu2 %v10141_v17  ;;  %2770 = vmatpush.bf16.msrb.mxu3 %v10142_v5 }
 0x479   :  { %2729 = vmatpush.bf16.msrb.mxu0 %v8146_v38  ;;  %2743 = vmatpush.bf16.msrb.mxu1 %v10143_v55  ;;  %v10235_v38 = vld [vmem:[#allocation44_spill] sm:$0xff] }
 0x47a   :  { %2757 = vmatpush.bf16.msrb.mxu2 %v10144_v23  ;;  %2771 = vmatpush.bf16.msrb.mxu3 %v10145_v51  ;;  %v10234_v23 = vld [vmem:[#allocation6_spill] sm:$0xff] }
 0x47d   :  { %2730 = vmatpush.bf16.msrb.mxu0 %v8180_v48  ;;  %2744 = vmatpush.bf16.msrb.mxu1 %v8191_v10 }
 0x47e   :  { %2758 = vmatpush.bf16.msrb.mxu2 %v8203_v9  ;;  %2772 = vmatpush.bf16.msrb.mxu3 %v8205_v44  ;;  %v10233_v9 = vld [vmem:[#allocation117_spill] sm:$0xff] }
 0x481   :  { %2835 = vmatpush.bf16.msra.mxu0 %v7045_v15  ;;  %2849 = vmatpush.bf16.msra.mxu1 %v10198_v42  ;;  %v10231_v42 = vld [vmem:[#allocation110_spill] sm:$0xff]  ;;  %v10232_v15 = vld [vmem:[#allocation119_spill] sm:$0xff] }
 0x482   :  { %2863 = vmatpush.bf16.msra.mxu2 %v10199_v36  ;;  %2877 = vmatpush.bf16.msra.mxu3 %v10200_v32  ;;  %v1242_v44 = vadd.f32 %v10232_v15, %v10231_v42  ;;  %v10238_v15 = vld [vmem:[#allocation46_spill] sm:$0xff] }
 0x483   :  { %v10240_v42 = vld [vmem:[#allocation122_spill] sm:$0xff] }
 0x485   :  { %2836 = vmatpush.bf16.msra.mxu0 %v10201_v29  ;;  %2850 = vmatpush.bf16.msra.mxu1 %v10202_v58 }
 0x486   :  { %2864 = vmatpush.bf16.msra.mxu2 %v10203_v46  ;;  %2878 = vmatpush.bf16.msra.mxu3 %v10204_v16  ;;  %v10230_v16 = vld [vmem:[#allocation40_spill] sm:$0xff] }
 0x489   :  { %2837 = vmatpush.bf16.msra.mxu0 %v10205_v40  ;;  %2851 = vmatpush.bf16.msra.mxu1 %v10206_v7  ;;  %v10217_v7 = vld [vmem:[#allocation48_spill] sm:$0xff]  ;;  %v10229_v40 = vld [vmem:[#allocation5_spill] sm:$0xff] }
 0x48a   :  { %2865 = vmatpush.bf16.msra.mxu2 %v10207_v59  ;;  %2879 = vmatpush.bf16.msra.mxu3 %v10208_v33  ;;  %v10218_v59 = vld [vmem:[#allocation49_spill] sm:$0xff]  ;;  %v10219_v33 = vld [vmem:[#allocation50_spill] sm:$0xff] }
 0x48d   :  { %2838 = vmatpush.bf16.msra.mxu0 %v10209_v30  ;;  %2852 = vmatpush.bf16.msra.mxu1 %v10210_v2  ;;  %v10220_v30 = vld [vmem:[#allocation52_spill] sm:$0xff]  ;;  %v10221_v2 = vld [vmem:[#allocation55_spill] sm:$0xff] }
 0x48e   :  { %2866 = vmatpush.bf16.msra.mxu2 %v10211_v3  ;;  %2880 = vmatpush.bf16.msra.mxu3 %v10212_v22  ;;  %v10222_v3 = vld [vmem:[#allocation56_spill] sm:$0xff]  ;;  %v10223_v22 = vld [vmem:[#allocation57_spill] sm:$0xff] }
 0x491   :  { %2839 = vmatpush.bf16.msra.mxu0 %v10213_v27  ;;  %2853 = vmatpush.bf16.msra.mxu1 %v10214_v28  ;;  %v10224_v27 = vld [vmem:[#allocation59_spill] sm:$0xff]  ;;  %v10225_v28 = vld [vmem:[#allocation62_spill] sm:$0xff] }
 0x492   :  { %2867 = vmatpush.bf16.msra.mxu2 %v10215_v52  ;;  %2881 = vmatpush.bf16.msra.mxu3 %v10216_v18  ;;  %v10226_v52 = vld [vmem:[#allocation63_spill] sm:$0xff]  ;;  %v10227_v18 = vld [vmem:[#allocation64_spill] sm:$0xff] }
 0x495   :  { %2840 = vmatpush.bf16.msra.mxu0 %v10217_v7  ;;  %2854 = vmatpush.bf16.msra.mxu1 %v10218_v59  ;;  %v10228_v7 = vld [vmem:[#allocation65_spill] sm:$0xff] }
 0x496   :  { %2868 = vmatpush.bf16.msra.mxu2 %v10219_v33  ;;  %2882 = vmatpush.bf16.msra.mxu3 %v10220_v30 }
 0x499   :  { %2841 = vmatpush.bf16.msra.mxu0 %v10221_v2  ;;  %2855 = vmatpush.bf16.msra.mxu1 %v10222_v3 }
 0x49a   :  { %2869 = vmatpush.bf16.msra.mxu2 %v10223_v22  ;;  %2883 = vmatpush.bf16.msra.mxu3 %v10224_v27 }
 0x49d   :  { %2842 = vmatpush.bf16.msra.mxu0 %v10225_v28  ;;  %2856 = vmatpush.bf16.msra.mxu1 %v10226_v52 }
 0x49e   :  { %2870 = vmatpush.bf16.msra.mxu2 %v10227_v18  ;;  %2884 = vmatpush.bf16.msra.mxu3 %v10228_v7 }
 0x4dc   :  { %v8563_v59 = vpop.f32.mrf.mxu0  ;;  %v8565_v33 = vpop.f32.mrf.mxu1 }
 0x4e3   :  { %v8567_v30 = vpop.f32.mrf.mxu2  ;;  %v8569_v2 = vpop.f32.mrf.mxu3 }
 0x4e4   :  { %v8571_v3 = vpop.f32.mrf.mxu0  ;;  %v8573_v22 = vpop.f32.mrf.mxu1 }
 0x4eb   :  { %v8575_v27 = vpop.f32.mrf.mxu2  ;;  %v8577_v28 = vpop.f32.mrf.mxu3 }
 0x4ec   :  { %v2631_v52 = vpop.f32.mrf.mxu0  ;;  %v2645_v18 = vpop.f32.mrf.mxu1 }
 0x4ed   :  { %v2678_v7 = vadd.f32 %v2631_v52, %v10229_v40  ;;  %v2679_v46 = vadd.f32 %v2645_v18, %v10230_v16  ;;  %v10236_v40 = vld [vmem:[#allocation121_spill] sm:$0xff]  ;;  %v10237_v18 = vld [vmem:[#allocation120_spill] sm:$0xff] }
 0x4ee   :  { %v1291_v52 = vadd.f32 %v10236_v40, %v1242_v44 }
 0x4ef   :  { %v2686_v58 = vmul.f32 0.5, %v2678_v7  ;;  %v2694_v29 = vmul.f32 0.5, %v2679_v46 }
 0x4f0   :  { %v1340_v11 = vadd.f32 %v10240_v42, %v1291_v52 }
 0x4f1   :  { %5827 = vtanh.f32 %v2686_v58 }
 0x4f2   :  { %5829 = vtanh.f32 %v2694_v29 }
 0x4f3   :  { %v2659_v32 = vpop.f32.mrf.mxu2  ;;  %v2673_v36 = vpop.f32.mrf.mxu3 }
 0x4f4   :  { %v2680_v10 = vadd.f32 %v2659_v32, %v10233_v9  ;;  %v2633_v48 = vpop.f32.mrf.mxu0  ;;  %v2647_v51 = vpop.f32.mrf.mxu1  ;;  %v2681_v17 = vadd.f32 %v2673_v36, %v10237_v18  ;;  %v10239_v9 = vld [vmem:[#allocation118_spill] sm:$0xff] }
 0x4f5   :  { %v2682_v55 = vadd.f32 %v2633_v48, %v10234_v23  ;;  %v2683_v5 = vadd.f32 %v2647_v51, %v10235_v38  ;;  %v1193_v32 = vadd.f32 %v10239_v9, %v10238_v15 }
 0x4f6   :  { %5831 = vtanh.f32 %v2680_v10  ;;  %v2704_v23 = vmul.f32 0.5, %v2681_v17 }
 0x4f7   :  { %v5828_v16 = vpop.eup %5827  ;;  %v2687_v46 = vmul.f32 0.5, %v2682_v55  ;;  %v2695_v58 = vmul.f32 0.5, %v2683_v5 }
 0x4f8   :  { %v5830_v29 = vpop.eup %5829  ;;  %v2690_v7 = vmul.f32 0.5, %v5828_v16 }
 0x4f9   :  { %v2698_v19 = vmul.f32 0.5, %v5830_v29  ;;  %5833 = vtanh.f32 %v2687_v46 }
 0x4fa   :  { %v2692_v48 = vadd.f32 0.5, %v2690_v7  ;;  %5835 = vtanh.f32 %v2695_v58 }
 0x4fb   :  { %v2700_v38 = vadd.f32 0.5, %v2698_v19  ;;  %v2661_v51 = vpop.f32.mrf.mxu2  ;;  %v2675_v44 = vpop.f32.mrf.mxu3 }
 0x4fc   :  { %v5832_v10 = vpop.eup %5831  ;;  %v2684_v55 = vadd.f32 %v2661_v51, %v1193_v32  ;;  %v2685_v5 = vadd.f32 %v2675_v44, %v1340_v11 }
 0x4fd   :  { %v2712_v40 = vmul.f32 %v2700_v38, %v8426_v21  ;;  %v2714_v16 = vmul.f32 %v5832_v10, %v2692_v48 }
 0x4fe   :  { %5837 = vtanh.f32 %v2684_v55  ;;  %v2705_v36 = vmul.f32 0.5, %v2685_v5 }
 0x4ff   :  { %v5834_v46 = vpop.eup %5833  ;;  %v8592_v29 = vadd.f32 %v2714_v16, %v2712_v40  ;;  %5839 = vtanh.f32 %v2704_v23  ;;  %v10242_v40 = vld [vmem:[#allocation72_spill] sm:$0xff]  ;;  %v10243_v16 = vld [vmem:[#allocation73_spill] sm:$0xff] }
 0x500   :  { %v5836_v18 = vpop.eup %5835  ;;  %v2691_v42 = vmul.f32 0.5, %v5834_v46  ;;  %5841 = vtanh.f32 %v2705_v36  ;;  %v10244_v36 = vld [vmem:[#allocation75_spill] sm:$0xff]  ;;  %v10245_v46 = vld [vmem:[#allocation76_spill] sm:$0xff] }
 0x501   :  { %v2699_v52 = vmul.f32 0.5, %v5836_v18  ;;  %5843 = vtanh.f32 %v8592_v29  ;;  %v10246_v18 = vld [vmem:[#allocation77_spill] sm:$0xff] }
 0x502   :  { %v2693_v19 = vadd.f32 0.5, %v2691_v42  ;;  %v10247_v42 = vld [vmem:[#allocation78_spill] sm:$0xff] }
 0x503   :  { %v2701_v58 = vadd.f32 0.5, %v2699_v52  ;;  %v10248_v52 = vld [vmem:[#allocation79_spill] sm:$0xff] }
 0x504   :  { %v5838_v7 = vpop.eup %5837 }
 0x505   :  { %v2713_v17 = vmul.f32 %v2701_v58, %v8430_v6  ;;  %v2715_v15 = vmul.f32 %v5838_v7, %v2693_v19  ;;  %v5840_v11 = vpop.eup %5839  ;;  %v10241_v6 = vld [vmem:[#allocation71_spill] sm:$0xff]  ;;  %v10249_v19 = vld [vmem:[#allocation81_spill] sm:$0xff]  ;;  %v10250_v58 = vld [vmem:[#allocation82_spill] sm:$0xff] }
 0x506   :  { %v5842_v9 = vpop.eup %5841  ;;  %v2708_v32 = vmul.f32 0.5, %v5840_v11  ;;  %v10251_v7 = vld [vmem:[#allocation84_spill] sm:$0xff]  ;;  %v10254_v11 = vld [vmem:[#allocation87_spill] sm:$0xff] }
 0x507   :  { %v8596_v21 = vadd.f32 %v2715_v15, %v2713_v17  ;;  %v2709_v48 = vmul.f32 0.5, %v5842_v9  ;;  %v5844_v38 = vpop.eup %5843  ;;  %v10252_v17 = vld [vmem:[#allocation85_spill] sm:$0xff]  ;;  %v10253_v15 = vld [vmem:[#allocation86_spill] sm:$0xff]  ;;  %v10255_v9 = vld [vmem:[#allocation88_spill] sm:$0xff] }
 0x508   :  { %v2710_v51 = vadd.f32 0.5, %v2708_v32  ;;  %v10256_v32 = vld [vmem:[#allocation91_spill] sm:$0xff] }
 0x509   :  { %5845 = vtanh.f32 %v8596_v21  ;;  %v2711_v44 = vadd.f32 0.5, %v2709_v48  ;;  %v10257_v48 = vld [vmem:[#allocation92_spill] sm:$0xff] }
 0x50a   :  { %v2720_v23 = vmul.f32 %v5844_v38, %v2710_v51  ;;  %v10258_v38 = vld [vmem:[#allocation93_spill] sm:$0xff]  ;;  %v10259_v51 = vld [vmem:[#allocation94_spill] sm:$0xff] }
 0x50f   :  { %v5846_v10 = vpop.eup %5845 }
 0x510   :  { %v2721_v55 = vmul.f32 %v5846_v10, %v2711_v44  ;;  %v10260_v44 = vld [vmem:[#allocation95_spill] sm:$0xff]  ;;  %v10261_v10 = vld [vmem:[#allocation96_spill] sm:$0xff] }
 0x512   :  { %v8599_v5 = vpack.c.bf16 %v2721_v55, %v2720_v23  ;;  %v10262_v23 = vld [vmem:[#allocation97_spill] sm:$0xff]  ;;  %v10263_v55 = vld [vmem:[#allocation99_spill] sm:$0xff] }
 0x514   :  { %2731 = vmatmul.bf16.vlgmr.msrb.gmra.mxu0 %v8599_v5  ;;  %2745 = vmatmul.bf16.vlgmr.msrb.gmra.mxu1 %v8599_v5 }
 0x515   :  { %2759 = vmatmul.bf16.vlgmr.msrb.gmra.mxu2 %v8599_v5  ;;  %2773 = vmatmul.bf16.vlgmr.msrb.gmra.mxu3 %v8599_v5 }
 0x516   :  { %2891 = vmatpush.bf16.msrb.mxu0 %v10158_v41  ;;  %2905 = vmatpush.bf16.msrb.mxu1 %v10159_v14 }
 0x517   :  { %2919 = vmatpush.bf16.msrb.mxu2 %v10160_v54  ;;  %2933 = vmatpush.bf16.msrb.mxu3 %v10161_v34 }
 0x51a   :  { %2892 = vmatpush.bf16.msrb.mxu0 %v10162_v35  ;;  %2906 = vmatpush.bf16.msrb.mxu1 %v10241_v6 }
 0x51b   :  { %2920 = vmatpush.bf16.msrb.mxu2 %v10242_v40  ;;  %2934 = vmatpush.bf16.msrb.mxu3 %v10243_v16 }
 0x51e   :  { %2893 = vmatpush.bf16.msrb.mxu0 %v10244_v36  ;;  %2907 = vmatpush.bf16.msrb.mxu1 %v10245_v46 }
 0x51f   :  { %2921 = vmatpush.bf16.msrb.mxu2 %v10246_v18  ;;  %2935 = vmatpush.bf16.msrb.mxu3 %v10247_v42 }
 0x522   :  { %2894 = vmatpush.bf16.msrb.mxu0 %v10248_v52  ;;  %2908 = vmatpush.bf16.msrb.mxu1 %v10249_v19 }
 0x523   :  { %2922 = vmatpush.bf16.msrb.mxu2 %v10250_v58  ;;  %2936 = vmatpush.bf16.msrb.mxu3 %v10251_v7 }
 0x526   :  { %2895 = vmatpush.bf16.msrb.mxu0 %v10252_v17  ;;  %2909 = vmatpush.bf16.msrb.mxu1 %v10253_v15  ;;  %v10264_v15 = vld [vmem:[#allocation101_spill] sm:$0xff] }
 0x527   :  { %2923 = vmatpush.bf16.msrb.mxu2 %v10254_v11  ;;  %2937 = vmatpush.bf16.msrb.mxu3 %v10255_v9  ;;  %v10265_v11 = vld [vmem:[#allocation102_spill] sm:$0xff]  ;;  %v10266_v9 = vld [vmem:[#allocation103_spill] sm:$0xff] }
 0x52a   :  { %2896 = vmatpush.bf16.msrb.mxu0 %v10256_v32  ;;  %2910 = vmatpush.bf16.msrb.mxu1 %v10257_v48  ;;  %v10267_v32 = vld [vmem:[#allocation105_spill] sm:$0xff]  ;;  %v10268_v48 = vld [vmem:[#allocation187_spill] sm:$0xff] }
 0x52b   :  { %2924 = vmatpush.bf16.msrb.mxu2 %v10258_v38  ;;  %2938 = vmatpush.bf16.msrb.mxu3 %v10259_v51  ;;  %v2576_v38 = vadd.f32 %v8563_v59, %v10268_v48  ;;  %v2592_v59 = vadd.f32 %v8573_v22, %v10191_v31  ;;  %v2606_v22 = vadd.f32 %v8575_v27, %v10192_v61 }
 0x52e   :  { %2897 = vmatpush.bf16.msrb.mxu0 %v10260_v44  ;;  %2911 = vmatpush.bf16.msrb.mxu1 %v10261_v10  ;;  %v2590_v44 = vadd.f32 %v8565_v33, %v10191_v31 }
 0x52f   :  { %2925 = vmatpush.bf16.msrb.mxu2 %v10262_v23  ;;  %2939 = vmatpush.bf16.msrb.mxu3 %v10263_v55 }
 0x532   :  { %2898 = vmatpush.bf16.msrb.mxu0 %v10264_v15  ;;  %2912 = vmatpush.bf16.msrb.mxu1 %v10265_v11  ;;  %v2604_v11 = vadd.f32 %v8567_v30, %v10192_v61 }
 0x533   :  { %2926 = vmatpush.bf16.msrb.mxu2 %v10266_v9  ;;  %2940 = vmatpush.bf16.msrb.mxu3 %v10267_v32  ;;  %v2578_v32 = vadd.f32 %v8571_v3, %v10268_v48 }
 0x591   :  { %v2732_v51 = vpop.f32.mrf.mxu0  ;;  %v2746_v10 = vpop.f32.mrf.mxu1 }
 0x592   :  { %v2779_v17 = vadd.f32 %v2732_v51, %v2576_v38  ;;  %v2780_v23 = vadd.f32 %v2746_v10, %v2590_v44 }
 0x594   :  { %v2787_v7 = vmul.f32 0.5, %v2779_v17  ;;  %v2795_v55 = vmul.f32 0.5, %v2780_v23 }
 0x596   :  { %5847 = vtanh.f32 %v2787_v7  ;;  %v2618_v7 = vadd.f32 %v8569_v2, %v10193_v62 }
 0x597   :  { %5849 = vtanh.f32 %v2795_v55 }
 0x598   :  { %v2760_v9 = vpop.f32.mrf.mxu2  ;;  %v2774_v15 = vpop.f32.mrf.mxu3 }
 0x599   :  { %v2781_v33 = vadd.f32 %v2760_v9, %v2604_v11  ;;  %v2734_v58 = vpop.f32.mrf.mxu0  ;;  %v2748_v19 = vpop.f32.mrf.mxu1  ;;  %v2782_v3 = vadd.f32 %v2774_v15, %v2618_v7  ;;  %v2620_v11 = vadd.f32 %v8577_v28, %v10193_v62 }
 0x59a   :  { %v2783_v38 = vadd.f32 %v2734_v58, %v2578_v32  ;;  %v2784_v51 = vadd.f32 %v2748_v19, %v2592_v59 }
 0x59b   :  { %5851 = vtanh.f32 %v2781_v33  ;;  %v2805_v59 = vmul.f32 0.5, %v2782_v3 }
 0x59c   :  { %v5848_v17 = vpop.eup %5847  ;;  %v2788_v30 = vmul.f32 0.5, %v2783_v38  ;;  %v2796_v44 = vmul.f32 0.5, %v2784_v51 }
 0x59d   :  { %v5850_v10 = vpop.eup %5849  ;;  %v2791_v23 = vmul.f32 0.5, %v5848_v17 }
 0x59e   :  { %v2799_v55 = vmul.f32 0.5, %v5850_v10  ;;  %5853 = vtanh.f32 %v2788_v30 }
 0x59f   :  { %v2793_v58 = vadd.f32 0.5, %v2791_v23  ;;  %5855 = vtanh.f32 %v2796_v44 }
 0x5a0   :  { %v2801_v19 = vadd.f32 0.5, %v2799_v55  ;;  %v2762_v9 = vpop.f32.mrf.mxu2  ;;  %v2776_v2 = vpop.f32.mrf.mxu3 }
 0x5a1   :  { %v5852_v32 = vpop.eup %5851  ;;  %v2785_v33 = vadd.f32 %v2762_v9, %v2606_v22  ;;  %v2786_v38 = vadd.f32 %v2776_v2, %v2620_v11 }
 0x5a2   :  { %v2813_v51 = vmul.f32 %v2801_v19, %v8488_v1  ;;  %v2815_v15 = vmul.f32 %v5852_v32, %v2793_v58 }
 0x5a3   :  { %5857 = vtanh.f32 %v2785_v33  ;;  %v2806_v7 = vmul.f32 0.5, %v2786_v38 }
 0x5a4   :  { %v5854_v17 = vpop.eup %5853  ;;  %v8654_v30 = vadd.f32 %v2815_v15, %v2813_v51  ;;  %5859 = vtanh.f32 %v2805_v59 }
 0x5a5   :  { %v5856_v27 = vpop.eup %5855  ;;  %v2792_v28 = vmul.f32 0.5, %v5854_v17  ;;  %5861 = vtanh.f32 %v2806_v7  ;;  %v10270_v7 = vld [vmem:[#allocation174_spill] sm:$0xff]  ;;  %v10271_v17 = vld [vmem:[#allocation175_spill] sm:$0xff] }
 0x5a6   :  { %v2800_v10 = vmul.f32 0.5, %v5856_v27  ;;  %5863 = vtanh.f32 %v8654_v30  ;;  %v10272_v27 = vld [vmem:[#allocation176_spill] sm:$0xff] }
 0x5a7   :  { %v2794_v44 = vadd.f32 0.5, %v2792_v28  ;;  %v10273_v28 = vld [vmem:[#allocation178_spill] sm:$0xff] }
 0x5a8   :  { %v2802_v23 = vadd.f32 0.5, %v2800_v10  ;;  %v10274_v10 = vld [vmem:[#allocation179_spill] sm:$0xff] }
 0x5a9   :  { %v5858_v55 = vpop.eup %5857 }
 0x5aa   :  { %v2814_v3 = vmul.f32 %v2802_v23, %v8492_v13  ;;  %v2816_v22 = vmul.f32 %v5858_v55, %v2794_v44  ;;  %v5860_v11 = vpop.eup %5859  ;;  %v10269_v13 = vld [vmem:[#allocation173_spill] sm:$0xff]  ;;  %v10277_v23 = vld [vmem:[#allocation182_spill] sm:$0xff]  ;;  %v10278_v55 = vld [vmem:[#allocation183_spill] sm:$0xff] }
 0x5ab   :  { %v5862_v9 = vpop.eup %5861  ;;  %v2809_v58 = vmul.f32 0.5, %v5860_v11  ;;  %v10276_v44 = vld [vmem:[#allocation181_spill] sm:$0xff] }
 0x5ac   :  { %v8658_v1 = vadd.f32 %v2816_v22, %v2814_v3  ;;  %v2810_v19 = vmul.f32 0.5, %v5862_v9  ;;  %v5864_v2 = vpop.eup %5863  ;;  %v10279_v3 = vld [vmem:[#allocation184_spill] sm:$0xff]  ;;  %v10280_v22 = vld [vmem:[#allocation185_spill] sm:$0xff]  ;;  %v10282_v9 = vld [vmem:[#allocation14_spill] sm:$0xff] }
 0x5ad   :  { %v2811_v32 = vadd.f32 0.5, %v2809_v58  ;;  %v10281_v11 = vld [vmem:[#allocation13_spill] sm:$0xff]  ;;  %v10283_v58 = vld [vmem:[#allocation15_spill] sm:$0xff] }
 0x5ae   :  { %5865 = vtanh.f32 %v8658_v1  ;;  %v2812_v59 = vadd.f32 0.5, %v2810_v19  ;;  %v10284_v19 = vld [vmem:[#allocation17_spill] sm:$0xff] }
 0x5af   :  { %v2821_v38 = vmul.f32 %v5864_v2, %v2811_v32  ;;  %v10285_v2 = vld [vmem:[#allocation20_spill] sm:$0xff]  ;;  %v10286_v32 = vld [vmem:[#allocation21_spill] sm:$0xff] }
 0x5b4   :  { %v5866_v33 = vpop.eup %5865 }
 0x5b5   :  { %v2822_v51 = vmul.f32 %v5866_v33, %v2812_v59  ;;  %v10287_v59 = vld [vmem:[#allocation22_spill] sm:$0xff]  ;;  %v10288_v33 = vld [vmem:[#allocation25_spill] sm:$0xff] }
 0x5b7   :  { %v2834_v15 = vpack.c.bf16 %v2822_v51, %v2821_v38  ;;  %v10289_v38 = vld [vmem:[#allocation29_spill] sm:$0xff]  ;;  %v10290_v51 = vld [vmem:[#allocation30_spill] sm:$0xff] }
 0x5b9   :  { %2843 = vmatmul.bf16.vlgmr.msra.gmra.mxu0 %v2834_v15  ;;  %2857 = vmatmul.bf16.vlgmr.msra.gmra.mxu1 %v2834_v15 }
 0x5ba   :  { %2871 = vmatmul.bf16.vlgmr.msra.gmra.mxu2 %v2834_v15  ;;  %2885 = vmatmul.bf16.vlgmr.msra.gmra.mxu3 %v2834_v15  ;;  %v10291_v15 = vld [vmem:[#allocation31_spill] sm:$0xff] }
 0x5bb   :  { %2992 = vmatpush.bf16.msra.mxu0 %v10119_v8  ;;  %3006 = vmatpush.bf16.msra.mxu1 %v10120_v0 }
 0x5bc   :  { %3020 = vmatpush.bf16.msra.mxu2 %v10121_v57  ;;  %3034 = vmatpush.bf16.msra.mxu3 %v10122_v43 }
 0x5bf   :  { %2993 = vmatpush.bf16.msra.mxu0 %v10123_v26  ;;  %3007 = vmatpush.bf16.msra.mxu1 %v10124_v25 }
 0x5c0   :  { %3021 = vmatpush.bf16.msra.mxu2 %v10125_v39  ;;  %3035 = vmatpush.bf16.msra.mxu3 %v10126_v4 }
 0x5c3   :  { %2994 = vmatpush.bf16.msra.mxu0 %v10127_v47  ;;  %3008 = vmatpush.bf16.msra.mxu1 %v10128_v49 }
 0x5c4   :  { %3022 = vmatpush.bf16.msra.mxu2 %v10129_v12  ;;  %3036 = vmatpush.bf16.msra.mxu3 %v10130_v24 }
 0x5c7   :  { %2995 = vmatpush.bf16.msra.mxu0 %v10131_v53  ;;  %3009 = vmatpush.bf16.msra.mxu1 %v10194_v50 }
 0x5c8   :  { %3023 = vmatpush.bf16.msra.mxu2 %v10195_v37  ;;  %3037 = vmatpush.bf16.msra.mxu3 %v10196_v20  ;;  %v10319_v20 = vld [vmem:[#allocation51_spill] sm:$0xff] }
 0x5c9   :  { %2899 = vmatmul.bf16.vlgmr.msrb.gmra.mxu0 %v8599_v5  ;;  %2913 = vmatmul.bf16.vlgmr.msrb.gmra.mxu1 %v8599_v5 }
 0x5ca   :  { %2927 = vmatmul.bf16.vlgmr.msrb.gmra.mxu2 %v8599_v5  ;;  %2941 = vmatmul.bf16.vlgmr.msrb.gmra.mxu3 %v8599_v5  ;;  %v10275_v5 = vld [vmem:[#allocation180_spill] sm:$0xff] }
 0x5cb   :  { %2996 = vmatpush.bf16.msra.mxu0 %v10197_v45  ;;  %3010 = vmatpush.bf16.msra.mxu1 %v10136_v60  ;;  %v10318_v60 = vld [vmem:[#allocation8_spill] sm:$0xff] }
 0x5cc   :  { %3024 = vmatpush.bf16.msra.mxu2 %v10137_v63  ;;  %3038 = vmatpush.bf16.msra.mxu3 %v10138_v56 }
 0x5cf   :  { %2997 = vmatpush.bf16.msra.mxu0 %v10269_v13  ;;  %3011 = vmatpush.bf16.msra.mxu1 %v10270_v7  ;;  %v10317_v7 = vld [vmem:[#allocation123_spill] sm:$0xff] }
 0x5d0   :  { %3025 = vmatpush.bf16.msra.mxu2 %v10271_v17  ;;  %3039 = vmatpush.bf16.msra.mxu3 %v10272_v27  ;;  %v10316_v27 = vld [vmem:[#allocation125_spill] sm:$0xff] }
 0x5d3   :  { %2998 = vmatpush.bf16.msra.mxu0 %v10273_v28  ;;  %3012 = vmatpush.bf16.msra.mxu1 %v10274_v10  ;;  %v10315_v28 = vld [vmem:[#allocation110_spill] sm:$0xff] }
 0x5d4   :  { %3026 = vmatpush.bf16.msra.mxu2 %v10275_v5  ;;  %3040 = vmatpush.bf16.msra.mxu3 %v10276_v44  ;;  %v1247_v17 = vadd.f32 %v10316_v27, %v10315_v28  ;;  %v10322_v27 = vld [vmem:[#allocation53_spill] sm:$0xff]  ;;  %v10324_v28 = vld [vmem:[#allocation128_spill] sm:$0xff] }
 0x5d7   :  { %2999 = vmatpush.bf16.msra.mxu0 %v10277_v23  ;;  %3013 = vmatpush.bf16.msra.mxu1 %v10278_v55 }
 0x5d8   :  { %3027 = vmatpush.bf16.msra.mxu2 %v10279_v3  ;;  %3041 = vmatpush.bf16.msra.mxu3 %v10280_v22  ;;  %v10313_v22 = vld [vmem:[#allocation7_spill] sm:$0xff] }
 0x5d9   :  { %v10314_v3 = vld [vmem:[#allocation47_spill] sm:$0xff] }
 0x5db   :  { %3104 = vmatpush.bf16.msrb.mxu0 %v10281_v11  ;;  %3118 = vmatpush.bf16.msrb.mxu1 %v10282_v9  ;;  %v10292_v11 = vld [vmem:[#allocation32_spill] sm:$0xff]  ;;  %v10293_v9 = vld [vmem:[#allocation34_spill] sm:$0xff] }
 0x5dc   :  { %3132 = vmatpush.bf16.msrb.mxu2 %v10283_v58  ;;  %3146 = vmatpush.bf16.msrb.mxu3 %v10284_v19  ;;  %v10294_v58 = vld [vmem:[#allocation35_spill] sm:$0xff]  ;;  %v10295_v19 = vld [vmem:[#allocation36_spill] sm:$0xff] }
 0x5df   :  { %3105 = vmatpush.bf16.msrb.mxu0 %v10285_v2  ;;  %3119 = vmatpush.bf16.msrb.mxu1 %v10286_v32  ;;  %v10296_v2 = vld [vmem:[#allocation38_spill] sm:$0xff]  ;;  %v10297_v32 = vld [vmem:[#allocation41_spill] sm:$0xff] }
 0x5e0   :  { %3133 = vmatpush.bf16.msrb.mxu2 %v10287_v59  ;;  %3147 = vmatpush.bf16.msrb.mxu3 %v10288_v33  ;;  %v10298_v59 = vld [vmem:[#allocation42_spill] sm:$0xff]  ;;  %v10299_v33 = vld [vmem:[#allocation43_spill] sm:$0xff] }
 0x5e3   :  { %3106 = vmatpush.bf16.msrb.mxu0 %v10289_v38  ;;  %3120 = vmatpush.bf16.msrb.mxu1 %v10290_v51  ;;  %v10300_v38 = vld [vmem:[#allocation45_spill] sm:$0xff]  ;;  %v10301_v51 = vld [vmem:[#allocation48_spill] sm:$0xff] }
 0x5e4   :  { %3134 = vmatpush.bf16.msrb.mxu2 %v10291_v15  ;;  %3148 = vmatpush.bf16.msrb.mxu3 %v10292_v11  ;;  %v10302_v15 = vld [vmem:[#allocation49_spill] sm:$0xff]  ;;  %v10303_v11 = vld [vmem:[#allocation50_spill] sm:$0xff] }
 0x5e7   :  { %3107 = vmatpush.bf16.msrb.mxu0 %v10293_v9  ;;  %3121 = vmatpush.bf16.msrb.mxu1 %v10294_v58  ;;  %v10304_v9 = vld [vmem:[#allocation52_spill] sm:$0xff]  ;;  %v10305_v58 = vld [vmem:[#allocation55_spill] sm:$0xff] }
 0x5e8   :  { %3135 = vmatpush.bf16.msrb.mxu2 %v10295_v19  ;;  %3149 = vmatpush.bf16.msrb.mxu3 %v10296_v2  ;;  %v10306_v19 = vld [vmem:[#allocation56_spill] sm:$0xff]  ;;  %v10307_v2 = vld [vmem:[#allocation57_spill] sm:$0xff] }
 0x5eb   :  { %3108 = vmatpush.bf16.msrb.mxu0 %v10297_v32  ;;  %3122 = vmatpush.bf16.msrb.mxu1 %v10298_v59  ;;  %v10308_v32 = vld [vmem:[#allocation59_spill] sm:$0xff]  ;;  %v10309_v59 = vld [vmem:[#allocation62_spill] sm:$0xff] }
 0x5ec   :  { %3136 = vmatpush.bf16.msrb.mxu2 %v10299_v33  ;;  %3150 = vmatpush.bf16.msrb.mxu3 %v10300_v38  ;;  %v10310_v33 = vld [vmem:[#allocation63_spill] sm:$0xff]  ;;  %v10311_v38 = vld [vmem:[#allocation64_spill] sm:$0xff] }
 0x5ef   :  { %3109 = vmatpush.bf16.msrb.mxu0 %v10301_v51  ;;  %3123 = vmatpush.bf16.msrb.mxu1 %v10302_v15  ;;  %v10312_v51 = vld [vmem:[#allocation65_spill] sm:$0xff] }
 0x5f0   :  { %3137 = vmatpush.bf16.msrb.mxu2 %v10303_v11  ;;  %3151 = vmatpush.bf16.msrb.mxu3 %v10304_v9 }
 0x5f3   :  { %3110 = vmatpush.bf16.msrb.mxu0 %v10305_v58  ;;  %3124 = vmatpush.bf16.msrb.mxu1 %v10306_v19 }
 0x5f4   :  { %3138 = vmatpush.bf16.msrb.mxu2 %v10307_v2  ;;  %3152 = vmatpush.bf16.msrb.mxu3 %v10308_v32 }
 0x5f7   :  { %3111 = vmatpush.bf16.msrb.mxu0 %v10309_v59  ;;  %3125 = vmatpush.bf16.msrb.mxu1 %v10310_v33 }
 0x5f8   :  { %3139 = vmatpush.bf16.msrb.mxu2 %v10311_v38  ;;  %3153 = vmatpush.bf16.msrb.mxu3 %v10312_v51 }
 0x636   :  { %v8729_v15 = vpop.f32.mrf.mxu0  ;;  %v8731_v11 = vpop.f32.mrf.mxu1 }
 0x63d   :  { %v8733_v9 = vpop.f32.mrf.mxu2  ;;  %v8735_v58 = vpop.f32.mrf.mxu3 }
 0x63e   :  { %v8737_v19 = vpop.f32.mrf.mxu0  ;;  %v8739_v2 = vpop.f32.mrf.mxu1 }
 0x645   :  { %v8741_v32 = vpop.f32.mrf.mxu2  ;;  %v8743_v59 = vpop.f32.mrf.mxu3 }
 0x646   :  { %v2900_v33 = vpop.f32.mrf.mxu0  ;;  %v2914_v38 = vpop.f32.mrf.mxu1 }
 0x647   :  { %v2947_v51 = vadd.f32 %v2900_v33, %v10313_v22  ;;  %v2948_v55 = vadd.f32 %v2914_v38, %v10314_v3  ;;  %v10320_v22 = vld [vmem:[#allocation127_spill] sm:$0xff] }
 0x648   :  { %v1296_v33 = vadd.f32 %v10320_v22, %v1247_v17 }
 0x649   :  { %v2955_v23 = vmul.f32 0.5, %v2947_v51  ;;  %v2963_v44 = vmul.f32 0.5, %v2948_v55  ;;  %v10321_v51 = vld [vmem:[#allocation126_spill] sm:$0xff] }
 0x64a   :  { %v1345_v24 = vadd.f32 %v10324_v28, %v1296_v33 }
 0x64b   :  { %5867 = vtanh.f32 %v2955_v23 }
 0x64c   :  { %5869 = vtanh.f32 %v2963_v44 }
 0x64d   :  { %v2928_v5 = vpop.f32.mrf.mxu2  ;;  %v2942_v10 = vpop.f32.mrf.mxu3 }
 0x64e   :  { %v2949_v13 = vadd.f32 %v2928_v5, %v10317_v7  ;;  %v2902_v56 = vpop.f32.mrf.mxu0  ;;  %v2916_v63 = vpop.f32.mrf.mxu1  ;;  %v2950_v50 = vadd.f32 %v2942_v10, %v10321_v51  ;;  %v10323_v7 = vld [vmem:[#allocation124_spill] sm:$0xff] }
 0x64f   :  { %v2951_v45 = vadd.f32 %v2902_v56, %v10318_v60  ;;  %v2952_v37 = vadd.f32 %v2916_v63, %v10319_v20  ;;  %v1198_v5 = vadd.f32 %v10323_v7, %v10322_v27 }
 0x650   :  { %5871 = vtanh.f32 %v2949_v13  ;;  %v2973_v17 = vmul.f32 0.5, %v2950_v50 }
 0x651   :  { %v5868_v3 = vpop.eup %5867  ;;  %v2956_v55 = vmul.f32 0.5, %v2951_v45  ;;  %v2964_v23 = vmul.f32 0.5, %v2952_v37 }
 0x652   :  { %v5870_v44 = vpop.eup %5869  ;;  %v2959_v38 = vmul.f32 0.5, %v5868_v3 }
 0x653   :  { %v2967_v53 = vmul.f32 0.5, %v5870_v44  ;;  %5873 = vtanh.f32 %v2956_v55 }
 0x654   :  { %v2961_v60 = vadd.f32 0.5, %v2959_v38  ;;  %5875 = vtanh.f32 %v2964_v23 }
 0x655   :  { %v2969_v63 = vadd.f32 0.5, %v2967_v53  ;;  %v2930_v56 = vpop.f32.mrf.mxu2  ;;  %v2944_v20 = vpop.f32.mrf.mxu3 }
 0x656   :  { %v5872_v13 = vpop.eup %5871  ;;  %v2953_v45 = vadd.f32 %v2930_v56, %v1198_v5  ;;  %v2954_v37 = vadd.f32 %v2944_v20, %v1345_v24 }
 0x657   :  { %v2981_v22 = vmul.f32 %v2969_v63, %v8592_v29  ;;  %v2983_v3 = vmul.f32 %v5872_v13, %v2961_v60 }
 0x658   :  { %5877 = vtanh.f32 %v2953_v45  ;;  %v2974_v10 = vmul.f32 0.5, %v2954_v37 }
 0x659   :  { %v5874_v55 = vpop.eup %5873  ;;  %v8758_v44 = vadd.f32 %v2983_v3, %v2981_v22  ;;  %5879 = vtanh.f32 %v2973_v17  ;;  %v10326_v22 = vld [vmem:[#allocation82_spill] sm:$0xff]  ;;  %v10327_v3 = vld [vmem:[#allocation84_spill] sm:$0xff] }
 0x65a   :  { %v5876_v51 = vpop.eup %5875  ;;  %v2960_v28 = vmul.f32 0.5, %v5874_v55  ;;  %5881 = vtanh.f32 %v2974_v10  ;;  %v10328_v10 = vld [vmem:[#allocation85_spill] sm:$0xff]  ;;  %v10329_v55 = vld [vmem:[#allocation86_spill] sm:$0xff] }
 0x65b   :  { %v2968_v33 = vmul.f32 0.5, %v5876_v51  ;;  %5883 = vtanh.f32 %v8758_v44  ;;  %v10330_v51 = vld [vmem:[#allocation87_spill] sm:$0xff] }
 0x65c   :  { %v2962_v53 = vadd.f32 0.5, %v2960_v28  ;;  %v10331_v28 = vld [vmem:[#allocation88_spill] sm:$0xff] }
 0x65d   :  { %v2970_v23 = vadd.f32 0.5, %v2968_v33  ;;  %v10332_v33 = vld [vmem:[#allocation91_spill] sm:$0xff] }
 0x65e   :  { %v5878_v38 = vpop.eup %5877 }
 0x65f   :  { %v2982_v50 = vmul.f32 %v2970_v23, %v8596_v21  ;;  %v2984_v27 = vmul.f32 %v5878_v38, %v2962_v53  ;;  %v5880_v24 = vpop.eup %5879  ;;  %v10325_v21 = vld [vmem:[#allocation81_spill] sm:$0xff]  ;;  %v10333_v53 = vld [vmem:[#allocation92_spill] sm:$0xff]  ;;  %v10335_v38 = vld [vmem:[#allocation94_spill] sm:$0xff] }
 0x660   :  { %v5882_v7 = vpop.eup %5881  ;;  %v2977_v5 = vmul.f32 0.5, %v5880_v24  ;;  %v10334_v23 = vld [vmem:[#allocation93_spill] sm:$0xff] }
 0x661   :  { %v8762_v29 = vadd.f32 %v2984_v27, %v2982_v50  ;;  %v2978_v60 = vmul.f32 0.5, %v5882_v7  ;;  %v5884_v63 = vpop.eup %5883  ;;  %v10336_v50 = vld [vmem:[#allocation95_spill] sm:$0xff]  ;;  %v10337_v27 = vld [vmem:[#allocation96_spill] sm:$0xff]  ;;  %v10338_v24 = vld [vmem:[#allocation97_spill] sm:$0xff] }
 0x662   :  { %v2979_v56 = vadd.f32 0.5, %v2977_v5  ;;  %v10339_v7 = vld [vmem:[#allocation99_spill] sm:$0xff]  ;;  %v10340_v5 = vld [vmem:[#allocation101_spill] sm:$0xff] }
 0x663   :  { %5885 = vtanh.f32 %v8762_v29  ;;  %v2980_v20 = vadd.f32 0.5, %v2978_v60  ;;  %v10341_v60 = vld [vmem:[#allocation102_spill] sm:$0xff] }
 0x664   :  { %v2989_v17 = vmul.f32 %v5884_v63, %v2979_v56  ;;  %v10342_v63 = vld [vmem:[#allocation103_spill] sm:$0xff]  ;;  %v10343_v56 = vld [vmem:[#allocation105_spill] sm:$0xff] }
 0x669   :  { %v5886_v13 = vpop.eup %5885 }
 0x66a   :  { %v2990_v45 = vmul.f32 %v5886_v13, %v2980_v20  ;;  %v2845_v20 = vadd.f32 %v8729_v15, %v10268_v48  ;;  %v2859_v13 = vadd.f32 %v8731_v11, %v10191_v31  ;;  %v2861_v15 = vadd.f32 %v8739_v2, %v10191_v31 }
 0x66b   :  { %v2875_v2 = vadd.f32 %v8741_v32, %v10192_v61 }
 0x66c   :  { %v8765_v37 = vpack.c.bf16 %v2990_v45, %v2989_v17 }
 0x66e   :  { %3000 = vmatmul.bf16.vlgmr.msra.gmra.mxu0 %v8765_v37  ;;  %3014 = vmatmul.bf16.vlgmr.msra.gmra.mxu1 %v8765_v37 }
 0x66f   :  { %3028 = vmatmul.bf16.vlgmr.msra.gmra.mxu2 %v8765_v37  ;;  %3042 = vmatmul.bf16.vlgmr.msra.gmra.mxu3 %v8765_v37 }
 0x670   :  { %3160 = vmatpush.bf16.msra.mxu0 %v10158_v41  ;;  %3174 = vmatpush.bf16.msra.mxu1 %v10159_v14 }
 0x671   :  { %3188 = vmatpush.bf16.msra.mxu2 %v10160_v54  ;;  %3202 = vmatpush.bf16.msra.mxu3 %v10161_v34 }
 0x674   :  { %3161 = vmatpush.bf16.msra.mxu0 %v10162_v35  ;;  %3175 = vmatpush.bf16.msra.mxu1 %v10241_v6 }
 0x675   :  { %3189 = vmatpush.bf16.msra.mxu2 %v10242_v40  ;;  %3203 = vmatpush.bf16.msra.mxu3 %v10243_v16 }
 0x678   :  { %3162 = vmatpush.bf16.msra.mxu0 %v10244_v36  ;;  %3176 = vmatpush.bf16.msra.mxu1 %v10245_v46 }
 0x679   :  { %3190 = vmatpush.bf16.msra.mxu2 %v10246_v18  ;;  %3204 = vmatpush.bf16.msra.mxu3 %v10247_v42 }
 0x67c   :  { %3163 = vmatpush.bf16.msra.mxu0 %v10248_v52  ;;  %3177 = vmatpush.bf16.msra.mxu1 %v10325_v21 }
 0x67d   :  { %3191 = vmatpush.bf16.msra.mxu2 %v10326_v22  ;;  %3205 = vmatpush.bf16.msra.mxu3 %v10327_v3 }
 0x680   :  { %3164 = vmatpush.bf16.msra.mxu0 %v10328_v10  ;;  %3178 = vmatpush.bf16.msra.mxu1 %v10329_v55 }
 0x681   :  { %3192 = vmatpush.bf16.msra.mxu2 %v10330_v51  ;;  %3206 = vmatpush.bf16.msra.mxu3 %v10331_v28 }
 0x684   :  { %3165 = vmatpush.bf16.msra.mxu0 %v10332_v33  ;;  %3179 = vmatpush.bf16.msra.mxu1 %v10333_v53 }
 0x685   :  { %3193 = vmatpush.bf16.msra.mxu2 %v10334_v23  ;;  %3207 = vmatpush.bf16.msra.mxu3 %v10335_v38 }
 0x688   :  { %3166 = vmatpush.bf16.msra.mxu0 %v10336_v50  ;;  %3180 = vmatpush.bf16.msra.mxu1 %v10337_v27 }
 0x689   :  { %3194 = vmatpush.bf16.msra.mxu2 %v10338_v24  ;;  %3208 = vmatpush.bf16.msra.mxu3 %v10339_v7 }
 0x68c   :  { %3167 = vmatpush.bf16.msra.mxu0 %v10340_v5  ;;  %3181 = vmatpush.bf16.msra.mxu1 %v10341_v60  ;;  %v2873_v60 = vadd.f32 %v8733_v9, %v10192_v61 }
 0x68d   :  { %3195 = vmatpush.bf16.msra.mxu2 %v10342_v63  ;;  %3209 = vmatpush.bf16.msra.mxu3 %v10343_v56  ;;  %v2847_v56 = vadd.f32 %v8737_v19, %v10268_v48 }
 0x6eb   :  { %v3001_v17 = vpop.f32.mrf.mxu0  ;;  %v3015_v45 = vpop.f32.mrf.mxu1 }
 0x6ec   :  { %v3048_v27 = vadd.f32 %v3001_v17, %v2845_v20  ;;  %v3049_v24 = vadd.f32 %v3015_v45, %v2859_v13 }
 0x6ee   :  { %v3056_v50 = vmul.f32 0.5, %v3048_v27  ;;  %v3064_v7 = vmul.f32 0.5, %v3049_v24 }
 0x6f0   :  { %5887 = vtanh.f32 %v3056_v50  ;;  %v2887_v50 = vadd.f32 %v8735_v58, %v10193_v62 }
 0x6f1   :  { %5889 = vtanh.f32 %v3064_v7 }
 0x6f2   :  { %v3029_v63 = vpop.f32.mrf.mxu2  ;;  %v3043_v5 = vpop.f32.mrf.mxu3 }
 0x6f3   :  { %v3050_v11 = vadd.f32 %v3029_v63, %v2873_v60  ;;  %v3003_v38 = vpop.f32.mrf.mxu0  ;;  %v3017_v23 = vpop.f32.mrf.mxu1  ;;  %v3051_v19 = vadd.f32 %v3043_v5, %v2887_v50  ;;  %v2889_v60 = vadd.f32 %v8743_v59, %v10193_v62 }
 0x6f4   :  { %v3052_v20 = vadd.f32 %v3003_v38, %v2847_v56  ;;  %v3053_v13 = vadd.f32 %v3017_v23, %v2861_v15 }
 0x6f5   :  { %5891 = vtanh.f32 %v3050_v11  ;;  %v3074_v15 = vmul.f32 0.5, %v3051_v19 }
 0x6f6   :  { %v5888_v27 = vpop.eup %5887  ;;  %v3057_v9 = vmul.f32 0.5, %v3052_v20  ;;  %v3065_v24 = vmul.f32 0.5, %v3053_v13 }
 0x6f7   :  { %v5890_v7 = vpop.eup %5889  ;;  %v3060_v17 = vmul.f32 0.5, %v5888_v27 }
 0x6f8   :  { %v3068_v45 = vmul.f32 0.5, %v5890_v7  ;;  %5893 = vtanh.f32 %v3057_v9 }
 0x6f9   :  { %v3062_v38 = vadd.f32 0.5, %v3060_v17  ;;  %5895 = vtanh.f32 %v3065_v24 }
 0x6fa   :  { %v3070_v23 = vadd.f32 0.5, %v3068_v45  ;;  %v3031_v63 = vpop.f32.mrf.mxu2  ;;  %v3045_v58 = vpop.f32.mrf.mxu3 }
 0x6fb   :  { %v5892_v56 = vpop.eup %5891  ;;  %v3054_v11 = vadd.f32 %v3031_v63, %v2875_v2  ;;  %v3055_v20 = vadd.f32 %v3045_v58, %v2889_v60 }
 0x6fc   :  { %v3082_v13 = vmul.f32 %v3070_v23, %v8654_v30  ;;  %v3084_v5 = vmul.f32 %v5892_v56, %v3062_v38 }
 0x6fd   :  { %5897 = vtanh.f32 %v3054_v11  ;;  %v3075_v50 = vmul.f32 0.5, %v3055_v20 }
 0x6fe   :  { %v5894_v27 = vpop.eup %5893  ;;  %v8820_v9 = vadd.f32 %v3084_v5, %v3082_v13  ;;  %5899 = vtanh.f32 %v3074_v15 }
 0x6ff   :  { %v5896_v32 = vpop.eup %5895  ;;  %v3061_v59 = vmul.f32 0.5, %v5894_v27  ;;  %5901 = vtanh.f32 %v3075_v50  ;;  %v10345_v50 = vld [vmem:[#allocation165_spill] sm:$0xff]  ;;  %v10346_v27 = vld [vmem:[#allocation166_spill] sm:$0xff] }
 0x700   :  { %v3069_v7 = vmul.f32 0.5, %v5896_v32  ;;  %5903 = vtanh.f32 %v8820_v9  ;;  %v10347_v32 = vld [vmem:[#allocation167_spill] sm:$0xff] }
 0x701   :  { %v3063_v24 = vadd.f32 0.5, %v3061_v59  ;;  %v10348_v59 = vld [vmem:[#allocation168_spill] sm:$0xff] }
 0x702   :  { %v3071_v17 = vadd.f32 0.5, %v3069_v7  ;;  %v10349_v7 = vld [vmem:[#allocation169_spill] sm:$0xff] }
 0x703   :  { %v5898_v45 = vpop.eup %5897 }
 0x704   :  { %v3083_v19 = vmul.f32 %v3071_v17, %v8658_v1  ;;  %v3085_v2 = vmul.f32 %v5898_v45, %v3063_v24  ;;  %v5900_v60 = vpop.eup %5899  ;;  %v10344_v1 = vld [vmem:[#allocation164_spill] sm:$0xff]  ;;  %v10350_v24 = vld [vmem:[#allocation170_spill] sm:$0xff]  ;;  %v10351_v17 = vld [vmem:[#allocation171_spill] sm:$0xff] }
 0x705   :  { %v5902_v63 = vpop.eup %5901  ;;  %v3078_v38 = vmul.f32 0.5, %v5900_v60  ;;  %v10352_v45 = vld [vmem:[#allocation172_spill] sm:$0xff]  ;;  %v10355_v60 = vld [vmem:[#allocation175_spill] sm:$0xff] }
 0x706   :  { %v8824_v30 = vadd.f32 %v3085_v2, %v3083_v19  ;;  %v3079_v23 = vmul.f32 0.5, %v5902_v63  ;;  %v5904_v58 = vpop.eup %5903  ;;  %v10353_v19 = vld [vmem:[#allocation173_spill] sm:$0xff]  ;;  %v10354_v2 = vld [vmem:[#allocation174_spill] sm:$0xff]  ;;  %v10356_v63 = vld [vmem:[#allocation176_spill] sm:$0xff] }
 0x707   :  { %v3080_v56 = vadd.f32 0.5, %v3078_v38  ;;  %v10357_v38 = vld [vmem:[#allocation178_spill] sm:$0xff] }
 0x708   :  { %5905 = vtanh.f32 %v8824_v30  ;;  %v3081_v15 = vadd.f32 0.5, %v3079_v23  ;;  %v10358_v23 = vld [vmem:[#allocation179_spill] sm:$0xff] }
 0x709   :  { %v3090_v20 = vmul.f32 %v5904_v58, %v3080_v56  ;;  %v10360_v58 = vld [vmem:[#allocation181_spill] sm:$0xff]  ;;  %v10361_v56 = vld [vmem:[#allocation182_spill] sm:$0xff] }
 0x70e   :  { %v5906_v11 = vpop.eup %5905 }
 0x70f   :  { %v3091_v13 = vmul.f32 %v5906_v11, %v3081_v15  ;;  %v10362_v15 = vld [vmem:[#allocation183_spill] sm:$0xff]  ;;  %v10363_v11 = vld [vmem:[#allocation184_spill] sm:$0xff] }
 0x711   :  { %v3103_v5 = vpack.c.bf16 %v3091_v13, %v3090_v20  ;;  %v10364_v20 = vld [vmem:[#allocation185_spill] sm:$0xff] }
 0x712   :  { %v10365_v13 = vld [vmem:[#allocation13_spill] sm:$0xff] }
 0x713   :  { %3112 = vmatmul.bf16.vlgmr.msrb.gmra.mxu0 %v3103_v5  ;;  %3126 = vmatmul.bf16.vlgmr.msrb.gmra.mxu1 %v3103_v5 }
 0x714   :  { %3140 = vmatmul.bf16.vlgmr.msrb.gmra.mxu2 %v3103_v5  ;;  %3154 = vmatmul.bf16.vlgmr.msrb.gmra.mxu3 %v3103_v5  ;;  %v10366_v5 = vld [vmem:[#allocation14_spill] sm:$0xff] }
 0x715   :  { %3261 = vmatpush.bf16.msrb.mxu0 %v10119_v8  ;;  %3275 = vmatpush.bf16.msrb.mxu1 %v10120_v0 }
 0x716   :  { %3289 = vmatpush.bf16.msrb.mxu2 %v10121_v57  ;;  %3303 = vmatpush.bf16.msrb.mxu3 %v10122_v43 }
 0x719   :  { %3262 = vmatpush.bf16.msrb.mxu0 %v10123_v26  ;;  %3276 = vmatpush.bf16.msrb.mxu1 %v10124_v25 }
 0x71a   :  { %3290 = vmatpush.bf16.msrb.mxu2 %v10125_v39  ;;  %3304 = vmatpush.bf16.msrb.mxu3 %v10126_v4  ;;  %v10403_v39 = vld [vmem:[#allocation58_spill] sm:$0xff] }
 0x71d   :  { %3263 = vmatpush.bf16.msrb.mxu0 %v10127_v47  ;;  %3277 = vmatpush.bf16.msrb.mxu1 %v10128_v49  ;;  %v10402_v47 = vld [vmem:[#allocation10_spill] sm:$0xff] }
 0x71e   :  { %3291 = vmatpush.bf16.msrb.mxu2 %v10129_v12  ;;  %3305 = vmatpush.bf16.msrb.mxu3 %v10344_v1 }
 0x721   :  { %3264 = vmatpush.bf16.msrb.mxu0 %v10345_v50  ;;  %3278 = vmatpush.bf16.msrb.mxu1 %v10346_v27  ;;  %v10401_v50 = vld [vmem:[#allocation129_spill] sm:$0xff] }
 0x722   :  { %3292 = vmatpush.bf16.msrb.mxu2 %v10347_v32  ;;  %3306 = vmatpush.bf16.msrb.mxu3 %v10348_v59  ;;  %v10399_v59 = vld [vmem:[#allocation110_spill] sm:$0xff]  ;;  %v10400_v32 = vld [vmem:[#allocation131_spill] sm:$0xff] }
 0x723   :  { %3168 = vmatmul.bf16.vlgmr.msra.gmra.mxu0 %v8765_v37  ;;  %3182 = vmatmul.bf16.vlgmr.msra.gmra.mxu1 %v8765_v37  ;;  %v1252_v27 = vadd.f32 %v10400_v32, %v10399_v59  ;;  %v10406_v32 = vld [vmem:[#allocation60_spill] sm:$0xff]  ;;  %v10408_v59 = vld [vmem:[#allocation134_spill] sm:$0xff] }
 0x724   :  { %3196 = vmatmul.bf16.vlgmr.msra.gmra.mxu2 %v8765_v37  ;;  %3210 = vmatmul.bf16.vlgmr.msra.gmra.mxu3 %v8765_v37  ;;  %v10359_v37 = vld [vmem:[#allocation180_spill] sm:$0xff] }
 0x725   :  { %3265 = vmatpush.bf16.msrb.mxu0 %v10349_v7  ;;  %3279 = vmatpush.bf16.msrb.mxu1 %v10350_v24 }
 0x726   :  { %3293 = vmatpush.bf16.msrb.mxu2 %v10351_v17  ;;  %3307 = vmatpush.bf16.msrb.mxu3 %v10352_v45 }
 0x729   :  { %3266 = vmatpush.bf16.msrb.mxu0 %v10353_v19  ;;  %3280 = vmatpush.bf16.msrb.mxu1 %v10354_v2  ;;  %v10398_v2 = vld [vmem:[#allocation54_spill] sm:$0xff] }
 0x72a   :  { %3294 = vmatpush.bf16.msrb.mxu2 %v10355_v60  ;;  %3308 = vmatpush.bf16.msrb.mxu3 %v10356_v63  ;;  %v10367_v63 = vld [vmem:[#allocation15_spill] sm:$0xff]  ;;  %v10397_v60 = vld [vmem:[#allocation9_spill] sm:$0xff] }
 0x72d   :  { %3267 = vmatpush.bf16.msrb.mxu0 %v10357_v38  ;;  %3281 = vmatpush.bf16.msrb.mxu1 %v10358_v23  ;;  %v10368_v38 = vld [vmem:[#allocation17_spill] sm:$0xff]  ;;  %v10369_v23 = vld [vmem:[#allocation20_spill] sm:$0xff] }
 0x72e   :  { %3295 = vmatpush.bf16.msrb.mxu2 %v10359_v37  ;;  %3309 = vmatpush.bf16.msrb.mxu3 %v10360_v58  ;;  %v10370_v37 = vld [vmem:[#allocation21_spill] sm:$0xff]  ;;  %v10371_v58 = vld [vmem:[#allocation22_spill] sm:$0xff] }
 0x731   :  { %3268 = vmatpush.bf16.msrb.mxu0 %v10361_v56  ;;  %3282 = vmatpush.bf16.msrb.mxu1 %v10362_v15  ;;  %v10372_v56 = vld [vmem:[#allocation25_spill] sm:$0xff] }
 0x732   :  { %3296 = vmatpush.bf16.msrb.mxu2 %v10363_v11  ;;  %3310 = vmatpush.bf16.msrb.mxu3 %v10364_v20  ;;  %v10373_v15 = vld [vmem:[#allocation29_spill] sm:$0xff]  ;;  %v10374_v11 = vld [vmem:[#allocation30_spill] sm:$0xff]  ;;  %v10375_v20 = vld [vmem:[#allocation31_spill] sm:$0xff] }
 0x735   :  { %3373 = vmatpush.bf16.msra.mxu0 %v10365_v13  ;;  %3387 = vmatpush.bf16.msra.mxu1 %v10366_v5  ;;  %v10376_v13 = vld [vmem:[#allocation32_spill] sm:$0xff]  ;;  %v10377_v5 = vld [vmem:[#allocation34_spill] sm:$0xff] }
 0x736   :  { %3401 = vmatpush.bf16.msra.mxu2 %v10367_v63  ;;  %3415 = vmatpush.bf16.msra.mxu3 %v10368_v38  ;;  %v10378_v63 = vld [vmem:[#allocation35_spill] sm:$0xff]  ;;  %v10379_v38 = vld [vmem:[#allocation36_spill] sm:$0xff] }
 0x739   :  { %3374 = vmatpush.bf16.msra.mxu0 %v10369_v23  ;;  %3388 = vmatpush.bf16.msra.mxu1 %v10370_v37  ;;  %v10380_v23 = vld [vmem:[#allocation38_spill] sm:$0xff]  ;;  %v10381_v37 = vld [vmem:[#allocation41_spill] sm:$0xff] }
 0x73a   :  { %3402 = vmatpush.bf16.msra.mxu2 %v10371_v58  ;;  %3416 = vmatpush.bf16.msra.mxu3 %v10372_v56  ;;  %v10382_v58 = vld [vmem:[#allocation42_spill] sm:$0xff]  ;;  %v10383_v56 = vld [vmem:[#allocation43_spill] sm:$0xff] }
 0x73d   :  { %3375 = vmatpush.bf16.msra.mxu0 %v10373_v15  ;;  %3389 = vmatpush.bf16.msra.mxu1 %v10374_v11  ;;  %v10384_v15 = vld [vmem:[#allocation45_spill] sm:$0xff]  ;;  %v10385_v11 = vld [vmem:[#allocation48_spill] sm:$0xff] }
 0x73e   :  { %3403 = vmatpush.bf16.msra.mxu2 %v10375_v20  ;;  %3417 = vmatpush.bf16.msra.mxu3 %v10376_v13  ;;  %v10386_v20 = vld [vmem:[#allocation49_spill] sm:$0xff]  ;;  %v10387_v13 = vld [vmem:[#allocation50_spill] sm:$0xff] }
 0x741   :  { %3376 = vmatpush.bf16.msra.mxu0 %v10377_v5  ;;  %3390 = vmatpush.bf16.msra.mxu1 %v10378_v63  ;;  %v10388_v5 = vld [vmem:[#allocation52_spill] sm:$0xff]  ;;  %v10389_v63 = vld [vmem:[#allocation55_spill] sm:$0xff] }
 0x742   :  { %3404 = vmatpush.bf16.msra.mxu2 %v10379_v38  ;;  %3418 = vmatpush.bf16.msra.mxu3 %v10380_v23  ;;  %v10390_v38 = vld [vmem:[#allocation56_spill] sm:$0xff]  ;;  %v10391_v23 = vld [vmem:[#allocation57_spill] sm:$0xff] }
 0x745   :  { %3377 = vmatpush.bf16.msra.mxu0 %v10381_v37  ;;  %3391 = vmatpush.bf16.msra.mxu1 %v10382_v58  ;;  %v10392_v37 = vld [vmem:[#allocation59_spill] sm:$0xff]  ;;  %v10393_v58 = vld [vmem:[#allocation62_spill] sm:$0xff] }
 0x746   :  { %3405 = vmatpush.bf16.msra.mxu2 %v10383_v56  ;;  %3419 = vmatpush.bf16.msra.mxu3 %v10384_v15  ;;  %v10394_v56 = vld [vmem:[#allocation63_spill] sm:$0xff]  ;;  %v10395_v15 = vld [vmem:[#allocation64_spill] sm:$0xff] }
 0x749   :  { %3378 = vmatpush.bf16.msra.mxu0 %v10385_v11  ;;  %3392 = vmatpush.bf16.msra.mxu1 %v10386_v20  ;;  %v10396_v11 = vld [vmem:[#allocation65_spill] sm:$0xff] }
 0x74a   :  { %3406 = vmatpush.bf16.msra.mxu2 %v10387_v13  ;;  %3420 = vmatpush.bf16.msra.mxu3 %v10388_v5 }
 0x74d   :  { %3379 = vmatpush.bf16.msra.mxu0 %v10389_v63  ;;  %3393 = vmatpush.bf16.msra.mxu1 %v10390_v38 }
 0x74e   :  { %3407 = vmatpush.bf16.msra.mxu2 %v10391_v23  ;;  %3421 = vmatpush.bf16.msra.mxu3 %v10392_v37 }
 0x751   :  { %3380 = vmatpush.bf16.msra.mxu0 %v10393_v58  ;;  %3394 = vmatpush.bf16.msra.mxu1 %v10394_v56 }
 0x752   :  { %3408 = vmatpush.bf16.msra.mxu2 %v10395_v15  ;;  %3422 = vmatpush.bf16.msra.mxu3 %v10396_v11 }
 0x790   :  { %v8895_v20 = vpop.f32.mrf.mxu0  ;;  %v8897_v13 = vpop.f32.mrf.mxu1 }
 0x797   :  { %v8899_v5 = vpop.f32.mrf.mxu2  ;;  %v8901_v63 = vpop.f32.mrf.mxu3 }
 0x798   :  { %v8903_v38 = vpop.f32.mrf.mxu0  ;;  %v8905_v23 = vpop.f32.mrf.mxu1 }
 0x79f   :  { %v8907_v37 = vpop.f32.mrf.mxu2  ;;  %v8909_v58 = vpop.f32.mrf.mxu3 }
 0x7a0   :  { %v3169_v56 = vpop.f32.mrf.mxu0  ;;  %v3183_v15 = vpop.f32.mrf.mxu1 }
 0x7a1   :  { %v3216_v11 = vadd.f32 %v3169_v56, %v10397_v60  ;;  %v3217_v19 = vadd.f32 %v3183_v15, %v10398_v2  ;;  %v10404_v60 = vld [vmem:[#allocation133_spill] sm:$0xff] }
 0x7a2   :  { %v1301_v56 = vadd.f32 %v10404_v60, %v1252_v27 }
 0x7a3   :  { %v3224_v45 = vmul.f32 0.5, %v3216_v11  ;;  %v3232_v17 = vmul.f32 0.5, %v3217_v19  ;;  %v10405_v11 = vld [vmem:[#allocation132_spill] sm:$0xff] }
 0x7a4   :  { %v1350_v57 = vadd.f32 %v10408_v59, %v1301_v56 }
 0x7a5   :  { %5907 = vtanh.f32 %v3224_v45 }
 0x7a6   :  { %5909 = vtanh.f32 %v3232_v17 }
 0x7a7   :  { %v3197_v24 = vpop.f32.mrf.mxu2  ;;  %v3211_v7 = vpop.f32.mrf.mxu3 }
 0x7a8   :  { %v3218_v1 = vadd.f32 %v3197_v24, %v10401_v50  ;;  %v3171_v12 = vpop.f32.mrf.mxu0  ;;  %v3185_v49 = vpop.f32.mrf.mxu1  ;;  %v3219_v26 = vadd.f32 %v3211_v7, %v10405_v11  ;;  %v10407_v50 = vld [vmem:[#allocation130_spill] sm:$0xff] }
 0x7a9   :  { %v3220_v4 = vadd.f32 %v3171_v12, %v10402_v47  ;;  %v3221_v25 = vadd.f32 %v3185_v49, %v10403_v39  ;;  %v1203_v24 = vadd.f32 %v10407_v50, %v10406_v32 }
 0x7aa   :  { %5911 = vtanh.f32 %v3218_v1  ;;  %v3242_v27 = vmul.f32 0.5, %v3219_v26 }
 0x7ab   :  { %v5908_v2 = vpop.eup %5907  ;;  %v3225_v19 = vmul.f32 0.5, %v3220_v4  ;;  %v3233_v45 = vmul.f32 0.5, %v3221_v25 }
 0x7ac   :  { %v5910_v17 = vpop.eup %5909  ;;  %v3228_v15 = vmul.f32 0.5, %v5908_v2 }
 0x7ad   :  { %v3236_v43 = vmul.f32 0.5, %v5910_v17  ;;  %5913 = vtanh.f32 %v3225_v19 }
 0x7ae   :  { %v3230_v47 = vadd.f32 0.5, %v3228_v15  ;;  %5915 = vtanh.f32 %v3233_v45 }
 0x7af   :  { %v3238_v39 = vadd.f32 0.5, %v3236_v43  ;;  %v3199_v49 = vpop.f32.mrf.mxu2  ;;  %v3213_v12 = vpop.f32.mrf.mxu3 }
 0x7b0   :  { %v5912_v1 = vpop.eup %5911  ;;  %v3222_v4 = vadd.f32 %v3199_v49, %v1203_v24  ;;  %v3223_v25 = vadd.f32 %v3213_v12, %v1350_v57 }
 0x7b1   :  { %v3250_v60 = vmul.f32 %v3238_v39, %v8758_v44  ;;  %v3252_v2 = vmul.f32 %v5912_v1, %v3230_v47 }
 0x7b2   :  { %5917 = vtanh.f32 %v3222_v4  ;;  %v3243_v7 = vmul.f32 0.5, %v3223_v25 }
 0x7b3   :  { %v5914_v19 = vpop.eup %5913  ;;  %v8924_v17 = vadd.f32 %v3252_v2, %v3250_v60  ;;  %5919 = vtanh.f32 %v3242_v27  ;;  %v10410_v60 = vld [vmem:[#allocation94_spill] sm:$0xff]  ;;  %v10411_v2 = vld [vmem:[#allocation95_spill] sm:$0xff] }
 0x7b4   :  { %v5916_v11 = vpop.eup %5915  ;;  %v3229_v59 = vmul.f32 0.5, %v5914_v19  ;;  %5921 = vtanh.f32 %v3243_v7  ;;  %v10412_v7 = vld [vmem:[#allocation96_spill] sm:$0xff]  ;;  %v10413_v19 = vld [vmem:[#allocation97_spill] sm:$0xff] }
 0x7b5   :  { %v3237_v56 = vmul.f32 0.5, %v5916_v11  ;;  %5923 = vtanh.f32 %v8924_v17  ;;  %v10414_v11 = vld [vmem:[#allocation99_spill] sm:$0xff] }
 0x7b6   :  { %v3231_v43 = vadd.f32 0.5, %v3229_v59  ;;  %v10415_v59 = vld [vmem:[#allocation101_spill] sm:$0xff] }
 0x7b7   :  { %v3239_v45 = vadd.f32 0.5, %v3237_v56  ;;  %v10416_v56 = vld [vmem:[#allocation102_spill] sm:$0xff] }
 0x7b8   :  { %v5918_v15 = vpop.eup %5917 }
 0x7b9   :  { %v3251_v26 = vmul.f32 %v3239_v45, %v8762_v29  ;;  %v3253_v32 = vmul.f32 %v5918_v15, %v3231_v43  ;;  %v5920_v57 = vpop.eup %5919  ;;  %v10409_v29 = vld [vmem:[#allocation93_spill] sm:$0xff]  ;;  %v10417_v43 = vld [vmem:[#allocation103_spill] sm:$0xff]  ;;  %v3114_v15 = vadd.f32 %v8895_v20, %v10268_v48  ;;  %v3130_v20 = vadd.f32 %v8905_v23, %v10191_v31 }
 0x7ba   :  { %v5922_v50 = vpop.eup %5921  ;;  %v3246_v24 = vmul.f32 0.5, %v5920_v57  ;;  %v10418_v45 = vld [vmem:[#allocation105_spill] sm:$0xff]  ;;  %v3144_v23 = vadd.f32 %v8907_v37, %v10192_v61 }
 0x7bb   :  { %v8928_v44 = vadd.f32 %v3253_v32, %v3251_v26  ;;  %v3247_v47 = vmul.f32 0.5, %v5922_v50  ;;  %v5924_v39 = vpop.eup %5923  ;;  %v3128_v26 = vadd.f32 %v8897_v13, %v10191_v31 }
 0x7bc   :  { %v3248_v49 = vadd.f32 0.5, %v3246_v24 }
 0x7bd   :  { %5925 = vtanh.f32 %v8928_v44  ;;  %v3249_v12 = vadd.f32 0.5, %v3247_v47 }
 0x7be   :  { %v3258_v27 = vmul.f32 %v5924_v39, %v3248_v49  ;;  %v3142_v49 = vadd.f32 %v8899_v5, %v10192_v61 }
 0x7c3   :  { %v5926_v1 = vpop.eup %5925 }
 0x7c4   :  { %v3259_v4 = vmul.f32 %v5926_v1, %v3249_v12  ;;  %v3116_v12 = vadd.f32 %v8903_v38, %v10268_v48 }
 0x7c6   :  { %v8931_v25 = vpack.c.bf16 %v3259_v4, %v3258_v27 }
 0x7c8   :  { %3269 = vmatmul.bf16.vlgmr.msrb.gmra.mxu0 %v8931_v25  ;;  %3283 = vmatmul.bf16.vlgmr.msrb.gmra.mxu1 %v8931_v25 }
 0x7c9   :  { %3297 = vmatmul.bf16.vlgmr.msrb.gmra.mxu2 %v8931_v25  ;;  %3311 = vmatmul.bf16.vlgmr.msrb.gmra.mxu3 %v8931_v25 }
 0x7ca   :  { %3429 = vmatpush.bf16.msrb.mxu0 %v10158_v41  ;;  %3443 = vmatpush.bf16.msrb.mxu1 %v10159_v14 }
 0x7cb   :  { %3457 = vmatpush.bf16.msrb.mxu2 %v10160_v54  ;;  %3471 = vmatpush.bf16.msrb.mxu3 %v10161_v34 }
 0x7ce   :  { %3430 = vmatpush.bf16.msrb.mxu0 %v10162_v35  ;;  %3444 = vmatpush.bf16.msrb.mxu1 %v10241_v6 }
 0x7cf   :  { %3458 = vmatpush.bf16.msrb.mxu2 %v10242_v40  ;;  %3472 = vmatpush.bf16.msrb.mxu3 %v10243_v16 }
 0x7d2   :  { %3431 = vmatpush.bf16.msrb.mxu0 %v10244_v36  ;;  %3445 = vmatpush.bf16.msrb.mxu1 %v10245_v46 }
 0x7d3   :  { %3459 = vmatpush.bf16.msrb.mxu2 %v10246_v18  ;;  %3473 = vmatpush.bf16.msrb.mxu3 %v10247_v42 }
 0x7d6   :  { %3432 = vmatpush.bf16.msrb.mxu0 %v10248_v52  ;;  %3446 = vmatpush.bf16.msrb.mxu1 %v10325_v21 }
 0x7d7   :  { %3460 = vmatpush.bf16.msrb.mxu2 %v10326_v22  ;;  %3474 = vmatpush.bf16.msrb.mxu3 %v10327_v3 }
 0x7da   :  { %3433 = vmatpush.bf16.msrb.mxu0 %v10328_v10  ;;  %3447 = vmatpush.bf16.msrb.mxu1 %v10329_v55 }
 0x7db   :  { %3461 = vmatpush.bf16.msrb.mxu2 %v10330_v51  ;;  %3475 = vmatpush.bf16.msrb.mxu3 %v10331_v28 }
 0x7de   :  { %3434 = vmatpush.bf16.msrb.mxu0 %v10332_v33  ;;  %3448 = vmatpush.bf16.msrb.mxu1 %v10333_v53 }
 0x7df   :  { %3462 = vmatpush.bf16.msrb.mxu2 %v10409_v29  ;;  %3476 = vmatpush.bf16.msrb.mxu3 %v10410_v60 }
 0x7e2   :  { %3435 = vmatpush.bf16.msrb.mxu0 %v10411_v2  ;;  %3449 = vmatpush.bf16.msrb.mxu1 %v10412_v7 }
 0x7e3   :  { %3463 = vmatpush.bf16.msrb.mxu2 %v10413_v19  ;;  %3477 = vmatpush.bf16.msrb.mxu3 %v10414_v11 }
 0x7e6   :  { %3436 = vmatpush.bf16.msrb.mxu0 %v10415_v59  ;;  %3450 = vmatpush.bf16.msrb.mxu1 %v10416_v56 }
 0x7e7   :  { %3464 = vmatpush.bf16.msrb.mxu2 %v10417_v43  ;;  %3478 = vmatpush.bf16.msrb.mxu3 %v10418_v45 }
 0x845   :  { %v3270_v32 = vpop.f32.mrf.mxu0  ;;  %v3284_v57 = vpop.f32.mrf.mxu1 }
 0x846   :  { %v3317_v50 = vadd.f32 %v3270_v32, %v3114_v15  ;;  %v3318_v24 = vadd.f32 %v3284_v57, %v3128_v26  ;;  %v3156_v32 = vadd.f32 %v8901_v63, %v10193_v62 }
 0x848   :  { %v3325_v47 = vmul.f32 0.5, %v3317_v50  ;;  %v3333_v39 = vmul.f32 0.5, %v3318_v24 }
 0x84a   :  { %5927 = vtanh.f32 %v3325_v47 }
 0x84b   :  { %5929 = vtanh.f32 %v3333_v39 }
 0x84c   :  { %v3298_v1 = vpop.f32.mrf.mxu2  ;;  %v3312_v27 = vpop.f32.mrf.mxu3 }
 0x84d   :  { %v3319_v13 = vadd.f32 %v3298_v1, %v3142_v49  ;;  %v3272_v4 = vpop.f32.mrf.mxu0  ;;  %v3286_v45 = vpop.f32.mrf.mxu1  ;;  %v3320_v38 = vadd.f32 %v3312_v27, %v3156_v32  ;;  %v3158_v49 = vadd.f32 %v8909_v58, %v10193_v62 }
 0x84e   :  { %v3321_v15 = vadd.f32 %v3272_v4, %v3116_v12  ;;  %v3322_v26 = vadd.f32 %v3286_v45, %v3130_v20 }
 0x84f   :  { %5931 = vtanh.f32 %v3319_v13  ;;  %v3343_v13 = vmul.f32 0.5, %v3320_v38 }
 0x850   :  { %v5928_v57 = vpop.eup %5927  ;;  %v3326_v5 = vmul.f32 0.5, %v3321_v15  ;;  %v3334_v50 = vmul.f32 0.5, %v3322_v26 }
 0x851   :  { %v5930_v24 = vpop.eup %5929  ;;  %v3329_v47 = vmul.f32 0.5, %v5928_v57 }
 0x852   :  { %v3337_v39 = vmul.f32 0.5, %v5930_v24  ;;  %5933 = vtanh.f32 %v3326_v5 }
 0x853   :  { %v3331_v12 = vadd.f32 0.5, %v3329_v47  ;;  %5935 = vtanh.f32 %v3334_v50 }
 0x854   :  { %v3339_v45 = vadd.f32 0.5, %v3337_v39  ;;  %v3300_v20 = vpop.f32.mrf.mxu2  ;;  %v3314_v63 = vpop.f32.mrf.mxu3 }
 0x855   :  { %v5932_v1 = vpop.eup %5931  ;;  %v3323_v4 = vadd.f32 %v3300_v20, %v3144_v23  ;;  %v3324_v15 = vadd.f32 %v3314_v63, %v3158_v49 }
 0x856   :  { %v3351_v26 = vmul.f32 %v3339_v45, %v8820_v9  ;;  %v3353_v27 = vmul.f32 %v5932_v1, %v3331_v12 }
 0x857   :  { %5937 = vtanh.f32 %v3323_v4  ;;  %v3344_v32 = vmul.f32 0.5, %v3324_v15 }
 0x858   :  { %v5934_v57 = vpop.eup %5933  ;;  %v8986_v5 = vadd.f32 %v3353_v27, %v3351_v26  ;;  %5939 = vtanh.f32 %v3343_v13 }
 0x859   :  { %v5936_v37 = vpop.eup %5935  ;;  %v3330_v58 = vmul.f32 0.5, %v5934_v57  ;;  %5941 = vtanh.f32 %v3344_v32  ;;  %v10422_v32 = vld [vmem:[#allocation154_spill] sm:$0xff]  ;;  %v10423_v57 = vld [vmem:[#allocation155_spill] sm:$0xff] }
 0x85a   :  { %10419 = vst [vmem:[#allocation177_spill] sm:$0xff] %v8986_v5  ;;  %v3338_v24 = vmul.f32 0.5, %v5936_v37  ;;  %5943 = vtanh.f32 %v8986_v5  ;;  %v10424_v37 = vld [vmem:[#allocation156_spill] sm:$0xff] }
 0x85b   :  { %v3332_v50 = vadd.f32 0.5, %v3330_v58  ;;  %v10425_v58 = vld [vmem:[#allocation157_spill] sm:$0xff] }
 0x85c   :  { %v3340_v47 = vadd.f32 0.5, %v3338_v24  ;;  %v10426_v24 = vld [vmem:[#allocation158_spill] sm:$0xff] }
 0x85d   :  { %v5938_v39 = vpop.eup %5937 }
 0x85e   :  { %v3352_v38 = vmul.f32 %v3340_v47, %v8824_v30  ;;  %v3354_v23 = vmul.f32 %v5938_v39, %v3332_v50  ;;  %v5940_v49 = vpop.eup %5939  ;;  %v10421_v30 = vld [vmem:[#allocation152_spill] sm:$0xff]  ;;  %v10427_v50 = vld [vmem:[#allocation161_spill] sm:$0xff]  ;;  %v10428_v47 = vld [vmem:[#allocation162_spill] sm:$0xff] }
 0x85f   :  { %v5942_v20 = vpop.eup %5941  ;;  %v3347_v12 = vmul.f32 0.5, %v5940_v49  ;;  %v10429_v39 = vld [vmem:[#allocation163_spill] sm:$0xff]  ;;  %v10432_v49 = vld [vmem:[#allocation166_spill] sm:$0xff] }
 0x860   :  { %v8990_v9 = vadd.f32 %v3354_v23, %v3352_v38  ;;  %v3348_v45 = vmul.f32 0.5, %v5942_v20  ;;  %v5944_v63 = vpop.eup %5943  ;;  %v10430_v38 = vld [vmem:[#allocation164_spill] sm:$0xff]  ;;  %v10431_v23 = vld [vmem:[#allocation165_spill] sm:$0xff]  ;;  %v10433_v20 = vld [vmem:[#allocation167_spill] sm:$0xff] }
 0x861   :  { %v3349_v1 = vadd.f32 0.5, %v3347_v12  ;;  %v10434_v12 = vld [vmem:[#allocation168_spill] sm:$0xff] }
 0x862   :  { %10420 = vst [vmem:[#allocation3_spill] sm:$0xff] %v8990_v9  ;;  %5945 = vtanh.f32 %v8990_v9  ;;  %v3350_v13 = vadd.f32 0.5, %v3348_v45  ;;  %v10435_v45 = vld [vmem:[#allocation169_spill] sm:$0xff]  ;;  %v10492_v9 = vld [vmem:[#allocation12_spill] sm:$0xff] }
 0x863   :  { %v3359_v15 = vmul.f32 %v5944_v63, %v3349_v1  ;;  %v10436_v63 = vld [vmem:[#allocation170_spill] sm:$0xff]  ;;  %v10437_v1 = vld [vmem:[#allocation171_spill] sm:$0xff] }
 0x868   :  { %v5946_v4 = vpop.eup %5945 }
 0x869   :  { %v3360_v26 = vmul.f32 %v5946_v4, %v3350_v13  ;;  %v10438_v13 = vld [vmem:[#allocation172_spill] sm:$0xff]  ;;  %v10439_v4 = vld [vmem:[#allocation173_spill] sm:$0xff] }
 0x86b   :  { %v3372_v27 = vpack.c.bf16 %v3360_v26, %v3359_v15  ;;  %v10440_v15 = vld [vmem:[#allocation174_spill] sm:$0xff]  ;;  %v10441_v26 = vld [vmem:[#allocation175_spill] sm:$0xff] }
 0x86d   :  { %3381 = vmatmul.bf16.vlgmr.msra.gmra.mxu0 %v3372_v27  ;;  %3395 = vmatmul.bf16.vlgmr.msra.gmra.mxu1 %v3372_v27 }
 0x86e   :  { %3409 = vmatmul.bf16.vlgmr.msra.gmra.mxu2 %v3372_v27  ;;  %3423 = vmatmul.bf16.vlgmr.msra.gmra.mxu3 %v3372_v27  ;;  %v10442_v27 = vld [vmem:[#allocation176_spill] sm:$0xff] }
 0x86f   :  { %3530 = vmatpush.bf16.msra.mxu0 %v10119_v8  ;;  %3544 = vmatpush.bf16.msra.mxu1 %v10120_v0 }
 0x870   :  { %3558 = vmatpush.bf16.msra.mxu2 %v10421_v30  ;;  %3572 = vmatpush.bf16.msra.mxu3 %v10422_v32  ;;  %v10491_v32 = vld [vmem:[#allocation135_spill] sm:$0xff] }
 0x873   :  { %3531 = vmatpush.bf16.msra.mxu0 %v10423_v57  ;;  %3545 = vmatpush.bf16.msra.mxu1 %v10424_v37  ;;  %v10490_v37 = vld [vmem:[#allocation137_spill] sm:$0xff] }
 0x874   :  { %3559 = vmatpush.bf16.msra.mxu2 %v10425_v58  ;;  %3573 = vmatpush.bf16.msra.mxu3 %v10426_v24  ;;  %v10489_v58 = vld [vmem:[#allocation110_spill] sm:$0xff] }
 0x875   :  { %v1257_v57 = vadd.f32 %v10490_v37, %v10489_v58  ;;  %v10496_v37 = vld [vmem:[#allocation80_spill] sm:$0xff] }
 0x876   :  { %v10498_v58 = vld [vmem:[#allocation140_spill] sm:$0xff] }
 0x877   :  { %3532 = vmatpush.bf16.msra.mxu0 %v10427_v50  ;;  %3546 = vmatpush.bf16.msra.mxu1 %v10428_v47 }
 0x878   :  { %3560 = vmatpush.bf16.msra.mxu2 %v10429_v39  ;;  %3574 = vmatpush.bf16.msra.mxu3 %v10430_v38 }
 0x87b   :  { %3533 = vmatpush.bf16.msra.mxu0 %v10431_v23  ;;  %3547 = vmatpush.bf16.msra.mxu1 %v10432_v49  ;;  %v10487_v49 = vld [vmem:[#allocation11_spill] sm:$0xff]  ;;  %v10488_v23 = vld [vmem:[#allocation61_spill] sm:$0xff] }
 0x87c   :  { %3561 = vmatpush.bf16.msra.mxu2 %v10433_v20  ;;  %3575 = vmatpush.bf16.msra.mxu3 %v10434_v12  ;;  %v10443_v12 = vld [vmem:[#allocation178_spill] sm:$0xff]  ;;  %v10444_v20 = vld [vmem:[#allocation179_spill] sm:$0xff] }
 0x87d   :  { %3437 = vmatmul.bf16.vlgmr.msrb.gmra.mxu0 %v8931_v25  ;;  %3451 = vmatmul.bf16.vlgmr.msrb.gmra.mxu1 %v8931_v25 }
 0x87e   :  { %3465 = vmatmul.bf16.vlgmr.msrb.gmra.mxu2 %v8931_v25  ;;  %3479 = vmatmul.bf16.vlgmr.msrb.gmra.mxu3 %v8931_v25  ;;  %v10445_v25 = vld [vmem:[#allocation180_spill] sm:$0xff] }
 0x87f   :  { %3534 = vmatpush.bf16.msra.mxu0 %v10435_v45  ;;  %3548 = vmatpush.bf16.msra.mxu1 %v10436_v63  ;;  %v10446_v45 = vld [vmem:[#allocation181_spill] sm:$0xff]  ;;  %v10447_v63 = vld [vmem:[#allocation182_spill] sm:$0xff] }
 0x880   :  { %3562 = vmatpush.bf16.msra.mxu2 %v10437_v1  ;;  %3576 = vmatpush.bf16.msra.mxu3 %v10438_v13  ;;  %v10448_v1 = vld [vmem:[#allocation183_spill] sm:$0xff]  ;;  %v10449_v13 = vld [vmem:[#allocation184_spill] sm:$0xff] }
 0x883   :  { %3535 = vmatpush.bf16.msra.mxu0 %v10439_v4  ;;  %3549 = vmatpush.bf16.msra.mxu1 %v10440_v15  ;;  %v10450_v4 = vld [vmem:[#allocation185_spill] sm:$0xff] }
 0x884   :  { %3563 = vmatpush.bf16.msra.mxu2 %v10441_v26  ;;  %3577 = vmatpush.bf16.msra.mxu3 %v10442_v27  ;;  %v10451_v15 = vld [vmem:[#allocation13_spill] sm:$0xff]  ;;  %v10452_v26 = vld [vmem:[#allocation14_spill] sm:$0xff]  ;;  %v10453_v27 = vld [vmem:[#allocation15_spill] sm:$0xff] }
 0x887   :  { %3536 = vmatpush.bf16.msra.mxu0 %v10443_v12  ;;  %3550 = vmatpush.bf16.msra.mxu1 %v10444_v20  ;;  %v10454_v12 = vld [vmem:[#allocation17_spill] sm:$0xff]  ;;  %v10455_v20 = vld [vmem:[#allocation20_spill] sm:$0xff] }
 0x888   :  { %3564 = vmatpush.bf16.msra.mxu2 %v10445_v25  ;;  %3578 = vmatpush.bf16.msra.mxu3 %v10446_v45  ;;  %v10456_v25 = vld [vmem:[#allocation21_spill] sm:$0xff]  ;;  %v10457_v45 = vld [vmem:[#allocation22_spill] sm:$0xff] }
 0x88b   :  { %3537 = vmatpush.bf16.msra.mxu0 %v10447_v63  ;;  %3551 = vmatpush.bf16.msra.mxu1 %v10448_v1  ;;  %v10458_v63 = vld [vmem:[#allocation25_spill] sm:$0xff] }
 0x88c   :  { %3565 = vmatpush.bf16.msra.mxu2 %v10449_v13  ;;  %3579 = vmatpush.bf16.msra.mxu3 %v10450_v4  ;;  %v10459_v1 = vld [vmem:[#allocation29_spill] sm:$0xff]  ;;  %v10460_v13 = vld [vmem:[#allocation30_spill] sm:$0xff]  ;;  %v10461_v4 = vld [vmem:[#allocation31_spill] sm:$0xff] }
 0x88f   :  { %3642 = vmatpush.bf16.msrb.mxu0 %v10451_v15  ;;  %3656 = vmatpush.bf16.msrb.mxu1 %v10452_v26  ;;  %v10462_v15 = vld [vmem:[#allocation32_spill] sm:$0xff]  ;;  %v10463_v26 = vld [vmem:[#allocation34_spill] sm:$0xff] }
 0x890   :  { %3670 = vmatpush.bf16.msrb.mxu2 %v10453_v27  ;;  %3684 = vmatpush.bf16.msrb.mxu3 %v10454_v12  ;;  %v10464_v27 = vld [vmem:[#allocation35_spill] sm:$0xff]  ;;  %v10465_v12 = vld [vmem:[#allocation36_spill] sm:$0xff] }
 0x893   :  { %3643 = vmatpush.bf16.msrb.mxu0 %v10455_v20  ;;  %3657 = vmatpush.bf16.msrb.mxu1 %v10456_v25  ;;  %v10466_v20 = vld [vmem:[#allocation38_spill] sm:$0xff]  ;;  %v10467_v25 = vld [vmem:[#allocation41_spill] sm:$0xff] }
 0x894   :  { %3671 = vmatpush.bf16.msrb.mxu2 %v10457_v45  ;;  %3685 = vmatpush.bf16.msrb.mxu3 %v10458_v63  ;;  %v10468_v45 = vld [vmem:[#allocation42_spill] sm:$0xff]  ;;  %v10469_v63 = vld [vmem:[#allocation43_spill] sm:$0xff] }
 0x897   :  { %3644 = vmatpush.bf16.msrb.mxu0 %v10459_v1  ;;  %3658 = vmatpush.bf16.msrb.mxu1 %v10460_v13  ;;  %v10470_v1 = vld [vmem:[#allocation45_spill] sm:$0xff]  ;;  %v10471_v13 = vld [vmem:[#allocation48_spill] sm:$0xff] }
 0x898   :  { %3672 = vmatpush.bf16.msrb.mxu2 %v10461_v4  ;;  %3686 = vmatpush.bf16.msrb.mxu3 %v10462_v15  ;;  %v10472_v4 = vld [vmem:[#allocation49_spill] sm:$0xff]  ;;  %v10473_v15 = vld [vmem:[#allocation50_spill] sm:$0xff] }
 0x89b   :  { %3645 = vmatpush.bf16.msrb.mxu0 %v10463_v26  ;;  %3659 = vmatpush.bf16.msrb.mxu1 %v10464_v27  ;;  %v10474_v26 = vld [vmem:[#allocation52_spill] sm:$0xff]  ;;  %v10475_v27 = vld [vmem:[#allocation55_spill] sm:$0xff] }
 0x89c   :  { %3673 = vmatpush.bf16.msrb.mxu2 %v10465_v12  ;;  %3687 = vmatpush.bf16.msrb.mxu3 %v10466_v20  ;;  %v10476_v12 = vld [vmem:[#allocation56_spill] sm:$0xff]  ;;  %v10477_v20 = vld [vmem:[#allocation57_spill] sm:$0xff] }
 0x89f   :  { %3646 = vmatpush.bf16.msrb.mxu0 %v10467_v25  ;;  %3660 = vmatpush.bf16.msrb.mxu1 %v10468_v45  ;;  %v10478_v25 = vld [vmem:[#allocation59_spill] sm:$0xff]  ;;  %v10479_v45 = vld [vmem:[#allocation62_spill] sm:$0xff] }
 0x8a0   :  { %3674 = vmatpush.bf16.msrb.mxu2 %v10469_v63  ;;  %3688 = vmatpush.bf16.msrb.mxu3 %v10470_v1  ;;  %v10480_v63 = vld [vmem:[#allocation63_spill] sm:$0xff]  ;;  %v10481_v1 = vld [vmem:[#allocation64_spill] sm:$0xff] }
 0x8a3   :  { %3647 = vmatpush.bf16.msrb.mxu0 %v10471_v13  ;;  %3661 = vmatpush.bf16.msrb.mxu1 %v10472_v4  ;;  %v10482_v13 = vld [vmem:[#allocation65_spill] sm:$0xff] }
 0x8a4   :  { %3675 = vmatpush.bf16.msrb.mxu2 %v10473_v15  ;;  %3689 = vmatpush.bf16.msrb.mxu3 %v10474_v26 }
 0x8a7   :  { %3648 = vmatpush.bf16.msrb.mxu0 %v10475_v27  ;;  %3662 = vmatpush.bf16.msrb.mxu1 %v10476_v12 }
 0x8a8   :  { %3676 = vmatpush.bf16.msrb.mxu2 %v10477_v20  ;;  %3690 = vmatpush.bf16.msrb.mxu3 %v10478_v25 }
 0x8ab   :  { %3649 = vmatpush.bf16.msrb.mxu0 %v10479_v45  ;;  %3663 = vmatpush.bf16.msrb.mxu1 %v10480_v63 }
 0x8ac   :  { %3677 = vmatpush.bf16.msrb.mxu2 %v10481_v1  ;;  %3691 = vmatpush.bf16.msrb.mxu3 %v10482_v13 }
 0x8ea   :  { %v9061_v4 = vpop.f32.mrf.mxu0  ;;  %v9063_v15 = vpop.f32.mrf.mxu1 }
 0x8f1   :  { %v9065_v26 = vpop.f32.mrf.mxu2  ;;  %v9067_v27 = vpop.f32.mrf.mxu3 }
 0x8f2   :  { %10483 = vst [vmem:[#allocation33_spill] sm:$0xff] %v9067_v27  ;;  %v9069_v12 = vpop.f32.mrf.mxu0  ;;  %v9071_v20 = vpop.f32.mrf.mxu1 }
 0x8f3   :  { %10484 = vst [vmem:[#allocation113_spill] sm:$0xff] %v9071_v20 }
 0x8f9   :  { %v9073_v25 = vpop.f32.mrf.mxu2  ;;  %v9075_v45 = vpop.f32.mrf.mxu3 }
 0x8fa   :  { %10485 = vst [vmem:[#allocation111_spill] sm:$0xff] %v9073_v25  ;;  %v3438_v63 = vpop.f32.mrf.mxu0  ;;  %v3452_v1 = vpop.f32.mrf.mxu1 }
 0x8fb   :  { %10486 = vst [vmem:[#allocation4_spill] sm:$0xff] %v9075_v45  ;;  %v3485_v13 = vadd.f32 %v3438_v63, %v10487_v49  ;;  %v3486_v38 = vadd.f32 %v3452_v1, %v10488_v23  ;;  %v10493_v45 = vld [vmem:[#allocation74_spill] sm:$0xff]  ;;  %v10494_v49 = vld [vmem:[#allocation139_spill] sm:$0xff] }
 0x8fc   :  { %v1306_v63 = vadd.f32 %v10494_v49, %v1257_v57 }
 0x8fd   :  { %v3493_v39 = vmul.f32 0.5, %v3485_v13  ;;  %v3501_v47 = vmul.f32 0.5, %v3486_v38  ;;  %v10495_v13 = vld [vmem:[#allocation138_spill] sm:$0xff] }
 0x8fe   :  { %v1355_v20 = vadd.f32 %v10498_v58, %v1306_v63 }
 0x8ff   :  { %5947 = vtanh.f32 %v3493_v39 }
 0x900   :  { %5949 = vtanh.f32 %v3501_v47 }
 0x901   :  { %v3466_v50 = vpop.f32.mrf.mxu2  ;;  %v3480_v24 = vpop.f32.mrf.mxu3 }
 0x902   :  { %v3487_v30 = vadd.f32 %v3466_v50, %v10491_v32  ;;  %v3440_v0 = vpop.f32.mrf.mxu0  ;;  %v3454_v8 = vpop.f32.mrf.mxu1  ;;  %v3488_v27 = vadd.f32 %v3480_v24, %v10495_v13  ;;  %v10497_v32 = vld [vmem:[#allocation136_spill] sm:$0xff] }
 0x903   :  { %v3489_v5 = vadd.f32 %v3440_v0, %v10492_v9  ;;  %v3490_v25 = vadd.f32 %v3454_v8, %v10493_v45  ;;  %v1208_v50 = vadd.f32 %v10497_v32, %v10496_v37 }
 0x904   :  { %5951 = vtanh.f32 %v3487_v30  ;;  %v3511_v45 = vmul.f32 0.5, %v3488_v27 }
 0x905   :  { %v5948_v23 = vpop.eup %5947  ;;  %v3494_v38 = vmul.f32 0.5, %v3489_v5  ;;  %v3502_v39 = vmul.f32 0.5, %v3490_v25 }
 0x906   :  { %v5950_v47 = vpop.eup %5949  ;;  %v3497_v1 = vmul.f32 0.5, %v5948_v23 }
 0x907   :  { %v3505_v62 = vmul.f32 0.5, %v5950_v47  ;;  %5953 = vtanh.f32 %v3494_v38 }
 0x908   :  { %v3499_v0 = vadd.f32 0.5, %v3497_v1  ;;  %5955 = vtanh.f32 %v3502_v39 }
 0x909   :  { %v3507_v8 = vadd.f32 0.5, %v3505_v62  ;;  %v3468_v9 = vpop.f32.mrf.mxu2  ;;  %v3482_v57 = vpop.f32.mrf.mxu3 }
 0x90a   :  { %v5952_v30 = vpop.eup %5951  ;;  %v3491_v5 = vadd.f32 %v3468_v9, %v1208_v50  ;;  %v3492_v25 = vadd.f32 %v3482_v57, %v1355_v20 }
 0x90b   :  { %v3519_v49 = vmul.f32 %v3507_v8, %v8924_v17  ;;  %v3521_v23 = vmul.f32 %v5952_v30, %v3499_v0 }
 0x90c   :  { %5957 = vtanh.f32 %v3491_v5  ;;  %v3512_v24 = vmul.f32 0.5, %v3492_v25 }
 0x90d   :  { %v5954_v38 = vpop.eup %5953  ;;  %v9090_v47 = vadd.f32 %v3521_v23, %v3519_v49  ;;  %5959 = vtanh.f32 %v3511_v45  ;;  %v3383_v49 = vadd.f32 %v9061_v4, %v10268_v48  ;;  %v3397_v23 = vadd.f32 %v9063_v15, %v10191_v31 }
 0x90e   :  { %v5956_v13 = vpop.eup %5955  ;;  %v3498_v58 = vmul.f32 0.5, %v5954_v38  ;;  %5961 = vtanh.f32 %v3512_v24 }
 0x90f   :  { %v3506_v63 = vmul.f32 0.5, %v5956_v13  ;;  %5963 = vtanh.f32 %v9090_v47 }
 0x910   :  { %v3500_v62 = vadd.f32 0.5, %v3498_v58 }
 0x911   :  { %v3508_v39 = vadd.f32 0.5, %v3506_v63 }
 0x912   :  { %v5958_v1 = vpop.eup %5957 }
 0x913   :  { %v3520_v27 = vmul.f32 %v3508_v39, %v8928_v44  ;;  %v3522_v37 = vmul.f32 %v5958_v1, %v3500_v62  ;;  %v5960_v20 = vpop.eup %5959  ;;  %v10499_v44 = vld [vmem:[#allocation105_spill] sm:$0xff]  ;;  %v3411_v39 = vadd.f32 %v9065_v26, %v10192_v61  ;;  %v3385_v1 = vadd.f32 %v9069_v12, %v10268_v48 }
 0x914   :  { %v5962_v32 = vpop.eup %5961  ;;  %v3515_v50 = vmul.f32 0.5, %v5960_v20 }
 0x915   :  { %v9094_v17 = vadd.f32 %v3522_v37, %v3520_v27  ;;  %v3516_v0 = vmul.f32 0.5, %v5962_v32  ;;  %v5964_v8 = vpop.eup %5963  ;;  %v10500_v27 = vld [vmem:[#allocation113_spill] sm:$0xff] }
 0x916   :  { %v3517_v9 = vadd.f32 0.5, %v3515_v50  ;;  %v3399_v4 = vadd.f32 %v10500_v27, %v10191_v31 }
 0x917   :  { %5965 = vtanh.f32 %v9094_v17  ;;  %v3518_v57 = vadd.f32 0.5, %v3516_v0 }
 0x918   :  { %v3527_v45 = vmul.f32 %v5964_v8, %v3517_v9  ;;  %v10501_v9 = vld [vmem:[#allocation190_spill] sm:$0xff] }
 0x91d   :  { %v5966_v30 = vpop.eup %5965 }
 0x91e   :  { %v3528_v5 = vmul.f32 %v5966_v30, %v3518_v57  ;;  %v10502_v57 = vld [vmem:[#allocation33_spill] sm:$0xff] }
 0x91f   :  { %v3425_v30 = vadd.f32 %v10502_v57, %v10501_v9 }
 0x920   :  { %v9097_v25 = vpack.c.bf16 %v3528_v5, %v3527_v45 }
 0x922   :  { %3538 = vmatmul.bf16.vlgmr.msra.gmra.mxu0 %v9097_v25  ;;  %3552 = vmatmul.bf16.vlgmr.msra.gmra.mxu1 %v9097_v25 }
 0x923   :  { %3566 = vmatmul.bf16.vlgmr.msra.gmra.mxu2 %v9097_v25  ;;  %3580 = vmatmul.bf16.vlgmr.msra.gmra.mxu3 %v9097_v25 }
 0x924   :  { %3698 = vmatpush.bf16.msra.mxu0 %v10158_v41  ;;  %3712 = vmatpush.bf16.msra.mxu1 %v10159_v14 }
 0x925   :  { %3726 = vmatpush.bf16.msra.mxu2 %v10160_v54  ;;  %3740 = vmatpush.bf16.msra.mxu3 %v10161_v34 }
 0x928   :  { %3699 = vmatpush.bf16.msra.mxu0 %v10162_v35  ;;  %3713 = vmatpush.bf16.msra.mxu1 %v10241_v6 }
 0x929   :  { %3727 = vmatpush.bf16.msra.mxu2 %v10242_v40  ;;  %3741 = vmatpush.bf16.msra.mxu3 %v10243_v16 }
 0x92c   :  { %3700 = vmatpush.bf16.msra.mxu0 %v10244_v36  ;;  %3714 = vmatpush.bf16.msra.mxu1 %v10245_v46 }
 0x92d   :  { %3728 = vmatpush.bf16.msra.mxu2 %v10246_v18  ;;  %3742 = vmatpush.bf16.msra.mxu3 %v10247_v42 }
 0x930   :  { %3701 = vmatpush.bf16.msra.mxu0 %v10248_v52  ;;  %3715 = vmatpush.bf16.msra.mxu1 %v10325_v21 }
 0x931   :  { %3729 = vmatpush.bf16.msra.mxu2 %v10326_v22  ;;  %3743 = vmatpush.bf16.msra.mxu3 %v10327_v3 }
 0x934   :  { %3702 = vmatpush.bf16.msra.mxu0 %v10328_v10  ;;  %3716 = vmatpush.bf16.msra.mxu1 %v10329_v55 }
 0x935   :  { %3730 = vmatpush.bf16.msra.mxu2 %v10330_v51  ;;  %3744 = vmatpush.bf16.msra.mxu3 %v10331_v28 }
 0x938   :  { %3703 = vmatpush.bf16.msra.mxu0 %v10332_v33  ;;  %3717 = vmatpush.bf16.msra.mxu1 %v10333_v53 }
 0x939   :  { %3731 = vmatpush.bf16.msra.mxu2 %v10409_v29  ;;  %3745 = vmatpush.bf16.msra.mxu3 %v10410_v60 }
 0x93c   :  { %3704 = vmatpush.bf16.msra.mxu0 %v10411_v2  ;;  %3718 = vmatpush.bf16.msra.mxu1 %v10412_v7 }
 0x93d   :  { %3732 = vmatpush.bf16.msra.mxu2 %v10413_v19  ;;  %3746 = vmatpush.bf16.msra.mxu3 %v10414_v11 }
 0x940   :  { %3705 = vmatpush.bf16.msra.mxu0 %v10415_v59  ;;  %3719 = vmatpush.bf16.msra.mxu1 %v10416_v56 }
 0x941   :  { %3733 = vmatpush.bf16.msra.mxu2 %v10417_v43  ;;  %3747 = vmatpush.bf16.msra.mxu3 %v10499_v44 }
 0x99f   :  { %v3539_v24 = vpop.f32.mrf.mxu0  ;;  %v3553_v38 = vpop.f32.mrf.mxu1 }
 0x9a0   :  { %v3586_v13 = vadd.f32 %v3539_v24, %v3383_v49  ;;  %v3587_v58 = vadd.f32 %v3553_v38, %v3397_v23  ;;  %v10503_v38 = vld [vmem:[#allocation111_spill] sm:$0xff] }
 0x9a2   :  { %v3594_v63 = vmul.f32 0.5, %v3586_v13  ;;  %v3602_v62 = vmul.f32 0.5, %v3587_v58  ;;  %v3413_v13 = vadd.f32 %v10503_v38, %v10192_v61  ;;  %v10504_v58 = vld [vmem:[#allocation4_spill] sm:$0xff]  ;;  %v10507_v38 = vld [vmem:[#allocation3_spill] sm:$0xff] }
 0x9a4   :  { %5967 = vtanh.f32 %v3594_v63  ;;  %v3427_v63 = vadd.f32 %v10504_v58, %v10501_v9  ;;  %v10588_v9 = vld [vmem:[#allocation143_spill] sm:$0xff] }
 0x9a5   :  { %5969 = vtanh.f32 %v3602_v62 }
 0x9a6   :  { %v3567_v37 = vpop.f32.mrf.mxu2  ;;  %v3581_v20 = vpop.f32.mrf.mxu3 }
 0x9a7   :  { %v3588_v15 = vadd.f32 %v3567_v37, %v3411_v39  ;;  %v3541_v32 = vpop.f32.mrf.mxu0  ;;  %v3555_v50 = vpop.f32.mrf.mxu1  ;;  %v3589_v12 = vadd.f32 %v3581_v20, %v3425_v30 }
 0x9a8   :  { %v3590_v0 = vadd.f32 %v3541_v32, %v3385_v1  ;;  %v3591_v8 = vadd.f32 %v3555_v50, %v3399_v4  ;;  %v10505_v50 = vld [vmem:[#allocation177_spill] sm:$0xff] }
 0x9a9   :  { %5971 = vtanh.f32 %v3588_v15  ;;  %v3612_v37 = vmul.f32 0.5, %v3589_v12 }
 0x9aa   :  { %v5968_v45 = vpop.eup %5967  ;;  %v3595_v26 = vmul.f32 0.5, %v3590_v0  ;;  %v3603_v5 = vmul.f32 0.5, %v3591_v8 }
 0x9ab   :  { %v5970_v49 = vpop.eup %5969  ;;  %v3598_v23 = vmul.f32 0.5, %v5968_v45 }
 0x9ac   :  { %v3606_v24 = vmul.f32 0.5, %v5970_v49  ;;  %5973 = vtanh.f32 %v3595_v26 }
 0x9ad   :  { %v3600_v62 = vadd.f32 0.5, %v3598_v23  ;;  %5975 = vtanh.f32 %v3603_v5 }
 0x9ae   :  { %v3608_v39 = vadd.f32 0.5, %v3606_v24  ;;  %v3569_v1 = vpop.f32.mrf.mxu2  ;;  %v3583_v27 = vpop.f32.mrf.mxu3 }
 0x9af   :  { %v5972_v4 = vpop.eup %5971  ;;  %v3592_v15 = vadd.f32 %v3569_v1, %v3413_v13  ;;  %v3593_v32 = vadd.f32 %v3583_v27, %v3427_v63 }
 0x9b0   :  { %v3620_v0 = vmul.f32 %v3608_v39, %v10505_v50  ;;  %v3622_v20 = vmul.f32 %v5972_v4, %v3600_v62 }
 0x9b1   :  { %5977 = vtanh.f32 %v3592_v15  ;;  %v3613_v8 = vmul.f32 0.5, %v3593_v32 }
 0x9b2   :  { %v5974_v57 = vpop.eup %5973  ;;  %v9152_v30 = vadd.f32 %v3622_v20, %v3620_v0  ;;  %5979 = vtanh.f32 %v3612_v37  ;;  %v10509_v20 = vld [vmem:[#allocation149_spill] sm:$0xff] }
 0x9b3   :  { %v5976_v45 = vpop.eup %5975  ;;  %v3599_v26 = vmul.f32 0.5, %v5974_v57  ;;  %5981 = vtanh.f32 %v3613_v8  ;;  %v10510_v8 = vld [vmem:[#allocation151_spill] sm:$0xff]  ;;  %v10511_v57 = vld [vmem:[#allocation152_spill] sm:$0xff] }
 0x9b4   :  { %10506 = vst [vmem:[#allocation37_spill] sm:$0xff] %v9152_v30  ;;  %v3607_v49 = vmul.f32 0.5, %v5976_v45  ;;  %5983 = vtanh.f32 %v9152_v30  ;;  %v10512_v45 = vld [vmem:[#allocation154_spill] sm:$0xff]  ;;  %v10585_v30 = vld [vmem:[#allocation28_spill] sm:$0xff] }
 0x9b5   :  { %v3601_v5 = vadd.f32 0.5, %v3599_v26  ;;  %v10513_v26 = vld [vmem:[#allocation155_spill] sm:$0xff] }
 0x9b6   :  { %v3609_v23 = vadd.f32 0.5, %v3607_v49  ;;  %v10514_v49 = vld [vmem:[#allocation156_spill] sm:$0xff] }
 0x9b7   :  { %v5978_v24 = vpop.eup %5977 }
 0x9b8   :  { %v3621_v12 = vmul.f32 %v3609_v23, %v10507_v38  ;;  %v3623_v13 = vmul.f32 %v5978_v24, %v3601_v5  ;;  %v5980_v58 = vpop.eup %5979  ;;  %v10515_v5 = vld [vmem:[#allocation157_spill] sm:$0xff]  ;;  %v10516_v23 = vld [vmem:[#allocation158_spill] sm:$0xff] }
 0x9b9   :  { %v5982_v63 = vpop.eup %5981  ;;  %v3616_v39 = vmul.f32 0.5, %v5980_v58  ;;  %v10517_v24 = vld [vmem:[#allocation161_spill] sm:$0xff]  ;;  %v10518_v38 = vld [vmem:[#allocation162_spill] sm:$0xff] }
 0x9ba   :  { %v9156_v62 = vadd.f32 %v3623_v13, %v3621_v12  ;;  %v3617_v1 = vmul.f32 0.5, %v5982_v63  ;;  %v5984_v27 = vpop.eup %5983  ;;  %v10519_v12 = vld [vmem:[#allocation163_spill] sm:$0xff]  ;;  %v10520_v13 = vld [vmem:[#allocation164_spill] sm:$0xff]  ;;  %v10521_v58 = vld [vmem:[#allocation165_spill] sm:$0xff] }
 0x9bb   :  { %v3618_v4 = vadd.f32 0.5, %v3616_v39  ;;  %v10522_v63 = vld [vmem:[#allocation166_spill] sm:$0xff]  ;;  %v10523_v39 = vld [vmem:[#allocation167_spill] sm:$0xff] }
 0x9bc   :  { %10508 = vst [vmem:[#allocation115_spill] sm:$0xff] %v9156_v62  ;;  %5985 = vtanh.f32 %v9156_v62  ;;  %v3619_v37 = vadd.f32 0.5, %v3617_v1  ;;  %v10524_v1 = vld [vmem:[#allocation168_spill] sm:$0xff] }
 0x9bd   :  { %v3628_v32 = vmul.f32 %v5984_v27, %v3618_v4  ;;  %v10525_v27 = vld [vmem:[#allocation169_spill] sm:$0xff]  ;;  %v10526_v4 = vld [vmem:[#allocation170_spill] sm:$0xff] }
 0x9c2   :  { %v5986_v15 = vpop.eup %5985 }
 0x9c3   :  { %v3629_v50 = vmul.f32 %v5986_v15, %v3619_v37  ;;  %v10527_v37 = vld [vmem:[#allocation171_spill] sm:$0xff]  ;;  %v10528_v15 = vld [vmem:[#allocation172_spill] sm:$0xff] }
 0x9c5   :  { %v3641_v0 = vpack.c.bf16 %v3629_v50, %v3628_v32  ;;  %v10529_v32 = vld [vmem:[#allocation173_spill] sm:$0xff]  ;;  %v10530_v50 = vld [vmem:[#allocation174_spill] sm:$0xff] }
 0x9c7   :  { %3650 = vmatmul.bf16.vlgmr.msrb.gmra.mxu0 %v3641_v0  ;;  %3664 = vmatmul.bf16.vlgmr.msrb.gmra.mxu1 %v3641_v0 }
 0x9c8   :  { %3678 = vmatmul.bf16.vlgmr.msrb.gmra.mxu2 %v3641_v0  ;;  %3692 = vmatmul.bf16.vlgmr.msrb.gmra.mxu3 %v3641_v0  ;;  %v10531_v0 = vld [vmem:[#allocation175_spill] sm:$0xff] }
 0x9c9   :  { %3799 = vmatpush.bf16.msrb.mxu0 %v10509_v20  ;;  %3813 = vmatpush.bf16.msrb.mxu1 %v10510_v8 }
 0x9ca   :  { %3827 = vmatpush.bf16.msrb.mxu2 %v10511_v57  ;;  %3841 = vmatpush.bf16.msrb.mxu3 %v10512_v45  ;;  %v10584_v57 = vld [vmem:[#allocation90_spill] sm:$0xff] }
 0x9cd   :  { %3800 = vmatpush.bf16.msrb.mxu0 %v10513_v26  ;;  %3814 = vmatpush.bf16.msrb.mxu1 %v10514_v49 }
 0x9ce   :  { %3828 = vmatpush.bf16.msrb.mxu2 %v10515_v5  ;;  %3842 = vmatpush.bf16.msrb.mxu3 %v10516_v23  ;;  %v10583_v5 = vld [vmem:[#allocation89_spill] sm:$0xff] }
 0x9d1   :  { %3801 = vmatpush.bf16.msrb.mxu0 %v10517_v24  ;;  %3815 = vmatpush.bf16.msrb.mxu1 %v10518_v38  ;;  %v10582_v24 = vld [vmem:[#allocation83_spill] sm:$0xff] }
 0x9d2   :  { %3829 = vmatpush.bf16.msrb.mxu2 %v10519_v12  ;;  %3843 = vmatpush.bf16.msrb.mxu3 %v10520_v13  ;;  %v10581_v12 = vld [vmem:[#allocation16_spill] sm:$0xff] }
 0x9d5   :  { %3802 = vmatpush.bf16.msrb.mxu0 %v10521_v58  ;;  %3816 = vmatpush.bf16.msrb.mxu1 %v10522_v63  ;;  %v10534_v63 = vld [vmem:[#allocation179_spill] sm:$0xff]  ;;  %v10579_v58 = vld [vmem:[#allocation24_spill] sm:$0xff] }
 0x9d6   :  { %3830 = vmatpush.bf16.msrb.mxu2 %v10523_v39  ;;  %3844 = vmatpush.bf16.msrb.mxu3 %v10524_v1  ;;  %v10532_v1 = vld [vmem:[#allocation176_spill] sm:$0xff]  ;;  %v10533_v39 = vld [vmem:[#allocation178_spill] sm:$0xff] }
 0x9d7   :  { %3706 = vmatmul.bf16.vlgmr.msra.gmra.mxu0 %v9097_v25  ;;  %3720 = vmatmul.bf16.vlgmr.msra.gmra.mxu1 %v9097_v25 }
 0x9d8   :  { %3734 = vmatmul.bf16.vlgmr.msra.gmra.mxu2 %v9097_v25  ;;  %3748 = vmatmul.bf16.vlgmr.msra.gmra.mxu3 %v9097_v25  ;;  %v10535_v25 = vld [vmem:[#allocation180_spill] sm:$0xff] }
 0x9d9   :  { %3803 = vmatpush.bf16.msrb.mxu0 %v10525_v27  ;;  %3817 = vmatpush.bf16.msrb.mxu1 %v10526_v4  ;;  %v10536_v27 = vld [vmem:[#allocation181_spill] sm:$0xff]  ;;  %v10537_v4 = vld [vmem:[#allocation182_spill] sm:$0xff] }
 0x9da   :  { %3831 = vmatpush.bf16.msrb.mxu2 %v10527_v37  ;;  %3845 = vmatpush.bf16.msrb.mxu3 %v10528_v15  ;;  %v10538_v37 = vld [vmem:[#allocation183_spill] sm:$0xff]  ;;  %v10539_v15 = vld [vmem:[#allocation184_spill] sm:$0xff] }
 0x9dd   :  { %3804 = vmatpush.bf16.msrb.mxu0 %v10529_v32  ;;  %3818 = vmatpush.bf16.msrb.mxu1 %v10530_v50  ;;  %v10540_v32 = vld [vmem:[#allocation185_spill] sm:$0xff] }
 0x9de   :  { %3832 = vmatpush.bf16.msrb.mxu2 %v10531_v0  ;;  %3846 = vmatpush.bf16.msrb.mxu3 %v10532_v1  ;;  %v10541_v50 = vld [vmem:[#allocation13_spill] sm:$0xff]  ;;  %v10542_v0 = vld [vmem:[#allocation14_spill] sm:$0xff]  ;;  %v10543_v1 = vld [vmem:[#allocation15_spill] sm:$0xff] }
 0x9e1   :  { %3805 = vmatpush.bf16.msrb.mxu0 %v10533_v39  ;;  %3819 = vmatpush.bf16.msrb.mxu1 %v10534_v63  ;;  %v10544_v39 = vld [vmem:[#allocation17_spill] sm:$0xff]  ;;  %v10545_v63 = vld [vmem:[#allocation20_spill] sm:$0xff] }
 0x9e2   :  { %3833 = vmatpush.bf16.msrb.mxu2 %v10535_v25  ;;  %3847 = vmatpush.bf16.msrb.mxu3 %v10536_v27  ;;  %v10546_v25 = vld [vmem:[#allocation21_spill] sm:$0xff]  ;;  %v10547_v27 = vld [vmem:[#allocation22_spill] sm:$0xff] }
 0x9e5   :  { %3806 = vmatpush.bf16.msrb.mxu0 %v10537_v4  ;;  %3820 = vmatpush.bf16.msrb.mxu1 %v10538_v37  ;;  %v10548_v4 = vld [vmem:[#allocation25_spill] sm:$0xff] }
 0x9e6   :  { %3834 = vmatpush.bf16.msrb.mxu2 %v10539_v15  ;;  %3848 = vmatpush.bf16.msrb.mxu3 %v10540_v32  ;;  %v10549_v37 = vld [vmem:[#allocation29_spill] sm:$0xff]  ;;  %v10550_v15 = vld [vmem:[#allocation30_spill] sm:$0xff]  ;;  %v10551_v32 = vld [vmem:[#allocation31_spill] sm:$0xff] }
 0x9e9   :  { %3911 = vmatpush.bf16.msra.mxu0 %v10541_v50  ;;  %3925 = vmatpush.bf16.msra.mxu1 %v10542_v0  ;;  %v10552_v50 = vld [vmem:[#allocation32_spill] sm:$0xff]  ;;  %v10553_v0 = vld [vmem:[#allocation34_spill] sm:$0xff] }
 0x9ea   :  { %3939 = vmatpush.bf16.msra.mxu2 %v10543_v1  ;;  %3953 = vmatpush.bf16.msra.mxu3 %v10544_v39  ;;  %v10554_v1 = vld [vmem:[#allocation35_spill] sm:$0xff]  ;;  %v10555_v39 = vld [vmem:[#allocation36_spill] sm:$0xff] }
 0x9ed   :  { %3912 = vmatpush.bf16.msra.mxu0 %v10545_v63  ;;  %3926 = vmatpush.bf16.msra.mxu1 %v10546_v25  ;;  %v10556_v63 = vld [vmem:[#allocation38_spill] sm:$0xff]  ;;  %v10557_v25 = vld [vmem:[#allocation41_spill] sm:$0xff] }
 0x9ee   :  { %3940 = vmatpush.bf16.msra.mxu2 %v10547_v27  ;;  %3954 = vmatpush.bf16.msra.mxu3 %v10548_v4  ;;  %v10558_v27 = vld [vmem:[#allocation42_spill] sm:$0xff]  ;;  %v10559_v4 = vld [vmem:[#allocation43_spill] sm:$0xff] }
 0x9f1   :  { %3913 = vmatpush.bf16.msra.mxu0 %v10549_v37  ;;  %3927 = vmatpush.bf16.msra.mxu1 %v10550_v15  ;;  %v10560_v37 = vld [vmem:[#allocation45_spill] sm:$0xff]  ;;  %v10561_v15 = vld [vmem:[#allocation48_spill] sm:$0xff] }
 0x9f2   :  { %3941 = vmatpush.bf16.msra.mxu2 %v10551_v32  ;;  %3955 = vmatpush.bf16.msra.mxu3 %v10552_v50  ;;  %v10562_v32 = vld [vmem:[#allocation49_spill] sm:$0xff]  ;;  %v10563_v50 = vld [vmem:[#allocation50_spill] sm:$0xff] }
 0x9f5   :  { %3914 = vmatpush.bf16.msra.mxu0 %v10553_v0  ;;  %3928 = vmatpush.bf16.msra.mxu1 %v10554_v1  ;;  %v10564_v0 = vld [vmem:[#allocation52_spill] sm:$0xff]  ;;  %v10565_v1 = vld [vmem:[#allocation55_spill] sm:$0xff] }
 0x9f6   :  { %3942 = vmatpush.bf16.msra.mxu2 %v10555_v39  ;;  %3956 = vmatpush.bf16.msra.mxu3 %v10556_v63  ;;  %v10566_v39 = vld [vmem:[#allocation56_spill] sm:$0xff]  ;;  %v10567_v63 = vld [vmem:[#allocation57_spill] sm:$0xff] }
 0x9f9   :  { %3915 = vmatpush.bf16.msra.mxu0 %v10557_v25  ;;  %3929 = vmatpush.bf16.msra.mxu1 %v10558_v27  ;;  %v10568_v25 = vld [vmem:[#allocation59_spill] sm:$0xff]  ;;  %v10569_v27 = vld [vmem:[#allocation62_spill] sm:$0xff] }
 0x9fa   :  { %3943 = vmatpush.bf16.msra.mxu2 %v10559_v4  ;;  %3957 = vmatpush.bf16.msra.mxu3 %v10560_v37  ;;  %v10570_v4 = vld [vmem:[#allocation63_spill] sm:$0xff]  ;;  %v10571_v37 = vld [vmem:[#allocation64_spill] sm:$0xff] }
 0x9fd   :  { %3916 = vmatpush.bf16.msra.mxu0 %v10561_v15  ;;  %3930 = vmatpush.bf16.msra.mxu1 %v10562_v32  ;;  %v10572_v15 = vld [vmem:[#allocation65_spill] sm:$0xff] }
 0x9fe   :  { %3944 = vmatpush.bf16.msra.mxu2 %v10563_v50  ;;  %3958 = vmatpush.bf16.msra.mxu3 %v10564_v0 }
 0xa01   :  { %3917 = vmatpush.bf16.msra.mxu0 %v10565_v1  ;;  %3931 = vmatpush.bf16.msra.mxu1 %v10566_v39 }
 0xa02   :  { %3945 = vmatpush.bf16.msra.mxu2 %v10567_v63  ;;  %3959 = vmatpush.bf16.msra.mxu3 %v10568_v25 }
 0xa05   :  { %3918 = vmatpush.bf16.msra.mxu0 %v10569_v27  ;;  %3932 = vmatpush.bf16.msra.mxu1 %v10570_v4 }
 0xa06   :  { %3946 = vmatpush.bf16.msra.mxu2 %v10571_v37  ;;  %3960 = vmatpush.bf16.msra.mxu3 %v10572_v15  ;;  %v10580_v15 = vld [vmem:[#allocation19_spill] sm:$0xff] }
 0xa07   :  { %v968_v13 = vadd.f32 %v10580_v15, %v10579_v58  ;;  %v10589_v58 = vld [vmem:[#allocation141_spill] sm:$0xff] }
 0xa09   :  { %v1017_v49 = vadd.f32 %v10583_v5, %v968_v13 }
 0xa0b   :  { %v1066_v8 = vadd.f32 %v10584_v57, %v1017_v49 }
 0xa44   :  { %v9227_v32 = vpop.f32.mrf.mxu0  ;;  %v9229_v50 = vpop.f32.mrf.mxu1 }
 0xa4b   :  { %v9231_v0 = vpop.f32.mrf.mxu2  ;;  %v9233_v1 = vpop.f32.mrf.mxu3 }
 0xa4c   :  { %10573 = vst [vmem:[#allocation114_spill] sm:$0xff] %v9231_v0  ;;  %v9235_v39 = vpop.f32.mrf.mxu0  ;;  %v9237_v63 = vpop.f32.mrf.mxu1 }
 0xa4d   :  { %10574 = vst [vmem:[#allocation39_spill] sm:$0xff] %v9233_v1  ;;  %v10587_v1 = vld [vmem:[#allocation110_spill] sm:$0xff] }
 0xa4e   :  { %10575 = vst [vmem:[#allocation112_spill] sm:$0xff] %v9235_v39  ;;  %v1262_v15 = vadd.f32 %v10588_v9, %v10587_v1  ;;  %v10595_v1 = vld [vmem:[#allocation146_spill] sm:$0xff] }
 0xa4f   :  { %10576 = vst [vmem:[#allocation116_spill] sm:$0xff] %v9237_v63  ;;  %v10592_v63 = vld [vmem:[#allocation100_spill] sm:$0xff] }
 0xa53   :  { %v9239_v25 = vpop.f32.mrf.mxu2  ;;  %v9241_v27 = vpop.f32.mrf.mxu3 }
 0xa54   :  { %10577 = vst [vmem:[#allocation186_spill] sm:$0xff] %v9239_v25  ;;  %v3707_v4 = vpop.f32.mrf.mxu0  ;;  %v3721_v37 = vpop.f32.mrf.mxu1 }
 0xa55   :  { %10578 = vst [vmem:[#allocation66_spill] sm:$0xff] %v9241_v27  ;;  %v3754_v38 = vadd.f32 %v3707_v4, %v10581_v12  ;;  %v3755_v23 = vadd.f32 %v3721_v37, %v10582_v24  ;;  %v10586_v27 = vld [vmem:[#allocation98_spill] sm:$0xff] }
 0xa56   :  { %v1115_v25 = vadd.f32 %v10586_v27, %v10585_v30  ;;  %v10590_v37 = vld [vmem:[#allocation18_spill] sm:$0xff]  ;;  %v10593_v30 = vld [vmem:[#allocation144_spill] sm:$0xff] }
 0xa57   :  { %v3762_v26 = vmul.f32 0.5, %v3754_v38  ;;  %v3770_v45 = vmul.f32 0.5, %v3755_v23  ;;  %v10591_v23 = vld [vmem:[#allocation145_spill] sm:$0xff] }
 0xa58   :  { %v1164_v39 = vadd.f32 %v10592_v63, %v1115_v25 }
 0xa59   :  { %5987 = vtanh.f32 %v3762_v26  ;;  %v1311_v26 = vadd.f32 %v10591_v23, %v1262_v15 }
 0xa5a   :  { %5989 = vtanh.f32 %v3770_v45 }
 0xa5b   :  { %v3735_v20 = vpop.f32.mrf.mxu2  ;;  %v3749_v62 = vpop.f32.mrf.mxu3  ;;  %v1360_v61 = vadd.f32 %v10595_v1, %v1311_v26 }
 0xa5c   :  { %v3756_v12 = vadd.f32 %v3735_v20, %v10589_v58  ;;  %v3709_v4 = vpop.f32.mrf.mxu0  ;;  %v3723_v24 = vpop.f32.mrf.mxu1  ;;  %v3757_v0 = vadd.f32 %v3749_v62, %v10593_v30  ;;  %v10594_v20 = vld [vmem:[#allocation142_spill] sm:$0xff] }
 0xa5d   :  { %v3758_v5 = vadd.f32 %v3709_v4, %v10590_v37  ;;  %v3759_v38 = vadd.f32 %v3723_v24, %v1066_v8  ;;  %v1213_v58 = vadd.f32 %v10594_v20, %v1164_v39 }
 0xa5e   :  { %5991 = vtanh.f32 %v3756_v12  ;;  %v3780_v37 = vmul.f32 0.5, %v3757_v0 }
 0xa5f   :  { %v5988_v45 = vpop.eup %5987  ;;  %v3763_v57 = vmul.f32 0.5, %v3758_v5  ;;  %v3771_v49 = vmul.f32 0.5, %v3759_v38 }
 0xa60   :  { %v5990_v13 = vpop.eup %5989  ;;  %v3766_v27 = vmul.f32 0.5, %v5988_v45 }
 0xa61   :  { %v3774_v9 = vmul.f32 0.5, %v5990_v13  ;;  %5993 = vtanh.f32 %v3763_v57 }
 0xa62   :  { %v3768_v4 = vadd.f32 0.5, %v3766_v27  ;;  %5995 = vtanh.f32 %v3771_v49 }
 0xa63   :  { %v3776_v8 = vadd.f32 0.5, %v3774_v9  ;;  %v3737_v15 = vpop.f32.mrf.mxu2  ;;  %v3751_v12 = vpop.f32.mrf.mxu3 }
 0xa64   :  { %v5992_v24 = vpop.eup %5991  ;;  %v3760_v5 = vadd.f32 %v3737_v15, %v1213_v58  ;;  %v3761_v38 = vadd.f32 %v3751_v12, %v1360_v61 }
 0xa65   :  { %v3788_v63 = vmul.f32 %v3776_v8, %v9090_v47  ;;  %v3790_v25 = vmul.f32 %v5992_v24, %v3768_v4 }
 0xa66   :  { %5997 = vtanh.f32 %v3760_v5  ;;  %v3781_v30 = vmul.f32 0.5, %v3761_v38 }
 0xa67   :  { %v5994_v62 = vpop.eup %5993  ;;  %v9261_v23 = vadd.f32 %v3790_v25, %v3788_v63  ;;  %5999 = vtanh.f32 %v3780_v37 }
 0xa68   :  { %v5996_v39 = vpop.eup %5995  ;;  %v3767_v1 = vmul.f32 0.5, %v5994_v62  ;;  %6001 = vtanh.f32 %v3781_v30 }
 0xa69   :  { %v3775_v26 = vmul.f32 0.5, %v5996_v39  ;;  %6003 = vtanh.f32 %v9261_v23 }
 0xa6a   :  { %v3769_v45 = vadd.f32 0.5, %v3767_v1 }
 0xa6b   :  { %v3777_v57 = vadd.f32 0.5, %v3775_v26 }
 0xa6c   :  { %v5998_v49 = vpop.eup %5997 }
 0xa6d   :  { %v3789_v0 = vmul.f32 %v3777_v57, %v9094_v17  ;;  %v3791_v13 = vmul.f32 %v5998_v49, %v3769_v45  ;;  %v6000_v61 = vpop.eup %5999  ;;  %v10604_v45 = vld [vmem:[#allocation37_spill] sm:$0xff] }
 0xa6e   :  { %v6002_v27 = vpop.eup %6001  ;;  %v3784_v9 = vmul.f32 0.5, %v6000_v61 }
 0xa6f   :  { %v9265_v47 = vadd.f32 %v3791_v13, %v3789_v0  ;;  %v3785_v20 = vmul.f32 0.5, %v6002_v27  ;;  %v6004_v58 = vpop.eup %6003 }
 0xa70   :  { %v3786_v4 = vadd.f32 0.5, %v3784_v9 }
 0xa71   :  { %6005 = vtanh.f32 %v9265_v47  ;;  %v3787_v8 = vadd.f32 0.5, %v3785_v20 }
 0xa72   :  { %v3796_v12 = vmul.f32 %v6004_v58, %v3786_v4 }
 0xa77   :  { %v6006_v15 = vpop.eup %6005 }
 0xa78   :  { %v3797_v24 = vmul.f32 %v6006_v15, %v3787_v8  ;;  %v10605_v15 = vld [vmem:[#allocation115_spill] sm:$0xff] }
 0xa7a   :  { %v9268_v37 = vpack.c.bf16 %v3797_v24, %v3796_v12 }
 0xa7c   :  { %3807 = vmatmul.bf16.vlgmr.msrb.gmra.mxu0 %v9268_v37  ;;  %3821 = vmatmul.bf16.vlgmr.msrb.gmra.mxu1 %v9268_v37 }
 0xa7d   :  { %3835 = vmatmul.bf16.vlgmr.msrb.gmra.mxu2 %v9268_v37  ;;  %3849 = vmatmul.bf16.vlgmr.msrb.gmra.mxu3 %v9268_v37 }
 0xa7e   :  { %3967 = vmatpush.bf16.msrb.mxu0 %v10158_v41  ;;  %3981 = vmatpush.bf16.msrb.mxu1 %v10159_v14  ;;  %v3652_v41 = vadd.f32 %v9227_v32, %v10268_v48  ;;  %v3666_v14 = vadd.f32 %v9229_v50, %v10191_v31  ;;  %v10603_v50 = vld [vmem:[#allocation66_spill] sm:$0xff] }
 0xa7f   :  { %3995 = vmatpush.bf16.msrb.mxu2 %v10160_v54  ;;  %4009 = vmatpush.bf16.msrb.mxu3 %v10161_v34 }
 0xa82   :  { %3968 = vmatpush.bf16.msrb.mxu0 %v10162_v35  ;;  %3982 = vmatpush.bf16.msrb.mxu1 %v10241_v6 }
 0xa83   :  { %3996 = vmatpush.bf16.msrb.mxu2 %v10242_v40  ;;  %4010 = vmatpush.bf16.msrb.mxu3 %v10243_v16 }
 0xa86   :  { %3969 = vmatpush.bf16.msrb.mxu0 %v10244_v36  ;;  %3983 = vmatpush.bf16.msrb.mxu1 %v10245_v46  ;;  %v10596_v36 = vld [vmem:[#allocation189_spill] sm:$0xff]  ;;  %v10597_v46 = vld [vmem:[#allocation114_spill] sm:$0xff] }
 0xa87   :  { %3997 = vmatpush.bf16.msrb.mxu2 %v10246_v18  ;;  %4011 = vmatpush.bf16.msrb.mxu3 %v10247_v42  ;;  %v3680_v18 = vadd.f32 %v10597_v46, %v10596_v36  ;;  %v10598_v42 = vld [vmem:[#allocation112_spill] sm:$0xff] }
 0xa8a   :  { %3970 = vmatpush.bf16.msrb.mxu0 %v10248_v52  ;;  %3984 = vmatpush.bf16.msrb.mxu1 %v10325_v21  ;;  %v3654_v52 = vadd.f32 %v10598_v42, %v10268_v48  ;;  %v10599_v21 = vld [vmem:[#allocation116_spill] sm:$0xff] }
 0xa8b   :  { %3998 = vmatpush.bf16.msrb.mxu2 %v10326_v22  ;;  %4012 = vmatpush.bf16.msrb.mxu3 %v10327_v3  ;;  %v3668_v22 = vadd.f32 %v10599_v21, %v10191_v31  ;;  %v10606_v21 = vld [vmem:[#allocation149_spill] sm:$0xff] }
 0xa8e   :  { %3971 = vmatpush.bf16.msrb.mxu0 %v10328_v10  ;;  %3985 = vmatpush.bf16.msrb.mxu1 %v10329_v55 }
 0xa8f   :  { %3999 = vmatpush.bf16.msrb.mxu2 %v10330_v51  ;;  %4013 = vmatpush.bf16.msrb.mxu3 %v10331_v28 }
 0xa92   :  { %3972 = vmatpush.bf16.msrb.mxu0 %v10332_v33  ;;  %3986 = vmatpush.bf16.msrb.mxu1 %v10333_v53 }
 0xa93   :  { %4000 = vmatpush.bf16.msrb.mxu2 %v10409_v29  ;;  %4014 = vmatpush.bf16.msrb.mxu3 %v10410_v60  ;;  %v10600_v29 = vld [vmem:[#allocation190_spill] sm:$0xff]  ;;  %v10601_v60 = vld [vmem:[#allocation39_spill] sm:$0xff] }
 0xa94   :  { %v3696_v5 = vadd.f32 %v10603_v50, %v10600_v29  ;;  %v10626_v50 = vld [vmem:[#allocation173_spill] sm:$0xff] }
 0xa96   :  { %3973 = vmatpush.bf16.msrb.mxu0 %v10411_v2  ;;  %3987 = vmatpush.bf16.msrb.mxu1 %v10412_v7  ;;  %v3694_v2 = vadd.f32 %v10601_v60, %v10600_v29  ;;  %v10615_v60 = vld [vmem:[#allocation162_spill] sm:$0xff] }
 0xa97   :  { %4001 = vmatpush.bf16.msrb.mxu2 %v10413_v19  ;;  %4015 = vmatpush.bf16.msrb.mxu3 %v10414_v11 }
 0xa9a   :  { %3974 = vmatpush.bf16.msrb.mxu0 %v10415_v59  ;;  %3988 = vmatpush.bf16.msrb.mxu1 %v10416_v56 }
 0xa9b   :  { %4002 = vmatpush.bf16.msrb.mxu2 %v10417_v43  ;;  %4016 = vmatpush.bf16.msrb.mxu3 %v10499_v44  ;;  %v10602_v44 = vld [vmem:[#allocation186_spill] sm:$0xff] }
 0xa9c   :  { %v3682_v32 = vadd.f32 %v10602_v44, %v10596_v36  ;;  %v10624_v44 = vld [vmem:[#allocation171_spill] sm:$0xff] }
 0xaf9   :  { %v3808_v54 = vpop.f32.mrf.mxu0  ;;  %v3822_v34 = vpop.f32.mrf.mxu1 }
 0xafa   :  { %v3855_v35 = vadd.f32 %v3808_v54, %v3652_v41  ;;  %v3856_v6 = vadd.f32 %v3822_v34, %v3666_v14 }
 0xafc   :  { %v3863_v40 = vmul.f32 0.5, %v3855_v35  ;;  %v3871_v16 = vmul.f32 0.5, %v3856_v6 }
 0xafe   :  { %6007 = vtanh.f32 %v3863_v40 }
 0xaff   :  { %6009 = vtanh.f32 %v3871_v16 }
 0xb00   :  { %v3836_v3 = vpop.f32.mrf.mxu2  ;;  %v3850_v10 = vpop.f32.mrf.mxu3 }
 0xb01   :  { %v3857_v55 = vadd.f32 %v3836_v3, %v3680_v18  ;;  %v3810_v51 = vpop.f32.mrf.mxu0  ;;  %v3824_v28 = vpop.f32.mrf.mxu1  ;;  %v3858_v43 = vadd.f32 %v3850_v10, %v3694_v2  ;;  %v10608_v3 = vld [vmem:[#allocation152_spill] sm:$0xff]  ;;  %v10609_v10 = vld [vmem:[#allocation154_spill] sm:$0xff]  ;;  %v10616_v2 = vld [vmem:[#allocation163_spill] sm:$0xff] }
 0xb02   :  { %v3859_v33 = vadd.f32 %v3810_v51, %v3654_v52  ;;  %v3860_v53 = vadd.f32 %v3824_v28, %v3668_v22  ;;  %v10607_v22 = vld [vmem:[#allocation151_spill] sm:$0xff]  ;;  %v10611_v51 = vld [vmem:[#allocation156_spill] sm:$0xff]  ;;  %v10612_v28 = vld [vmem:[#allocation157_spill] sm:$0xff] }
 0xb03   :  { %6011 = vtanh.f32 %v3857_v55  ;;  %v3881_v39 = vmul.f32 0.5, %v3858_v43  ;;  %v10610_v55 = vld [vmem:[#allocation155_spill] sm:$0xff]  ;;  %v10622_v43 = vld [vmem:[#allocation169_spill] sm:$0xff] }
 0xb04   :  { %v6008_v7 = vpop.eup %6007  ;;  %v3864_v19 = vmul.f32 0.5, %v3859_v33  ;;  %v3872_v11 = vmul.f32 0.5, %v3860_v53  ;;  %v10613_v33 = vld [vmem:[#allocation158_spill] sm:$0xff]  ;;  %v10614_v53 = vld [vmem:[#allocation161_spill] sm:$0xff] }
 0xb05   :  { %v6010_v59 = vpop.eup %6009  ;;  %v3867_v56 = vmul.f32 0.5, %v6008_v7  ;;  %v10617_v7 = vld [vmem:[#allocation164_spill] sm:$0xff] }
 0xb06   :  { %v3875_v17 = vmul.f32 0.5, %v6010_v59  ;;  %6013 = vtanh.f32 %v3864_v19  ;;  %v10618_v19 = vld [vmem:[#allocation165_spill] sm:$0xff]  ;;  %v10620_v59 = vld [vmem:[#allocation167_spill] sm:$0xff] }
 0xb07   :  { %v3869_v38 = vadd.f32 0.5, %v3867_v56  ;;  %6015 = vtanh.f32 %v3872_v11  ;;  %v10619_v11 = vld [vmem:[#allocation166_spill] sm:$0xff]  ;;  %v10621_v56 = vld [vmem:[#allocation168_spill] sm:$0xff] }
 0xb08   :  { %v3877_v63 = vadd.f32 0.5, %v3875_v17  ;;  %v3838_v25 = vpop.f32.mrf.mxu2  ;;  %v3852_v30 = vpop.f32.mrf.mxu3  ;;  %v10623_v17 = vld [vmem:[#allocation170_spill] sm:$0xff] }
 0xb09   :  { %v6012_v62 = vpop.eup %6011  ;;  %v3861_v1 = vadd.f32 %v3838_v25, %v3682_v32  ;;  %v3862_v26 = vadd.f32 %v3852_v30, %v3696_v5  ;;  %v10625_v32 = vld [vmem:[#allocation172_spill] sm:$0xff]  ;;  %v10627_v5 = vld [vmem:[#allocation174_spill] sm:$0xff]  ;;  %v10631_v30 = vld [vmem:[#allocation179_spill] sm:$0xff] }
 0xb0a   :  { %v3889_v57 = vmul.f32 %v3877_v63, %v10604_v45  ;;  %v3891_v49 = vmul.f32 %v6012_v62, %v3869_v38  ;;  %v10628_v38 = vld [vmem:[#allocation175_spill] sm:$0xff]  ;;  %v10629_v63 = vld [vmem:[#allocation176_spill] sm:$0xff]  ;;  %v10630_v25 = vld [vmem:[#allocation178_spill] sm:$0xff] }
 0xb0b   :  { %6017 = vtanh.f32 %v3861_v1  ;;  %v3882_v0 = vmul.f32 0.5, %v3862_v26  ;;  %v10633_v62 = vld [vmem:[#allocation181_spill] sm:$0xff]  ;;  %v10635_v1 = vld [vmem:[#allocation183_spill] sm:$0xff]  ;;  %v10636_v26 = vld [vmem:[#allocation184_spill] sm:$0xff] }
 0xb0c   :  { %v6014_v13 = vpop.eup %6013  ;;  %v9323_v61 = vadd.f32 %v3891_v49, %v3889_v57  ;;  %6019 = vtanh.f32 %v3881_v39  ;;  %v10634_v39 = vld [vmem:[#allocation182_spill] sm:$0xff]  ;;  %v10637_v45 = vld [vmem:[#allocation185_spill] sm:$0xff] }
 0xb0d   :  { %v6016_v27 = vpop.eup %6015  ;;  %v3868_v9 = vmul.f32 0.5, %v6014_v13  ;;  %6021 = vtanh.f32 %v3882_v0 }
 0xb0e   :  { %v3876_v20 = vmul.f32 0.5, %v6016_v27  ;;  %6023 = vtanh.f32 %v9323_v61 }
 0xb0f   :  { %v3870_v58 = vadd.f32 0.5, %v3868_v9 }
 0xb10   :  { %v3878_v4 = vadd.f32 0.5, %v3876_v20 }
 0xb11   :  { %v6018_v8 = vpop.eup %6017 }
 0xb12   :  { %v3890_v12 = vmul.f32 %v3878_v4, %v10605_v15  ;;  %v3892_v24 = vmul.f32 %v6018_v8, %v3870_v58  ;;  %v6020_v41 = vpop.eup %6019  ;;  %v10638_v15 = vld [vmem:[#allocation24_spill] sm:$0xff] }
 0xb13   :  { %v6022_v14 = vpop.eup %6021  ;;  %v3885_v34 = vmul.f32 0.5, %v6020_v41  ;;  %v10640_v41 = vld [vmem:[#allocation23_spill] sm:$0xff] }
 0xb14   :  { %v9327_v54 = vadd.f32 %v3892_v24, %v3890_v12  ;;  %v3886_v35 = vmul.f32 0.5, %v6022_v14  ;;  %v6024_v6 = vpop.eup %6023  ;;  %v10639_v12 = vld [vmem:[#allocation27_spill] sm:$0xff] }
 0xb15   :  { %v3887_v40 = vadd.f32 0.5, %v3885_v34  ;;  %v973_v24 = vadd.f32 %v10639_v12, %v10638_v15  ;;  %v10641_v34 = vld [vmem:[#allocation104_spill] sm:$0xff] }
 0xb16   :  { %6025 = vtanh.f32 %v9327_v54  ;;  %v3888_v16 = vadd.f32 0.5, %v3886_v35 }
 0xb17   :  { %v3897_v18 = vmul.f32 %v6024_v6, %v3887_v40  ;;  %v10642_v6 = vld [vmem:[#allocation106_spill] sm:$0xff] }
 0xb18   :  { %v1022_v40 = vadd.f32 %v10642_v6, %v973_v24 }
 0xb1c   :  { %v6026_v46 = vpop.eup %6025 }
 0xb1d   :  { %v3898_v42 = vmul.f32 %v6026_v46, %v3888_v16 }
 0xb1f   :  { %v3910_v52 = vpack.c.bf16 %v3898_v42, %v3897_v18  ;;  %v10643_v18 = vld [vmem:[#allocation107_spill] sm:$0xff] }
 0xb20   :  { %v1071_v42 = vadd.f32 %v10643_v18, %v1022_v40 }
 0xb21   :  { %3919 = vmatmul.bf16.vlgmr.msra.gmra.mxu0 %v3910_v52  ;;  %3933 = vmatmul.bf16.vlgmr.msra.gmra.mxu1 %v3910_v52 }
 0xb22   :  { %3947 = vmatmul.bf16.vlgmr.msra.gmra.mxu2 %v3910_v52  ;;  %3961 = vmatmul.bf16.vlgmr.msra.gmra.mxu3 %v3910_v52 }
 0xb23   :  { %4068 = vmatpush.bf16.msra.mxu0 %v10606_v21  ;;  %4082 = vmatpush.bf16.msra.mxu1 %v10607_v22  ;;  %v10644_v22 = vld [vmem:[#allocation28_spill] sm:$0xff] }
 0xb24   :  { %4096 = vmatpush.bf16.msra.mxu2 %v10608_v3  ;;  %4110 = vmatpush.bf16.msra.mxu3 %v10609_v10  ;;  %v10645_v3 = vld [vmem:[#allocation108_spill] sm:$0xff] }
 0xb25   :  { %v1120_v10 = vadd.f32 %v10645_v3, %v10644_v22 }
 0xb27   :  { %4069 = vmatpush.bf16.msra.mxu0 %v10610_v55  ;;  %4083 = vmatpush.bf16.msra.mxu1 %v10611_v51  ;;  %v10646_v55 = vld [vmem:[#allocation110_spill] sm:$0xff] }
 0xb28   :  { %4097 = vmatpush.bf16.msra.mxu2 %v10612_v28  ;;  %4111 = vmatpush.bf16.msra.mxu3 %v10613_v33  ;;  %v10647_v51 = vld [vmem:[#allocation150_spill] sm:$0xff]  ;;  %v10648_v33 = vld [vmem:[#allocation147_spill] sm:$0xff] }
 0xb29   :  { %v1267_v28 = vadd.f32 %v10647_v51, %v10646_v55 }
 0xb2b   :  { %4070 = vmatpush.bf16.msra.mxu0 %v10614_v53  ;;  %4084 = vmatpush.bf16.msra.mxu1 %v10615_v60  ;;  %v10649_v60 = vld [vmem:[#allocation153_spill] sm:$0xff] }
 0xb2c   :  { %4098 = vmatpush.bf16.msra.mxu2 %v10616_v2  ;;  %4112 = vmatpush.bf16.msra.mxu3 %v10617_v7 }
 0xb2f   :  { %4071 = vmatpush.bf16.msra.mxu0 %v10618_v19  ;;  %4085 = vmatpush.bf16.msra.mxu1 %v10619_v11  ;;  %v10650_v11 = vld [vmem:[#allocation26_spill] sm:$0xff] }
 0xb30   :  { %4099 = vmatpush.bf16.msra.mxu2 %v10620_v59  ;;  %4113 = vmatpush.bf16.msra.mxu3 %v10621_v56 }
 0xb31   :  { %3975 = vmatmul.bf16.vlgmr.msrb.gmra.mxu0 %v9268_v37  ;;  %3989 = vmatmul.bf16.vlgmr.msrb.gmra.mxu1 %v9268_v37 }
 0xb32   :  { %4003 = vmatmul.bf16.vlgmr.msrb.gmra.mxu2 %v9268_v37  ;;  %4017 = vmatmul.bf16.vlgmr.msrb.gmra.mxu3 %v9268_v37  ;;  %v10632_v37 = vld [vmem:[#allocation180_spill] sm:$0xff] }
 0xb33   :  { %4072 = vmatpush.bf16.msra.mxu0 %v10622_v43  ;;  %4086 = vmatpush.bf16.msra.mxu1 %v10623_v17  ;;  %v10651_v43 = vld [vmem:[#allocation159_spill] sm:$0xff] }
 0xb34   :  { %4100 = vmatpush.bf16.msra.mxu2 %v10624_v44  ;;  %4114 = vmatpush.bf16.msra.mxu3 %v10625_v32  ;;  %v1316_v17 = vadd.f32 %v10651_v43, %v1267_v28 }
 0xb37   :  { %4073 = vmatpush.bf16.msra.mxu0 %v10626_v50  ;;  %4087 = vmatpush.bf16.msra.mxu1 %v10627_v5 }
 0xb38   :  { %4101 = vmatpush.bf16.msra.mxu2 %v10628_v38  ;;  %4115 = vmatpush.bf16.msra.mxu3 %v10629_v63  ;;  %v10652_v63 = vld [vmem:[#allocation109_spill] sm:$0xff] }
 0xb3b   :  { %4074 = vmatpush.bf16.msra.mxu0 %v10630_v25  ;;  %4088 = vmatpush.bf16.msra.mxu1 %v10631_v30  ;;  %v1169_v25 = vadd.f32 %v10652_v63, %v1120_v10  ;;  %v5494_v63 = vld [vmem:[%s9645_s7 + $0xf8] sm:$0xf0] }
 0xb3c   :  { %4102 = vmatpush.bf16.msra.mxu2 %v10632_v37  ;;  %4116 = vmatpush.bf16.msra.mxu3 %v10633_v62  ;;  %v10653_v62 = vld [vmem:[#allocation148_spill] sm:$0xff] }
 0xb3f   :  { %4075 = vmatpush.bf16.msra.mxu0 %v10634_v39  ;;  %4089 = vmatpush.bf16.msra.mxu1 %v10635_v1  ;;  %v1218_v39 = vadd.f32 %v10653_v62, %v1169_v25  ;;  %v10654_v1 = vld [vmem:[#allocation160_spill] sm:$0xff]  ;;  %v5738_v62 = vld [vmem:[%s9645_s7 + $0xc4] sm:$0xf] }
 0xb40   :  { %4103 = vmatpush.bf16.msra.mxu2 %v10636_v26  ;;  %4117 = vmatpush.bf16.msra.mxu3 %v10637_v45  ;;  %v1365_v26 = vadd.f32 %v10654_v1, %v1316_v17  ;;  %v5486_v17 = vld [vmem:[%s9645_s7 + $0xf0] sm:$0xf0] }
 0xb41   :  { %v5470_v1 = vld [vmem:[%s9645_s7 + $0xd0] sm:$0xf0] }
 0xb9e   :  { %v9366_v57 = vpop.f32.mrf.mxu0  ;;  %v9368_v49 = vpop.f32.mrf.mxu1 }
 0xba5   :  { %v9370_v0 = vpop.f32.mrf.mxu2  ;;  %v9372_v13 = vpop.f32.mrf.mxu3 }
 0xba6   :  { %v9374_v27 = vpop.f32.mrf.mxu0  ;;  %v9376_v9 = vpop.f32.mrf.mxu1 }
 0xbad   :  { %v9378_v20 = vpop.f32.mrf.mxu2  ;;  %v9380_v58 = vpop.f32.mrf.mxu3 }
 0xbae   :  { %v3976_v4 = vpop.f32.mrf.mxu0  ;;  %v3990_v8 = vpop.f32.mrf.mxu1 }
 0xbaf   :  { %v4023_v14 = vadd.f32 %v3976_v4, %v10640_v41  ;;  %v4024_v35 = vadd.f32 %v3990_v8, %v10641_v34 }
 0xbb1   :  { %v4031_v16 = vmul.f32 0.5, %v4023_v14  ;;  %v4039_v46 = vmul.f32 0.5, %v4024_v35 }
 0xbb3   :  { %6027 = vtanh.f32 %v4031_v16 }
 0xbb4   :  { %6029 = vtanh.f32 %v4039_v46 }
 0xbb5   :  { %v4004_v52 = vpop.f32.mrf.mxu2  ;;  %v4018_v21 = vpop.f32.mrf.mxu3 }
 0xbb6   :  { %v4025_v53 = vadd.f32 %v4004_v52, %v10648_v33  ;;  %v4026_v2 = vadd.f32 %v4018_v21, %v10649_v60  ;;  %v3978_v7 = vpop.f32.mrf.mxu0  ;;  %v3992_v19 = vpop.f32.mrf.mxu1 }
 0xbb7   :  { %v4027_v59 = vadd.f32 %v3978_v7, %v10650_v11  ;;  %v4028_v56 = vadd.f32 %v3992_v19, %v1071_v42 }
 0xbb8   :  { %6031 = vtanh.f32 %v4025_v53  ;;  %v4049_v44 = vmul.f32 0.5, %v4026_v2 }
 0xbb9   :  { %v6028_v32 = vpop.eup %6027  ;;  %v4032_v50 = vmul.f32 0.5, %v4027_v59  ;;  %v4040_v5 = vmul.f32 0.5, %v4028_v56  ;;  %v5744_v59 = vld [vmem:[%s9645_s7 + $0xec] sm:$0xf0]  ;;  %v5742_v56 = vld [vmem:[%s9645_s7 + $0xe4] sm:$0xf] }
 0xbba   :  { %v6030_v38 = vpop.eup %6029  ;;  %v4035_v30 = vmul.f32 0.5, %v6028_v32  ;;  %6033 = vtanh.f32 %v4049_v44  ;;  %v5492_v44 = vld [vmem:[%s9645_s7 + $0xe8] sm:$0xf]  ;;  %v5745_v32 = vld [vmem:[%s9645_s7 + $0xf4] sm:$0xf0] }
 0xbbb   :  { %v4043_v37 = vmul.f32 0.5, %v6030_v38  ;;  %6035 = vtanh.f32 %v4032_v50  ;;  %v5489_v50 = vor.u32 %v5742_v56, %v5486_v17  ;;  %v5743_v38 = vld [vmem:[%s9645_s7 + $0xec] sm:$0xf]  ;;  %v5422_v56 = vld [vmem:[%s9645_s7 + $0x70] sm:$0xf0] }
 0xbbc   :  { %v4037_v45 = vadd.f32 0.5, %v4035_v30  ;;  %6037 = vtanh.f32 %v4040_v5  ;;  %v5493_v5 = vor.u32 %v5745_v32, %v5492_v44  ;;  %v5497_v25 = vor.u32 %v5743_v38, %v5494_v63  ;;  %v5468_v30 = vld [vmem:[%s9645_s7 + $0xc0] sm:$0xf]  ;;  %v5729_v17 = vld [vmem:[%s9645_s7 + $0x74] sm:$0xf0] }
 0xbbd   :  { %v4045_v4 = vadd.f32 0.5, %v4043_v37  ;;  %v4006_v8 = vpop.f32.mrf.mxu2  ;;  %v4020_v15 = vpop.f32.mrf.mxu3  ;;  %4385 = vmatpush.bf16.msrb.mxu1 %v5489_v50  ;;  %v5740_v37 = vld [vmem:[%s9645_s7 + $0xcc] sm:$0xf0]  ;;  %v5727_v50 = vld [vmem:[%s9645_s7 + $0x6c] sm:$0xf] }
 0xbbe   :  { %v6032_v12 = vpop.eup %6031  ;;  %v4029_v24 = vadd.f32 %v4006_v8, %v1218_v39  ;;  %v4030_v41 = vadd.f32 %v4020_v15, %v1365_v26  ;;  %4399 = vmatpush.bf16.msrb.mxu2 %v5493_v5  ;;  %4413 = vmatpush.bf16.msrb.mxu3 %v5497_v25  ;;  %v5469_v39 = vor.u32 %v5740_v37, %v5468_v30  ;;  %v5476_v26 = vld [vmem:[%s9645_s7 + $0xc8] sm:$0xf]  ;;  %v5739_v15 = vld [vmem:[%s9645_s7 + $0xcc] sm:$0xf]  ;;  %v5430_v5 = vld [vmem:[%s9645_s7 + $0x78] sm:$0xf0] }
 0xbbf   :  { %v4057_v14 = vmul.f32 %v4045_v4, %v9261_v23  ;;  %v4059_v34 = vmul.f32 %v6032_v12, %v4037_v45  ;;  %v5741_v45 = vld [vmem:[%s9645_s7 + $0xd4] sm:$0xf0]  ;;  %v5473_v4 = vor.u32 %v5738_v62, %v5470_v1  ;;  %v5478_v12 = vld [vmem:[%s9645_s7 + $0xd8] sm:$0xf0]  ;;  %v5433_v38 = vor.u32 %v5727_v50, %v5430_v5  ;;  %v5404_v63 = vld [vmem:[%s9645_s7 + $0x40] sm:$0xf] }
 0xbc0   :  { %v6034_v35 = vpop.eup %6033  ;;  %6039 = vtanh.f32 %v4029_v24  ;;  %v4050_v6 = vmul.f32 0.5, %v4030_v41  ;;  %v5477_v8 = vor.u32 %v5741_v45, %v5476_v26  ;;  %v5481_v24 = vor.u32 %v5739_v15, %v5478_v12  ;;  %v5452_v41 = vld [vmem:[%s9645_s7 + $0xa0] sm:$0xf]  ;;  %v5724_v25 = vld [vmem:[%s9645_s7 + $0x4c] sm:$0xf0] }
 0xbc1   :  { %v6036_v40 = vpop.eup %6035  ;;  %v4061_v16 = vadd.f32 %v4059_v34, %v4057_v14  ;;  %v4053_v52 = vmul.f32 0.5, %v6034_v35  ;;  %4386 = vmatpush.bf16.msrb.mxu1 %v5473_v4  ;;  %v5736_v14 = vld [vmem:[%s9645_s7 + $0xac] sm:$0xf0]  ;;  %v5734_v34 = vld [vmem:[%s9645_s7 + $0xa4] sm:$0xf]  ;;  %v5405_v37 = vor.u32 %v5724_v25, %v5404_v63 }
 0xbc2   :  { %v6038_v46 = vpop.eup %6037  ;;  %v4036_v18 = vmul.f32 0.5, %v6036_v40  ;;  %6041 = vtanh.f32 %v4050_v6  ;;  %4400 = vmatpush.bf16.msrb.mxu2 %v5477_v8  ;;  %4414 = vmatpush.bf16.msrb.mxu3 %v5481_v24  ;;  %v5453_v35 = vor.u32 %v5736_v14, %v5452_v41  ;;  %v5454_v6 = vld [vmem:[%s9645_s7 + $0xb0] sm:$0xf0]  ;;  %v5460_v40 = vld [vmem:[%s9645_s7 + $0xa8] sm:$0xf]  ;;  %v3921_v14 = vadd.f32 %v9366_v57, %v10268_v48 }
 0xbc3   :  { %6043 = vtanh.f32 %v4061_v16  ;;  %v4044_v42 = vmul.f32 0.5, %v6038_v46  ;;  %v4055_v23 = vadd.f32 0.5, %v4053_v52  ;;  %v5737_v16 = vld [vmem:[%s9645_s7 + $0xb4] sm:$0xf0]  ;;  %v5457_v46 = vor.u32 %v5734_v34, %v5454_v6  ;;  %v5462_v52 = vld [vmem:[%s9645_s7 + $0xb8] sm:$0xf0] }
 0xbc4   :  { %v4038_v21 = vadd.f32 0.5, %v4036_v18  ;;  %v5461_v18 = vor.u32 %v5737_v16, %v5460_v40  ;;  %v5722_v30 = vld [vmem:[%s9645_s7 + $0x44] sm:$0xf]  ;;  %v5406_v62 = vld [vmem:[%s9645_s7 + $0x50] sm:$0xf0]  ;;  %v3935_v34 = vadd.f32 %v9368_v49, %v10191_v31 }
 0xbc5   :  { %v4046_v22 = vadd.f32 0.5, %v4044_v42  ;;  %v5735_v42 = vld [vmem:[%s9645_s7 + $0xac] sm:$0xf]  ;;  %4387 = vmatpush.bf16.msrb.mxu1 %v5457_v46  ;;  %v5725_v1 = vld [vmem:[%s9645_s7 + $0x54] sm:$0xf0]  ;;  %v5409_v26 = vor.u32 %v5722_v30, %v5406_v62 }
 0xbc6   :  { %v6040_v3 = vpop.eup %6039  ;;  %4401 = vmatpush.bf16.msrb.mxu2 %v5461_v18  ;;  %v5723_v4 = vld [vmem:[%s9645_s7 + $0x4c] sm:$0xf]  ;;  %v5414_v8 = vld [vmem:[%s9645_s7 + $0x58] sm:$0xf0]  ;;  %v5388_v12 = vld [vmem:[%s9645_s7 + $0x20] sm:$0xf] }
 0xbc7   :  { %v4058_v10 = vmul.f32 %v4046_v22, %v9265_v47  ;;  %v4060_v55 = vmul.f32 %v6040_v3, %v4038_v21  ;;  %v5484_v47 = vld [vmem:[%s9645_s7 + $0xe0] sm:$0xf]  ;;  %v5465_v21 = vor.u32 %v5735_v42, %v5462_v52  ;;  %v5732_v3 = vld [vmem:[%s9645_s7 + $0x8c] sm:$0xf0]  ;;  %v5417_v15 = vor.u32 %v5723_v4, %v5414_v8  ;;  %v5718_v41 = vld [vmem:[%s9645_s7 + $0x24] sm:$0xf] }
 0xbc8   :  { %v6042_v51 = vpop.eup %6041  ;;  %v5485_v43 = vor.u32 %v5744_v59, %v5484_v47  ;;  %v5436_v22 = vld [vmem:[%s9645_s7 + $0x80] sm:$0xf]  ;;  %v5726_v47 = vld [vmem:[%s9645_s7 + $0x64] sm:$0xf]  ;;  %v5720_v24 = vld [vmem:[%s9645_s7 + $0x2c] sm:$0xf0] }
 0xbc9   :  { %v6044_v28 = vpop.eup %6043  ;;  %v4062_v33 = vadd.f32 %v4060_v55, %v4058_v10  ;;  %v4054_v60 = vmul.f32 0.5, %v6042_v51  ;;  %v5730_v10 = vld [vmem:[%s9645_s7 + $0x84] sm:$0xf]  ;;  %4415 = vmatpush.bf16.msrb.mxu3 %v5465_v21  ;;  %v5437_v55 = vor.u32 %v5732_v3, %v5436_v22  ;;  %v5438_v51 = vld [vmem:[%s9645_s7 + $0x90] sm:$0xf0]  ;;  %v5425_v44 = vor.u32 %v5726_v47, %v5422_v56 }
 0xbca   :  { %v4065_v53 = vmul.f32 %v6044_v28, %v4055_v23  ;;  %4371 = vmatpush.bf16.msrb.mxu0 %v5485_v43  ;;  %v5444_v23 = vld [vmem:[%s9645_s7 + $0x88] sm:$0xf]  ;;  %v5733_v28 = vld [vmem:[%s9645_s7 + $0x94] sm:$0xf0]  ;;  %v5390_v6 = vld [vmem:[%s9645_s7 + $0x30] sm:$0xf0]  ;;  %v3949_v56 = vadd.f32 %v9370_v0, %v10596_v36 }
 0xbcb   :  { %6045 = vtanh.f32 %v4062_v33  ;;  %v4056_v2 = vadd.f32 0.5, %v4054_v60  ;;  %v5441_v33 = vor.u32 %v5730_v10, %v5438_v51  ;;  %v5731_v60 = vld [vmem:[%s9645_s7 + $0x8c] sm:$0xf]  ;;  %v5428_v43 = vld [vmem:[%s9645_s7 + $0x68] sm:$0xf]  ;;  %v5393_v57 = vor.u32 %v5718_v41, %v5390_v6 }
 0xbcc   :  { %v5429_v32 = vor.u32 %v5729_v17, %v5428_v43  ;;  %v5396_v40 = vld [vmem:[%s9645_s7 + $0x28] sm:$0xf]  ;;  %v5721_v16 = vld [vmem:[%s9645_s7 + $0x34] sm:$0xf0]  ;;  %v5719_v49 = vld [vmem:[%s9645_s7 + $0x2c] sm:$0xf]  ;;  %v3963_v43 = vadd.f32 %v9372_v13, %v10600_v29  ;;  %v3923_v17 = vadd.f32 %v9374_v27, %v10268_v48 }
 0xbcd   :  { %4388 = vmatpush.bf16.msrb.mxu1 %v5441_v33  ;;  %v5397_v42 = vor.u32 %v5721_v16, %v5396_v40  ;;  %v5398_v52 = vld [vmem:[%s9645_s7 + $0x38] sm:$0xf0]  ;;  %v5372_v10 = vld [vmem:[%s9645_s7] sm:$0xf]  ;;  %v5714_v51 = vld [vmem:[%s9645_s7 + $0x4] sm:$0xf] }
 0xbce   :  { %4372 = vmatpush.bf16.msrb.mxu0 %v5469_v39  ;;  %v5412_v39 = vld [vmem:[%s9645_s7 + $0x48] sm:$0xf]  ;;  %v5401_v3 = vor.u32 %v5719_v49, %v5398_v52 }
 0xbcf   :  { %v5413_v45 = vor.u32 %v5725_v1, %v5412_v39 }
 0xbd1   :  { %v6046_v7 = vpop.eup %6045  ;;  %4389 = vmatpush.bf16.msrb.mxu1 %v5425_v44  ;;  %v3937_v44 = vadd.f32 %v9376_v9, %v10191_v31  ;;  %v3951_v31 = vadd.f32 %v9378_v20, %v10596_v36  ;;  %v3965_v9 = vadd.f32 %v9380_v58, %v10600_v29 }
 0xbd2   :  { %v4066_v19 = vmul.f32 %v6046_v7, %v4056_v2  ;;  %4373 = vmatpush.bf16.msrb.mxu0 %v5453_v35  ;;  %v5446_v2 = vld [vmem:[%s9645_s7 + $0x98] sm:$0xf0]  ;;  %v5389_v35 = vor.u32 %v5720_v24, %v5388_v12 }
 0xbd3   :  { %v5449_v7 = vor.u32 %v5731_v60, %v5446_v2  ;;  %v5380_v60 = vld [vmem:[%s9645_s7 + $0x8] sm:$0xf] }
 0xbd4   :  { %v4067_v11 = vpack.c.bf16 %v4066_v19, %v4065_v53  ;;  %v5445_v53 = vor.u32 %v5733_v28, %v5444_v23  ;;  %v5420_v19 = vld [vmem:[%s9645_s7 + $0x60] sm:$0xf] }
 0xbd5   :  { %4416 = vmatpush.bf16.msrb.mxu3 %v5449_v7  ;;  %4390 = vmatpush.bf16.msrb.mxu1 %v5409_v26  ;;  %v5717_v7 = vld [vmem:[%s9645_s7 + $0x14] sm:$0xf0] }
 0xbd6   :  { %4076 = vmatmul.bf16.vlgmr.msra.gmra.mxu0 %v4067_v11  ;;  %4090 = vmatmul.bf16.vlgmr.msra.gmra.mxu1 %v4067_v11  ;;  %v5381_v47 = vor.u32 %v5717_v7, %v5380_v60 }
 0xbd7   :  { %4104 = vmatmul.bf16.vlgmr.msra.gmra.mxu2 %v4067_v11  ;;  %4118 = vmatmul.bf16.vlgmr.msra.gmra.mxu3 %v4067_v11  ;;  %v5728_v11 = vld [vmem:[%s9645_s7 + $0x6c] sm:$0xf0] }
 0xbd8   :  { %4374 = vmatpush.bf16.msrb.mxu0 %v5437_v55  ;;  %4402 = vmatpush.bf16.msrb.mxu2 %v5445_v53  ;;  %v5421_v59 = vor.u32 %v5728_v11, %v5420_v19  ;;  %v5716_v55 = vld [vmem:[%s9645_s7 + $0xc] sm:$0xf0]  ;;  %v5374_v53 = vld [vmem:[%s9645_s7 + $0x10] sm:$0xf0]  ;;  %v5715_v19 = vld [vmem:[%s9645_s7 + $0xc] sm:$0xf] }
 0xbd9   :  { %4417 = vmatpush.bf16.msrb.mxu3 %v5433_v38  ;;  %4391 = vmatpush.bf16.msrb.mxu1 %v5393_v57  ;;  %v5373_v33 = vor.u32 %v5716_v55, %v5372_v10  ;;  %v5377_v2 = vor.u32 %v5714_v51, %v5374_v53  ;;  %v5382_v11 = vld [vmem:[%s9645_s7 + $0x18] sm:$0xf0] }
 0xbdc   :  { %4375 = vmatpush.bf16.msrb.mxu0 %v5421_v59  ;;  %4403 = vmatpush.bf16.msrb.mxu2 %v5429_v32  ;;  %v5385_v59 = vor.u32 %v5715_v19, %v5382_v11 }
 0xbdd   :  { %4418 = vmatpush.bf16.msrb.mxu3 %v5417_v15  ;;  %4392 = vmatpush.bf16.msrb.mxu1 %v5377_v2 }
 0xbe0   :  { %4376 = vmatpush.bf16.msrb.mxu0 %v5405_v37  ;;  %4404 = vmatpush.bf16.msrb.mxu2 %v5413_v45 }
 0xbe1   :  { %4419 = vmatpush.bf16.msrb.mxu3 %v5401_v3 }
 0xbe4   :  { %4377 = vmatpush.bf16.msrb.mxu0 %v5389_v35  ;;  %4405 = vmatpush.bf16.msrb.mxu2 %v5397_v42 }
 0xbe5   :  { %4420 = vmatpush.bf16.msrb.mxu3 %v5385_v59 }
 0xbe8   :  { %4378 = vmatpush.bf16.msrb.mxu0 %v5373_v33  ;;  %4406 = vmatpush.bf16.msrb.mxu2 %v5381_v47 }
 0xc53   :  { %v4077_v46 = vpop.f32.mrf.mxu0  ;;  %v4091_v18 = vpop.f32.mrf.mxu1 }
 0xc54   :  { %v4124_v21 = vadd.f32 %v4077_v46, %v3921_v14  ;;  %v4125_v22 = vadd.f32 %v4091_v18, %v3935_v34 }
 0xc56   :  { %v4132_v23 = vmul.f32 0.5, %v4124_v21  ;;  %v4140_v28 = vmul.f32 0.5, %v4125_v22 }
 0xc58   :  { %6047 = vtanh.f32 %v4132_v23 }
 0xc59   :  { %6049 = vtanh.f32 %v4140_v28 }
 0xc5a   :  { %v4105_v32 = vpop.f32.mrf.mxu2  ;;  %v4119_v50 = vpop.f32.mrf.mxu3 }
 0xc5b   :  { %v4126_v5 = vadd.f32 %v4105_v32, %v3949_v56  ;;  %v4127_v38 = vadd.f32 %v4119_v50, %v3963_v43  ;;  %v4079_v63 = vpop.f32.mrf.mxu0  ;;  %v4093_v25 = vpop.f32.mrf.mxu1 }
 0xc5c   :  { %v4128_v0 = vadd.f32 %v4079_v63, %v3923_v17  ;;  %v4129_v30 = vadd.f32 %v4093_v25, %v3937_v44 }
 0xc5d   :  { %6051 = vtanh.f32 %v4126_v5  ;;  %v4150_v13 = vmul.f32 0.5, %v4127_v38 }
 0xc5e   :  { %v6048_v37 = vpop.eup %6047  ;;  %v4133_v62 = vmul.f32 0.5, %v4128_v0  ;;  %v4141_v39 = vmul.f32 0.5, %v4129_v30 }
 0xc5f   :  { %v6050_v1 = vpop.eup %6049  ;;  %v4136_v48 = vmul.f32 0.5, %v6048_v37  ;;  %6053 = vtanh.f32 %v4150_v13 }
 0xc60   :  { %v4144_v27 = vmul.f32 0.5, %v6050_v1  ;;  %6055 = vtanh.f32 %v4133_v62 }
 0xc61   :  { %v4138_v26 = vadd.f32 0.5, %v4136_v48  ;;  %6057 = vtanh.f32 %v4141_v39 }
 0xc62   :  { %v4146_v45 = vadd.f32 0.5, %v4144_v27  ;;  %v4107_v4 = vpop.f32.mrf.mxu2  ;;  %v4121_v8 = vpop.f32.mrf.mxu3 }
 0xc63   :  { %v6052_v15 = vpop.eup %6051  ;;  %v4130_v12 = vadd.f32 %v4107_v4, %v3951_v31  ;;  %v4131_v24 = vadd.f32 %v4121_v8, %v3965_v9 }
 0xc64   :  { %v4158_v41 = vmul.f32 %v4146_v45, %v9323_v61  ;;  %v4160_v14 = vmul.f32 %v6052_v15, %v4138_v26 }
 0xc65   :  { %v6054_v34 = vpop.eup %6053  ;;  %6059 = vtanh.f32 %v4130_v12  ;;  %v4151_v35 = vmul.f32 0.5, %v4131_v24 }
 0xc66   :  { %v6056_v6 = vpop.eup %6055  ;;  %v4162_v40 = vadd.f32 %v4160_v14, %v4158_v41  ;;  %v4154_v58 = vmul.f32 0.5, %v6054_v34 }
 0xc67   :  { %v6058_v36 = vpop.eup %6057  ;;  %v4137_v20 = vmul.f32 0.5, %v6056_v6  ;;  %6061 = vtanh.f32 %v4151_v35 }
 0xc68   :  { %6063 = vtanh.f32 %v4162_v40  ;;  %v4145_v29 = vmul.f32 0.5, %v6058_v36  ;;  %v4156_v61 = vadd.f32 0.5, %v4154_v58 }
 0xc69   :  { %v4139_v16 = vadd.f32 0.5, %v4137_v20 }
 0xc6a   :  { %v4147_v46 = vadd.f32 0.5, %v4145_v29 }
 0xc6b   :  { %v6060_v18 = vpop.eup %6059 }
 0xc6c   :  { %v4159_v57 = vmul.f32 %v4147_v46, %v9327_v54  ;;  %v4161_v42 = vmul.f32 %v6060_v18, %v4139_v16  ;;  %v4201_v54 = vld [vmem:[%s9646_s8] sm:$0xf] }
 0xc6d   :  { %v6062_v49 = vpop.eup %6061  ;;  %v4203_v53 = vperm.slane %v4201_v54, 0  ;;  %v4204_v60 = vperm.slane %v4201_v54, 1  ;;  %v4205_v2 = vperm.slane %v4201_v54, 2  ;;  %v4206_v7 = vperm.slane %v4201_v54, 3 }
 0xc6e   :  { %v6064_v52 = vpop.eup %6063  ;;  %v4163_v21 = vadd.f32 %v4161_v42, %v4159_v57  ;;  %v4155_v3 = vmul.f32 0.5, %v6062_v49 }
 0xc6f   :  { %v4166_v22 = vmul.f32 %v6064_v52, %v4156_v61 }
 0xc70   :  { %6065 = vtanh.f32 %v4163_v21  ;;  %v4157_v10 = vadd.f32 0.5, %v4155_v3 }
 0xc76   :  { %v6066_v55 = vpop.eup %6065 }
 0xc77   :  { %v4167_v51 = vmul.f32 %v6066_v55, %v4157_v10 }
 0xc79   :  { %v4168_v23 = vpack.c.bf16 %v4167_v51, %v4166_v22 }
 0xc7b   :  { %4379 = vmatmul.bf16.vlgmr.msrb.gmra.mxu0 %v4168_v23  ;;  %4393 = vmatmul.bf16.vlgmr.msrb.gmra.mxu1 %v4168_v23 }
 0xc7c   :  { %4407 = vmatmul.bf16.vlgmr.msrb.gmra.mxu2 %v4168_v23  ;;  %4421 = vmatmul.bf16.vlgmr.msrb.gmra.mxu3 %v4168_v23 }
 0xcf8   :  { %v4380_v28 = vpop.f32.mrf.mxu0  ;;  %v4394_v33 = vpop.f32.mrf.mxu1 }
 0xcf9   :  { %v4381_v47 = vadd.f32 %v4380_v28, %v4203_v53  ;;  %v4395_v59 = vadd.f32 %v4394_v33, %v4204_v60 }
 0xcff   :  { %v4408_v19 = vpop.f32.mrf.mxu2  ;;  %v4422_v11 = vpop.f32.mrf.mxu3 }
 0xd00   :  { %v4409_v56 = vadd.f32 %v4408_v19, %v4205_v2  ;;  %v4423_v43 = vadd.f32 %v4422_v11, %v4206_v7  ;;  %v4382_v50 = vpop.f32.mrf.mxu0  ;;  %v4396_v5 = vpop.f32.mrf.mxu1 }
 0xd01   :  { %v4383_v25 = vadd.f32 %v4382_v50, %v4203_v53  ;;  %v4397_v0 = vadd.f32 %v4396_v5, %v4204_v60 }
 0xd02   :  { %v4427_v17 = vmax.f32 %v4381_v47, %v4409_v56  ;;  %v4428_v44 = vmax.f32 %v4395_v59, %v4423_v43 }
 0xd04   :  { %v4429_v32 = vmax.f32 %v4427_v17, %v4428_v44 }
 0xd06   :  { %4430 = vmax.xlane.f32.xlu0 %v4429_v32 }
 0xd07   :  { %v4410_v38 = vpop.f32.mrf.mxu2  ;;  %v4424_v63 = vpop.f32.mrf.mxu3 }
 0xd08   :  { %v4411_v30 = vadd.f32 %v4410_v38, %v4205_v2  ;;  %v4425_v13 = vadd.f32 %v4424_v63, %v4206_v7 }
 0xd0a   :  { %v4432_v37 = vmax.f32 %v4383_v25, %v4411_v30  ;;  %v4433_v62 = vmax.f32 %v4397_v0, %v4425_v13 }
 0xd0c   :  { %v4434_v39 = vmax.f32 %v4432_v37, %v4433_v62 }
 0xd0e   :  { %4435 = vmax.xlane.f32.xlu0 %v4434_v39 }
 0xd79   :  { %v4431_v1 = vpop.xlane.xlu0 %4430 }
 0xd7a   :  { %v4437_v48 = vsub.f32 %v4381_v47, %v4431_v1  ;;  %v4438_v27 = vsub.f32 %v4395_v59, %v4431_v1  ;;  %v4439_v31 = vsub.f32 %v4409_v56, %v4431_v1  ;;  %v4440_v9 = vsub.f32 %v4423_v43, %v4431_v1 }
 0xd7c   :  { %v4445_v26 = vmul.f32 1.442695, %v4437_v48  ;;  %v4447_v45 = vmul.f32 1.442695, %v4438_v27  ;;  %v4449_v4 = vmul.f32 1.442695, %v4439_v31 }
 0xd7d   :  { %v4451_v8 = vmul.f32 1.442695, %v4440_v9 }
 0xd7e   :  { %6067 = vpow2.f32 %v4445_v26 }
 0xd7f   :  { %6069 = vpow2.f32 %v4447_v45 }
 0xd80   :  { %6071 = vpow2.f32 %v4449_v4 }
 0xd81   :  { %v4436_v15 = vpop.xlane.xlu0 %4435  ;;  %6073 = vpow2.f32 %v4451_v8 }
 0xd82   :  { %v4441_v12 = vsub.f32 %v4383_v25, %v4436_v15  ;;  %v4442_v24 = vsub.f32 %v4397_v0, %v4436_v15  ;;  %v4443_v41 = vsub.f32 %v4411_v30, %v4436_v15  ;;  %v4444_v14 = vsub.f32 %v4425_v13, %v4436_v15 }
 0xd84   :  { %v6068_v34 = vpop.eup %6067  ;;  %v4453_v35 = vmul.f32 1.442695, %v4441_v12  ;;  %v4455_v6 = vmul.f32 1.442695, %v4442_v24  ;;  %v4457_v36 = vmul.f32 1.442695, %v4443_v41 }
 0xd85   :  { %v6070_v40 = vpop.eup %6069  ;;  %v4459_v58 = vmul.f32 1.442695, %v4444_v14 }
 0xd86   :  { %6075 = vpow2.f32 %v4453_v35  ;;  %v4461_v20 = vadd.f32 %v6070_v40, %v6068_v34  ;;  %v6072_v29 = vpop.eup %6071 }
 0xd87   :  { %6077 = vpow2.f32 %v4455_v6  ;;  %v6074_v46 = vpop.eup %6073 }
 0xd88   :  { %v4462_v16 = vadd.f32 %v6072_v29, %v4461_v20  ;;  %6079 = vpow2.f32 %v4457_v36 }
 0xd89   :  { %6081 = vpow2.f32 %v4459_v58 }
 0xd8a   :  { %v4463_v18 = vadd.f32 %v6074_v46, %v4462_v16 }
 0xd8c   :  { %v6076_v57 = vpop.eup %6075  ;;  %4464 = vadd.xlane.f32.xlu1 %v4463_v18 }
 0xd8d   :  { %v6078_v42 = vpop.eup %6077 }
 0xd8e   :  { %v4466_v49 = vadd.f32 %v6078_v42, %v6076_v57  ;;  %v6080_v61 = vpop.eup %6079 }
 0xd8f   :  { %v6082_v21 = vpop.eup %6081 }
 0xd90   :  { %v4467_v52 = vadd.f32 %v6080_v61, %v4466_v49 }
 0xd92   :  { %v4468_v22 = vadd.f32 %v6082_v21, %v4467_v52 }
 0xd94   :  { %4469 = vadd.xlane.f32.xlu1 %v4468_v22 }
 0xdff   :  { %v4465_v3 = vpop.xlane.xlu1 %4464 }
 0xe00   :  { %6083 = vrcp.f32 %v4465_v3 }
 0xe06   :  { %v6084_v10 = vpop.eup %6083 }
 0xe07   :  { %v4473_v55 = vmul.f32 %v6084_v10, %v4465_v3  ;;  %v4470_v51 = vpop.xlane.xlu1 %4469 }
 0xe08   :  { %6085 = vrcp.f32 %v4470_v51 }
 0xe09   :  { %v4475_v23 = vsub.f32 2.0, %v4473_v55 }
 0xe0b   :  { %v4477_v54 = vmul.f32 %v6084_v10, %v4475_v23 }
 0xe0d   :  { %v4479_v28 = vmul.f32 %v6068_v34, %v4477_v54  ;;  %v4480_v33 = vmul.f32 %v6070_v40, %v4477_v54  ;;  %v4481_v53 = vmul.f32 %v6072_v29, %v4477_v54  ;;  %v4482_v2 = vmul.f32 %v6074_v46, %v4477_v54 }
 0xe0e   :  { %v6086_v60 = vpop.eup %6085 }
 0xe0f   :  { %4487 = vst [vmem:[%s9647_s9] sm:$0xff] %v4479_v28  ;;  %v4474_v7 = vmul.f32 %v6086_v60, %v4470_v51 }
 0xe10   :  { %4488 = vst [vmem:[%s9647_s9 + $0x8] sm:$0xff] %v4480_v33 }
 0xe11   :  { %4489 = vst [vmem:[%s9647_s9 + $0x10] sm:$0xff] %v4481_v53  ;;  %v4476_v19 = vsub.f32 2.0, %v4474_v7 }
 0xe12   :  { %4490 = vst [vmem:[%s9647_s9 + $0x18] sm:$0xff] %v4482_v2 }
 0xe13   :  { %v4478_v11 = vmul.f32 %v6086_v60, %v4476_v19 }
 0xe15   :  { %v4483_v47 = vmul.f32 %v6076_v57, %v4478_v11  ;;  %v4484_v59 = vmul.f32 %v6078_v42, %v4478_v11  ;;  %v4485_v56 = vmul.f32 %v6080_v61, %v4478_v11  ;;  %v4486_v43 = vmul.f32 %v6082_v21, %v4478_v11 }
 0xe17   :  { %4491 = vst [vmem:[%s9647_s9 + $0x20] sm:$0xff] %v4483_v47 }
 0xe18   :  { %4492 = vst [vmem:[%s9647_s9 + $0x28] sm:$0xff] %v4484_v59 }
 0xe19   :  { %4493 = vst [vmem:[%s9647_s9 + $0x30] sm:$0xff] %v4485_v56 }
 0xe1a   :  { %4494 = vst [vmem:[%s9647_s9 + $0x38] sm:$0xff] %v4486_v43 }

</bundles_post_ra>
